<compile_context>
chip_gen: v5e
topology: v5e:2x2
jax: 0.10.0
libtpu: 0.0.40
codegen_flags: <defaults>
</compile_context>

<pallas_src>
import functools

import numpy as np
import jax
import jax.numpy as jnp
from jax.experimental import pallas as pl
from jax.experimental.pallas import tpu as pltpu

# ----------------------------------------------------------------------------
# Reduced-size config (same topology as the PyTorch module).
# ----------------------------------------------------------------------------
CONFIG = dict(
    in_chans=1,
    embed_dims=[16, 32, 64, 128],
    mlp_ratios=[2, 2, 2, 2],
    depths=[1, 1, 1, 1],
    num_stages=4,
)
LN_EPS = 1e-5
BN_EPS = 1e-5
BANK_W = 256          # lane width of both parameter banks (= max hidden width)
NUM_HEADS = 8         # w1, w2, rc1, rc2, g, g1, g2, phase


# ----------------------------------------------------------------------------
# Static layout plan for the two parameter banks (pure function of CONFIG, so
# the host-side packer and the kernel trace agree on every offset).
# ----------------------------------------------------------------------------
def _round8(n):
    return -(-n // 8) * 8


def _layout():
    dims, mr, depths = CONFIG["embed_dims"], CONFIG["mlp_ratios"], CONFIG["depths"]
    vctr, mctr = [0], [0]

    def vec(c, rows=1):                       # rows in the (R, 256) row bank
        r = vctr[0]
        vctr[0] += rows
        return (r, c)

    def mat(rows, cols):                      # 8-aligned slab in the matrix bank
        r = mctr[0]
        mctr[0] += _round8(rows)
        return (r, rows, cols)

    stages = []
    prev = CONFIG["in_chans"]
    for i in range(CONFIG["num_stages"]):
        c = dims[i]
        hid = c * mr[i]
        k = 7 if i == 0 else 3
        sp = {"pe_w": mat(k * prev, c), "pe_b": vec(c)}
        blocks = []
        for _ in range(depths[i]):
            blocks.append({
                "bn1_s": vec(c), "bn1_t": vec(c),
                "p1_w": mat(c, c), "p1_b": vec(c),
                "lka0_w": vec(c, rows=5), "lka0_b": vec(c),
                "lkas_w": vec(c, rows=7), "lkas_b": vec(c),
                "lka1_w": mat(c, c), "lka1_b": vec(c),
                "p2_w": mat(c, c), "p2_b": vec(c),
                "ls1": vec(c),
                "fc1_w": mat(c, hid), "fc1_b": vec(hid),
                "mdw_w": vec(hid, rows=3), "mdw_b": vec(hid),
                "fc2_w": mat(hid, c), "fc2_b": vec(c),
            })
        sp["blocks"] = blocks
        sp["ln_g"] = vec(c)
        sp["ln_b"] = vec(c)
        stages.append(sp)
        prev = c
    head_w = mat(dims[-1], NUM_HEADS)
    head_b = vec(NUM_HEADS)
    return {
        "stages": stages,
        "head_w": head_w,
        "head_b": head_b,
        "n_vec_rows": _round8(vctr[0]),
        "n_mat_rows": mctr[0],
    }


# ----------------------------------------------------------------------------
# In-kernel helpers.
# ----------------------------------------------------------------------------
def _sel_matrix(l_out, l_in, stride, offset):
    """(l_out, l_in) 0/1 f32 matrix S with S[l, j] = 1 iff j == stride*l+offset.

    Built from 2-D iotas (VPU only).  S @ x performs a (possibly strided) row
    gather with implicit zero padding on the otherwise-idle MXU -- no VMEM
    scratch stores, no misaligned sublane loads, no roll/mod semantics.
    """
    rows = jax.lax.broadcasted_iota(jnp.int32, (l_out, l_in), 0)
    cols = jax.lax.broadcasted_iota(jnp.int32, (l_out, l_in), 1)
    return (cols == stride * rows + offset).astype(jnp.float32)


def _erf(z):
    # Abramowitz & Stegun 7.1.26 (|err| < 1.5e-7): exact-GELU semantics using
    # VPU mul/add + one EUP exp + one EUP approximate reciprocal.
    a1, a2, a3, a4, a5 = (0.254829592, -0.284496736, 1.421413741,
                          -1.453152027, 1.061405429)
    p = 0.3275911
    az = jnp.abs(z)
    t = pl.reciprocal(1.0 + p * az, approx=True)
    poly = ((((a5 * t + a4) * t + a3) * t + a2) * t + a1) * t
    e = 1.0 - poly * jnp.exp(-az * az)
    return jnp.where(z >= 0.0, e, -e)


def _gelu(x):
    return 0.5 * x * (1.0 + _erf(x * 0.7071067811865476))


# ----------------------------------------------------------------------------
# The single fused kernel.
# ----------------------------------------------------------------------------
def _van_kernel(cols_ref, vec_ref, mat_ref, out_ref, *, plan, batch):
    dims = CONFIG["embed_dims"]
    num_stages = CONFIG["num_stages"]

    def vrow(meta, k=0):                       # (1, c) row from the row bank
        r, c = meta
        return vec_ref[r + k:r + k + 1, 0:c]

    def wmat(meta):                            # (rows, cols) slab from matrix bank
        r, n, c = meta
        return mat_ref[r:r + n, 0:c]

    def mm(x, w_meta, b_meta):                 # 1x1 conv == channel matmul (MXU)
        return (jnp.dot(x, wmat(w_meta), preferred_element_type=jnp.float32)
                + vrow(b_meta))

    def dwconv(x, w_meta, b_meta, ksz, dil, pad):
        """Depthwise 1-D conv, stride 1: per-tap row shift via selection-matrix
        matmul, then per-channel scale.  Taps reading only zero padding are
        skipped at trace time."""
        L = x.shape[0]
        acc = None
        for k in range(ksz):
            d = k * dil - pad
            if abs(d) >= L:
                continue
            xk = x if d == 0 else jnp.dot(_sel_matrix(L, L, 1, d), x,
                                          preferred_element_type=jnp.float32)
            term = xk * vrow(w_meta, k)
            acc = term if acc is None else acc + term
        return acc + vrow(b_meta)

    # Sequence lengths: stride-4 stage-0 embed done via host im2col, the three
    # stride-2 embeds are done in-kernel.
    lengths = [cols_ref.shape[1]]
    for _ in range(1, num_stages):
        lengths.append(lengths[-1] // 2)

    xs = [None] * batch                        # per-sample (L, C) activations

    for s in range(num_stages):
        sp = plan["stages"][s]
        C = dims[s]
        L = lengths[s]

        # --- OverlapPatchEmbed (BatchNorm folded into the conv on the host) ---
        if s == 0:
            for b in range(batch):
                xs[b] = mm(cols_ref[b], sp["pe_w"], sp["pe_b"])
        else:
            Lp, Cp = lengths[s - 1], dims[s - 1]
            r0 = sp["pe_w"][0]
            pe_b = vrow(sp["pe_b"])
            for b in range(batch):
                y = None
                for k in range(3):             # ksize=3, stride=2, pad=1
                    g = jnp.dot(_sel_matrix(L, Lp, 2, k - 1), xs[b],
                                preferred_element_type=jnp.float32)
                    wk = mat_ref[r0 + k * Cp:r0 + (k + 1) * Cp, 0:C]
                    t = jnp.dot(g, wk, preferred_element_type=jnp.float32)
                    y = t if y is None else y + t
                xs[b] = y + pe_b

        # --- Blocks: x += ls1*Attn(BN1(x));  x += Mlp'(x) (BN2, ls2 folded) ---
        for bp in sp["blocks"]:
            for b in range(batch):
                x = xs[b]
                h = x * vrow(bp["bn1_s"]) + vrow(bp["bn1_t"])        # BN1 affine
                shortcut = h
                h = _gelu(mm(h, bp["p1_w"], bp["p1_b"]))             # proj_1 + GELU
                u = h
                a = dwconv(h, bp["lka0_w"], bp["lka0_b"], 5, 1, 2)   # LKA.conv0
                a = dwconv(a, bp["lkas_w"], bp["lkas_b"], 7, 3, 9)   # LKA.conv_spatial
                a = mm(a, bp["lka1_w"], bp["lka1_b"])                # LKA.conv1 (1x1)
                h = u * a                                            # gating
                h = mm(h, bp["p2_w"], bp["p2_b"])                    # proj_2
                h = h + shortcut
                x = x + vrow(bp["ls1"]) * h                          # layer_scale_1
                h = mm(x, bp["fc1_w"], bp["fc1_b"])                  # fc1 (BN2 folded)
                h = dwconv(h, bp["mdw_w"], bp["mdw_b"], 3, 1, 1)     # Mlp DWConv
                h = _gelu(h)
                h = mm(h, bp["fc2_w"], bp["fc2_b"])                  # fc2 (ls2 folded)
                xs[b] = x + h

        # --- stage LayerNorm over channels ---
        ln_g, ln_b = vrow(sp["ln_g"]), vrow(sp["ln_b"])
        for b in range(batch):
            x = xs[b]
            mu = jnp.mean(x, axis=-1, keepdims=True)
            xc = x - mu
            var = jnp.mean(xc * xc, axis=-1, keepdims=True)
            xs[b] = xc * jax.lax.rsqrt(var + LN_EPS) * ln_g + ln_b

    # --- global average pool + 8 stacked Linear(C,1) heads + ReLU ---
    head_w, head_b = wmat(plan["head_w"]), vrow(plan["head_b"])
    for b in range(batch):
        pooled = jnp.mean(xs[b], axis=0, keepdims=True)              # (1, C_last)
        y = jnp.dot(pooled, head_w, preferred_element_type=jnp.float32) + head_b
        out_ref[b:b + 1, :] = jnp.maximum(y, 0.0)


# ----------------------------------------------------------------------------
# Host-side wrapper.
# ----------------------------------------------------------------------------
def _stage0_cols(x_ncl, ksize=7, stride=4):
    """(B, Cin, Lin) -> im2col columns (B, Lout, ksize*Cin) for the stride-4
    stage-0 patch embed (pad + strided slices + concat: one cheap XLA layout
    fusion feeding the single fused kernel).  Feature index = k*Cin + cin."""
    pad = ksize // 2
    B, Cin, Lin = x_ncl.shape
    x = jnp.transpose(x_ncl, (0, 2, 1))
    Lout = (Lin + 2 * pad - ksize) // stride + 1
    xp = jnp.pad(x, ((0, 0), (pad, pad), (0, 0)))
    hi = stride * (Lout - 1) + 1
    slabs = [jax.lax.slice(xp, (0, k, 0), (B, k + hi, Cin), (1, stride, 1))
             for k in range(ksize)]
    return jnp.concatenate(slabs, axis=-1)


def _estimate_cost(batch, l0):
    dims, mr, dep = CONFIG["embed_dims"], CONFIG["mlp_ratios"], CONFIG["depths"]
    prev = CONFIG["in_chans"]
    flops, trans = 0, 0
    L = l0
    for i in range(CONFIG["num_stages"]):
        c, hid = dims[i], dims[i] * mr[i]
        k = 7 if i == 0 else 3
        if i > 0:
            L //= 2
        flops += 2 * L * k * prev * c
        flops += dep[i] * (6 * L * c * c + 4 * L * c * hid
                           + 24 * L * L * c + 6 * L * L * hid)
        trans += dep[i] * 4 * L * (c + hid)
        prev = c
    flops += 2 * dims[-1] * NUM_HEADS
    return int(batch * flops), int(batch * trans)


def van_forward(vec_bank, mat_bank, x_ncl):
    """Full VAN forward: (B, in_chans, L_in) -> (B, 8)."""
    plan = _layout()
    batch = x_ncl.shape[0]
    cols = _stage0_cols(x_ncl)
    flops, trans = _estimate_cost(batch, cols.shape[1])
    bytes_accessed = 4 * (cols.size + vec_bank.size + mat_bank.size
                          + batch * NUM_HEADS)
    kernel = functools.partial(_van_kernel, plan=plan, batch=batch)
    return pl.pallas_call(
        kernel,
        out_shape=jax.ShapeDtypeStruct((batch, NUM_HEADS), jnp.float32),
        grid=(1,),
        in_specs=[
            pl.BlockSpec(cols.shape, lambda i: (0, 0, 0)),
            pl.BlockSpec(vec_bank.shape, lambda i: (0, 0)),
            pl.BlockSpec(mat_bank.shape, lambda i: (0, 0)),
        ],
        out_specs=pl.BlockSpec((batch, NUM_HEADS), lambda i: (0, 0)),
        compiler_params=pltpu.CompilerParams(
            dimension_semantics=("arbitrary",),
            vmem_limit_bytes=32 * 1024 * 1024),
        cost_estimate=pl.CostEstimate(flops=flops, transcendentals=trans,
                                      bytes_accessed=int(bytes_accessed)),
    )(cols, vec_bank, mat_bank)


# ----------------------------------------------------------------------------
# Parameter init (random, PyTorch-like structure) + host-side folding/packing.
# ----------------------------------------------------------------------------
class _KeyGen:
    def __init__(self, seed):
        self.key = jax.random.PRNGKey(seed)

    def __call__(self):
        self.key, sub = jax.random.split(self.key)
        return sub


def _normal(kg, shape, std):
    return np.asarray(std * jax.random.normal(kg(), shape, jnp.float32))


def init_raw_params(seed=0):
    kg = _KeyGen(seed)
    dims = CONFIG["embed_dims"]
    prev = CONFIG["in_chans"]
    stages = []
    for i in range(CONFIG["num_stages"]):
        c, hid = dims[i], dims[i] * CONFIG["mlp_ratios"][i]
        k = 7 if i == 0 else 3
        st = {
            # conv weight stored flat as (ksize*Cin, Cout), row = k*Cin + cin
            # (PyTorch Conv1d weight (Cout, Cin, K) transposed accordingly).
            "pe_w": _normal(kg, (k * prev, c), 0.05),
            "pe_b": _normal(kg, (c,), 0.02),
            "pe_bn_g": 1.0 + _normal(kg, (c,), 0.02),
            "pe_bn_b": _normal(kg, (c,), 0.02),
        }
        blocks = []
        for _ in range(CONFIG["depths"][i]):
            blocks.append({
                "bn1_g": 1.0 + _normal(kg, (c,), 0.02),
                "bn1_b": _normal(kg, (c,), 0.02),
                "p1_w": _normal(kg, (c, c), 0.05),
                "p1_b": _normal(kg, (c,), 0.02),
                "lka0_w": _normal(kg, (5, c), 0.1),      # depthwise: (taps, C)
                "lka0_b": _normal(kg, (c,), 0.02),
                "lkas_w": _normal(kg, (7, c), 0.1),
                "lkas_b": _normal(kg, (c,), 0.02),
                "lka1_w": _normal(kg, (c, c), 0.05),
                "lka1_b": _normal(kg, (c,), 0.02),
                "p2_w": _normal(kg, (c, c), 0.05),
                "p2_b": _normal(kg, (c,), 0.02),
                "ls1": 0.01 * np.ones((c,), np.float32),
                "bn2_g": 1.0 + _normal(kg, (c,), 0.02),
                "bn2_b": _normal(kg, (c,), 0.02),
                "fc1_w": _normal(kg, (c, hid), 0.05),
                "fc1_b": _normal(kg, (hid,), 0.02),
                "mdw_w": _normal(kg, (3, hid), 0.1),
                "mdw_b": _normal(kg, (hid,), 0.02),
                "fc2_w": _normal(kg, (hid, c), 0.05),
                "fc2_b": _normal(kg, (c,), 0.02),
                "ls2": 0.01 * np.ones((c,), np.float32),
            })
        st["blocks"] = blocks
        st["ln_g"] = 1.0 + _normal(kg, (c,), 0.02)
        st["ln_b"] = _normal(kg, (c,), 0.02)
        stages.append(st)
        prev = c
    return {"stages": stages,
            "head_w": _normal(kg, (dims[-1], NUM_HEADS), 0.05),
            "head_b": _normal(kg, (NUM_HEADS,), 0.02)}


def _bn_affine(gamma, beta):
    # Inference BatchNorm1d with running mean 0 / var 1 -> per-channel affine.
    return gamma / np.sqrt(1.0 + BN_EPS), beta


def fold_and_pack(raw):
    """One-time host-side folding + packing into two banks (2 parameter DMAs):
       * patch-embed BatchNorm -> pe_w / pe_b
       * Block BatchNorm2      -> fc1
       * layer_scale_2         -> fc2
       BatchNorm1 / layer_scale_1 stay in-kernel (Attention shortcut needs
       BN1(x) explicitly)."""
    plan = _layout()
    vec_bank = np.zeros((plan["n_vec_rows"], BANK_W), np.float32)
    mat_bank = np.zeros((plan["n_mat_rows"], BANK_W), np.float32)

    def put_rows(meta, v):
        r, c = meta
        v = np.asarray(v, np.float32).reshape(-1, c)
        vec_bank[r:r + v.shape[0], :c] = v

    def put_mat(meta, m):
        r, n, c = meta
        mat_bank[r:r + n, :c] = np.asarray(m, np.float32)

    for st, sp in zip(raw["stages"], plan["stages"]):
        s, t = _bn_affine(st["pe_bn_g"], st["pe_bn_b"])
        put_mat(sp["pe_w"], st["pe_w"] * s[None, :])
        put_rows(sp["pe_b"], st["pe_b"] * s + t)
        for bp, bpl in zip(st["blocks"], sp["blocks"]):
            s1, t1 = _bn_affine(bp["bn1_g"], bp["bn1_b"])
            s2, t2 = _bn_affine(bp["bn2_g"], bp["bn2_b"])
            put_rows(bpl["bn1_s"], s1)
            put_rows(bpl["bn1_t"], t1)
            put_mat(bpl["p1_w"], bp["p1_w"])
            put_rows(bpl["p1_b"], bp["p1_b"])
            put_rows(bpl["lka0_w"], bp["lka0_w"])
            put_rows(bpl["lka0_b"], bp["lka0_b"])
            put_rows(bpl["lkas_w"], bp["lkas_w"])
            put_rows(bpl["lkas_b"], bp["lkas_b"])
            put_mat(bpl["lka1_w"], bp["lka1_w"])
            put_rows(bpl["lka1_b"], bp["lka1_b"])
            put_mat(bpl["p2_w"], bp["p2_w"])
            put_rows(bpl["p2_b"], bp["p2_b"])
            put_rows(bpl["ls1"], bp["ls1"])
            put_mat(bpl["fc1_w"], s2[:, None] * bp["fc1_w"])
            put_rows(bpl["fc1_b"], bp["fc1_b"] + t2 @ bp["fc1_w"])
            put_rows(bpl["mdw_w"], bp["mdw_w"])
            put_rows(bpl["mdw_b"], bp["mdw_b"])
            put_mat(bpl["fc2_w"], bp["fc2_w"] * bp["ls2"][None, :])
            put_rows(bpl["fc2_b"], bp["fc2_b"] * bp["ls2"])
        put_rows(sp["ln_g"], st["ln_g"])
        put_rows(sp["ln_b"], st["ln_b"])
    put_mat(plan["head_w"], raw["head_w"])
    put_rows(plan["head_b"], raw["head_b"])
    return jnp.asarray(vec_bank), jnp.asarray(mat_bank)


# --------------------------------- main -------------------------------------
if __name__ == "__main__":
    B, C_IN, L_IN = 2, CONFIG["in_chans"], 64
    raw = init_raw_params(seed=0)
    vec_bank, mat_bank = fold_and_pack(raw)
    x = jax.random.normal(jax.random.PRNGKey(0), (B, C_IN, L_IN), jnp.float32)

    forward = jax.jit(van_forward)
    out = jax.block_until_ready(forward(vec_bank, mat_bank, x))

    assert out.shape == (B, NUM_HEADS), out.shape
    assert bool(jnp.all(jnp.isfinite(out)))
    print("KERNEL_OK")
</pallas_src>

<mosaic_0001>
module attributes {stable_mosaic.version = 11 : i64} {
  func.func @_van_kernel(%arg0: i32, %arg1: memref<2x16x7xf32, #tpu.memory_space<vmem>>, %arg2: memref<120x256xf32, #tpu.memory_space<vmem>>, %arg3: memref<1912x256xf32, #tpu.memory_space<vmem>>, %arg4: memref<2x8xf32, #tpu.memory_space<vmem>>) attributes {dimension_semantics = [#tpu.dimension_semantics<arbitrary>], iteration_bounds = array<i64: 1>, scalar_prefetch = 0 : i64, scratch_operands = 0 : i64, tpu.core_type = #tpu.core_type<tc>, window_params = [{pipeline_mode = #tpu.pipeline_mode<synchronous>, transform_indices = @transform_0, window_bounds = array<i64: 2, 16, 7>}, {pipeline_mode = #tpu.pipeline_mode<synchronous>, transform_indices = @transform_1, window_bounds = array<i64: 120, 256>}, {pipeline_mode = #tpu.pipeline_mode<synchronous>, transform_indices = @transform_2, window_bounds = array<i64: 1912, 256>}, {pipeline_mode = #tpu.pipeline_mode<synchronous>, transform_indices = @transform_3, window_bounds = array<i64: 2, 8>}]} {
    %c0 = arith.constant 0 : index
    %c0_0 = arith.constant 0 : index
    %c0_1 = arith.constant 0 : index
    %0 = vector.load %arg1[%c0, %c0_0, %c0_1] : memref<2x16x7xf32, #tpu.memory_space<vmem>>, vector<1x16x7xf32>
    %1 = vector.shape_cast %0 : vector<1x16x7xf32> to vector<16x7xf32>
    %c0_2 = arith.constant 0 : index
    %c0_3 = arith.constant 0 : index
    %2 = vector.load %arg3[%c0_2, %c0_3] : memref<1912x256xf32, #tpu.memory_space<vmem>>, vector<7x16xf32>
    %cst = arith.constant dense<0.000000e+00> : vector<16x16xf32>
    %3 = tpu.matmul %1, %2, %cst {dimension_numbers = #tpu.dot_dimension_numbers<[1], [0], [0], [1], [0, 0, 1, 1], [], []>} : vector<16x7xf32>, vector<7x16xf32>, vector<16x16xf32> -> vector<16x16xf32>
    %c0_4 = arith.constant 0 : index
    %c0_5 = arith.constant 0 : index
    %4 = vector.load %arg2[%c0_4, %c0_5] : memref<120x256xf32, #tpu.memory_space<vmem>>, vector<1x16xf32>
    %5 = vector.broadcast %4 : vector<1x16xf32> to vector<16x16xf32>
    %6 = arith.addf %3, %5 : vector<16x16xf32>
    %c1 = arith.constant 1 : index
    %c0_6 = arith.constant 0 : index
    %c0_7 = arith.constant 0 : index
    %7 = vector.load %arg1[%c1, %c0_6, %c0_7] : memref<2x16x7xf32, #tpu.memory_space<vmem>>, vector<1x16x7xf32>
    %8 = vector.shape_cast %7 : vector<1x16x7xf32> to vector<16x7xf32>
    %c0_8 = arith.constant 0 : index
    %c0_9 = arith.constant 0 : index
    %9 = vector.load %arg3[%c0_8, %c0_9] : memref<1912x256xf32, #tpu.memory_space<vmem>>, vector<7x16xf32>
    %cst_10 = arith.constant dense<0.000000e+00> : vector<16x16xf32>
    %10 = tpu.matmul %8, %9, %cst_10 {dimension_numbers = #tpu.dot_dimension_numbers<[1], [0], [0], [1], [0, 0, 1, 1], [], []>} : vector<16x7xf32>, vector<7x16xf32>, vector<16x16xf32> -> vector<16x16xf32>
    %c0_11 = arith.constant 0 : index
    %c0_12 = arith.constant 0 : index
    %11 = vector.load %arg2[%c0_11, %c0_12] : memref<120x256xf32, #tpu.memory_space<vmem>>, vector<1x16xf32>
    %12 = vector.broadcast %11 : vector<1x16xf32> to vector<16x16xf32>
    %13 = arith.addf %10, %12 : vector<16x16xf32>
    %c1_13 = arith.constant 1 : index
    %c0_14 = arith.constant 0 : index
    %14 = vector.load %arg2[%c1_13, %c0_14] : memref<120x256xf32, #tpu.memory_space<vmem>>, vector<1x16xf32>
    %15 = vector.broadcast %14 : vector<1x16xf32> to vector<16x16xf32>
    %16 = arith.mulf %6, %15 : vector<16x16xf32>
    %c2 = arith.constant 2 : index
    %c0_15 = arith.constant 0 : index
    %17 = vector.load %arg2[%c2, %c0_15] : memref<120x256xf32, #tpu.memory_space<vmem>>, vector<1x16xf32>
    %18 = vector.broadcast %17 : vector<1x16xf32> to vector<16x16xf32>
    %19 = arith.addf %16, %18 : vector<16x16xf32>
    %c8 = arith.constant 8 : index
    %c0_16 = arith.constant 0 : index
    %20 = vector.load %arg3[%c8, %c0_16] : memref<1912x256xf32, #tpu.memory_space<vmem>>, vector<16x16xf32>
    %cst_17 = arith.constant dense<0.000000e+00> : vector<16x16xf32>
    %21 = tpu.matmul %19, %20, %cst_17 {dimension_numbers = #tpu.dot_dimension_numbers<[1], [0], [0], [1], [0, 0, 1, 1], [], []>} : vector<16x16xf32>, vector<16x16xf32>, vector<16x16xf32> -> vector<16x16xf32>
    %c3 = arith.constant 3 : index
    %c0_18 = arith.constant 0 : index
    %22 = vector.load %arg2[%c3, %c0_18] : memref<120x256xf32, #tpu.memory_space<vmem>>, vector<1x16xf32>
    %23 = vector.broadcast %22 : vector<1x16xf32> to vector<16x16xf32>
    %24 = arith.addf %21, %23 : vector<16x16xf32>
    %cst_19 = arith.constant 5.000000e-01 : f32
    %25 = vector.broadcast %cst_19 : f32 to vector<16x16xf32>
    %26 = arith.mulf %25, %24 : vector<16x16xf32>
    %cst_20 = arith.constant 0.707106769 : f32
    %27 = vector.broadcast %cst_20 : f32 to vector<16x16xf32>
    %28 = arith.mulf %24, %27 : vector<16x16xf32>
    %29 = math.absf %28 : vector<16x16xf32>
    %cst_21 = arith.constant 0.327591091 : f32
    %30 = vector.broadcast %cst_21 : f32 to vector<16x16xf32>
    %31 = arith.mulf %30, %29 : vector<16x16xf32>
    %cst_22 = arith.constant 1.000000e+00 : f32
    %32 = vector.broadcast %cst_22 : f32 to vector<16x16xf32>
    %33 = arith.addf %32, %31 : vector<16x16xf32>
    %34 = tpu.reciprocal %33 {approx = true} : vector<16x16xf32> -> vector<16x16xf32>
    %cst_23 = arith.constant 1.06140542 : f32
    %35 = vector.broadcast %cst_23 : f32 to vector<16x16xf32>
    %36 = arith.mulf %35, %34 : vector<16x16xf32>
    %cst_24 = arith.constant -1.45315206 : f32
    %37 = vector.broadcast %cst_24 : f32 to vector<16x16xf32>
    %38 = arith.addf %36, %37 : vector<16x16xf32>
    %39 = arith.mulf %38, %34 : vector<16x16xf32>
    %cst_25 = arith.constant 1.42141378 : f32
    %40 = vector.broadcast %cst_25 : f32 to vector<16x16xf32>
    %41 = arith.addf %39, %40 : vector<16x16xf32>
    %42 = arith.mulf %41, %34 : vector<16x16xf32>
    %cst_26 = arith.constant -0.284496725 : f32
    %43 = vector.broadcast %cst_26 : f32 to vector<16x16xf32>
    %44 = arith.addf %42, %43 : vector<16x16xf32>
    %45 = arith.mulf %44, %34 : vector<16x16xf32>
    %cst_27 = arith.constant 0.254829586 : f32
    %46 = vector.broadcast %cst_27 : f32 to vector<16x16xf32>
    %47 = arith.addf %45, %46 : vector<16x16xf32>
    %48 = arith.mulf %47, %34 : vector<16x16xf32>
    %cst_28 = arith.constant 0.000000e+00 : f32
    %49 = vector.broadcast %cst_28 : f32 to vector<16x16xf32>
    %50 = arith.subf %49, %29 : vector<16x16xf32>
    %51 = arith.mulf %50, %29 : vector<16x16xf32>
    %52 = math.exp %51 : vector<16x16xf32>
    %53 = arith.mulf %48, %52 : vector<16x16xf32>
    %cst_29 = arith.constant 1.000000e+00 : f32
    %54 = vector.broadcast %cst_29 : f32 to vector<16x16xf32>
    %55 = arith.subf %54, %53 : vector<16x16xf32>
    %cst_30 = arith.constant 0.000000e+00 : f32
    %56 = vector.broadcast %cst_30 : f32 to vector<16x16xf32>
    %57 = arith.cmpf oge, %28, %56 : vector<16x16xf32>
    %cst_31 = arith.constant 0.000000e+00 : f32
    %58 = vector.broadcast %cst_31 : f32 to vector<16x16xf32>
    %59 = arith.subf %58, %55 : vector<16x16xf32>
    %60 = arith.select %57, %55, %59 : vector<16x16xi1>, vector<16x16xf32>
    %cst_32 = arith.constant 1.000000e+00 : f32
    %61 = vector.broadcast %cst_32 : f32 to vector<16x16xf32>
    %62 = arith.addf %61, %60 : vector<16x16xf32>
    %63 = arith.mulf %26, %62 : vector<16x16xf32>
    %64 = tpu.iota {dimensions = array<i32: 0>} : vector<16x16xi32>
    %65 = tpu.iota {dimensions = array<i32: 1>} : vector<16x16xi32>
    %c1_i32 = arith.constant 1 : i32
    %66 = vector.broadcast %c1_i32 : i32 to vector<16x16xi32>
    %67 = arith.muli %66, %64 : vector<16x16xi32>
    %c-2_i32 = arith.constant -2 : i32
    %68 = vector.broadcast %c-2_i32 : i32 to vector<16x16xi32>
    %69 = arith.addi %67, %68 : vector<16x16xi32>
    %70 = arith.cmpi eq, %65, %69 : vector<16x16xi32>
    %71 = arith.extui %70 : vector<16x16xi1> to vector<16x16xi32>
    %72 = arith.sitofp %71 : vector<16x16xi32> to vector<16x16xf32>
    %cst_33 = arith.constant dense<0.000000e+00> : vector<16x16xf32>
    %73 = tpu.matmul %72, %63, %cst_33 {dimension_numbers = #tpu.dot_dimension_numbers<[1], [0], [0], [1], [0, 0, 1, 1], [], []>} : vector<16x16xf32>, vector<16x16xf32>, vector<16x16xf32> -> vector<16x16xf32>
    %c4 = arith.constant 4 : index
    %c0_34 = arith.constant 0 : index
    %74 = vector.load %arg2[%c4, %c0_34] : memref<120x256xf32, #tpu.memory_space<vmem>>, vector<1x16xf32>
    %75 = vector.broadcast %74 : vector<1x16xf32> to vector<16x16xf32>
    %76 = arith.mulf %73, %75 : vector<16x16xf32>
    %77 = tpu.iota {dimensions = array<i32: 0>} : vector<16x16xi32>
    %78 = tpu.iota {dimensions = array<i32: 1>} : vector<16x16xi32>
    %c1_i32_35 = arith.constant 1 : i32
    %79 = vector.broadcast %c1_i32_35 : i32 to vector<16x16xi32>
    %80 = arith.muli %79, %77 : vector<16x16xi32>
    %c-1_i32 = arith.constant -1 : i32
    %81 = vector.broadcast %c-1_i32 : i32 to vector<16x16xi32>
    %82 = arith.addi %80, %81 : vector<16x16xi32>
    %83 = arith.cmpi eq, %78, %82 : vector<16x16xi32>
    %84 = arith.extui %83 : vector<16x16xi1> to vector<16x16xi32>
    %85 = arith.sitofp %84 : vector<16x16xi32> to vector<16x16xf32>
    %cst_36 = arith.constant dense<0.000000e+00> : vector<16x16xf32>
    %86 = tpu.matmul %85, %63, %cst_36 {dimension_numbers = #tpu.dot_dimension_numbers<[1], [0], [0], [1], [0, 0, 1, 1], [], []>} : vector<16x16xf32>, vector<16x16xf32>, vector<16x16xf32> -> vector<16x16xf32>
    %c5 = arith.constant 5 : index
    %c0_37 = arith.constant 0 : index
    %87 = vector.load %arg2[%c5, %c0_37] : memref<120x256xf32, #tpu.memory_space<vmem>>, vector<1x16xf32>
    %88 = vector.broadcast %87 : vector<1x16xf32> to vector<16x16xf32>
    %89 = arith.mulf %86, %88 : vector<16x16xf32>
    %90 = arith.addf %76, %89 : vector<16x16xf32>
    %c6 = arith.constant 6 : index
    %c0_38 = arith.constant 0 : index
    %91 = vector.load %arg2[%c6, %c0_38] : memref<120x256xf32, #tpu.memory_space<vmem>>, vector<1x16xf32>
    %92 = vector.broadcast %91 : vector<1x16xf32> to vector<16x16xf32>
    %93 = arith.mulf %63, %92 : vector<16x16xf32>
    %94 = arith.addf %90, %93 : vector<16x16xf32>
    %95 = tpu.iota {dimensions = array<i32: 0>} : vector<16x16xi32>
    %96 = tpu.iota {dimensions = array<i32: 1>} : vector<16x16xi32>
    %c1_i32_39 = arith.constant 1 : i32
    %97 = vector.broadcast %c1_i32_39 : i32 to vector<16x16xi32>
    %98 = arith.muli %97, %95 : vector<16x16xi32>
    %c1_i32_40 = arith.constant 1 : i32
    %99 = vector.broadcast %c1_i32_40 : i32 to vector<16x16xi32>
    %100 = arith.addi %98, %99 : vector<16x16xi32>
    %101 = arith.cmpi eq, %96, %100 : vector<16x16xi32>
    %102 = arith.extui %101 : vector<16x16xi1> to vector<16x16xi32>
    %103 = arith.sitofp %102 : vector<16x16xi32> to vector<16x16xf32>
    %cst_41 = arith.constant dense<0.000000e+00> : vector<16x16xf32>
    %104 = tpu.matmul %103, %63, %cst_41 {dimension_numbers = #tpu.dot_dimension_numbers<[1], [0], [0], [1], [0, 0, 1, 1], [], []>} : vector<16x16xf32>, vector<16x16xf32>, vector<16x16xf32> -> vector<16x16xf32>
    %c7 = arith.constant 7 : index
    %c0_42 = arith.constant 0 : index
    %105 = vector.load %arg2[%c7, %c0_42] : memref<120x256xf32, #tpu.memory_space<vmem>>, vector<1x16xf32>
    %106 = vector.broadcast %105 : vector<1x16xf32> to vector<16x16xf32>
    %107 = arith.mulf %104, %106 : vector<16x16xf32>
    %108 = arith.addf %94, %107 : vector<16x16xf32>
    %109 = tpu.iota {dimensions = array<i32: 0>} : vector<16x16xi32>
    %110 = tpu.iota {dimensions = array<i32: 1>} : vector<16x16xi32>
    %c1_i32_43 = arith.constant 1 : i32
    %111 = vector.broadcast %c1_i32_43 : i32 to vector<16x16xi32>
    %112 = arith.muli %111, %109 : vector<16x16xi32>
    %c2_i32 = arith.constant 2 : i32
    %113 = vector.broadcast %c2_i32 : i32 to vector<16x16xi32>
    %114 = arith.addi %112, %113 : vector<16x16xi32>
    %115 = arith.cmpi eq, %110, %114 : vector<16x16xi32>
    %116 = arith.extui %115 : vector<16x16xi1> to vector<16x16xi32>
    %117 = arith.sitofp %116 : vector<16x16xi32> to vector<16x16xf32>
    %cst_44 = arith.constant dense<0.000000e+00> : vector<16x16xf32>
    %118 = tpu.matmul %117, %63, %cst_44 {dimension_numbers = #tpu.dot_dimension_numbers<[1], [0], [0], [1], [0, 0, 1, 1], [], []>} : vector<16x16xf32>, vector<16x16xf32>, vector<16x16xf32> -> vector<16x16xf32>
    %c8_45 = arith.constant 8 : index
    %c0_46 = arith.constant 0 : index
    %119 = vector.load %arg2[%c8_45, %c0_46] : memref<120x256xf32, #tpu.memory_space<vmem>>, vector<1x16xf32>
    %120 = vector.broadcast %119 : vector<1x16xf32> to vector<16x16xf32>
    %121 = arith.mulf %118, %120 : vector<16x16xf32>
    %122 = arith.addf %108, %121 : vector<16x16xf32>
    %c9 = arith.constant 9 : index
    %c0_47 = arith.constant 0 : index
    %123 = vector.load %arg2[%c9, %c0_47] : memref<120x256xf32, #tpu.memory_space<vmem>>, vector<1x16xf32>
    %124 = vector.broadcast %123 : vector<1x16xf32> to vector<16x16xf32>
    %125 = arith.addf %122, %124 : vector<16x16xf32>
    %126 = tpu.iota {dimensions = array<i32: 0>} : vector<16x16xi32>
    %127 = tpu.iota {dimensions = array<i32: 1>} : vector<16x16xi32>
    %c1_i32_48 = arith.constant 1 : i32
    %128 = vector.broadcast %c1_i32_48 : i32 to vector<16x16xi32>
    %129 = arith.muli %128, %126 : vector<16x16xi32>
    %c-9_i32 = arith.constant -9 : i32
    %130 = vector.broadcast %c-9_i32 : i32 to vector<16x16xi32>
    %131 = arith.addi %129, %130 : vector<16x16xi32>
    %132 = arith.cmpi eq, %127, %131 : vector<16x16xi32>
    %133 = arith.extui %132 : vector<16x16xi1> to vector<16x16xi32>
    %134 = arith.sitofp %133 : vector<16x16xi32> to vector<16x16xf32>
    %cst_49 = arith.constant dense<0.000000e+00> : vector<16x16xf32>
    %135 = tpu.matmul %134, %125, %cst_49 {dimension_numbers = #tpu.dot_dimension_numbers<[1], [0], [0], [1], [0, 0, 1, 1], [], []>} : vector<16x16xf32>, vector<16x16xf32>, vector<16x16xf32> -> vector<16x16xf32>
    %c10 = arith.constant 10 : index
    %c0_50 = arith.constant 0 : index
    %136 = vector.load %arg2[%c10, %c0_50] : memref<120x256xf32, #tpu.memory_space<vmem>>, vector<1x16xf32>
    %137 = vector.broadcast %136 : vector<1x16xf32> to vector<16x16xf32>
    %138 = arith.mulf %135, %137 : vector<16x16xf32>
    %139 = tpu.iota {dimensions = array<i32: 0>} : vector<16x16xi32>
    %140 = tpu.iota {dimensions = array<i32: 1>} : vector<16x16xi32>
    %c1_i32_51 = arith.constant 1 : i32
    %141 = vector.broadcast %c1_i32_51 : i32 to vector<16x16xi32>
    %142 = arith.muli %141, %139 : vector<16x16xi32>
    %c-6_i32 = arith.constant -6 : i32
    %143 = vector.broadcast %c-6_i32 : i32 to vector<16x16xi32>
    %144 = arith.addi %142, %143 : vector<16x16xi32>
    %145 = arith.cmpi eq, %140, %144 : vector<16x16xi32>
    %146 = arith.extui %145 : vector<16x16xi1> to vector<16x16xi32>
    %147 = arith.sitofp %146 : vector<16x16xi32> to vector<16x16xf32>
    %cst_52 = arith.constant dense<0.000000e+00> : vector<16x16xf32>
    %148 = tpu.matmul %147, %125, %cst_52 {dimension_numbers = #tpu.dot_dimension_numbers<[1], [0], [0], [1], [0, 0, 1, 1], [], []>} : vector<16x16xf32>, vector<16x16xf32>, vector<16x16xf32> -> vector<16x16xf32>
    %c11 = arith.constant 11 : index
    %c0_53 = arith.constant 0 : index
    %149 = vector.load %arg2[%c11, %c0_53] : memref<120x256xf32, #tpu.memory_space<vmem>>, vector<1x16xf32>
    %150 = vector.broadcast %149 : vector<1x16xf32> to vector<16x16xf32>
    %151 = arith.mulf %148, %150 : vector<16x16xf32>
    %152 = arith.addf %138, %151 : vector<16x16xf32>
    %153 = tpu.iota {dimensions = array<i32: 0>} : vector<16x16xi32>
    %154 = tpu.iota {dimensions = array<i32: 1>} : vector<16x16xi32>
    %c1_i32_54 = arith.constant 1 : i32
    %155 = vector.broadcast %c1_i32_54 : i32 to vector<16x16xi32>
    %156 = arith.muli %155, %153 : vector<16x16xi32>
    %c-3_i32 = arith.constant -3 : i32
    %157 = vector.broadcast %c-3_i32 : i32 to vector<16x16xi32>
    %158 = arith.addi %156, %157 : vector<16x16xi32>
    %159 = arith.cmpi eq, %154, %158 : vector<16x16xi32>
    %160 = arith.extui %159 : vector<16x16xi1> to vector<16x16xi32>
    %161 = arith.sitofp %160 : vector<16x16xi32> to vector<16x16xf32>
    %cst_55 = arith.constant dense<0.000000e+00> : vector<16x16xf32>
    %162 = tpu.matmul %161, %125, %cst_55 {dimension_numbers = #tpu.dot_dimension_numbers<[1], [0], [0], [1], [0, 0, 1, 1], [], []>} : vector<16x16xf32>, vector<16x16xf32>, vector<16x16xf32> -> vector<16x16xf32>
    %c12 = arith.constant 12 : index
    %c0_56 = arith.constant 0 : index
    %163 = vector.load %arg2[%c12, %c0_56] : memref<120x256xf32, #tpu.memory_space<vmem>>, vector<1x16xf32>
    %164 = vector.broadcast %163 : vector<1x16xf32> to vector<16x16xf32>
    %165 = arith.mulf %162, %164 : vector<16x16xf32>
    %166 = arith.addf %152, %165 : vector<16x16xf32>
    %c13 = arith.constant 13 : index
    %c0_57 = arith.constant 0 : index
    %167 = vector.load %arg2[%c13, %c0_57] : memref<120x256xf32, #tpu.memory_space<vmem>>, vector<1x16xf32>
    %168 = vector.broadcast %167 : vector<1x16xf32> to vector<16x16xf32>
    %169 = arith.mulf %125, %168 : vector<16x16xf32>
    %170 = arith.addf %166, %169 : vector<16x16xf32>
    %171 = tpu.iota {dimensions = array<i32: 0>} : vector<16x16xi32>
    %172 = tpu.iota {dimensions = array<i32: 1>} : vector<16x16xi32>
    %c1_i32_58 = arith.constant 1 : i32
    %173 = vector.broadcast %c1_i32_58 : i32 to vector<16x16xi32>
    %174 = arith.muli %173, %171 : vector<16x16xi32>
    %c3_i32 = arith.constant 3 : i32
    %175 = vector.broadcast %c3_i32 : i32 to vector<16x16xi32>
    %176 = arith.addi %174, %175 : vector<16x16xi32>
    %177 = arith.cmpi eq, %172, %176 : vector<16x16xi32>
    %178 = arith.extui %177 : vector<16x16xi1> to vector<16x16xi32>
    %179 = arith.sitofp %178 : vector<16x16xi32> to vector<16x16xf32>
    %cst_59 = arith.constant dense<0.000000e+00> : vector<16x16xf32>
    %180 = tpu.matmul %179, %125, %cst_59 {dimension_numbers = #tpu.dot_dimension_numbers<[1], [0], [0], [1], [0, 0, 1, 1], [], []>} : vector<16x16xf32>, vector<16x16xf32>, vector<16x16xf32> -> vector<16x16xf32>
    %c14 = arith.constant 14 : index
    %c0_60 = arith.constant 0 : index
    %181 = vector.load %arg2[%c14, %c0_60] : memref<120x256xf32, #tpu.memory_space<vmem>>, vector<1x16xf32>
    %182 = vector.broadcast %181 : vector<1x16xf32> to vector<16x16xf32>
    %183 = arith.mulf %180, %182 : vector<16x16xf32>
    %184 = arith.addf %170, %183 : vector<16x16xf32>
    %185 = tpu.iota {dimensions = array<i32: 0>} : vector<16x16xi32>
    %186 = tpu.iota {dimensions = array<i32: 1>} : vector<16x16xi32>
    %c1_i32_61 = arith.constant 1 : i32
    %187 = vector.broadcast %c1_i32_61 : i32 to vector<16x16xi32>
    %188 = arith.muli %187, %185 : vector<16x16xi32>
    %c6_i32 = arith.constant 6 : i32
    %189 = vector.broadcast %c6_i32 : i32 to vector<16x16xi32>
    %190 = arith.addi %188, %189 : vector<16x16xi32>
    %191 = arith.cmpi eq, %186, %190 : vector<16x16xi32>
    %192 = arith.extui %191 : vector<16x16xi1> to vector<16x16xi32>
    %193 = arith.sitofp %192 : vector<16x16xi32> to vector<16x16xf32>
    %cst_62 = arith.constant dense<0.000000e+00> : vector<16x16xf32>
    %194 = tpu.matmul %193, %125, %cst_62 {dimension_numbers = #tpu.dot_dimension_numbers<[1], [0], [0], [1], [0, 0, 1, 1], [], []>} : vector<16x16xf32>, vector<16x16xf32>, vector<16x16xf32> -> vector<16x16xf32>
    %c15 = arith.constant 15 : index
    %c0_63 = arith.constant 0 : index
    %195 = vector.load %arg2[%c15, %c0_63] : memref<120x256xf32, #tpu.memory_space<vmem>>, vector<1x16xf32>
    %196 = vector.broadcast %195 : vector<1x16xf32> to vector<16x16xf32>
    %197 = arith.mulf %194, %196 : vector<16x16xf32>
    %198 = arith.addf %184, %197 : vector<16x16xf32>
    %199 = tpu.iota {dimensions = array<i32: 0>} : vector<16x16xi32>
    %200 = tpu.iota {dimensions = array<i32: 1>} : vector<16x16xi32>
    %c1_i32_64 = arith.constant 1 : i32
    %201 = vector.broadcast %c1_i32_64 : i32 to vector<16x16xi32>
    %202 = arith.muli %201, %199 : vector<16x16xi32>
    %c9_i32 = arith.constant 9 : i32
    %203 = vector.broadcast %c9_i32 : i32 to vector<16x16xi32>
    %204 = arith.addi %202, %203 : vector<16x16xi32>
    %205 = arith.cmpi eq, %200, %204 : vector<16x16xi32>
    %206 = arith.extui %205 : vector<16x16xi1> to vector<16x16xi32>
    %207 = arith.sitofp %206 : vector<16x16xi32> to vector<16x16xf32>
    %cst_65 = arith.constant dense<0.000000e+00> : vector<16x16xf32>
    %208 = tpu.matmul %207, %125, %cst_65 {dimension_numbers = #tpu.dot_dimension_numbers<[1], [0], [0], [1], [0, 0, 1, 1], [], []>} : vector<16x16xf32>, vector<16x16xf32>, vector<16x16xf32> -> vector<16x16xf32>
    %c16 = arith.constant 16 : index
    %c0_66 = arith.constant 0 : index
    %209 = vector.load %arg2[%c16, %c0_66] : memref<120x256xf32, #tpu.memory_space<vmem>>, vector<1x16xf32>
    %210 = vector.broadcast %209 : vector<1x16xf32> to vector<16x16xf32>
    %211 = arith.mulf %208, %210 : vector<16x16xf32>
    %212 = arith.addf %198, %211 : vector<16x16xf32>
    %c17 = arith.constant 17 : index
    %c0_67 = arith.constant 0 : index
    %213 = vector.load %arg2[%c17, %c0_67] : memref<120x256xf32, #tpu.memory_space<vmem>>, vector<1x16xf32>
    %214 = vector.broadcast %213 : vector<1x16xf32> to vector<16x16xf32>
    %215 = arith.addf %212, %214 : vector<16x16xf32>
    %c24 = arith.constant 24 : index
    %c0_68 = arith.constant 0 : index
    %216 = vector.load %arg3[%c24, %c0_68] : memref<1912x256xf32, #tpu.memory_space<vmem>>, vector<16x16xf32>
    %cst_69 = arith.constant dense<0.000000e+00> : vector<16x16xf32>
    %217 = tpu.matmul %215, %216, %cst_69 {dimension_numbers = #tpu.dot_dimension_numbers<[1], [0], [0], [1], [0, 0, 1, 1], [], []>} : vector<16x16xf32>, vector<16x16xf32>, vector<16x16xf32> -> vector<16x16xf32>
    %c18 = arith.constant 18 : index
    %c0_70 = arith.constant 0 : index
    %218 = vector.load %arg2[%c18, %c0_70] : memref<120x256xf32, #tpu.memory_space<vmem>>, vector<1x16xf32>
    %219 = vector.broadcast %218 : vector<1x16xf32> to vector<16x16xf32>
    %220 = arith.addf %217, %219 : vector<16x16xf32>
    %221 = arith.mulf %63, %220 : vector<16x16xf32>
    %c40 = arith.constant 40 : index
    %c0_71 = arith.constant 0 : index
    %222 = vector.load %arg3[%c40, %c0_71] : memref<1912x256xf32, #tpu.memory_space<vmem>>, vector<16x16xf32>
    %cst_72 = arith.constant dense<0.000000e+00> : vector<16x16xf32>
    %223 = tpu.matmul %221, %222, %cst_72 {dimension_numbers = #tpu.dot_dimension_numbers<[1], [0], [0], [1], [0, 0, 1, 1], [], []>} : vector<16x16xf32>, vector<16x16xf32>, vector<16x16xf32> -> vector<16x16xf32>
    %c19 = arith.constant 19 : index
    %c0_73 = arith.constant 0 : index
    %224 = vector.load %arg2[%c19, %c0_73] : memref<120x256xf32, #tpu.memory_space<vmem>>, vector<1x16xf32>
    %225 = vector.broadcast %224 : vector<1x16xf32> to vector<16x16xf32>
    %226 = arith.addf %223, %225 : vector<16x16xf32>
    %227 = arith.addf %226, %19 : vector<16x16xf32>
    %c20 = arith.constant 20 : index
    %c0_74 = arith.constant 0 : index
    %228 = vector.load %arg2[%c20, %c0_74] : memref<120x256xf32, #tpu.memory_space<vmem>>, vector<1x16xf32>
    %229 = vector.broadcast %228 : vector<1x16xf32> to vector<16x16xf32>
    %230 = arith.mulf %229, %227 : vector<16x16xf32>
    %231 = arith.addf %6, %230 : vector<16x16xf32>
    %c56 = arith.constant 56 : index
    %c0_75 = arith.constant 0 : index
    %232 = vector.load %arg3[%c56, %c0_75] : memref<1912x256xf32, #tpu.memory_space<vmem>>, vector<16x32xf32>
    %cst_76 = arith.constant dense<0.000000e+00> : vector<16x32xf32>
    %233 = tpu.matmul %231, %232, %cst_76 {dimension_numbers = #tpu.dot_dimension_numbers<[1], [0], [0], [1], [0, 0, 1, 1], [], []>} : vector<16x16xf32>, vector<16x32xf32>, vector<16x32xf32> -> vector<16x32xf32>
    %c21 = arith.constant 21 : index
    %c0_77 = arith.constant 0 : index
    %234 = vector.load %arg2[%c21, %c0_77] : memref<120x256xf32, #tpu.memory_space<vmem>>, vector<1x32xf32>
    %235 = vector.broadcast %234 : vector<1x32xf32> to vector<16x32xf32>
    %236 = arith.addf %233, %235 : vector<16x32xf32>
    %237 = tpu.iota {dimensions = array<i32: 0>} : vector<16x16xi32>
    %238 = tpu.iota {dimensions = array<i32: 1>} : vector<16x16xi32>
    %c1_i32_78 = arith.constant 1 : i32
    %239 = vector.broadcast %c1_i32_78 : i32 to vector<16x16xi32>
    %240 = arith.muli %239, %237 : vector<16x16xi32>
    %c-1_i32_79 = arith.constant -1 : i32
    %241 = vector.broadcast %c-1_i32_79 : i32 to vector<16x16xi32>
    %242 = arith.addi %240, %241 : vector<16x16xi32>
    %243 = arith.cmpi eq, %238, %242 : vector<16x16xi32>
    %244 = arith.extui %243 : vector<16x16xi1> to vector<16x16xi32>
    %245 = arith.sitofp %244 : vector<16x16xi32> to vector<16x16xf32>
    %cst_80 = arith.constant dense<0.000000e+00> : vector<16x32xf32>
    %246 = tpu.matmul %245, %236, %cst_80 {dimension_numbers = #tpu.dot_dimension_numbers<[1], [0], [0], [1], [0, 0, 1, 1], [], []>} : vector<16x16xf32>, vector<16x32xf32>, vector<16x32xf32> -> vector<16x32xf32>
    %c22 = arith.constant 22 : index
    %c0_81 = arith.constant 0 : index
    %247 = vector.load %arg2[%c22, %c0_81] : memref<120x256xf32, #tpu.memory_space<vmem>>, vector<1x32xf32>
    %248 = vector.broadcast %247 : vector<1x32xf32> to vector<16x32xf32>
    %249 = arith.mulf %246, %248 : vector<16x32xf32>
    %c23 = arith.constant 23 : index
    %c0_82 = arith.constant 0 : index
    %250 = vector.load %arg2[%c23, %c0_82] : memref<120x256xf32, #tpu.memory_space<vmem>>, vector<1x32xf32>
    %251 = vector.broadcast %250 : vector<1x32xf32> to vector<16x32xf32>
    %252 = arith.mulf %236, %251 : vector<16x32xf32>
    %253 = arith.addf %249, %252 : vector<16x32xf32>
    %254 = tpu.iota {dimensions = array<i32: 0>} : vector<16x16xi32>
    %255 = tpu.iota {dimensions = array<i32: 1>} : vector<16x16xi32>
    %c1_i32_83 = arith.constant 1 : i32
    %256 = vector.broadcast %c1_i32_83 : i32 to vector<16x16xi32>
    %257 = arith.muli %256, %254 : vector<16x16xi32>
    %c1_i32_84 = arith.constant 1 : i32
    %258 = vector.broadcast %c1_i32_84 : i32 to vector<16x16xi32>
    %259 = arith.addi %257, %258 : vector<16x16xi32>
    %260 = arith.cmpi eq, %255, %259 : vector<16x16xi32>
    %261 = arith.extui %260 : vector<16x16xi1> to vector<16x16xi32>
    %262 = arith.sitofp %261 : vector<16x16xi32> to vector<16x16xf32>
    %cst_85 = arith.constant dense<0.000000e+00> : vector<16x32xf32>
    %263 = tpu.matmul %262, %236, %cst_85 {dimension_numbers = #tpu.dot_dimension_numbers<[1], [0], [0], [1], [0, 0, 1, 1], [], []>} : vector<16x16xf32>, vector<16x32xf32>, vector<16x32xf32> -> vector<16x32xf32>
    %c24_86 = arith.constant 24 : index
    %c0_87 = arith.constant 0 : index
    %264 = vector.load %arg2[%c24_86, %c0_87] : memref<120x256xf32, #tpu.memory_space<vmem>>, vector<1x32xf32>
    %265 = vector.broadcast %264 : vector<1x32xf32> to vector<16x32xf32>
    %266 = arith.mulf %263, %265 : vector<16x32xf32>
    %267 = arith.addf %253, %266 : vector<16x32xf32>
    %c25 = arith.constant 25 : index
    %c0_88 = arith.constant 0 : index
    %268 = vector.load %arg2[%c25, %c0_88] : memref<120x256xf32, #tpu.memory_space<vmem>>, vector<1x32xf32>
    %269 = vector.broadcast %268 : vector<1x32xf32> to vector<16x32xf32>
    %270 = arith.addf %267, %269 : vector<16x32xf32>
    %cst_89 = arith.constant 5.000000e-01 : f32
    %271 = vector.broadcast %cst_89 : f32 to vector<16x32xf32>
    %272 = arith.mulf %271, %270 : vector<16x32xf32>
    %cst_90 = arith.constant 0.707106769 : f32
    %273 = vector.broadcast %cst_90 : f32 to vector<16x32xf32>
    %274 = arith.mulf %270, %273 : vector<16x32xf32>
    %275 = math.absf %274 : vector<16x32xf32>
    %cst_91 = arith.constant 0.327591091 : f32
    %276 = vector.broadcast %cst_91 : f32 to vector<16x32xf32>
    %277 = arith.mulf %276, %275 : vector<16x32xf32>
    %cst_92 = arith.constant 1.000000e+00 : f32
    %278 = vector.broadcast %cst_92 : f32 to vector<16x32xf32>
    %279 = arith.addf %278, %277 : vector<16x32xf32>
    %280 = tpu.reciprocal %279 {approx = true} : vector<16x32xf32> -> vector<16x32xf32>
    %cst_93 = arith.constant 1.06140542 : f32
    %281 = vector.broadcast %cst_93 : f32 to vector<16x32xf32>
    %282 = arith.mulf %281, %280 : vector<16x32xf32>
    %cst_94 = arith.constant -1.45315206 : f32
    %283 = vector.broadcast %cst_94 : f32 to vector<16x32xf32>
    %284 = arith.addf %282, %283 : vector<16x32xf32>
    %285 = arith.mulf %284, %280 : vector<16x32xf32>
    %cst_95 = arith.constant 1.42141378 : f32
    %286 = vector.broadcast %cst_95 : f32 to vector<16x32xf32>
    %287 = arith.addf %285, %286 : vector<16x32xf32>
    %288 = arith.mulf %287, %280 : vector<16x32xf32>
    %cst_96 = arith.constant -0.284496725 : f32
    %289 = vector.broadcast %cst_96 : f32 to vector<16x32xf32>
    %290 = arith.addf %288, %289 : vector<16x32xf32>
    %291 = arith.mulf %290, %280 : vector<16x32xf32>
    %cst_97 = arith.constant 0.254829586 : f32
    %292 = vector.broadcast %cst_97 : f32 to vector<16x32xf32>
    %293 = arith.addf %291, %292 : vector<16x32xf32>
    %294 = arith.mulf %293, %280 : vector<16x32xf32>
    %cst_98 = arith.constant 0.000000e+00 : f32
    %295 = vector.broadcast %cst_98 : f32 to vector<16x32xf32>
    %296 = arith.subf %295, %275 : vector<16x32xf32>
    %297 = arith.mulf %296, %275 : vector<16x32xf32>
    %298 = math.exp %297 : vector<16x32xf32>
    %299 = arith.mulf %294, %298 : vector<16x32xf32>
    %cst_99 = arith.constant 1.000000e+00 : f32
    %300 = vector.broadcast %cst_99 : f32 to vector<16x32xf32>
    %301 = arith.subf %300, %299 : vector<16x32xf32>
    %cst_100 = arith.constant 0.000000e+00 : f32
    %302 = vector.broadcast %cst_100 : f32 to vector<16x32xf32>
    %303 = arith.cmpf oge, %274, %302 : vector<16x32xf32>
    %cst_101 = arith.constant 0.000000e+00 : f32
    %304 = vector.broadcast %cst_101 : f32 to vector<16x32xf32>
    %305 = arith.subf %304, %301 : vector<16x32xf32>
    %306 = arith.select %303, %301, %305 : vector<16x32xi1>, vector<16x32xf32>
    %cst_102 = arith.constant 1.000000e+00 : f32
    %307 = vector.broadcast %cst_102 : f32 to vector<16x32xf32>
    %308 = arith.addf %307, %306 : vector<16x32xf32>
    %309 = arith.mulf %272, %308 : vector<16x32xf32>
    %c72 = arith.constant 72 : index
    %c0_103 = arith.constant 0 : index
    %310 = vector.load %arg3[%c72, %c0_103] : memref<1912x256xf32, #tpu.memory_space<vmem>>, vector<32x16xf32>
    %cst_104 = arith.constant dense<0.000000e+00> : vector<16x16xf32>
    %311 = tpu.matmul %309, %310, %cst_104 {dimension_numbers = #tpu.dot_dimension_numbers<[1], [0], [0], [1], [0, 0, 1, 1], [], []>} : vector<16x32xf32>, vector<32x16xf32>, vector<16x16xf32> -> vector<16x16xf32>
    %c26 = arith.constant 26 : index
    %c0_105 = arith.constant 0 : index
    %312 = vector.load %arg2[%c26, %c0_105] : memref<120x256xf32, #tpu.memory_space<vmem>>, vector<1x16xf32>
    %313 = vector.broadcast %312 : vector<1x16xf32> to vector<16x16xf32>
    %314 = arith.addf %311, %313 : vector<16x16xf32>
    %315 = arith.addf %231, %314 : vector<16x16xf32>
    %c1_106 = arith.constant 1 : index
    %c0_107 = arith.constant 0 : index
    %316 = vector.load %arg2[%c1_106, %c0_107] : memref<120x256xf32, #tpu.memory_space<vmem>>, vector<1x16xf32>
    %317 = vector.broadcast %316 : vector<1x16xf32> to vector<16x16xf32>
    %318 = arith.mulf %13, %317 : vector<16x16xf32>
    %c2_108 = arith.constant 2 : index
    %c0_109 = arith.constant 0 : index
    %319 = vector.load %arg2[%c2_108, %c0_109] : memref<120x256xf32, #tpu.memory_space<vmem>>, vector<1x16xf32>
    %320 = vector.broadcast %319 : vector<1x16xf32> to vector<16x16xf32>
    %321 = arith.addf %318, %320 : vector<16x16xf32>
    %c8_110 = arith.constant 8 : index
    %c0_111 = arith.constant 0 : index
    %322 = vector.load %arg3[%c8_110, %c0_111] : memref<1912x256xf32, #tpu.memory_space<vmem>>, vector<16x16xf32>
    %cst_112 = arith.constant dense<0.000000e+00> : vector<16x16xf32>
    %323 = tpu.matmul %321, %322, %cst_112 {dimension_numbers = #tpu.dot_dimension_numbers<[1], [0], [0], [1], [0, 0, 1, 1], [], []>} : vector<16x16xf32>, vector<16x16xf32>, vector<16x16xf32> -> vector<16x16xf32>
    %c3_113 = arith.constant 3 : index
    %c0_114 = arith.constant 0 : index
    %324 = vector.load %arg2[%c3_113, %c0_114] : memref<120x256xf32, #tpu.memory_space<vmem>>, vector<1x16xf32>
    %325 = vector.broadcast %324 : vector<1x16xf32> to vector<16x16xf32>
    %326 = arith.addf %323, %325 : vector<16x16xf32>
    %cst_115 = arith.constant 5.000000e-01 : f32
    %327 = vector.broadcast %cst_115 : f32 to vector<16x16xf32>
    %328 = arith.mulf %327, %326 : vector<16x16xf32>
    %cst_116 = arith.constant 0.707106769 : f32
    %329 = vector.broadcast %cst_116 : f32 to vector<16x16xf32>
    %330 = arith.mulf %326, %329 : vector<16x16xf32>
    %331 = math.absf %330 : vector<16x16xf32>
    %cst_117 = arith.constant 0.327591091 : f32
    %332 = vector.broadcast %cst_117 : f32 to vector<16x16xf32>
    %333 = arith.mulf %332, %331 : vector<16x16xf32>
    %cst_118 = arith.constant 1.000000e+00 : f32
    %334 = vector.broadcast %cst_118 : f32 to vector<16x16xf32>
    %335 = arith.addf %334, %333 : vector<16x16xf32>
    %336 = tpu.reciprocal %335 {approx = true} : vector<16x16xf32> -> vector<16x16xf32>
    %cst_119 = arith.constant 1.06140542 : f32
    %337 = vector.broadcast %cst_119 : f32 to vector<16x16xf32>
    %338 = arith.mulf %337, %336 : vector<16x16xf32>
    %cst_120 = arith.constant -1.45315206 : f32
    %339 = vector.broadcast %cst_120 : f32 to vector<16x16xf32>
    %340 = arith.addf %338, %339 : vector<16x16xf32>
    %341 = arith.mulf %340, %336 : vector<16x16xf32>
    %cst_121 = arith.constant 1.42141378 : f32
    %342 = vector.broadcast %cst_121 : f32 to vector<16x16xf32>
    %343 = arith.addf %341, %342 : vector<16x16xf32>
    %344 = arith.mulf %343, %336 : vector<16x16xf32>
    %cst_122 = arith.constant -0.284496725 : f32
    %345 = vector.broadcast %cst_122 : f32 to vector<16x16xf32>
    %346 = arith.addf %344, %345 : vector<16x16xf32>
    %347 = arith.mulf %346, %336 : vector<16x16xf32>
    %cst_123 = arith.constant 0.254829586 : f32
    %348 = vector.broadcast %cst_123 : f32 to vector<16x16xf32>
    %349 = arith.addf %347, %348 : vector<16x16xf32>
    %350 = arith.mulf %349, %336 : vector<16x16xf32>
    %cst_124 = arith.constant 0.000000e+00 : f32
    %351 = vector.broadcast %cst_124 : f32 to vector<16x16xf32>
    %352 = arith.subf %351, %331 : vector<16x16xf32>
    %353 = arith.mulf %352, %331 : vector<16x16xf32>
    %354 = math.exp %353 : vector<16x16xf32>
    %355 = arith.mulf %350, %354 : vector<16x16xf32>
    %cst_125 = arith.constant 1.000000e+00 : f32
    %356 = vector.broadcast %cst_125 : f32 to vector<16x16xf32>
    %357 = arith.subf %356, %355 : vector<16x16xf32>
    %cst_126 = arith.constant 0.000000e+00 : f32
    %358 = vector.broadcast %cst_126 : f32 to vector<16x16xf32>
    %359 = arith.cmpf oge, %330, %358 : vector<16x16xf32>
    %cst_127 = arith.constant 0.000000e+00 : f32
    %360 = vector.broadcast %cst_127 : f32 to vector<16x16xf32>
    %361 = arith.subf %360, %357 : vector<16x16xf32>
    %362 = arith.select %359, %357, %361 : vector<16x16xi1>, vector<16x16xf32>
    %cst_128 = arith.constant 1.000000e+00 : f32
    %363 = vector.broadcast %cst_128 : f32 to vector<16x16xf32>
    %364 = arith.addf %363, %362 : vector<16x16xf32>
    %365 = arith.mulf %328, %364 : vector<16x16xf32>
    %366 = tpu.iota {dimensions = array<i32: 0>} : vector<16x16xi32>
    %367 = tpu.iota {dimensions = array<i32: 1>} : vector<16x16xi32>
    %c1_i32_129 = arith.constant 1 : i32
    %368 = vector.broadcast %c1_i32_129 : i32 to vector<16x16xi32>
    %369 = arith.muli %368, %366 : vector<16x16xi32>
    %c-2_i32_130 = arith.constant -2 : i32
    %370 = vector.broadcast %c-2_i32_130 : i32 to vector<16x16xi32>
    %371 = arith.addi %369, %370 : vector<16x16xi32>
    %372 = arith.cmpi eq, %367, %371 : vector<16x16xi32>
    %373 = arith.extui %372 : vector<16x16xi1> to vector<16x16xi32>
    %374 = arith.sitofp %373 : vector<16x16xi32> to vector<16x16xf32>
    %cst_131 = arith.constant dense<0.000000e+00> : vector<16x16xf32>
    %375 = tpu.matmul %374, %365, %cst_131 {dimension_numbers = #tpu.dot_dimension_numbers<[1], [0], [0], [1], [0, 0, 1, 1], [], []>} : vector<16x16xf32>, vector<16x16xf32>, vector<16x16xf32> -> vector<16x16xf32>
    %c4_132 = arith.constant 4 : index
    %c0_133 = arith.constant 0 : index
    %376 = vector.load %arg2[%c4_132, %c0_133] : memref<120x256xf32, #tpu.memory_space<vmem>>, vector<1x16xf32>
    %377 = vector.broadcast %376 : vector<1x16xf32> to vector<16x16xf32>
    %378 = arith.mulf %375, %377 : vector<16x16xf32>
    %379 = tpu.iota {dimensions = array<i32: 0>} : vector<16x16xi32>
    %380 = tpu.iota {dimensions = array<i32: 1>} : vector<16x16xi32>
    %c1_i32_134 = arith.constant 1 : i32
    %381 = vector.broadcast %c1_i32_134 : i32 to vector<16x16xi32>
    %382 = arith.muli %381, %379 : vector<16x16xi32>
    %c-1_i32_135 = arith.constant -1 : i32
    %383 = vector.broadcast %c-1_i32_135 : i32 to vector<16x16xi32>
    %384 = arith.addi %382, %383 : vector<16x16xi32>
    %385 = arith.cmpi eq, %380, %384 : vector<16x16xi32>
    %386 = arith.extui %385 : vector<16x16xi1> to vector<16x16xi32>
    %387 = arith.sitofp %386 : vector<16x16xi32> to vector<16x16xf32>
    %cst_136 = arith.constant dense<0.000000e+00> : vector<16x16xf32>
    %388 = tpu.matmul %387, %365, %cst_136 {dimension_numbers = #tpu.dot_dimension_numbers<[1], [0], [0], [1], [0, 0, 1, 1], [], []>} : vector<16x16xf32>, vector<16x16xf32>, vector<16x16xf32> -> vector<16x16xf32>
    %c5_137 = arith.constant 5 : index
    %c0_138 = arith.constant 0 : index
    %389 = vector.load %arg2[%c5_137, %c0_138] : memref<120x256xf32, #tpu.memory_space<vmem>>, vector<1x16xf32>
    %390 = vector.broadcast %389 : vector<1x16xf32> to vector<16x16xf32>
    %391 = arith.mulf %388, %390 : vector<16x16xf32>
    %392 = arith.addf %378, %391 : vector<16x16xf32>
    %c6_139 = arith.constant 6 : index
    %c0_140 = arith.constant 0 : index
    %393 = vector.load %arg2[%c6_139, %c0_140] : memref<120x256xf32, #tpu.memory_space<vmem>>, vector<1x16xf32>
    %394 = vector.broadcast %393 : vector<1x16xf32> to vector<16x16xf32>
    %395 = arith.mulf %365, %394 : vector<16x16xf32>
    %396 = arith.addf %392, %395 : vector<16x16xf32>
    %397 = tpu.iota {dimensions = array<i32: 0>} : vector<16x16xi32>
    %398 = tpu.iota {dimensions = array<i32: 1>} : vector<16x16xi32>
    %c1_i32_141 = arith.constant 1 : i32
    %399 = vector.broadcast %c1_i32_141 : i32 to vector<16x16xi32>
    %400 = arith.muli %399, %397 : vector<16x16xi32>
    %c1_i32_142 = arith.constant 1 : i32
    %401 = vector.broadcast %c1_i32_142 : i32 to vector<16x16xi32>
    %402 = arith.addi %400, %401 : vector<16x16xi32>
    %403 = arith.cmpi eq, %398, %402 : vector<16x16xi32>
    %404 = arith.extui %403 : vector<16x16xi1> to vector<16x16xi32>
    %405 = arith.sitofp %404 : vector<16x16xi32> to vector<16x16xf32>
    %cst_143 = arith.constant dense<0.000000e+00> : vector<16x16xf32>
    %406 = tpu.matmul %405, %365, %cst_143 {dimension_numbers = #tpu.dot_dimension_numbers<[1], [0], [0], [1], [0, 0, 1, 1], [], []>} : vector<16x16xf32>, vector<16x16xf32>, vector<16x16xf32> -> vector<16x16xf32>
    %c7_144 = arith.constant 7 : index
    %c0_145 = arith.constant 0 : index
    %407 = vector.load %arg2[%c7_144, %c0_145] : memref<120x256xf32, #tpu.memory_space<vmem>>, vector<1x16xf32>
    %408 = vector.broadcast %407 : vector<1x16xf32> to vector<16x16xf32>
    %409 = arith.mulf %406, %408 : vector<16x16xf32>
    %410 = arith.addf %396, %409 : vector<16x16xf32>
    %411 = tpu.iota {dimensions = array<i32: 0>} : vector<16x16xi32>
    %412 = tpu.iota {dimensions = array<i32: 1>} : vector<16x16xi32>
    %c1_i32_146 = arith.constant 1 : i32
    %413 = vector.broadcast %c1_i32_146 : i32 to vector<16x16xi32>
    %414 = arith.muli %413, %411 : vector<16x16xi32>
    %c2_i32_147 = arith.constant 2 : i32
    %415 = vector.broadcast %c2_i32_147 : i32 to vector<16x16xi32>
    %416 = arith.addi %414, %415 : vector<16x16xi32>
    %417 = arith.cmpi eq, %412, %416 : vector<16x16xi32>
    %418 = arith.extui %417 : vector<16x16xi1> to vector<16x16xi32>
    %419 = arith.sitofp %418 : vector<16x16xi32> to vector<16x16xf32>
    %cst_148 = arith.constant dense<0.000000e+00> : vector<16x16xf32>
    %420 = tpu.matmul %419, %365, %cst_148 {dimension_numbers = #tpu.dot_dimension_numbers<[1], [0], [0], [1], [0, 0, 1, 1], [], []>} : vector<16x16xf32>, vector<16x16xf32>, vector<16x16xf32> -> vector<16x16xf32>
    %c8_149 = arith.constant 8 : index
    %c0_150 = arith.constant 0 : index
    %421 = vector.load %arg2[%c8_149, %c0_150] : memref<120x256xf32, #tpu.memory_space<vmem>>, vector<1x16xf32>
    %422 = vector.broadcast %421 : vector<1x16xf32> to vector<16x16xf32>
    %423 = arith.mulf %420, %422 : vector<16x16xf32>
    %424 = arith.addf %410, %423 : vector<16x16xf32>
    %c9_151 = arith.constant 9 : index
    %c0_152 = arith.constant 0 : index
    %425 = vector.load %arg2[%c9_151, %c0_152] : memref<120x256xf32, #tpu.memory_space<vmem>>, vector<1x16xf32>
    %426 = vector.broadcast %425 : vector<1x16xf32> to vector<16x16xf32>
    %427 = arith.addf %424, %426 : vector<16x16xf32>
    %428 = tpu.iota {dimensions = array<i32: 0>} : vector<16x16xi32>
    %429 = tpu.iota {dimensions = array<i32: 1>} : vector<16x16xi32>
    %c1_i32_153 = arith.constant 1 : i32
    %430 = vector.broadcast %c1_i32_153 : i32 to vector<16x16xi32>
    %431 = arith.muli %430, %428 : vector<16x16xi32>
    %c-9_i32_154 = arith.constant -9 : i32
    %432 = vector.broadcast %c-9_i32_154 : i32 to vector<16x16xi32>
    %433 = arith.addi %431, %432 : vector<16x16xi32>
    %434 = arith.cmpi eq, %429, %433 : vector<16x16xi32>
    %435 = arith.extui %434 : vector<16x16xi1> to vector<16x16xi32>
    %436 = arith.sitofp %435 : vector<16x16xi32> to vector<16x16xf32>
    %cst_155 = arith.constant dense<0.000000e+00> : vector<16x16xf32>
    %437 = tpu.matmul %436, %427, %cst_155 {dimension_numbers = #tpu.dot_dimension_numbers<[1], [0], [0], [1], [0, 0, 1, 1], [], []>} : vector<16x16xf32>, vector<16x16xf32>, vector<16x16xf32> -> vector<16x16xf32>
    %c10_156 = arith.constant 10 : index
    %c0_157 = arith.constant 0 : index
    %438 = vector.load %arg2[%c10_156, %c0_157] : memref<120x256xf32, #tpu.memory_space<vmem>>, vector<1x16xf32>
    %439 = vector.broadcast %438 : vector<1x16xf32> to vector<16x16xf32>
    %440 = arith.mulf %437, %439 : vector<16x16xf32>
    %441 = tpu.iota {dimensions = array<i32: 0>} : vector<16x16xi32>
    %442 = tpu.iota {dimensions = array<i32: 1>} : vector<16x16xi32>
    %c1_i32_158 = arith.constant 1 : i32
    %443 = vector.broadcast %c1_i32_158 : i32 to vector<16x16xi32>
    %444 = arith.muli %443, %441 : vector<16x16xi32>
    %c-6_i32_159 = arith.constant -6 : i32
    %445 = vector.broadcast %c-6_i32_159 : i32 to vector<16x16xi32>
    %446 = arith.addi %444, %445 : vector<16x16xi32>
    %447 = arith.cmpi eq, %442, %446 : vector<16x16xi32>
    %448 = arith.extui %447 : vector<16x16xi1> to vector<16x16xi32>
    %449 = arith.sitofp %448 : vector<16x16xi32> to vector<16x16xf32>
    %cst_160 = arith.constant dense<0.000000e+00> : vector<16x16xf32>
    %450 = tpu.matmul %449, %427, %cst_160 {dimension_numbers = #tpu.dot_dimension_numbers<[1], [0], [0], [1], [0, 0, 1, 1], [], []>} : vector<16x16xf32>, vector<16x16xf32>, vector<16x16xf32> -> vector<16x16xf32>
    %c11_161 = arith.constant 11 : index
    %c0_162 = arith.constant 0 : index
    %451 = vector.load %arg2[%c11_161, %c0_162] : memref<120x256xf32, #tpu.memory_space<vmem>>, vector<1x16xf32>
    %452 = vector.broadcast %451 : vector<1x16xf32> to vector<16x16xf32>
    %453 = arith.mulf %450, %452 : vector<16x16xf32>
    %454 = arith.addf %440, %453 : vector<16x16xf32>
    %455 = tpu.iota {dimensions = array<i32: 0>} : vector<16x16xi32>
    %456 = tpu.iota {dimensions = array<i32: 1>} : vector<16x16xi32>
    %c1_i32_163 = arith.constant 1 : i32
    %457 = vector.broadcast %c1_i32_163 : i32 to vector<16x16xi32>
    %458 = arith.muli %457, %455 : vector<16x16xi32>
    %c-3_i32_164 = arith.constant -3 : i32
    %459 = vector.broadcast %c-3_i32_164 : i32 to vector<16x16xi32>
    %460 = arith.addi %458, %459 : vector<16x16xi32>
    %461 = arith.cmpi eq, %456, %460 : vector<16x16xi32>
    %462 = arith.extui %461 : vector<16x16xi1> to vector<16x16xi32>
    %463 = arith.sitofp %462 : vector<16x16xi32> to vector<16x16xf32>
    %cst_165 = arith.constant dense<0.000000e+00> : vector<16x16xf32>
    %464 = tpu.matmul %463, %427, %cst_165 {dimension_numbers = #tpu.dot_dimension_numbers<[1], [0], [0], [1], [0, 0, 1, 1], [], []>} : vector<16x16xf32>, vector<16x16xf32>, vector<16x16xf32> -> vector<16x16xf32>
    %c12_166 = arith.constant 12 : index
    %c0_167 = arith.constant 0 : index
    %465 = vector.load %arg2[%c12_166, %c0_167] : memref<120x256xf32, #tpu.memory_space<vmem>>, vector<1x16xf32>
    %466 = vector.broadcast %465 : vector<1x16xf32> to vector<16x16xf32>
    %467 = arith.mulf %464, %466 : vector<16x16xf32>
    %468 = arith.addf %454, %467 : vector<16x16xf32>
    %c13_168 = arith.constant 13 : index
    %c0_169 = arith.constant 0 : index
    %469 = vector.load %arg2[%c13_168, %c0_169] : memref<120x256xf32, #tpu.memory_space<vmem>>, vector<1x16xf32>
    %470 = vector.broadcast %469 : vector<1x16xf32> to vector<16x16xf32>
    %471 = arith.mulf %427, %470 : vector<16x16xf32>
    %472 = arith.addf %468, %471 : vector<16x16xf32>
    %473 = tpu.iota {dimensions = array<i32: 0>} : vector<16x16xi32>
    %474 = tpu.iota {dimensions = array<i32: 1>} : vector<16x16xi32>
    %c1_i32_170 = arith.constant 1 : i32
    %475 = vector.broadcast %c1_i32_170 : i32 to vector<16x16xi32>
    %476 = arith.muli %475, %473 : vector<16x16xi32>
    %c3_i32_171 = arith.constant 3 : i32
    %477 = vector.broadcast %c3_i32_171 : i32 to vector<16x16xi32>
    %478 = arith.addi %476, %477 : vector<16x16xi32>
    %479 = arith.cmpi eq, %474, %478 : vector<16x16xi32>
    %480 = arith.extui %479 : vector<16x16xi1> to vector<16x16xi32>
    %481 = arith.sitofp %480 : vector<16x16xi32> to vector<16x16xf32>
    %cst_172 = arith.constant dense<0.000000e+00> : vector<16x16xf32>
    %482 = tpu.matmul %481, %427, %cst_172 {dimension_numbers = #tpu.dot_dimension_numbers<[1], [0], [0], [1], [0, 0, 1, 1], [], []>} : vector<16x16xf32>, vector<16x16xf32>, vector<16x16xf32> -> vector<16x16xf32>
    %c14_173 = arith.constant 14 : index
    %c0_174 = arith.constant 0 : index
    %483 = vector.load %arg2[%c14_173, %c0_174] : memref<120x256xf32, #tpu.memory_space<vmem>>, vector<1x16xf32>
    %484 = vector.broadcast %483 : vector<1x16xf32> to vector<16x16xf32>
    %485 = arith.mulf %482, %484 : vector<16x16xf32>
    %486 = arith.addf %472, %485 : vector<16x16xf32>
    %487 = tpu.iota {dimensions = array<i32: 0>} : vector<16x16xi32>
    %488 = tpu.iota {dimensions = array<i32: 1>} : vector<16x16xi32>
    %c1_i32_175 = arith.constant 1 : i32
    %489 = vector.broadcast %c1_i32_175 : i32 to vector<16x16xi32>
    %490 = arith.muli %489, %487 : vector<16x16xi32>
    %c6_i32_176 = arith.constant 6 : i32
    %491 = vector.broadcast %c6_i32_176 : i32 to vector<16x16xi32>
    %492 = arith.addi %490, %491 : vector<16x16xi32>
    %493 = arith.cmpi eq, %488, %492 : vector<16x16xi32>
    %494 = arith.extui %493 : vector<16x16xi1> to vector<16x16xi32>
    %495 = arith.sitofp %494 : vector<16x16xi32> to vector<16x16xf32>
    %cst_177 = arith.constant dense<0.000000e+00> : vector<16x16xf32>
    %496 = tpu.matmul %495, %427, %cst_177 {dimension_numbers = #tpu.dot_dimension_numbers<[1], [0], [0], [1], [0, 0, 1, 1], [], []>} : vector<16x16xf32>, vector<16x16xf32>, vector<16x16xf32> -> vector<16x16xf32>
    %c15_178 = arith.constant 15 : index
    %c0_179 = arith.constant 0 : index
    %497 = vector.load %arg2[%c15_178, %c0_179] : memref<120x256xf32, #tpu.memory_space<vmem>>, vector<1x16xf32>
    %498 = vector.broadcast %497 : vector<1x16xf32> to vector<16x16xf32>
    %499 = arith.mulf %496, %498 : vector<16x16xf32>
    %500 = arith.addf %486, %499 : vector<16x16xf32>
    %501 = tpu.iota {dimensions = array<i32: 0>} : vector<16x16xi32>
    %502 = tpu.iota {dimensions = array<i32: 1>} : vector<16x16xi32>
    %c1_i32_180 = arith.constant 1 : i32
    %503 = vector.broadcast %c1_i32_180 : i32 to vector<16x16xi32>
    %504 = arith.muli %503, %501 : vector<16x16xi32>
    %c9_i32_181 = arith.constant 9 : i32
    %505 = vector.broadcast %c9_i32_181 : i32 to vector<16x16xi32>
    %506 = arith.addi %504, %505 : vector<16x16xi32>
    %507 = arith.cmpi eq, %502, %506 : vector<16x16xi32>
    %508 = arith.extui %507 : vector<16x16xi1> to vector<16x16xi32>
    %509 = arith.sitofp %508 : vector<16x16xi32> to vector<16x16xf32>
    %cst_182 = arith.constant dense<0.000000e+00> : vector<16x16xf32>
    %510 = tpu.matmul %509, %427, %cst_182 {dimension_numbers = #tpu.dot_dimension_numbers<[1], [0], [0], [1], [0, 0, 1, 1], [], []>} : vector<16x16xf32>, vector<16x16xf32>, vector<16x16xf32> -> vector<16x16xf32>
    %c16_183 = arith.constant 16 : index
    %c0_184 = arith.constant 0 : index
    %511 = vector.load %arg2[%c16_183, %c0_184] : memref<120x256xf32, #tpu.memory_space<vmem>>, vector<1x16xf32>
    %512 = vector.broadcast %511 : vector<1x16xf32> to vector<16x16xf32>
    %513 = arith.mulf %510, %512 : vector<16x16xf32>
    %514 = arith.addf %500, %513 : vector<16x16xf32>
    %c17_185 = arith.constant 17 : index
    %c0_186 = arith.constant 0 : index
    %515 = vector.load %arg2[%c17_185, %c0_186] : memref<120x256xf32, #tpu.memory_space<vmem>>, vector<1x16xf32>
    %516 = vector.broadcast %515 : vector<1x16xf32> to vector<16x16xf32>
    %517 = arith.addf %514, %516 : vector<16x16xf32>
    %c24_187 = arith.constant 24 : index
    %c0_188 = arith.constant 0 : index
    %518 = vector.load %arg3[%c24_187, %c0_188] : memref<1912x256xf32, #tpu.memory_space<vmem>>, vector<16x16xf32>
    %cst_189 = arith.constant dense<0.000000e+00> : vector<16x16xf32>
    %519 = tpu.matmul %517, %518, %cst_189 {dimension_numbers = #tpu.dot_dimension_numbers<[1], [0], [0], [1], [0, 0, 1, 1], [], []>} : vector<16x16xf32>, vector<16x16xf32>, vector<16x16xf32> -> vector<16x16xf32>
    %c18_190 = arith.constant 18 : index
    %c0_191 = arith.constant 0 : index
    %520 = vector.load %arg2[%c18_190, %c0_191] : memref<120x256xf32, #tpu.memory_space<vmem>>, vector<1x16xf32>
    %521 = vector.broadcast %520 : vector<1x16xf32> to vector<16x16xf32>
    %522 = arith.addf %519, %521 : vector<16x16xf32>
    %523 = arith.mulf %365, %522 : vector<16x16xf32>
    %c40_192 = arith.constant 40 : index
    %c0_193 = arith.constant 0 : index
    %524 = vector.load %arg3[%c40_192, %c0_193] : memref<1912x256xf32, #tpu.memory_space<vmem>>, vector<16x16xf32>
    %cst_194 = arith.constant dense<0.000000e+00> : vector<16x16xf32>
    %525 = tpu.matmul %523, %524, %cst_194 {dimension_numbers = #tpu.dot_dimension_numbers<[1], [0], [0], [1], [0, 0, 1, 1], [], []>} : vector<16x16xf32>, vector<16x16xf32>, vector<16x16xf32> -> vector<16x16xf32>
    %c19_195 = arith.constant 19 : index
    %c0_196 = arith.constant 0 : index
    %526 = vector.load %arg2[%c19_195, %c0_196] : memref<120x256xf32, #tpu.memory_space<vmem>>, vector<1x16xf32>
    %527 = vector.broadcast %526 : vector<1x16xf32> to vector<16x16xf32>
    %528 = arith.addf %525, %527 : vector<16x16xf32>
    %529 = arith.addf %528, %321 : vector<16x16xf32>
    %c20_197 = arith.constant 20 : index
    %c0_198 = arith.constant 0 : index
    %530 = vector.load %arg2[%c20_197, %c0_198] : memref<120x256xf32, #tpu.memory_space<vmem>>, vector<1x16xf32>
    %531 = vector.broadcast %530 : vector<1x16xf32> to vector<16x16xf32>
    %532 = arith.mulf %531, %529 : vector<16x16xf32>
    %533 = arith.addf %13, %532 : vector<16x16xf32>
    %c56_199 = arith.constant 56 : index
    %c0_200 = arith.constant 0 : index
    %534 = vector.load %arg3[%c56_199, %c0_200] : memref<1912x256xf32, #tpu.memory_space<vmem>>, vector<16x32xf32>
    %cst_201 = arith.constant dense<0.000000e+00> : vector<16x32xf32>
    %535 = tpu.matmul %533, %534, %cst_201 {dimension_numbers = #tpu.dot_dimension_numbers<[1], [0], [0], [1], [0, 0, 1, 1], [], []>} : vector<16x16xf32>, vector<16x32xf32>, vector<16x32xf32> -> vector<16x32xf32>
    %c21_202 = arith.constant 21 : index
    %c0_203 = arith.constant 0 : index
    %536 = vector.load %arg2[%c21_202, %c0_203] : memref<120x256xf32, #tpu.memory_space<vmem>>, vector<1x32xf32>
    %537 = vector.broadcast %536 : vector<1x32xf32> to vector<16x32xf32>
    %538 = arith.addf %535, %537 : vector<16x32xf32>
    %539 = tpu.iota {dimensions = array<i32: 0>} : vector<16x16xi32>
    %540 = tpu.iota {dimensions = array<i32: 1>} : vector<16x16xi32>
    %c1_i32_204 = arith.constant 1 : i32
    %541 = vector.broadcast %c1_i32_204 : i32 to vector<16x16xi32>
    %542 = arith.muli %541, %539 : vector<16x16xi32>
    %c-1_i32_205 = arith.constant -1 : i32
    %543 = vector.broadcast %c-1_i32_205 : i32 to vector<16x16xi32>
    %544 = arith.addi %542, %543 : vector<16x16xi32>
    %545 = arith.cmpi eq, %540, %544 : vector<16x16xi32>
    %546 = arith.extui %545 : vector<16x16xi1> to vector<16x16xi32>
    %547 = arith.sitofp %546 : vector<16x16xi32> to vector<16x16xf32>
    %cst_206 = arith.constant dense<0.000000e+00> : vector<16x32xf32>
    %548 = tpu.matmul %547, %538, %cst_206 {dimension_numbers = #tpu.dot_dimension_numbers<[1], [0], [0], [1], [0, 0, 1, 1], [], []>} : vector<16x16xf32>, vector<16x32xf32>, vector<16x32xf32> -> vector<16x32xf32>
    %c22_207 = arith.constant 22 : index
    %c0_208 = arith.constant 0 : index
    %549 = vector.load %arg2[%c22_207, %c0_208] : memref<120x256xf32, #tpu.memory_space<vmem>>, vector<1x32xf32>
    %550 = vector.broadcast %549 : vector<1x32xf32> to vector<16x32xf32>
    %551 = arith.mulf %548, %550 : vector<16x32xf32>
    %c23_209 = arith.constant 23 : index
    %c0_210 = arith.constant 0 : index
    %552 = vector.load %arg2[%c23_209, %c0_210] : memref<120x256xf32, #tpu.memory_space<vmem>>, vector<1x32xf32>
    %553 = vector.broadcast %552 : vector<1x32xf32> to vector<16x32xf32>
    %554 = arith.mulf %538, %553 : vector<16x32xf32>
    %555 = arith.addf %551, %554 : vector<16x32xf32>
    %556 = tpu.iota {dimensions = array<i32: 0>} : vector<16x16xi32>
    %557 = tpu.iota {dimensions = array<i32: 1>} : vector<16x16xi32>
    %c1_i32_211 = arith.constant 1 : i32
    %558 = vector.broadcast %c1_i32_211 : i32 to vector<16x16xi32>
    %559 = arith.muli %558, %556 : vector<16x16xi32>
    %c1_i32_212 = arith.constant 1 : i32
    %560 = vector.broadcast %c1_i32_212 : i32 to vector<16x16xi32>
    %561 = arith.addi %559, %560 : vector<16x16xi32>
    %562 = arith.cmpi eq, %557, %561 : vector<16x16xi32>
    %563 = arith.extui %562 : vector<16x16xi1> to vector<16x16xi32>
    %564 = arith.sitofp %563 : vector<16x16xi32> to vector<16x16xf32>
    %cst_213 = arith.constant dense<0.000000e+00> : vector<16x32xf32>
    %565 = tpu.matmul %564, %538, %cst_213 {dimension_numbers = #tpu.dot_dimension_numbers<[1], [0], [0], [1], [0, 0, 1, 1], [], []>} : vector<16x16xf32>, vector<16x32xf32>, vector<16x32xf32> -> vector<16x32xf32>
    %c24_214 = arith.constant 24 : index
    %c0_215 = arith.constant 0 : index
    %566 = vector.load %arg2[%c24_214, %c0_215] : memref<120x256xf32, #tpu.memory_space<vmem>>, vector<1x32xf32>
    %567 = vector.broadcast %566 : vector<1x32xf32> to vector<16x32xf32>
    %568 = arith.mulf %565, %567 : vector<16x32xf32>
    %569 = arith.addf %555, %568 : vector<16x32xf32>
    %c25_216 = arith.constant 25 : index
    %c0_217 = arith.constant 0 : index
    %570 = vector.load %arg2[%c25_216, %c0_217] : memref<120x256xf32, #tpu.memory_space<vmem>>, vector<1x32xf32>
    %571 = vector.broadcast %570 : vector<1x32xf32> to vector<16x32xf32>
    %572 = arith.addf %569, %571 : vector<16x32xf32>
    %cst_218 = arith.constant 5.000000e-01 : f32
    %573 = vector.broadcast %cst_218 : f32 to vector<16x32xf32>
    %574 = arith.mulf %573, %572 : vector<16x32xf32>
    %cst_219 = arith.constant 0.707106769 : f32
    %575 = vector.broadcast %cst_219 : f32 to vector<16x32xf32>
    %576 = arith.mulf %572, %575 : vector<16x32xf32>
    %577 = math.absf %576 : vector<16x32xf32>
    %cst_220 = arith.constant 0.327591091 : f32
    %578 = vector.broadcast %cst_220 : f32 to vector<16x32xf32>
    %579 = arith.mulf %578, %577 : vector<16x32xf32>
    %cst_221 = arith.constant 1.000000e+00 : f32
    %580 = vector.broadcast %cst_221 : f32 to vector<16x32xf32>
    %581 = arith.addf %580, %579 : vector<16x32xf32>
    %582 = tpu.reciprocal %581 {approx = true} : vector<16x32xf32> -> vector<16x32xf32>
    %cst_222 = arith.constant 1.06140542 : f32
    %583 = vector.broadcast %cst_222 : f32 to vector<16x32xf32>
    %584 = arith.mulf %583, %582 : vector<16x32xf32>
    %cst_223 = arith.constant -1.45315206 : f32
    %585 = vector.broadcast %cst_223 : f32 to vector<16x32xf32>
    %586 = arith.addf %584, %585 : vector<16x32xf32>
    %587 = arith.mulf %586, %582 : vector<16x32xf32>
    %cst_224 = arith.constant 1.42141378 : f32
    %588 = vector.broadcast %cst_224 : f32 to vector<16x32xf32>
    %589 = arith.addf %587, %588 : vector<16x32xf32>
    %590 = arith.mulf %589, %582 : vector<16x32xf32>
    %cst_225 = arith.constant -0.284496725 : f32
    %591 = vector.broadcast %cst_225 : f32 to vector<16x32xf32>
    %592 = arith.addf %590, %591 : vector<16x32xf32>
    %593 = arith.mulf %592, %582 : vector<16x32xf32>
    %cst_226 = arith.constant 0.254829586 : f32
    %594 = vector.broadcast %cst_226 : f32 to vector<16x32xf32>
    %595 = arith.addf %593, %594 : vector<16x32xf32>
    %596 = arith.mulf %595, %582 : vector<16x32xf32>
    %cst_227 = arith.constant 0.000000e+00 : f32
    %597 = vector.broadcast %cst_227 : f32 to vector<16x32xf32>
    %598 = arith.subf %597, %577 : vector<16x32xf32>
    %599 = arith.mulf %598, %577 : vector<16x32xf32>
    %600 = math.exp %599 : vector<16x32xf32>
    %601 = arith.mulf %596, %600 : vector<16x32xf32>
    %cst_228 = arith.constant 1.000000e+00 : f32
    %602 = vector.broadcast %cst_228 : f32 to vector<16x32xf32>
    %603 = arith.subf %602, %601 : vector<16x32xf32>
    %cst_229 = arith.constant 0.000000e+00 : f32
    %604 = vector.broadcast %cst_229 : f32 to vector<16x32xf32>
    %605 = arith.cmpf oge, %576, %604 : vector<16x32xf32>
    %cst_230 = arith.constant 0.000000e+00 : f32
    %606 = vector.broadcast %cst_230 : f32 to vector<16x32xf32>
    %607 = arith.subf %606, %603 : vector<16x32xf32>
    %608 = arith.select %605, %603, %607 : vector<16x32xi1>, vector<16x32xf32>
    %cst_231 = arith.constant 1.000000e+00 : f32
    %609 = vector.broadcast %cst_231 : f32 to vector<16x32xf32>
    %610 = arith.addf %609, %608 : vector<16x32xf32>
    %611 = arith.mulf %574, %610 : vector<16x32xf32>
    %c72_232 = arith.constant 72 : index
    %c0_233 = arith.constant 0 : index
    %612 = vector.load %arg3[%c72_232, %c0_233] : memref<1912x256xf32, #tpu.memory_space<vmem>>, vector<32x16xf32>
    %cst_234 = arith.constant dense<0.000000e+00> : vector<16x16xf32>
    %613 = tpu.matmul %611, %612, %cst_234 {dimension_numbers = #tpu.dot_dimension_numbers<[1], [0], [0], [1], [0, 0, 1, 1], [], []>} : vector<16x32xf32>, vector<32x16xf32>, vector<16x16xf32> -> vector<16x16xf32>
    %c26_235 = arith.constant 26 : index
    %c0_236 = arith.constant 0 : index
    %614 = vector.load %arg2[%c26_235, %c0_236] : memref<120x256xf32, #tpu.memory_space<vmem>>, vector<1x16xf32>
    %615 = vector.broadcast %614 : vector<1x16xf32> to vector<16x16xf32>
    %616 = arith.addf %613, %615 : vector<16x16xf32>
    %617 = arith.addf %533, %616 : vector<16x16xf32>
    %c27 = arith.constant 27 : index
    %c0_237 = arith.constant 0 : index
    %618 = vector.load %arg2[%c27, %c0_237] : memref<120x256xf32, #tpu.memory_space<vmem>>, vector<1x16xf32>
    %c28 = arith.constant 28 : index
    %c0_238 = arith.constant 0 : index
    %619 = vector.load %arg2[%c28, %c0_238] : memref<120x256xf32, #tpu.memory_space<vmem>>, vector<1x16xf32>
    %cst_239 = arith.constant dense<0.000000e+00> : vector<16xf32>
    %620 = vector.multi_reduction <add>, %315, %cst_239 [1] : vector<16x16xf32> to vector<16xf32>
    %621 = vector.shape_cast %620 : vector<16xf32> to vector<16x1xf32>
    %cst_240 = arith.constant 1.600000e+01 : f32
    %622 = vector.broadcast %cst_240 : f32 to vector<16x1xf32>
    %623 = arith.divf %621, %622 : vector<16x1xf32>
    %624 = vector.broadcast %623 : vector<16x1xf32> to vector<16x16xf32>
    %625 = arith.subf %315, %624 : vector<16x16xf32>
    %626 = arith.mulf %625, %625 : vector<16x16xf32>
    %cst_241 = arith.constant dense<0.000000e+00> : vector<16xf32>
    %627 = vector.multi_reduction <add>, %626, %cst_241 [1] : vector<16x16xf32> to vector<16xf32>
    %628 = vector.shape_cast %627 : vector<16xf32> to vector<16x1xf32>
    %cst_242 = arith.constant 1.600000e+01 : f32
    %629 = vector.broadcast %cst_242 : f32 to vector<16x1xf32>
    %630 = arith.divf %628, %629 : vector<16x1xf32>
    %cst_243 = arith.constant 9.99999974E-6 : f32
    %631 = vector.broadcast %cst_243 : f32 to vector<16x1xf32>
    %632 = arith.addf %630, %631 : vector<16x1xf32>
    %633 = math.rsqrt %632 : vector<16x1xf32>
    %634 = vector.broadcast %633 : vector<16x1xf32> to vector<16x16xf32>
    %635 = arith.mulf %625, %634 : vector<16x16xf32>
    %636 = vector.broadcast %618 : vector<1x16xf32> to vector<16x16xf32>
    %637 = arith.mulf %635, %636 : vector<16x16xf32>
    %638 = vector.broadcast %619 : vector<1x16xf32> to vector<16x16xf32>
    %639 = arith.addf %637, %638 : vector<16x16xf32>
    %cst_244 = arith.constant dense<0.000000e+00> : vector<16xf32>
    %640 = vector.multi_reduction <add>, %617, %cst_244 [1] : vector<16x16xf32> to vector<16xf32>
    %641 = vector.shape_cast %640 : vector<16xf32> to vector<16x1xf32>
    %cst_245 = arith.constant 1.600000e+01 : f32
    %642 = vector.broadcast %cst_245 : f32 to vector<16x1xf32>
    %643 = arith.divf %641, %642 : vector<16x1xf32>
    %644 = vector.broadcast %643 : vector<16x1xf32> to vector<16x16xf32>
    %645 = arith.subf %617, %644 : vector<16x16xf32>
    %646 = arith.mulf %645, %645 : vector<16x16xf32>
    %cst_246 = arith.constant dense<0.000000e+00> : vector<16xf32>
    %647 = vector.multi_reduction <add>, %646, %cst_246 [1] : vector<16x16xf32> to vector<16xf32>
    %648 = vector.shape_cast %647 : vector<16xf32> to vector<16x1xf32>
    %cst_247 = arith.constant 1.600000e+01 : f32
    %649 = vector.broadcast %cst_247 : f32 to vector<16x1xf32>
    %650 = arith.divf %648, %649 : vector<16x1xf32>
    %cst_248 = arith.constant 9.99999974E-6 : f32
    %651 = vector.broadcast %cst_248 : f32 to vector<16x1xf32>
    %652 = arith.addf %650, %651 : vector<16x1xf32>
    %653 = math.rsqrt %652 : vector<16x1xf32>
    %654 = vector.broadcast %653 : vector<16x1xf32> to vector<16x16xf32>
    %655 = arith.mulf %645, %654 : vector<16x16xf32>
    %656 = vector.broadcast %618 : vector<1x16xf32> to vector<16x16xf32>
    %657 = arith.mulf %655, %656 : vector<16x16xf32>
    %658 = vector.broadcast %619 : vector<1x16xf32> to vector<16x16xf32>
    %659 = arith.addf %657, %658 : vector<16x16xf32>
    %c29 = arith.constant 29 : index
    %c0_249 = arith.constant 0 : index
    %660 = vector.load %arg2[%c29, %c0_249] : memref<120x256xf32, #tpu.memory_space<vmem>>, vector<1x32xf32>
    %661 = tpu.iota {dimensions = array<i32: 0>} : vector<8x16xi32>
    %662 = tpu.iota {dimensions = array<i32: 1>} : vector<8x16xi32>
    %c2_i32_250 = arith.constant 2 : i32
    %663 = vector.broadcast %c2_i32_250 : i32 to vector<8x16xi32>
    %664 = arith.muli %663, %661 : vector<8x16xi32>
    %c-1_i32_251 = arith.constant -1 : i32
    %665 = vector.broadcast %c-1_i32_251 : i32 to vector<8x16xi32>
    %666 = arith.addi %664, %665 : vector<8x16xi32>
    %667 = arith.cmpi eq, %662, %666 : vector<8x16xi32>
    %668 = arith.extui %667 : vector<8x16xi1> to vector<8x16xi32>
    %669 = arith.sitofp %668 : vector<8x16xi32> to vector<8x16xf32>
    %cst_252 = arith.constant dense<0.000000e+00> : vector<8x16xf32>
    %670 = tpu.matmul %669, %639, %cst_252 {dimension_numbers = #tpu.dot_dimension_numbers<[1], [0], [0], [1], [0, 0, 1, 1], [], []>} : vector<8x16xf32>, vector<16x16xf32>, vector<8x16xf32> -> vector<8x16xf32>
    %c104 = arith.constant 104 : index
    %c0_253 = arith.constant 0 : index
    %671 = vector.load %arg3[%c104, %c0_253] : memref<1912x256xf32, #tpu.memory_space<vmem>>, vector<16x32xf32>
    %cst_254 = arith.constant dense<0.000000e+00> : vector<8x32xf32>
    %672 = tpu.matmul %670, %671, %cst_254 {dimension_numbers = #tpu.dot_dimension_numbers<[1], [0], [0], [1], [0, 0, 1, 1], [], []>} : vector<8x16xf32>, vector<16x32xf32>, vector<8x32xf32> -> vector<8x32xf32>
    %673 = tpu.iota {dimensions = array<i32: 0>} : vector<8x16xi32>
    %674 = tpu.iota {dimensions = array<i32: 1>} : vector<8x16xi32>
    %c2_i32_255 = arith.constant 2 : i32
    %675 = vector.broadcast %c2_i32_255 : i32 to vector<8x16xi32>
    %676 = arith.muli %675, %673 : vector<8x16xi32>
    %c0_i32 = arith.constant 0 : i32
    %677 = vector.broadcast %c0_i32 : i32 to vector<8x16xi32>
    %678 = arith.addi %676, %677 : vector<8x16xi32>
    %679 = arith.cmpi eq, %674, %678 : vector<8x16xi32>
    %680 = arith.extui %679 : vector<8x16xi1> to vector<8x16xi32>
    %681 = arith.sitofp %680 : vector<8x16xi32> to vector<8x16xf32>
    %cst_256 = arith.constant dense<0.000000e+00> : vector<8x16xf32>
    %682 = tpu.matmul %681, %639, %cst_256 {dimension_numbers = #tpu.dot_dimension_numbers<[1], [0], [0], [1], [0, 0, 1, 1], [], []>} : vector<8x16xf32>, vector<16x16xf32>, vector<8x16xf32> -> vector<8x16xf32>
    %c120 = arith.constant 120 : index
    %c0_257 = arith.constant 0 : index
    %683 = vector.load %arg3[%c120, %c0_257] : memref<1912x256xf32, #tpu.memory_space<vmem>>, vector<16x32xf32>
    %cst_258 = arith.constant dense<0.000000e+00> : vector<8x32xf32>
    %684 = tpu.matmul %682, %683, %cst_258 {dimension_numbers = #tpu.dot_dimension_numbers<[1], [0], [0], [1], [0, 0, 1, 1], [], []>} : vector<8x16xf32>, vector<16x32xf32>, vector<8x32xf32> -> vector<8x32xf32>
    %685 = arith.addf %672, %684 : vector<8x32xf32>
    %686 = tpu.iota {dimensions = array<i32: 0>} : vector<8x16xi32>
    %687 = tpu.iota {dimensions = array<i32: 1>} : vector<8x16xi32>
    %c2_i32_259 = arith.constant 2 : i32
    %688 = vector.broadcast %c2_i32_259 : i32 to vector<8x16xi32>
    %689 = arith.muli %688, %686 : vector<8x16xi32>
    %c1_i32_260 = arith.constant 1 : i32
    %690 = vector.broadcast %c1_i32_260 : i32 to vector<8x16xi32>
    %691 = arith.addi %689, %690 : vector<8x16xi32>
    %692 = arith.cmpi eq, %687, %691 : vector<8x16xi32>
    %693 = arith.extui %692 : vector<8x16xi1> to vector<8x16xi32>
    %694 = arith.sitofp %693 : vector<8x16xi32> to vector<8x16xf32>
    %cst_261 = arith.constant dense<0.000000e+00> : vector<8x16xf32>
    %695 = tpu.matmul %694, %639, %cst_261 {dimension_numbers = #tpu.dot_dimension_numbers<[1], [0], [0], [1], [0, 0, 1, 1], [], []>} : vector<8x16xf32>, vector<16x16xf32>, vector<8x16xf32> -> vector<8x16xf32>
    %c136 = arith.constant 136 : index
    %c0_262 = arith.constant 0 : index
    %696 = vector.load %arg3[%c136, %c0_262] : memref<1912x256xf32, #tpu.memory_space<vmem>>, vector<16x32xf32>
    %cst_263 = arith.constant dense<0.000000e+00> : vector<8x32xf32>
    %697 = tpu.matmul %695, %696, %cst_263 {dimension_numbers = #tpu.dot_dimension_numbers<[1], [0], [0], [1], [0, 0, 1, 1], [], []>} : vector<8x16xf32>, vector<16x32xf32>, vector<8x32xf32> -> vector<8x32xf32>
    %698 = arith.addf %685, %697 : vector<8x32xf32>
    %699 = vector.broadcast %660 : vector<1x32xf32> to vector<8x32xf32>
    %700 = arith.addf %698, %699 : vector<8x32xf32>
    %701 = tpu.iota {dimensions = array<i32: 0>} : vector<8x16xi32>
    %702 = tpu.iota {dimensions = array<i32: 1>} : vector<8x16xi32>
    %c2_i32_264 = arith.constant 2 : i32
    %703 = vector.broadcast %c2_i32_264 : i32 to vector<8x16xi32>
    %704 = arith.muli %703, %701 : vector<8x16xi32>
    %c-1_i32_265 = arith.constant -1 : i32
    %705 = vector.broadcast %c-1_i32_265 : i32 to vector<8x16xi32>
    %706 = arith.addi %704, %705 : vector<8x16xi32>
    %707 = arith.cmpi eq, %702, %706 : vector<8x16xi32>
    %708 = arith.extui %707 : vector<8x16xi1> to vector<8x16xi32>
    %709 = arith.sitofp %708 : vector<8x16xi32> to vector<8x16xf32>
    %cst_266 = arith.constant dense<0.000000e+00> : vector<8x16xf32>
    %710 = tpu.matmul %709, %659, %cst_266 {dimension_numbers = #tpu.dot_dimension_numbers<[1], [0], [0], [1], [0, 0, 1, 1], [], []>} : vector<8x16xf32>, vector<16x16xf32>, vector<8x16xf32> -> vector<8x16xf32>
    %c104_267 = arith.constant 104 : index
    %c0_268 = arith.constant 0 : index
    %711 = vector.load %arg3[%c104_267, %c0_268] : memref<1912x256xf32, #tpu.memory_space<vmem>>, vector<16x32xf32>
    %cst_269 = arith.constant dense<0.000000e+00> : vector<8x32xf32>
    %712 = tpu.matmul %710, %711, %cst_269 {dimension_numbers = #tpu.dot_dimension_numbers<[1], [0], [0], [1], [0, 0, 1, 1], [], []>} : vector<8x16xf32>, vector<16x32xf32>, vector<8x32xf32> -> vector<8x32xf32>
    %713 = tpu.iota {dimensions = array<i32: 0>} : vector<8x16xi32>
    %714 = tpu.iota {dimensions = array<i32: 1>} : vector<8x16xi32>
    %c2_i32_270 = arith.constant 2 : i32
    %715 = vector.broadcast %c2_i32_270 : i32 to vector<8x16xi32>
    %716 = arith.muli %715, %713 : vector<8x16xi32>
    %c0_i32_271 = arith.constant 0 : i32
    %717 = vector.broadcast %c0_i32_271 : i32 to vector<8x16xi32>
    %718 = arith.addi %716, %717 : vector<8x16xi32>
    %719 = arith.cmpi eq, %714, %718 : vector<8x16xi32>
    %720 = arith.extui %719 : vector<8x16xi1> to vector<8x16xi32>
    %721 = arith.sitofp %720 : vector<8x16xi32> to vector<8x16xf32>
    %cst_272 = arith.constant dense<0.000000e+00> : vector<8x16xf32>
    %722 = tpu.matmul %721, %659, %cst_272 {dimension_numbers = #tpu.dot_dimension_numbers<[1], [0], [0], [1], [0, 0, 1, 1], [], []>} : vector<8x16xf32>, vector<16x16xf32>, vector<8x16xf32> -> vector<8x16xf32>
    %c120_273 = arith.constant 120 : index
    %c0_274 = arith.constant 0 : index
    %723 = vector.load %arg3[%c120_273, %c0_274] : memref<1912x256xf32, #tpu.memory_space<vmem>>, vector<16x32xf32>
    %cst_275 = arith.constant dense<0.000000e+00> : vector<8x32xf32>
    %724 = tpu.matmul %722, %723, %cst_275 {dimension_numbers = #tpu.dot_dimension_numbers<[1], [0], [0], [1], [0, 0, 1, 1], [], []>} : vector<8x16xf32>, vector<16x32xf32>, vector<8x32xf32> -> vector<8x32xf32>
    %725 = arith.addf %712, %724 : vector<8x32xf32>
    %726 = tpu.iota {dimensions = array<i32: 0>} : vector<8x16xi32>
    %727 = tpu.iota {dimensions = array<i32: 1>} : vector<8x16xi32>
    %c2_i32_276 = arith.constant 2 : i32
    %728 = vector.broadcast %c2_i32_276 : i32 to vector<8x16xi32>
    %729 = arith.muli %728, %726 : vector<8x16xi32>
    %c1_i32_277 = arith.constant 1 : i32
    %730 = vector.broadcast %c1_i32_277 : i32 to vector<8x16xi32>
    %731 = arith.addi %729, %730 : vector<8x16xi32>
    %732 = arith.cmpi eq, %727, %731 : vector<8x16xi32>
    %733 = arith.extui %732 : vector<8x16xi1> to vector<8x16xi32>
    %734 = arith.sitofp %733 : vector<8x16xi32> to vector<8x16xf32>
    %cst_278 = arith.constant dense<0.000000e+00> : vector<8x16xf32>
    %735 = tpu.matmul %734, %659, %cst_278 {dimension_numbers = #tpu.dot_dimension_numbers<[1], [0], [0], [1], [0, 0, 1, 1], [], []>} : vector<8x16xf32>, vector<16x16xf32>, vector<8x16xf32> -> vector<8x16xf32>
    %c136_279 = arith.constant 136 : index
    %c0_280 = arith.constant 0 : index
    %736 = vector.load %arg3[%c136_279, %c0_280] : memref<1912x256xf32, #tpu.memory_space<vmem>>, vector<16x32xf32>
    %cst_281 = arith.constant dense<0.000000e+00> : vector<8x32xf32>
    %737 = tpu.matmul %735, %736, %cst_281 {dimension_numbers = #tpu.dot_dimension_numbers<[1], [0], [0], [1], [0, 0, 1, 1], [], []>} : vector<8x16xf32>, vector<16x32xf32>, vector<8x32xf32> -> vector<8x32xf32>
    %738 = arith.addf %725, %737 : vector<8x32xf32>
    %739 = vector.broadcast %660 : vector<1x32xf32> to vector<8x32xf32>
    %740 = arith.addf %738, %739 : vector<8x32xf32>
    %c30 = arith.constant 30 : index
    %c0_282 = arith.constant 0 : index
    %741 = vector.load %arg2[%c30, %c0_282] : memref<120x256xf32, #tpu.memory_space<vmem>>, vector<1x32xf32>
    %742 = vector.broadcast %741 : vector<1x32xf32> to vector<8x32xf32>
    %743 = arith.mulf %700, %742 : vector<8x32xf32>
    %c31 = arith.constant 31 : index
    %c0_283 = arith.constant 0 : index
    %744 = vector.load %arg2[%c31, %c0_283] : memref<120x256xf32, #tpu.memory_space<vmem>>, vector<1x32xf32>
    %745 = vector.broadcast %744 : vector<1x32xf32> to vector<8x32xf32>
    %746 = arith.addf %743, %745 : vector<8x32xf32>
    %c152 = arith.constant 152 : index
    %c0_284 = arith.constant 0 : index
    %747 = vector.load %arg3[%c152, %c0_284] : memref<1912x256xf32, #tpu.memory_space<vmem>>, vector<32x32xf32>
    %cst_285 = arith.constant dense<0.000000e+00> : vector<8x32xf32>
    %748 = tpu.matmul %746, %747, %cst_285 {dimension_numbers = #tpu.dot_dimension_numbers<[1], [0], [0], [1], [0, 0, 1, 1], [], []>} : vector<8x32xf32>, vector<32x32xf32>, vector<8x32xf32> -> vector<8x32xf32>
    %c32 = arith.constant 32 : index
    %c0_286 = arith.constant 0 : index
    %749 = vector.load %arg2[%c32, %c0_286] : memref<120x256xf32, #tpu.memory_space<vmem>>, vector<1x32xf32>
    %750 = vector.broadcast %749 : vector<1x32xf32> to vector<8x32xf32>
    %751 = arith.addf %748, %750 : vector<8x32xf32>
    %cst_287 = arith.constant 5.000000e-01 : f32
    %752 = vector.broadcast %cst_287 : f32 to vector<8x32xf32>
    %753 = arith.mulf %752, %751 : vector<8x32xf32>
    %cst_288 = arith.constant 0.707106769 : f32
    %754 = vector.broadcast %cst_288 : f32 to vector<8x32xf32>
    %755 = arith.mulf %751, %754 : vector<8x32xf32>
    %756 = math.absf %755 : vector<8x32xf32>
    %cst_289 = arith.constant 0.327591091 : f32
    %757 = vector.broadcast %cst_289 : f32 to vector<8x32xf32>
    %758 = arith.mulf %757, %756 : vector<8x32xf32>
    %cst_290 = arith.constant 1.000000e+00 : f32
    %759 = vector.broadcast %cst_290 : f32 to vector<8x32xf32>
    %760 = arith.addf %759, %758 : vector<8x32xf32>
    %761 = tpu.reciprocal %760 {approx = true} : vector<8x32xf32> -> vector<8x32xf32>
    %cst_291 = arith.constant 1.06140542 : f32
    %762 = vector.broadcast %cst_291 : f32 to vector<8x32xf32>
    %763 = arith.mulf %762, %761 : vector<8x32xf32>
    %cst_292 = arith.constant -1.45315206 : f32
    %764 = vector.broadcast %cst_292 : f32 to vector<8x32xf32>
    %765 = arith.addf %763, %764 : vector<8x32xf32>
    %766 = arith.mulf %765, %761 : vector<8x32xf32>
    %cst_293 = arith.constant 1.42141378 : f32
    %767 = vector.broadcast %cst_293 : f32 to vector<8x32xf32>
    %768 = arith.addf %766, %767 : vector<8x32xf32>
    %769 = arith.mulf %768, %761 : vector<8x32xf32>
    %cst_294 = arith.constant -0.284496725 : f32
    %770 = vector.broadcast %cst_294 : f32 to vector<8x32xf32>
    %771 = arith.addf %769, %770 : vector<8x32xf32>
    %772 = arith.mulf %771, %761 : vector<8x32xf32>
    %cst_295 = arith.constant 0.254829586 : f32
    %773 = vector.broadcast %cst_295 : f32 to vector<8x32xf32>
    %774 = arith.addf %772, %773 : vector<8x32xf32>
    %775 = arith.mulf %774, %761 : vector<8x32xf32>
    %cst_296 = arith.constant 0.000000e+00 : f32
    %776 = vector.broadcast %cst_296 : f32 to vector<8x32xf32>
    %777 = arith.subf %776, %756 : vector<8x32xf32>
    %778 = arith.mulf %777, %756 : vector<8x32xf32>
    %779 = math.exp %778 : vector<8x32xf32>
    %780 = arith.mulf %775, %779 : vector<8x32xf32>
    %cst_297 = arith.constant 1.000000e+00 : f32
    %781 = vector.broadcast %cst_297 : f32 to vector<8x32xf32>
    %782 = arith.subf %781, %780 : vector<8x32xf32>
    %cst_298 = arith.constant 0.000000e+00 : f32
    %783 = vector.broadcast %cst_298 : f32 to vector<8x32xf32>
    %784 = arith.cmpf oge, %755, %783 : vector<8x32xf32>
    %cst_299 = arith.constant 0.000000e+00 : f32
    %785 = vector.broadcast %cst_299 : f32 to vector<8x32xf32>
    %786 = arith.subf %785, %782 : vector<8x32xf32>
    %787 = arith.select %784, %782, %786 : vector<8x32xi1>, vector<8x32xf32>
    %cst_300 = arith.constant 1.000000e+00 : f32
    %788 = vector.broadcast %cst_300 : f32 to vector<8x32xf32>
    %789 = arith.addf %788, %787 : vector<8x32xf32>
    %790 = arith.mulf %753, %789 : vector<8x32xf32>
    %791 = tpu.iota {dimensions = array<i32: 0>} : vector<8x8xi32>
    %792 = tpu.iota {dimensions = array<i32: 1>} : vector<8x8xi32>
    %c1_i32_301 = arith.constant 1 : i32
    %793 = vector.broadcast %c1_i32_301 : i32 to vector<8x8xi32>
    %794 = arith.muli %793, %791 : vector<8x8xi32>
    %c-2_i32_302 = arith.constant -2 : i32
    %795 = vector.broadcast %c-2_i32_302 : i32 to vector<8x8xi32>
    %796 = arith.addi %794, %795 : vector<8x8xi32>
    %797 = arith.cmpi eq, %792, %796 : vector<8x8xi32>
    %798 = arith.extui %797 : vector<8x8xi1> to vector<8x8xi32>
    %799 = arith.sitofp %798 : vector<8x8xi32> to vector<8x8xf32>
    %cst_303 = arith.constant dense<0.000000e+00> : vector<8x32xf32>
    %800 = tpu.matmul %799, %790, %cst_303 {dimension_numbers = #tpu.dot_dimension_numbers<[1], [0], [0], [1], [0, 0, 1, 1], [], []>} : vector<8x8xf32>, vector<8x32xf32>, vector<8x32xf32> -> vector<8x32xf32>
    %c33 = arith.constant 33 : index
    %c0_304 = arith.constant 0 : index
    %801 = vector.load %arg2[%c33, %c0_304] : memref<120x256xf32, #tpu.memory_space<vmem>>, vector<1x32xf32>
    %802 = vector.broadcast %801 : vector<1x32xf32> to vector<8x32xf32>
    %803 = arith.mulf %800, %802 : vector<8x32xf32>
    %804 = tpu.iota {dimensions = array<i32: 0>} : vector<8x8xi32>
    %805 = tpu.iota {dimensions = array<i32: 1>} : vector<8x8xi32>
    %c1_i32_305 = arith.constant 1 : i32
    %806 = vector.broadcast %c1_i32_305 : i32 to vector<8x8xi32>
    %807 = arith.muli %806, %804 : vector<8x8xi32>
    %c-1_i32_306 = arith.constant -1 : i32
    %808 = vector.broadcast %c-1_i32_306 : i32 to vector<8x8xi32>
    %809 = arith.addi %807, %808 : vector<8x8xi32>
    %810 = arith.cmpi eq, %805, %809 : vector<8x8xi32>
    %811 = arith.extui %810 : vector<8x8xi1> to vector<8x8xi32>
    %812 = arith.sitofp %811 : vector<8x8xi32> to vector<8x8xf32>
    %cst_307 = arith.constant dense<0.000000e+00> : vector<8x32xf32>
    %813 = tpu.matmul %812, %790, %cst_307 {dimension_numbers = #tpu.dot_dimension_numbers<[1], [0], [0], [1], [0, 0, 1, 1], [], []>} : vector<8x8xf32>, vector<8x32xf32>, vector<8x32xf32> -> vector<8x32xf32>
    %c34 = arith.constant 34 : index
    %c0_308 = arith.constant 0 : index
    %814 = vector.load %arg2[%c34, %c0_308] : memref<120x256xf32, #tpu.memory_space<vmem>>, vector<1x32xf32>
    %815 = vector.broadcast %814 : vector<1x32xf32> to vector<8x32xf32>
    %816 = arith.mulf %813, %815 : vector<8x32xf32>
    %817 = arith.addf %803, %816 : vector<8x32xf32>
    %c35 = arith.constant 35 : index
    %c0_309 = arith.constant 0 : index
    %818 = vector.load %arg2[%c35, %c0_309] : memref<120x256xf32, #tpu.memory_space<vmem>>, vector<1x32xf32>
    %819 = vector.broadcast %818 : vector<1x32xf32> to vector<8x32xf32>
    %820 = arith.mulf %790, %819 : vector<8x32xf32>
    %821 = arith.addf %817, %820 : vector<8x32xf32>
    %822 = tpu.iota {dimensions = array<i32: 0>} : vector<8x8xi32>
    %823 = tpu.iota {dimensions = array<i32: 1>} : vector<8x8xi32>
    %c1_i32_310 = arith.constant 1 : i32
    %824 = vector.broadcast %c1_i32_310 : i32 to vector<8x8xi32>
    %825 = arith.muli %824, %822 : vector<8x8xi32>
    %c1_i32_311 = arith.constant 1 : i32
    %826 = vector.broadcast %c1_i32_311 : i32 to vector<8x8xi32>
    %827 = arith.addi %825, %826 : vector<8x8xi32>
    %828 = arith.cmpi eq, %823, %827 : vector<8x8xi32>
    %829 = arith.extui %828 : vector<8x8xi1> to vector<8x8xi32>
    %830 = arith.sitofp %829 : vector<8x8xi32> to vector<8x8xf32>
    %cst_312 = arith.constant dense<0.000000e+00> : vector<8x32xf32>
    %831 = tpu.matmul %830, %790, %cst_312 {dimension_numbers = #tpu.dot_dimension_numbers<[1], [0], [0], [1], [0, 0, 1, 1], [], []>} : vector<8x8xf32>, vector<8x32xf32>, vector<8x32xf32> -> vector<8x32xf32>
    %c36 = arith.constant 36 : index
    %c0_313 = arith.constant 0 : index
    %832 = vector.load %arg2[%c36, %c0_313] : memref<120x256xf32, #tpu.memory_space<vmem>>, vector<1x32xf32>
    %833 = vector.broadcast %832 : vector<1x32xf32> to vector<8x32xf32>
    %834 = arith.mulf %831, %833 : vector<8x32xf32>
    %835 = arith.addf %821, %834 : vector<8x32xf32>
    %836 = tpu.iota {dimensions = array<i32: 0>} : vector<8x8xi32>
    %837 = tpu.iota {dimensions = array<i32: 1>} : vector<8x8xi32>
    %c1_i32_314 = arith.constant 1 : i32
    %838 = vector.broadcast %c1_i32_314 : i32 to vector<8x8xi32>
    %839 = arith.muli %838, %836 : vector<8x8xi32>
    %c2_i32_315 = arith.constant 2 : i32
    %840 = vector.broadcast %c2_i32_315 : i32 to vector<8x8xi32>
    %841 = arith.addi %839, %840 : vector<8x8xi32>
    %842 = arith.cmpi eq, %837, %841 : vector<8x8xi32>
    %843 = arith.extui %842 : vector<8x8xi1> to vector<8x8xi32>
    %844 = arith.sitofp %843 : vector<8x8xi32> to vector<8x8xf32>
    %cst_316 = arith.constant dense<0.000000e+00> : vector<8x32xf32>
    %845 = tpu.matmul %844, %790, %cst_316 {dimension_numbers = #tpu.dot_dimension_numbers<[1], [0], [0], [1], [0, 0, 1, 1], [], []>} : vector<8x8xf32>, vector<8x32xf32>, vector<8x32xf32> -> vector<8x32xf32>
    %c37 = arith.constant 37 : index
    %c0_317 = arith.constant 0 : index
    %846 = vector.load %arg2[%c37, %c0_317] : memref<120x256xf32, #tpu.memory_space<vmem>>, vector<1x32xf32>
    %847 = vector.broadcast %846 : vector<1x32xf32> to vector<8x32xf32>
    %848 = arith.mulf %845, %847 : vector<8x32xf32>
    %849 = arith.addf %835, %848 : vector<8x32xf32>
    %c38 = arith.constant 38 : index
    %c0_318 = arith.constant 0 : index
    %850 = vector.load %arg2[%c38, %c0_318] : memref<120x256xf32, #tpu.memory_space<vmem>>, vector<1x32xf32>
    %851 = vector.broadcast %850 : vector<1x32xf32> to vector<8x32xf32>
    %852 = arith.addf %849, %851 : vector<8x32xf32>
    %853 = tpu.iota {dimensions = array<i32: 0>} : vector<8x8xi32>
    %854 = tpu.iota {dimensions = array<i32: 1>} : vector<8x8xi32>
    %c1_i32_319 = arith.constant 1 : i32
    %855 = vector.broadcast %c1_i32_319 : i32 to vector<8x8xi32>
    %856 = arith.muli %855, %853 : vector<8x8xi32>
    %c-6_i32_320 = arith.constant -6 : i32
    %857 = vector.broadcast %c-6_i32_320 : i32 to vector<8x8xi32>
    %858 = arith.addi %856, %857 : vector<8x8xi32>
    %859 = arith.cmpi eq, %854, %858 : vector<8x8xi32>
    %860 = arith.extui %859 : vector<8x8xi1> to vector<8x8xi32>
    %861 = arith.sitofp %860 : vector<8x8xi32> to vector<8x8xf32>
    %cst_321 = arith.constant dense<0.000000e+00> : vector<8x32xf32>
    %862 = tpu.matmul %861, %852, %cst_321 {dimension_numbers = #tpu.dot_dimension_numbers<[1], [0], [0], [1], [0, 0, 1, 1], [], []>} : vector<8x8xf32>, vector<8x32xf32>, vector<8x32xf32> -> vector<8x32xf32>
    %c40_322 = arith.constant 40 : index
    %c0_323 = arith.constant 0 : index
    %863 = vector.load %arg2[%c40_322, %c0_323] : memref<120x256xf32, #tpu.memory_space<vmem>>, vector<1x32xf32>
    %864 = vector.broadcast %863 : vector<1x32xf32> to vector<8x32xf32>
    %865 = arith.mulf %862, %864 : vector<8x32xf32>
    %866 = tpu.iota {dimensions = array<i32: 0>} : vector<8x8xi32>
    %867 = tpu.iota {dimensions = array<i32: 1>} : vector<8x8xi32>
    %c1_i32_324 = arith.constant 1 : i32
    %868 = vector.broadcast %c1_i32_324 : i32 to vector<8x8xi32>
    %869 = arith.muli %868, %866 : vector<8x8xi32>
    %c-3_i32_325 = arith.constant -3 : i32
    %870 = vector.broadcast %c-3_i32_325 : i32 to vector<8x8xi32>
    %871 = arith.addi %869, %870 : vector<8x8xi32>
    %872 = arith.cmpi eq, %867, %871 : vector<8x8xi32>
    %873 = arith.extui %872 : vector<8x8xi1> to vector<8x8xi32>
    %874 = arith.sitofp %873 : vector<8x8xi32> to vector<8x8xf32>
    %cst_326 = arith.constant dense<0.000000e+00> : vector<8x32xf32>
    %875 = tpu.matmul %874, %852, %cst_326 {dimension_numbers = #tpu.dot_dimension_numbers<[1], [0], [0], [1], [0, 0, 1, 1], [], []>} : vector<8x8xf32>, vector<8x32xf32>, vector<8x32xf32> -> vector<8x32xf32>
    %c41 = arith.constant 41 : index
    %c0_327 = arith.constant 0 : index
    %876 = vector.load %arg2[%c41, %c0_327] : memref<120x256xf32, #tpu.memory_space<vmem>>, vector<1x32xf32>
    %877 = vector.broadcast %876 : vector<1x32xf32> to vector<8x32xf32>
    %878 = arith.mulf %875, %877 : vector<8x32xf32>
    %879 = arith.addf %865, %878 : vector<8x32xf32>
    %c42 = arith.constant 42 : index
    %c0_328 = arith.constant 0 : index
    %880 = vector.load %arg2[%c42, %c0_328] : memref<120x256xf32, #tpu.memory_space<vmem>>, vector<1x32xf32>
    %881 = vector.broadcast %880 : vector<1x32xf32> to vector<8x32xf32>
    %882 = arith.mulf %852, %881 : vector<8x32xf32>
    %883 = arith.addf %879, %882 : vector<8x32xf32>
    %884 = tpu.iota {dimensions = array<i32: 0>} : vector<8x8xi32>
    %885 = tpu.iota {dimensions = array<i32: 1>} : vector<8x8xi32>
    %c1_i32_329 = arith.constant 1 : i32
    %886 = vector.broadcast %c1_i32_329 : i32 to vector<8x8xi32>
    %887 = arith.muli %886, %884 : vector<8x8xi32>
    %c3_i32_330 = arith.constant 3 : i32
    %888 = vector.broadcast %c3_i32_330 : i32 to vector<8x8xi32>
    %889 = arith.addi %887, %888 : vector<8x8xi32>
    %890 = arith.cmpi eq, %885, %889 : vector<8x8xi32>
    %891 = arith.extui %890 : vector<8x8xi1> to vector<8x8xi32>
    %892 = arith.sitofp %891 : vector<8x8xi32> to vector<8x8xf32>
    %cst_331 = arith.constant dense<0.000000e+00> : vector<8x32xf32>
    %893 = tpu.matmul %892, %852, %cst_331 {dimension_numbers = #tpu.dot_dimension_numbers<[1], [0], [0], [1], [0, 0, 1, 1], [], []>} : vector<8x8xf32>, vector<8x32xf32>, vector<8x32xf32> -> vector<8x32xf32>
    %c43 = arith.constant 43 : index
    %c0_332 = arith.constant 0 : index
    %894 = vector.load %arg2[%c43, %c0_332] : memref<120x256xf32, #tpu.memory_space<vmem>>, vector<1x32xf32>
    %895 = vector.broadcast %894 : vector<1x32xf32> to vector<8x32xf32>
    %896 = arith.mulf %893, %895 : vector<8x32xf32>
    %897 = arith.addf %883, %896 : vector<8x32xf32>
    %898 = tpu.iota {dimensions = array<i32: 0>} : vector<8x8xi32>
    %899 = tpu.iota {dimensions = array<i32: 1>} : vector<8x8xi32>
    %c1_i32_333 = arith.constant 1 : i32
    %900 = vector.broadcast %c1_i32_333 : i32 to vector<8x8xi32>
    %901 = arith.muli %900, %898 : vector<8x8xi32>
    %c6_i32_334 = arith.constant 6 : i32
    %902 = vector.broadcast %c6_i32_334 : i32 to vector<8x8xi32>
    %903 = arith.addi %901, %902 : vector<8x8xi32>
    %904 = arith.cmpi eq, %899, %903 : vector<8x8xi32>
    %905 = arith.extui %904 : vector<8x8xi1> to vector<8x8xi32>
    %906 = arith.sitofp %905 : vector<8x8xi32> to vector<8x8xf32>
    %cst_335 = arith.constant dense<0.000000e+00> : vector<8x32xf32>
    %907 = tpu.matmul %906, %852, %cst_335 {dimension_numbers = #tpu.dot_dimension_numbers<[1], [0], [0], [1], [0, 0, 1, 1], [], []>} : vector<8x8xf32>, vector<8x32xf32>, vector<8x32xf32> -> vector<8x32xf32>
    %c44 = arith.constant 44 : index
    %c0_336 = arith.constant 0 : index
    %908 = vector.load %arg2[%c44, %c0_336] : memref<120x256xf32, #tpu.memory_space<vmem>>, vector<1x32xf32>
    %909 = vector.broadcast %908 : vector<1x32xf32> to vector<8x32xf32>
    %910 = arith.mulf %907, %909 : vector<8x32xf32>
    %911 = arith.addf %897, %910 : vector<8x32xf32>
    %c46 = arith.constant 46 : index
    %c0_337 = arith.constant 0 : index
    %912 = vector.load %arg2[%c46, %c0_337] : memref<120x256xf32, #tpu.memory_space<vmem>>, vector<1x32xf32>
    %913 = vector.broadcast %912 : vector<1x32xf32> to vector<8x32xf32>
    %914 = arith.addf %911, %913 : vector<8x32xf32>
    %c184 = arith.constant 184 : index
    %c0_338 = arith.constant 0 : index
    %915 = vector.load %arg3[%c184, %c0_338] : memref<1912x256xf32, #tpu.memory_space<vmem>>, vector<32x32xf32>
    %cst_339 = arith.constant dense<0.000000e+00> : vector<8x32xf32>
    %916 = tpu.matmul %914, %915, %cst_339 {dimension_numbers = #tpu.dot_dimension_numbers<[1], [0], [0], [1], [0, 0, 1, 1], [], []>} : vector<8x32xf32>, vector<32x32xf32>, vector<8x32xf32> -> vector<8x32xf32>
    %c47 = arith.constant 47 : index
    %c0_340 = arith.constant 0 : index
    %917 = vector.load %arg2[%c47, %c0_340] : memref<120x256xf32, #tpu.memory_space<vmem>>, vector<1x32xf32>
    %918 = vector.broadcast %917 : vector<1x32xf32> to vector<8x32xf32>
    %919 = arith.addf %916, %918 : vector<8x32xf32>
    %920 = arith.mulf %790, %919 : vector<8x32xf32>
    %c216 = arith.constant 216 : index
    %c0_341 = arith.constant 0 : index
    %921 = vector.load %arg3[%c216, %c0_341] : memref<1912x256xf32, #tpu.memory_space<vmem>>, vector<32x32xf32>
    %cst_342 = arith.constant dense<0.000000e+00> : vector<8x32xf32>
    %922 = tpu.matmul %920, %921, %cst_342 {dimension_numbers = #tpu.dot_dimension_numbers<[1], [0], [0], [1], [0, 0, 1, 1], [], []>} : vector<8x32xf32>, vector<32x32xf32>, vector<8x32xf32> -> vector<8x32xf32>
    %c48 = arith.constant 48 : index
    %c0_343 = arith.constant 0 : index
    %923 = vector.load %arg2[%c48, %c0_343] : memref<120x256xf32, #tpu.memory_space<vmem>>, vector<1x32xf32>
    %924 = vector.broadcast %923 : vector<1x32xf32> to vector<8x32xf32>
    %925 = arith.addf %922, %924 : vector<8x32xf32>
    %926 = arith.addf %925, %746 : vector<8x32xf32>
    %c49 = arith.constant 49 : index
    %c0_344 = arith.constant 0 : index
    %927 = vector.load %arg2[%c49, %c0_344] : memref<120x256xf32, #tpu.memory_space<vmem>>, vector<1x32xf32>
    %928 = vector.broadcast %927 : vector<1x32xf32> to vector<8x32xf32>
    %929 = arith.mulf %928, %926 : vector<8x32xf32>
    %930 = arith.addf %700, %929 : vector<8x32xf32>
    %c248 = arith.constant 248 : index
    %c0_345 = arith.constant 0 : index
    %931 = vector.load %arg3[%c248, %c0_345] : memref<1912x256xf32, #tpu.memory_space<vmem>>, vector<32x64xf32>
    %cst_346 = arith.constant dense<0.000000e+00> : vector<8x64xf32>
    %932 = tpu.matmul %930, %931, %cst_346 {dimension_numbers = #tpu.dot_dimension_numbers<[1], [0], [0], [1], [0, 0, 1, 1], [], []>} : vector<8x32xf32>, vector<32x64xf32>, vector<8x64xf32> -> vector<8x64xf32>
    %c50 = arith.constant 50 : index
    %c0_347 = arith.constant 0 : index
    %933 = vector.load %arg2[%c50, %c0_347] : memref<120x256xf32, #tpu.memory_space<vmem>>, vector<1x64xf32>
    %934 = vector.broadcast %933 : vector<1x64xf32> to vector<8x64xf32>
    %935 = arith.addf %932, %934 : vector<8x64xf32>
    %936 = tpu.iota {dimensions = array<i32: 0>} : vector<8x8xi32>
    %937 = tpu.iota {dimensions = array<i32: 1>} : vector<8x8xi32>
    %c1_i32_348 = arith.constant 1 : i32
    %938 = vector.broadcast %c1_i32_348 : i32 to vector<8x8xi32>
    %939 = arith.muli %938, %936 : vector<8x8xi32>
    %c-1_i32_349 = arith.constant -1 : i32
    %940 = vector.broadcast %c-1_i32_349 : i32 to vector<8x8xi32>
    %941 = arith.addi %939, %940 : vector<8x8xi32>
    %942 = arith.cmpi eq, %937, %941 : vector<8x8xi32>
    %943 = arith.extui %942 : vector<8x8xi1> to vector<8x8xi32>
    %944 = arith.sitofp %943 : vector<8x8xi32> to vector<8x8xf32>
    %cst_350 = arith.constant dense<0.000000e+00> : vector<8x64xf32>
    %945 = tpu.matmul %944, %935, %cst_350 {dimension_numbers = #tpu.dot_dimension_numbers<[1], [0], [0], [1], [0, 0, 1, 1], [], []>} : vector<8x8xf32>, vector<8x64xf32>, vector<8x64xf32> -> vector<8x64xf32>
    %c51 = arith.constant 51 : index
    %c0_351 = arith.constant 0 : index
    %946 = vector.load %arg2[%c51, %c0_351] : memref<120x256xf32, #tpu.memory_space<vmem>>, vector<1x64xf32>
    %947 = vector.broadcast %946 : vector<1x64xf32> to vector<8x64xf32>
    %948 = arith.mulf %945, %947 : vector<8x64xf32>
    %c52 = arith.constant 52 : index
    %c0_352 = arith.constant 0 : index
    %949 = vector.load %arg2[%c52, %c0_352] : memref<120x256xf32, #tpu.memory_space<vmem>>, vector<1x64xf32>
    %950 = vector.broadcast %949 : vector<1x64xf32> to vector<8x64xf32>
    %951 = arith.mulf %935, %950 : vector<8x64xf32>
    %952 = arith.addf %948, %951 : vector<8x64xf32>
    %953 = tpu.iota {dimensions = array<i32: 0>} : vector<8x8xi32>
    %954 = tpu.iota {dimensions = array<i32: 1>} : vector<8x8xi32>
    %c1_i32_353 = arith.constant 1 : i32
    %955 = vector.broadcast %c1_i32_353 : i32 to vector<8x8xi32>
    %956 = arith.muli %955, %953 : vector<8x8xi32>
    %c1_i32_354 = arith.constant 1 : i32
    %957 = vector.broadcast %c1_i32_354 : i32 to vector<8x8xi32>
    %958 = arith.addi %956, %957 : vector<8x8xi32>
    %959 = arith.cmpi eq, %954, %958 : vector<8x8xi32>
    %960 = arith.extui %959 : vector<8x8xi1> to vector<8x8xi32>
    %961 = arith.sitofp %960 : vector<8x8xi32> to vector<8x8xf32>
    %cst_355 = arith.constant dense<0.000000e+00> : vector<8x64xf32>
    %962 = tpu.matmul %961, %935, %cst_355 {dimension_numbers = #tpu.dot_dimension_numbers<[1], [0], [0], [1], [0, 0, 1, 1], [], []>} : vector<8x8xf32>, vector<8x64xf32>, vector<8x64xf32> -> vector<8x64xf32>
    %c53 = arith.constant 53 : index
    %c0_356 = arith.constant 0 : index
    %963 = vector.load %arg2[%c53, %c0_356] : memref<120x256xf32, #tpu.memory_space<vmem>>, vector<1x64xf32>
    %964 = vector.broadcast %963 : vector<1x64xf32> to vector<8x64xf32>
    %965 = arith.mulf %962, %964 : vector<8x64xf32>
    %966 = arith.addf %952, %965 : vector<8x64xf32>
    %c54 = arith.constant 54 : index
    %c0_357 = arith.constant 0 : index
    %967 = vector.load %arg2[%c54, %c0_357] : memref<120x256xf32, #tpu.memory_space<vmem>>, vector<1x64xf32>
    %968 = vector.broadcast %967 : vector<1x64xf32> to vector<8x64xf32>
    %969 = arith.addf %966, %968 : vector<8x64xf32>
    %cst_358 = arith.constant 5.000000e-01 : f32
    %970 = vector.broadcast %cst_358 : f32 to vector<8x64xf32>
    %971 = arith.mulf %970, %969 : vector<8x64xf32>
    %cst_359 = arith.constant 0.707106769 : f32
    %972 = vector.broadcast %cst_359 : f32 to vector<8x64xf32>
    %973 = arith.mulf %969, %972 : vector<8x64xf32>
    %974 = math.absf %973 : vector<8x64xf32>
    %cst_360 = arith.constant 0.327591091 : f32
    %975 = vector.broadcast %cst_360 : f32 to vector<8x64xf32>
    %976 = arith.mulf %975, %974 : vector<8x64xf32>
    %cst_361 = arith.constant 1.000000e+00 : f32
    %977 = vector.broadcast %cst_361 : f32 to vector<8x64xf32>
    %978 = arith.addf %977, %976 : vector<8x64xf32>
    %979 = tpu.reciprocal %978 {approx = true} : vector<8x64xf32> -> vector<8x64xf32>
    %cst_362 = arith.constant 1.06140542 : f32
    %980 = vector.broadcast %cst_362 : f32 to vector<8x64xf32>
    %981 = arith.mulf %980, %979 : vector<8x64xf32>
    %cst_363 = arith.constant -1.45315206 : f32
    %982 = vector.broadcast %cst_363 : f32 to vector<8x64xf32>
    %983 = arith.addf %981, %982 : vector<8x64xf32>
    %984 = arith.mulf %983, %979 : vector<8x64xf32>
    %cst_364 = arith.constant 1.42141378 : f32
    %985 = vector.broadcast %cst_364 : f32 to vector<8x64xf32>
    %986 = arith.addf %984, %985 : vector<8x64xf32>
    %987 = arith.mulf %986, %979 : vector<8x64xf32>
    %cst_365 = arith.constant -0.284496725 : f32
    %988 = vector.broadcast %cst_365 : f32 to vector<8x64xf32>
    %989 = arith.addf %987, %988 : vector<8x64xf32>
    %990 = arith.mulf %989, %979 : vector<8x64xf32>
    %cst_366 = arith.constant 0.254829586 : f32
    %991 = vector.broadcast %cst_366 : f32 to vector<8x64xf32>
    %992 = arith.addf %990, %991 : vector<8x64xf32>
    %993 = arith.mulf %992, %979 : vector<8x64xf32>
    %cst_367 = arith.constant 0.000000e+00 : f32
    %994 = vector.broadcast %cst_367 : f32 to vector<8x64xf32>
    %995 = arith.subf %994, %974 : vector<8x64xf32>
    %996 = arith.mulf %995, %974 : vector<8x64xf32>
    %997 = math.exp %996 : vector<8x64xf32>
    %998 = arith.mulf %993, %997 : vector<8x64xf32>
    %cst_368 = arith.constant 1.000000e+00 : f32
    %999 = vector.broadcast %cst_368 : f32 to vector<8x64xf32>
    %1000 = arith.subf %999, %998 : vector<8x64xf32>
    %cst_369 = arith.constant 0.000000e+00 : f32
    %1001 = vector.broadcast %cst_369 : f32 to vector<8x64xf32>
    %1002 = arith.cmpf oge, %973, %1001 : vector<8x64xf32>
    %cst_370 = arith.constant 0.000000e+00 : f32
    %1003 = vector.broadcast %cst_370 : f32 to vector<8x64xf32>
    %1004 = arith.subf %1003, %1000 : vector<8x64xf32>
    %1005 = arith.select %1002, %1000, %1004 : vector<8x64xi1>, vector<8x64xf32>
    %cst_371 = arith.constant 1.000000e+00 : f32
    %1006 = vector.broadcast %cst_371 : f32 to vector<8x64xf32>
    %1007 = arith.addf %1006, %1005 : vector<8x64xf32>
    %1008 = arith.mulf %971, %1007 : vector<8x64xf32>
    %c280 = arith.constant 280 : index
    %c0_372 = arith.constant 0 : index
    %1009 = vector.load %arg3[%c280, %c0_372] : memref<1912x256xf32, #tpu.memory_space<vmem>>, vector<64x32xf32>
    %cst_373 = arith.constant dense<0.000000e+00> : vector<8x32xf32>
    %1010 = tpu.matmul %1008, %1009, %cst_373 {dimension_numbers = #tpu.dot_dimension_numbers<[1], [0], [0], [1], [0, 0, 1, 1], [], []>} : vector<8x64xf32>, vector<64x32xf32>, vector<8x32xf32> -> vector<8x32xf32>
    %c55 = arith.constant 55 : index
    %c0_374 = arith.constant 0 : index
    %1011 = vector.load %arg2[%c55, %c0_374] : memref<120x256xf32, #tpu.memory_space<vmem>>, vector<1x32xf32>
    %1012 = vector.broadcast %1011 : vector<1x32xf32> to vector<8x32xf32>
    %1013 = arith.addf %1010, %1012 : vector<8x32xf32>
    %1014 = arith.addf %930, %1013 : vector<8x32xf32>
    %c30_375 = arith.constant 30 : index
    %c0_376 = arith.constant 0 : index
    %1015 = vector.load %arg2[%c30_375, %c0_376] : memref<120x256xf32, #tpu.memory_space<vmem>>, vector<1x32xf32>
    %1016 = vector.broadcast %1015 : vector<1x32xf32> to vector<8x32xf32>
    %1017 = arith.mulf %740, %1016 : vector<8x32xf32>
    %c31_377 = arith.constant 31 : index
    %c0_378 = arith.constant 0 : index
    %1018 = vector.load %arg2[%c31_377, %c0_378] : memref<120x256xf32, #tpu.memory_space<vmem>>, vector<1x32xf32>
    %1019 = vector.broadcast %1018 : vector<1x32xf32> to vector<8x32xf32>
    %1020 = arith.addf %1017, %1019 : vector<8x32xf32>
    %c152_379 = arith.constant 152 : index
    %c0_380 = arith.constant 0 : index
    %1021 = vector.load %arg3[%c152_379, %c0_380] : memref<1912x256xf32, #tpu.memory_space<vmem>>, vector<32x32xf32>
    %cst_381 = arith.constant dense<0.000000e+00> : vector<8x32xf32>
    %1022 = tpu.matmul %1020, %1021, %cst_381 {dimension_numbers = #tpu.dot_dimension_numbers<[1], [0], [0], [1], [0, 0, 1, 1], [], []>} : vector<8x32xf32>, vector<32x32xf32>, vector<8x32xf32> -> vector<8x32xf32>
    %c32_382 = arith.constant 32 : index
    %c0_383 = arith.constant 0 : index
    %1023 = vector.load %arg2[%c32_382, %c0_383] : memref<120x256xf32, #tpu.memory_space<vmem>>, vector<1x32xf32>
    %1024 = vector.broadcast %1023 : vector<1x32xf32> to vector<8x32xf32>
    %1025 = arith.addf %1022, %1024 : vector<8x32xf32>
    %cst_384 = arith.constant 5.000000e-01 : f32
    %1026 = vector.broadcast %cst_384 : f32 to vector<8x32xf32>
    %1027 = arith.mulf %1026, %1025 : vector<8x32xf32>
    %cst_385 = arith.constant 0.707106769 : f32
    %1028 = vector.broadcast %cst_385 : f32 to vector<8x32xf32>
    %1029 = arith.mulf %1025, %1028 : vector<8x32xf32>
    %1030 = math.absf %1029 : vector<8x32xf32>
    %cst_386 = arith.constant 0.327591091 : f32
    %1031 = vector.broadcast %cst_386 : f32 to vector<8x32xf32>
    %1032 = arith.mulf %1031, %1030 : vector<8x32xf32>
    %cst_387 = arith.constant 1.000000e+00 : f32
    %1033 = vector.broadcast %cst_387 : f32 to vector<8x32xf32>
    %1034 = arith.addf %1033, %1032 : vector<8x32xf32>
    %1035 = tpu.reciprocal %1034 {approx = true} : vector<8x32xf32> -> vector<8x32xf32>
    %cst_388 = arith.constant 1.06140542 : f32
    %1036 = vector.broadcast %cst_388 : f32 to vector<8x32xf32>
    %1037 = arith.mulf %1036, %1035 : vector<8x32xf32>
    %cst_389 = arith.constant -1.45315206 : f32
    %1038 = vector.broadcast %cst_389 : f32 to vector<8x32xf32>
    %1039 = arith.addf %1037, %1038 : vector<8x32xf32>
    %1040 = arith.mulf %1039, %1035 : vector<8x32xf32>
    %cst_390 = arith.constant 1.42141378 : f32
    %1041 = vector.broadcast %cst_390 : f32 to vector<8x32xf32>
    %1042 = arith.addf %1040, %1041 : vector<8x32xf32>
    %1043 = arith.mulf %1042, %1035 : vector<8x32xf32>
    %cst_391 = arith.constant -0.284496725 : f32
    %1044 = vector.broadcast %cst_391 : f32 to vector<8x32xf32>
    %1045 = arith.addf %1043, %1044 : vector<8x32xf32>
    %1046 = arith.mulf %1045, %1035 : vector<8x32xf32>
    %cst_392 = arith.constant 0.254829586 : f32
    %1047 = vector.broadcast %cst_392 : f32 to vector<8x32xf32>
    %1048 = arith.addf %1046, %1047 : vector<8x32xf32>
    %1049 = arith.mulf %1048, %1035 : vector<8x32xf32>
    %cst_393 = arith.constant 0.000000e+00 : f32
    %1050 = vector.broadcast %cst_393 : f32 to vector<8x32xf32>
    %1051 = arith.subf %1050, %1030 : vector<8x32xf32>
    %1052 = arith.mulf %1051, %1030 : vector<8x32xf32>
    %1053 = math.exp %1052 : vector<8x32xf32>
    %1054 = arith.mulf %1049, %1053 : vector<8x32xf32>
    %cst_394 = arith.constant 1.000000e+00 : f32
    %1055 = vector.broadcast %cst_394 : f32 to vector<8x32xf32>
    %1056 = arith.subf %1055, %1054 : vector<8x32xf32>
    %cst_395 = arith.constant 0.000000e+00 : f32
    %1057 = vector.broadcast %cst_395 : f32 to vector<8x32xf32>
    %1058 = arith.cmpf oge, %1029, %1057 : vector<8x32xf32>
    %cst_396 = arith.constant 0.000000e+00 : f32
    %1059 = vector.broadcast %cst_396 : f32 to vector<8x32xf32>
    %1060 = arith.subf %1059, %1056 : vector<8x32xf32>
    %1061 = arith.select %1058, %1056, %1060 : vector<8x32xi1>, vector<8x32xf32>
    %cst_397 = arith.constant 1.000000e+00 : f32
    %1062 = vector.broadcast %cst_397 : f32 to vector<8x32xf32>
    %1063 = arith.addf %1062, %1061 : vector<8x32xf32>
    %1064 = arith.mulf %1027, %1063 : vector<8x32xf32>
    %1065 = tpu.iota {dimensions = array<i32: 0>} : vector<8x8xi32>
    %1066 = tpu.iota {dimensions = array<i32: 1>} : vector<8x8xi32>
    %c1_i32_398 = arith.constant 1 : i32
    %1067 = vector.broadcast %c1_i32_398 : i32 to vector<8x8xi32>
    %1068 = arith.muli %1067, %1065 : vector<8x8xi32>
    %c-2_i32_399 = arith.constant -2 : i32
    %1069 = vector.broadcast %c-2_i32_399 : i32 to vector<8x8xi32>
    %1070 = arith.addi %1068, %1069 : vector<8x8xi32>
    %1071 = arith.cmpi eq, %1066, %1070 : vector<8x8xi32>
    %1072 = arith.extui %1071 : vector<8x8xi1> to vector<8x8xi32>
    %1073 = arith.sitofp %1072 : vector<8x8xi32> to vector<8x8xf32>
    %cst_400 = arith.constant dense<0.000000e+00> : vector<8x32xf32>
    %1074 = tpu.matmul %1073, %1064, %cst_400 {dimension_numbers = #tpu.dot_dimension_numbers<[1], [0], [0], [1], [0, 0, 1, 1], [], []>} : vector<8x8xf32>, vector<8x32xf32>, vector<8x32xf32> -> vector<8x32xf32>
    %c33_401 = arith.constant 33 : index
    %c0_402 = arith.constant 0 : index
    %1075 = vector.load %arg2[%c33_401, %c0_402] : memref<120x256xf32, #tpu.memory_space<vmem>>, vector<1x32xf32>
    %1076 = vector.broadcast %1075 : vector<1x32xf32> to vector<8x32xf32>
    %1077 = arith.mulf %1074, %1076 : vector<8x32xf32>
    %1078 = tpu.iota {dimensions = array<i32: 0>} : vector<8x8xi32>
    %1079 = tpu.iota {dimensions = array<i32: 1>} : vector<8x8xi32>
    %c1_i32_403 = arith.constant 1 : i32
    %1080 = vector.broadcast %c1_i32_403 : i32 to vector<8x8xi32>
    %1081 = arith.muli %1080, %1078 : vector<8x8xi32>
    %c-1_i32_404 = arith.constant -1 : i32
    %1082 = vector.broadcast %c-1_i32_404 : i32 to vector<8x8xi32>
    %1083 = arith.addi %1081, %1082 : vector<8x8xi32>
    %1084 = arith.cmpi eq, %1079, %1083 : vector<8x8xi32>
    %1085 = arith.extui %1084 : vector<8x8xi1> to vector<8x8xi32>
    %1086 = arith.sitofp %1085 : vector<8x8xi32> to vector<8x8xf32>
    %cst_405 = arith.constant dense<0.000000e+00> : vector<8x32xf32>
    %1087 = tpu.matmul %1086, %1064, %cst_405 {dimension_numbers = #tpu.dot_dimension_numbers<[1], [0], [0], [1], [0, 0, 1, 1], [], []>} : vector<8x8xf32>, vector<8x32xf32>, vector<8x32xf32> -> vector<8x32xf32>
    %c34_406 = arith.constant 34 : index
    %c0_407 = arith.constant 0 : index
    %1088 = vector.load %arg2[%c34_406, %c0_407] : memref<120x256xf32, #tpu.memory_space<vmem>>, vector<1x32xf32>
    %1089 = vector.broadcast %1088 : vector<1x32xf32> to vector<8x32xf32>
    %1090 = arith.mulf %1087, %1089 : vector<8x32xf32>
    %1091 = arith.addf %1077, %1090 : vector<8x32xf32>
    %c35_408 = arith.constant 35 : index
    %c0_409 = arith.constant 0 : index
    %1092 = vector.load %arg2[%c35_408, %c0_409] : memref<120x256xf32, #tpu.memory_space<vmem>>, vector<1x32xf32>
    %1093 = vector.broadcast %1092 : vector<1x32xf32> to vector<8x32xf32>
    %1094 = arith.mulf %1064, %1093 : vector<8x32xf32>
    %1095 = arith.addf %1091, %1094 : vector<8x32xf32>
    %1096 = tpu.iota {dimensions = array<i32: 0>} : vector<8x8xi32>
    %1097 = tpu.iota {dimensions = array<i32: 1>} : vector<8x8xi32>
    %c1_i32_410 = arith.constant 1 : i32
    %1098 = vector.broadcast %c1_i32_410 : i32 to vector<8x8xi32>
    %1099 = arith.muli %1098, %1096 : vector<8x8xi32>
    %c1_i32_411 = arith.constant 1 : i32
    %1100 = vector.broadcast %c1_i32_411 : i32 to vector<8x8xi32>
    %1101 = arith.addi %1099, %1100 : vector<8x8xi32>
    %1102 = arith.cmpi eq, %1097, %1101 : vector<8x8xi32>
    %1103 = arith.extui %1102 : vector<8x8xi1> to vector<8x8xi32>
    %1104 = arith.sitofp %1103 : vector<8x8xi32> to vector<8x8xf32>
    %cst_412 = arith.constant dense<0.000000e+00> : vector<8x32xf32>
    %1105 = tpu.matmul %1104, %1064, %cst_412 {dimension_numbers = #tpu.dot_dimension_numbers<[1], [0], [0], [1], [0, 0, 1, 1], [], []>} : vector<8x8xf32>, vector<8x32xf32>, vector<8x32xf32> -> vector<8x32xf32>
    %c36_413 = arith.constant 36 : index
    %c0_414 = arith.constant 0 : index
    %1106 = vector.load %arg2[%c36_413, %c0_414] : memref<120x256xf32, #tpu.memory_space<vmem>>, vector<1x32xf32>
    %1107 = vector.broadcast %1106 : vector<1x32xf32> to vector<8x32xf32>
    %1108 = arith.mulf %1105, %1107 : vector<8x32xf32>
    %1109 = arith.addf %1095, %1108 : vector<8x32xf32>
    %1110 = tpu.iota {dimensions = array<i32: 0>} : vector<8x8xi32>
    %1111 = tpu.iota {dimensions = array<i32: 1>} : vector<8x8xi32>
    %c1_i32_415 = arith.constant 1 : i32
    %1112 = vector.broadcast %c1_i32_415 : i32 to vector<8x8xi32>
    %1113 = arith.muli %1112, %1110 : vector<8x8xi32>
    %c2_i32_416 = arith.constant 2 : i32
    %1114 = vector.broadcast %c2_i32_416 : i32 to vector<8x8xi32>
    %1115 = arith.addi %1113, %1114 : vector<8x8xi32>
    %1116 = arith.cmpi eq, %1111, %1115 : vector<8x8xi32>
    %1117 = arith.extui %1116 : vector<8x8xi1> to vector<8x8xi32>
    %1118 = arith.sitofp %1117 : vector<8x8xi32> to vector<8x8xf32>
    %cst_417 = arith.constant dense<0.000000e+00> : vector<8x32xf32>
    %1119 = tpu.matmul %1118, %1064, %cst_417 {dimension_numbers = #tpu.dot_dimension_numbers<[1], [0], [0], [1], [0, 0, 1, 1], [], []>} : vector<8x8xf32>, vector<8x32xf32>, vector<8x32xf32> -> vector<8x32xf32>
    %c37_418 = arith.constant 37 : index
    %c0_419 = arith.constant 0 : index
    %1120 = vector.load %arg2[%c37_418, %c0_419] : memref<120x256xf32, #tpu.memory_space<vmem>>, vector<1x32xf32>
    %1121 = vector.broadcast %1120 : vector<1x32xf32> to vector<8x32xf32>
    %1122 = arith.mulf %1119, %1121 : vector<8x32xf32>
    %1123 = arith.addf %1109, %1122 : vector<8x32xf32>
    %c38_420 = arith.constant 38 : index
    %c0_421 = arith.constant 0 : index
    %1124 = vector.load %arg2[%c38_420, %c0_421] : memref<120x256xf32, #tpu.memory_space<vmem>>, vector<1x32xf32>
    %1125 = vector.broadcast %1124 : vector<1x32xf32> to vector<8x32xf32>
    %1126 = arith.addf %1123, %1125 : vector<8x32xf32>
    %1127 = tpu.iota {dimensions = array<i32: 0>} : vector<8x8xi32>
    %1128 = tpu.iota {dimensions = array<i32: 1>} : vector<8x8xi32>
    %c1_i32_422 = arith.constant 1 : i32
    %1129 = vector.broadcast %c1_i32_422 : i32 to vector<8x8xi32>
    %1130 = arith.muli %1129, %1127 : vector<8x8xi32>
    %c-6_i32_423 = arith.constant -6 : i32
    %1131 = vector.broadcast %c-6_i32_423 : i32 to vector<8x8xi32>
    %1132 = arith.addi %1130, %1131 : vector<8x8xi32>
    %1133 = arith.cmpi eq, %1128, %1132 : vector<8x8xi32>
    %1134 = arith.extui %1133 : vector<8x8xi1> to vector<8x8xi32>
    %1135 = arith.sitofp %1134 : vector<8x8xi32> to vector<8x8xf32>
    %cst_424 = arith.constant dense<0.000000e+00> : vector<8x32xf32>
    %1136 = tpu.matmul %1135, %1126, %cst_424 {dimension_numbers = #tpu.dot_dimension_numbers<[1], [0], [0], [1], [0, 0, 1, 1], [], []>} : vector<8x8xf32>, vector<8x32xf32>, vector<8x32xf32> -> vector<8x32xf32>
    %c40_425 = arith.constant 40 : index
    %c0_426 = arith.constant 0 : index
    %1137 = vector.load %arg2[%c40_425, %c0_426] : memref<120x256xf32, #tpu.memory_space<vmem>>, vector<1x32xf32>
    %1138 = vector.broadcast %1137 : vector<1x32xf32> to vector<8x32xf32>
    %1139 = arith.mulf %1136, %1138 : vector<8x32xf32>
    %1140 = tpu.iota {dimensions = array<i32: 0>} : vector<8x8xi32>
    %1141 = tpu.iota {dimensions = array<i32: 1>} : vector<8x8xi32>
    %c1_i32_427 = arith.constant 1 : i32
    %1142 = vector.broadcast %c1_i32_427 : i32 to vector<8x8xi32>
    %1143 = arith.muli %1142, %1140 : vector<8x8xi32>
    %c-3_i32_428 = arith.constant -3 : i32
    %1144 = vector.broadcast %c-3_i32_428 : i32 to vector<8x8xi32>
    %1145 = arith.addi %1143, %1144 : vector<8x8xi32>
    %1146 = arith.cmpi eq, %1141, %1145 : vector<8x8xi32>
    %1147 = arith.extui %1146 : vector<8x8xi1> to vector<8x8xi32>
    %1148 = arith.sitofp %1147 : vector<8x8xi32> to vector<8x8xf32>
    %cst_429 = arith.constant dense<0.000000e+00> : vector<8x32xf32>
    %1149 = tpu.matmul %1148, %1126, %cst_429 {dimension_numbers = #tpu.dot_dimension_numbers<[1], [0], [0], [1], [0, 0, 1, 1], [], []>} : vector<8x8xf32>, vector<8x32xf32>, vector<8x32xf32> -> vector<8x32xf32>
    %c41_430 = arith.constant 41 : index
    %c0_431 = arith.constant 0 : index
    %1150 = vector.load %arg2[%c41_430, %c0_431] : memref<120x256xf32, #tpu.memory_space<vmem>>, vector<1x32xf32>
    %1151 = vector.broadcast %1150 : vector<1x32xf32> to vector<8x32xf32>
    %1152 = arith.mulf %1149, %1151 : vector<8x32xf32>
    %1153 = arith.addf %1139, %1152 : vector<8x32xf32>
    %c42_432 = arith.constant 42 : index
    %c0_433 = arith.constant 0 : index
    %1154 = vector.load %arg2[%c42_432, %c0_433] : memref<120x256xf32, #tpu.memory_space<vmem>>, vector<1x32xf32>
    %1155 = vector.broadcast %1154 : vector<1x32xf32> to vector<8x32xf32>
    %1156 = arith.mulf %1126, %1155 : vector<8x32xf32>
    %1157 = arith.addf %1153, %1156 : vector<8x32xf32>
    %1158 = tpu.iota {dimensions = array<i32: 0>} : vector<8x8xi32>
    %1159 = tpu.iota {dimensions = array<i32: 1>} : vector<8x8xi32>
    %c1_i32_434 = arith.constant 1 : i32
    %1160 = vector.broadcast %c1_i32_434 : i32 to vector<8x8xi32>
    %1161 = arith.muli %1160, %1158 : vector<8x8xi32>
    %c3_i32_435 = arith.constant 3 : i32
    %1162 = vector.broadcast %c3_i32_435 : i32 to vector<8x8xi32>
    %1163 = arith.addi %1161, %1162 : vector<8x8xi32>
    %1164 = arith.cmpi eq, %1159, %1163 : vector<8x8xi32>
    %1165 = arith.extui %1164 : vector<8x8xi1> to vector<8x8xi32>
    %1166 = arith.sitofp %1165 : vector<8x8xi32> to vector<8x8xf32>
    %cst_436 = arith.constant dense<0.000000e+00> : vector<8x32xf32>
    %1167 = tpu.matmul %1166, %1126, %cst_436 {dimension_numbers = #tpu.dot_dimension_numbers<[1], [0], [0], [1], [0, 0, 1, 1], [], []>} : vector<8x8xf32>, vector<8x32xf32>, vector<8x32xf32> -> vector<8x32xf32>
    %c43_437 = arith.constant 43 : index
    %c0_438 = arith.constant 0 : index
    %1168 = vector.load %arg2[%c43_437, %c0_438] : memref<120x256xf32, #tpu.memory_space<vmem>>, vector<1x32xf32>
    %1169 = vector.broadcast %1168 : vector<1x32xf32> to vector<8x32xf32>
    %1170 = arith.mulf %1167, %1169 : vector<8x32xf32>
    %1171 = arith.addf %1157, %1170 : vector<8x32xf32>
    %1172 = tpu.iota {dimensions = array<i32: 0>} : vector<8x8xi32>
    %1173 = tpu.iota {dimensions = array<i32: 1>} : vector<8x8xi32>
    %c1_i32_439 = arith.constant 1 : i32
    %1174 = vector.broadcast %c1_i32_439 : i32 to vector<8x8xi32>
    %1175 = arith.muli %1174, %1172 : vector<8x8xi32>
    %c6_i32_440 = arith.constant 6 : i32
    %1176 = vector.broadcast %c6_i32_440 : i32 to vector<8x8xi32>
    %1177 = arith.addi %1175, %1176 : vector<8x8xi32>
    %1178 = arith.cmpi eq, %1173, %1177 : vector<8x8xi32>
    %1179 = arith.extui %1178 : vector<8x8xi1> to vector<8x8xi32>
    %1180 = arith.sitofp %1179 : vector<8x8xi32> to vector<8x8xf32>
    %cst_441 = arith.constant dense<0.000000e+00> : vector<8x32xf32>
    %1181 = tpu.matmul %1180, %1126, %cst_441 {dimension_numbers = #tpu.dot_dimension_numbers<[1], [0], [0], [1], [0, 0, 1, 1], [], []>} : vector<8x8xf32>, vector<8x32xf32>, vector<8x32xf32> -> vector<8x32xf32>
    %c44_442 = arith.constant 44 : index
    %c0_443 = arith.constant 0 : index
    %1182 = vector.load %arg2[%c44_442, %c0_443] : memref<120x256xf32, #tpu.memory_space<vmem>>, vector<1x32xf32>
    %1183 = vector.broadcast %1182 : vector<1x32xf32> to vector<8x32xf32>
    %1184 = arith.mulf %1181, %1183 : vector<8x32xf32>
    %1185 = arith.addf %1171, %1184 : vector<8x32xf32>
    %c46_444 = arith.constant 46 : index
    %c0_445 = arith.constant 0 : index
    %1186 = vector.load %arg2[%c46_444, %c0_445] : memref<120x256xf32, #tpu.memory_space<vmem>>, vector<1x32xf32>
    %1187 = vector.broadcast %1186 : vector<1x32xf32> to vector<8x32xf32>
    %1188 = arith.addf %1185, %1187 : vector<8x32xf32>
    %c184_446 = arith.constant 184 : index
    %c0_447 = arith.constant 0 : index
    %1189 = vector.load %arg3[%c184_446, %c0_447] : memref<1912x256xf32, #tpu.memory_space<vmem>>, vector<32x32xf32>
    %cst_448 = arith.constant dense<0.000000e+00> : vector<8x32xf32>
    %1190 = tpu.matmul %1188, %1189, %cst_448 {dimension_numbers = #tpu.dot_dimension_numbers<[1], [0], [0], [1], [0, 0, 1, 1], [], []>} : vector<8x32xf32>, vector<32x32xf32>, vector<8x32xf32> -> vector<8x32xf32>
    %c47_449 = arith.constant 47 : index
    %c0_450 = arith.constant 0 : index
    %1191 = vector.load %arg2[%c47_449, %c0_450] : memref<120x256xf32, #tpu.memory_space<vmem>>, vector<1x32xf32>
    %1192 = vector.broadcast %1191 : vector<1x32xf32> to vector<8x32xf32>
    %1193 = arith.addf %1190, %1192 : vector<8x32xf32>
    %1194 = arith.mulf %1064, %1193 : vector<8x32xf32>
    %c216_451 = arith.constant 216 : index
    %c0_452 = arith.constant 0 : index
    %1195 = vector.load %arg3[%c216_451, %c0_452] : memref<1912x256xf32, #tpu.memory_space<vmem>>, vector<32x32xf32>
    %cst_453 = arith.constant dense<0.000000e+00> : vector<8x32xf32>
    %1196 = tpu.matmul %1194, %1195, %cst_453 {dimension_numbers = #tpu.dot_dimension_numbers<[1], [0], [0], [1], [0, 0, 1, 1], [], []>} : vector<8x32xf32>, vector<32x32xf32>, vector<8x32xf32> -> vector<8x32xf32>
    %c48_454 = arith.constant 48 : index
    %c0_455 = arith.constant 0 : index
    %1197 = vector.load %arg2[%c48_454, %c0_455] : memref<120x256xf32, #tpu.memory_space<vmem>>, vector<1x32xf32>
    %1198 = vector.broadcast %1197 : vector<1x32xf32> to vector<8x32xf32>
    %1199 = arith.addf %1196, %1198 : vector<8x32xf32>
    %1200 = arith.addf %1199, %1020 : vector<8x32xf32>
    %c49_456 = arith.constant 49 : index
    %c0_457 = arith.constant 0 : index
    %1201 = vector.load %arg2[%c49_456, %c0_457] : memref<120x256xf32, #tpu.memory_space<vmem>>, vector<1x32xf32>
    %1202 = vector.broadcast %1201 : vector<1x32xf32> to vector<8x32xf32>
    %1203 = arith.mulf %1202, %1200 : vector<8x32xf32>
    %1204 = arith.addf %740, %1203 : vector<8x32xf32>
    %c248_458 = arith.constant 248 : index
    %c0_459 = arith.constant 0 : index
    %1205 = vector.load %arg3[%c248_458, %c0_459] : memref<1912x256xf32, #tpu.memory_space<vmem>>, vector<32x64xf32>
    %cst_460 = arith.constant dense<0.000000e+00> : vector<8x64xf32>
    %1206 = tpu.matmul %1204, %1205, %cst_460 {dimension_numbers = #tpu.dot_dimension_numbers<[1], [0], [0], [1], [0, 0, 1, 1], [], []>} : vector<8x32xf32>, vector<32x64xf32>, vector<8x64xf32> -> vector<8x64xf32>
    %c50_461 = arith.constant 50 : index
    %c0_462 = arith.constant 0 : index
    %1207 = vector.load %arg2[%c50_461, %c0_462] : memref<120x256xf32, #tpu.memory_space<vmem>>, vector<1x64xf32>
    %1208 = vector.broadcast %1207 : vector<1x64xf32> to vector<8x64xf32>
    %1209 = arith.addf %1206, %1208 : vector<8x64xf32>
    %1210 = tpu.iota {dimensions = array<i32: 0>} : vector<8x8xi32>
    %1211 = tpu.iota {dimensions = array<i32: 1>} : vector<8x8xi32>
    %c1_i32_463 = arith.constant 1 : i32
    %1212 = vector.broadcast %c1_i32_463 : i32 to vector<8x8xi32>
    %1213 = arith.muli %1212, %1210 : vector<8x8xi32>
    %c-1_i32_464 = arith.constant -1 : i32
    %1214 = vector.broadcast %c-1_i32_464 : i32 to vector<8x8xi32>
    %1215 = arith.addi %1213, %1214 : vector<8x8xi32>
    %1216 = arith.cmpi eq, %1211, %1215 : vector<8x8xi32>
    %1217 = arith.extui %1216 : vector<8x8xi1> to vector<8x8xi32>
    %1218 = arith.sitofp %1217 : vector<8x8xi32> to vector<8x8xf32>
    %cst_465 = arith.constant dense<0.000000e+00> : vector<8x64xf32>
    %1219 = tpu.matmul %1218, %1209, %cst_465 {dimension_numbers = #tpu.dot_dimension_numbers<[1], [0], [0], [1], [0, 0, 1, 1], [], []>} : vector<8x8xf32>, vector<8x64xf32>, vector<8x64xf32> -> vector<8x64xf32>
    %c51_466 = arith.constant 51 : index
    %c0_467 = arith.constant 0 : index
    %1220 = vector.load %arg2[%c51_466, %c0_467] : memref<120x256xf32, #tpu.memory_space<vmem>>, vector<1x64xf32>
    %1221 = vector.broadcast %1220 : vector<1x64xf32> to vector<8x64xf32>
    %1222 = arith.mulf %1219, %1221 : vector<8x64xf32>
    %c52_468 = arith.constant 52 : index
    %c0_469 = arith.constant 0 : index
    %1223 = vector.load %arg2[%c52_468, %c0_469] : memref<120x256xf32, #tpu.memory_space<vmem>>, vector<1x64xf32>
    %1224 = vector.broadcast %1223 : vector<1x64xf32> to vector<8x64xf32>
    %1225 = arith.mulf %1209, %1224 : vector<8x64xf32>
    %1226 = arith.addf %1222, %1225 : vector<8x64xf32>
    %1227 = tpu.iota {dimensions = array<i32: 0>} : vector<8x8xi32>
    %1228 = tpu.iota {dimensions = array<i32: 1>} : vector<8x8xi32>
    %c1_i32_470 = arith.constant 1 : i32
    %1229 = vector.broadcast %c1_i32_470 : i32 to vector<8x8xi32>
    %1230 = arith.muli %1229, %1227 : vector<8x8xi32>
    %c1_i32_471 = arith.constant 1 : i32
    %1231 = vector.broadcast %c1_i32_471 : i32 to vector<8x8xi32>
    %1232 = arith.addi %1230, %1231 : vector<8x8xi32>
    %1233 = arith.cmpi eq, %1228, %1232 : vector<8x8xi32>
    %1234 = arith.extui %1233 : vector<8x8xi1> to vector<8x8xi32>
    %1235 = arith.sitofp %1234 : vector<8x8xi32> to vector<8x8xf32>
    %cst_472 = arith.constant dense<0.000000e+00> : vector<8x64xf32>
    %1236 = tpu.matmul %1235, %1209, %cst_472 {dimension_numbers = #tpu.dot_dimension_numbers<[1], [0], [0], [1], [0, 0, 1, 1], [], []>} : vector<8x8xf32>, vector<8x64xf32>, vector<8x64xf32> -> vector<8x64xf32>
    %c53_473 = arith.constant 53 : index
    %c0_474 = arith.constant 0 : index
    %1237 = vector.load %arg2[%c53_473, %c0_474] : memref<120x256xf32, #tpu.memory_space<vmem>>, vector<1x64xf32>
    %1238 = vector.broadcast %1237 : vector<1x64xf32> to vector<8x64xf32>
    %1239 = arith.mulf %1236, %1238 : vector<8x64xf32>
    %1240 = arith.addf %1226, %1239 : vector<8x64xf32>
    %c54_475 = arith.constant 54 : index
    %c0_476 = arith.constant 0 : index
    %1241 = vector.load %arg2[%c54_475, %c0_476] : memref<120x256xf32, #tpu.memory_space<vmem>>, vector<1x64xf32>
    %1242 = vector.broadcast %1241 : vector<1x64xf32> to vector<8x64xf32>
    %1243 = arith.addf %1240, %1242 : vector<8x64xf32>
    %cst_477 = arith.constant 5.000000e-01 : f32
    %1244 = vector.broadcast %cst_477 : f32 to vector<8x64xf32>
    %1245 = arith.mulf %1244, %1243 : vector<8x64xf32>
    %cst_478 = arith.constant 0.707106769 : f32
    %1246 = vector.broadcast %cst_478 : f32 to vector<8x64xf32>
    %1247 = arith.mulf %1243, %1246 : vector<8x64xf32>
    %1248 = math.absf %1247 : vector<8x64xf32>
    %cst_479 = arith.constant 0.327591091 : f32
    %1249 = vector.broadcast %cst_479 : f32 to vector<8x64xf32>
    %1250 = arith.mulf %1249, %1248 : vector<8x64xf32>
    %cst_480 = arith.constant 1.000000e+00 : f32
    %1251 = vector.broadcast %cst_480 : f32 to vector<8x64xf32>
    %1252 = arith.addf %1251, %1250 : vector<8x64xf32>
    %1253 = tpu.reciprocal %1252 {approx = true} : vector<8x64xf32> -> vector<8x64xf32>
    %cst_481 = arith.constant 1.06140542 : f32
    %1254 = vector.broadcast %cst_481 : f32 to vector<8x64xf32>
    %1255 = arith.mulf %1254, %1253 : vector<8x64xf32>
    %cst_482 = arith.constant -1.45315206 : f32
    %1256 = vector.broadcast %cst_482 : f32 to vector<8x64xf32>
    %1257 = arith.addf %1255, %1256 : vector<8x64xf32>
    %1258 = arith.mulf %1257, %1253 : vector<8x64xf32>
    %cst_483 = arith.constant 1.42141378 : f32
    %1259 = vector.broadcast %cst_483 : f32 to vector<8x64xf32>
    %1260 = arith.addf %1258, %1259 : vector<8x64xf32>
    %1261 = arith.mulf %1260, %1253 : vector<8x64xf32>
    %cst_484 = arith.constant -0.284496725 : f32
    %1262 = vector.broadcast %cst_484 : f32 to vector<8x64xf32>
    %1263 = arith.addf %1261, %1262 : vector<8x64xf32>
    %1264 = arith.mulf %1263, %1253 : vector<8x64xf32>
    %cst_485 = arith.constant 0.254829586 : f32
    %1265 = vector.broadcast %cst_485 : f32 to vector<8x64xf32>
    %1266 = arith.addf %1264, %1265 : vector<8x64xf32>
    %1267 = arith.mulf %1266, %1253 : vector<8x64xf32>
    %cst_486 = arith.constant 0.000000e+00 : f32
    %1268 = vector.broadcast %cst_486 : f32 to vector<8x64xf32>
    %1269 = arith.subf %1268, %1248 : vector<8x64xf32>
    %1270 = arith.mulf %1269, %1248 : vector<8x64xf32>
    %1271 = math.exp %1270 : vector<8x64xf32>
    %1272 = arith.mulf %1267, %1271 : vector<8x64xf32>
    %cst_487 = arith.constant 1.000000e+00 : f32
    %1273 = vector.broadcast %cst_487 : f32 to vector<8x64xf32>
    %1274 = arith.subf %1273, %1272 : vector<8x64xf32>
    %cst_488 = arith.constant 0.000000e+00 : f32
    %1275 = vector.broadcast %cst_488 : f32 to vector<8x64xf32>
    %1276 = arith.cmpf oge, %1247, %1275 : vector<8x64xf32>
    %cst_489 = arith.constant 0.000000e+00 : f32
    %1277 = vector.broadcast %cst_489 : f32 to vector<8x64xf32>
    %1278 = arith.subf %1277, %1274 : vector<8x64xf32>
    %1279 = arith.select %1276, %1274, %1278 : vector<8x64xi1>, vector<8x64xf32>
    %cst_490 = arith.constant 1.000000e+00 : f32
    %1280 = vector.broadcast %cst_490 : f32 to vector<8x64xf32>
    %1281 = arith.addf %1280, %1279 : vector<8x64xf32>
    %1282 = arith.mulf %1245, %1281 : vector<8x64xf32>
    %c280_491 = arith.constant 280 : index
    %c0_492 = arith.constant 0 : index
    %1283 = vector.load %arg3[%c280_491, %c0_492] : memref<1912x256xf32, #tpu.memory_space<vmem>>, vector<64x32xf32>
    %cst_493 = arith.constant dense<0.000000e+00> : vector<8x32xf32>
    %1284 = tpu.matmul %1282, %1283, %cst_493 {dimension_numbers = #tpu.dot_dimension_numbers<[1], [0], [0], [1], [0, 0, 1, 1], [], []>} : vector<8x64xf32>, vector<64x32xf32>, vector<8x32xf32> -> vector<8x32xf32>
    %c55_494 = arith.constant 55 : index
    %c0_495 = arith.constant 0 : index
    %1285 = vector.load %arg2[%c55_494, %c0_495] : memref<120x256xf32, #tpu.memory_space<vmem>>, vector<1x32xf32>
    %1286 = vector.broadcast %1285 : vector<1x32xf32> to vector<8x32xf32>
    %1287 = arith.addf %1284, %1286 : vector<8x32xf32>
    %1288 = arith.addf %1204, %1287 : vector<8x32xf32>
    %c56_496 = arith.constant 56 : index
    %c0_497 = arith.constant 0 : index
    %1289 = vector.load %arg2[%c56_496, %c0_497] : memref<120x256xf32, #tpu.memory_space<vmem>>, vector<1x32xf32>
    %c57 = arith.constant 57 : index
    %c0_498 = arith.constant 0 : index
    %1290 = vector.load %arg2[%c57, %c0_498] : memref<120x256xf32, #tpu.memory_space<vmem>>, vector<1x32xf32>
    %cst_499 = arith.constant dense<0.000000e+00> : vector<8xf32>
    %1291 = vector.multi_reduction <add>, %1014, %cst_499 [1] : vector<8x32xf32> to vector<8xf32>
    %1292 = vector.shape_cast %1291 : vector<8xf32> to vector<8x1xf32>
    %cst_500 = arith.constant 3.200000e+01 : f32
    %1293 = vector.broadcast %cst_500 : f32 to vector<8x1xf32>
    %1294 = arith.divf %1292, %1293 : vector<8x1xf32>
    %1295 = vector.broadcast %1294 : vector<8x1xf32> to vector<8x32xf32>
    %1296 = arith.subf %1014, %1295 : vector<8x32xf32>
    %1297 = arith.mulf %1296, %1296 : vector<8x32xf32>
    %cst_501 = arith.constant dense<0.000000e+00> : vector<8xf32>
    %1298 = vector.multi_reduction <add>, %1297, %cst_501 [1] : vector<8x32xf32> to vector<8xf32>
    %1299 = vector.shape_cast %1298 : vector<8xf32> to vector<8x1xf32>
    %cst_502 = arith.constant 3.200000e+01 : f32
    %1300 = vector.broadcast %cst_502 : f32 to vector<8x1xf32>
    %1301 = arith.divf %1299, %1300 : vector<8x1xf32>
    %cst_503 = arith.constant 9.99999974E-6 : f32
    %1302 = vector.broadcast %cst_503 : f32 to vector<8x1xf32>
    %1303 = arith.addf %1301, %1302 : vector<8x1xf32>
    %1304 = math.rsqrt %1303 : vector<8x1xf32>
    %1305 = vector.broadcast %1304 : vector<8x1xf32> to vector<8x32xf32>
    %1306 = arith.mulf %1296, %1305 : vector<8x32xf32>
    %1307 = vector.broadcast %1289 : vector<1x32xf32> to vector<8x32xf32>
    %1308 = arith.mulf %1306, %1307 : vector<8x32xf32>
    %1309 = vector.broadcast %1290 : vector<1x32xf32> to vector<8x32xf32>
    %1310 = arith.addf %1308, %1309 : vector<8x32xf32>
    %cst_504 = arith.constant dense<0.000000e+00> : vector<8xf32>
    %1311 = vector.multi_reduction <add>, %1288, %cst_504 [1] : vector<8x32xf32> to vector<8xf32>
    %1312 = vector.shape_cast %1311 : vector<8xf32> to vector<8x1xf32>
    %cst_505 = arith.constant 3.200000e+01 : f32
    %1313 = vector.broadcast %cst_505 : f32 to vector<8x1xf32>
    %1314 = arith.divf %1312, %1313 : vector<8x1xf32>
    %1315 = vector.broadcast %1314 : vector<8x1xf32> to vector<8x32xf32>
    %1316 = arith.subf %1288, %1315 : vector<8x32xf32>
    %1317 = arith.mulf %1316, %1316 : vector<8x32xf32>
    %cst_506 = arith.constant dense<0.000000e+00> : vector<8xf32>
    %1318 = vector.multi_reduction <add>, %1317, %cst_506 [1] : vector<8x32xf32> to vector<8xf32>
    %1319 = vector.shape_cast %1318 : vector<8xf32> to vector<8x1xf32>
    %cst_507 = arith.constant 3.200000e+01 : f32
    %1320 = vector.broadcast %cst_507 : f32 to vector<8x1xf32>
    %1321 = arith.divf %1319, %1320 : vector<8x1xf32>
    %cst_508 = arith.constant 9.99999974E-6 : f32
    %1322 = vector.broadcast %cst_508 : f32 to vector<8x1xf32>
    %1323 = arith.addf %1321, %1322 : vector<8x1xf32>
    %1324 = math.rsqrt %1323 : vector<8x1xf32>
    %1325 = vector.broadcast %1324 : vector<8x1xf32> to vector<8x32xf32>
    %1326 = arith.mulf %1316, %1325 : vector<8x32xf32>
    %1327 = vector.broadcast %1289 : vector<1x32xf32> to vector<8x32xf32>
    %1328 = arith.mulf %1326, %1327 : vector<8x32xf32>
    %1329 = vector.broadcast %1290 : vector<1x32xf32> to vector<8x32xf32>
    %1330 = arith.addf %1328, %1329 : vector<8x32xf32>
    %c58 = arith.constant 58 : index
    %c0_509 = arith.constant 0 : index
    %1331 = vector.load %arg2[%c58, %c0_509] : memref<120x256xf32, #tpu.memory_space<vmem>>, vector<1x64xf32>
    %1332 = tpu.iota {dimensions = array<i32: 0>} : vector<4x8xi32>
    %1333 = tpu.iota {dimensions = array<i32: 1>} : vector<4x8xi32>
    %c2_i32_510 = arith.constant 2 : i32
    %1334 = vector.broadcast %c2_i32_510 : i32 to vector<4x8xi32>
    %1335 = arith.muli %1334, %1332 : vector<4x8xi32>
    %c-1_i32_511 = arith.constant -1 : i32
    %1336 = vector.broadcast %c-1_i32_511 : i32 to vector<4x8xi32>
    %1337 = arith.addi %1335, %1336 : vector<4x8xi32>
    %1338 = arith.cmpi eq, %1333, %1337 : vector<4x8xi32>
    %1339 = arith.extui %1338 : vector<4x8xi1> to vector<4x8xi32>
    %1340 = arith.sitofp %1339 : vector<4x8xi32> to vector<4x8xf32>
    %cst_512 = arith.constant dense<0.000000e+00> : vector<4x32xf32>
    %1341 = tpu.matmul %1340, %1310, %cst_512 {dimension_numbers = #tpu.dot_dimension_numbers<[1], [0], [0], [1], [0, 0, 1, 1], [], []>} : vector<4x8xf32>, vector<8x32xf32>, vector<4x32xf32> -> vector<4x32xf32>
    %c344 = arith.constant 344 : index
    %c0_513 = arith.constant 0 : index
    %1342 = vector.load %arg3[%c344, %c0_513] : memref<1912x256xf32, #tpu.memory_space<vmem>>, vector<32x64xf32>
    %cst_514 = arith.constant dense<0.000000e+00> : vector<4x64xf32>
    %1343 = tpu.matmul %1341, %1342, %cst_514 {dimension_numbers = #tpu.dot_dimension_numbers<[1], [0], [0], [1], [0, 0, 1, 1], [], []>} : vector<4x32xf32>, vector<32x64xf32>, vector<4x64xf32> -> vector<4x64xf32>
    %1344 = tpu.iota {dimensions = array<i32: 0>} : vector<4x8xi32>
    %1345 = tpu.iota {dimensions = array<i32: 1>} : vector<4x8xi32>
    %c2_i32_515 = arith.constant 2 : i32
    %1346 = vector.broadcast %c2_i32_515 : i32 to vector<4x8xi32>
    %1347 = arith.muli %1346, %1344 : vector<4x8xi32>
    %c0_i32_516 = arith.constant 0 : i32
    %1348 = vector.broadcast %c0_i32_516 : i32 to vector<4x8xi32>
    %1349 = arith.addi %1347, %1348 : vector<4x8xi32>
    %1350 = arith.cmpi eq, %1345, %1349 : vector<4x8xi32>
    %1351 = arith.extui %1350 : vector<4x8xi1> to vector<4x8xi32>
    %1352 = arith.sitofp %1351 : vector<4x8xi32> to vector<4x8xf32>
    %cst_517 = arith.constant dense<0.000000e+00> : vector<4x32xf32>
    %1353 = tpu.matmul %1352, %1310, %cst_517 {dimension_numbers = #tpu.dot_dimension_numbers<[1], [0], [0], [1], [0, 0, 1, 1], [], []>} : vector<4x8xf32>, vector<8x32xf32>, vector<4x32xf32> -> vector<4x32xf32>
    %c376 = arith.constant 376 : index
    %c0_518 = arith.constant 0 : index
    %1354 = vector.load %arg3[%c376, %c0_518] : memref<1912x256xf32, #tpu.memory_space<vmem>>, vector<32x64xf32>
    %cst_519 = arith.constant dense<0.000000e+00> : vector<4x64xf32>
    %1355 = tpu.matmul %1353, %1354, %cst_519 {dimension_numbers = #tpu.dot_dimension_numbers<[1], [0], [0], [1], [0, 0, 1, 1], [], []>} : vector<4x32xf32>, vector<32x64xf32>, vector<4x64xf32> -> vector<4x64xf32>
    %1356 = arith.addf %1343, %1355 : vector<4x64xf32>
    %1357 = tpu.iota {dimensions = array<i32: 0>} : vector<4x8xi32>
    %1358 = tpu.iota {dimensions = array<i32: 1>} : vector<4x8xi32>
    %c2_i32_520 = arith.constant 2 : i32
    %1359 = vector.broadcast %c2_i32_520 : i32 to vector<4x8xi32>
    %1360 = arith.muli %1359, %1357 : vector<4x8xi32>
    %c1_i32_521 = arith.constant 1 : i32
    %1361 = vector.broadcast %c1_i32_521 : i32 to vector<4x8xi32>
    %1362 = arith.addi %1360, %1361 : vector<4x8xi32>
    %1363 = arith.cmpi eq, %1358, %1362 : vector<4x8xi32>
    %1364 = arith.extui %1363 : vector<4x8xi1> to vector<4x8xi32>
    %1365 = arith.sitofp %1364 : vector<4x8xi32> to vector<4x8xf32>
    %cst_522 = arith.constant dense<0.000000e+00> : vector<4x32xf32>
    %1366 = tpu.matmul %1365, %1310, %cst_522 {dimension_numbers = #tpu.dot_dimension_numbers<[1], [0], [0], [1], [0, 0, 1, 1], [], []>} : vector<4x8xf32>, vector<8x32xf32>, vector<4x32xf32> -> vector<4x32xf32>
    %c408 = arith.constant 408 : index
    %c0_523 = arith.constant 0 : index
    %1367 = vector.load %arg3[%c408, %c0_523] : memref<1912x256xf32, #tpu.memory_space<vmem>>, vector<32x64xf32>
    %cst_524 = arith.constant dense<0.000000e+00> : vector<4x64xf32>
    %1368 = tpu.matmul %1366, %1367, %cst_524 {dimension_numbers = #tpu.dot_dimension_numbers<[1], [0], [0], [1], [0, 0, 1, 1], [], []>} : vector<4x32xf32>, vector<32x64xf32>, vector<4x64xf32> -> vector<4x64xf32>
    %1369 = arith.addf %1356, %1368 : vector<4x64xf32>
    %1370 = vector.broadcast %1331 : vector<1x64xf32> to vector<4x64xf32>
    %1371 = arith.addf %1369, %1370 : vector<4x64xf32>
    %1372 = tpu.iota {dimensions = array<i32: 0>} : vector<4x8xi32>
    %1373 = tpu.iota {dimensions = array<i32: 1>} : vector<4x8xi32>
    %c2_i32_525 = arith.constant 2 : i32
    %1374 = vector.broadcast %c2_i32_525 : i32 to vector<4x8xi32>
    %1375 = arith.muli %1374, %1372 : vector<4x8xi32>
    %c-1_i32_526 = arith.constant -1 : i32
    %1376 = vector.broadcast %c-1_i32_526 : i32 to vector<4x8xi32>
    %1377 = arith.addi %1375, %1376 : vector<4x8xi32>
    %1378 = arith.cmpi eq, %1373, %1377 : vector<4x8xi32>
    %1379 = arith.extui %1378 : vector<4x8xi1> to vector<4x8xi32>
    %1380 = arith.sitofp %1379 : vector<4x8xi32> to vector<4x8xf32>
    %cst_527 = arith.constant dense<0.000000e+00> : vector<4x32xf32>
    %1381 = tpu.matmul %1380, %1330, %cst_527 {dimension_numbers = #tpu.dot_dimension_numbers<[1], [0], [0], [1], [0, 0, 1, 1], [], []>} : vector<4x8xf32>, vector<8x32xf32>, vector<4x32xf32> -> vector<4x32xf32>
    %c344_528 = arith.constant 344 : index
    %c0_529 = arith.constant 0 : index
    %1382 = vector.load %arg3[%c344_528, %c0_529] : memref<1912x256xf32, #tpu.memory_space<vmem>>, vector<32x64xf32>
    %cst_530 = arith.constant dense<0.000000e+00> : vector<4x64xf32>
    %1383 = tpu.matmul %1381, %1382, %cst_530 {dimension_numbers = #tpu.dot_dimension_numbers<[1], [0], [0], [1], [0, 0, 1, 1], [], []>} : vector<4x32xf32>, vector<32x64xf32>, vector<4x64xf32> -> vector<4x64xf32>
    %1384 = tpu.iota {dimensions = array<i32: 0>} : vector<4x8xi32>
    %1385 = tpu.iota {dimensions = array<i32: 1>} : vector<4x8xi32>
    %c2_i32_531 = arith.constant 2 : i32
    %1386 = vector.broadcast %c2_i32_531 : i32 to vector<4x8xi32>
    %1387 = arith.muli %1386, %1384 : vector<4x8xi32>
    %c0_i32_532 = arith.constant 0 : i32
    %1388 = vector.broadcast %c0_i32_532 : i32 to vector<4x8xi32>
    %1389 = arith.addi %1387, %1388 : vector<4x8xi32>
    %1390 = arith.cmpi eq, %1385, %1389 : vector<4x8xi32>
    %1391 = arith.extui %1390 : vector<4x8xi1> to vector<4x8xi32>
    %1392 = arith.sitofp %1391 : vector<4x8xi32> to vector<4x8xf32>
    %cst_533 = arith.constant dense<0.000000e+00> : vector<4x32xf32>
    %1393 = tpu.matmul %1392, %1330, %cst_533 {dimension_numbers = #tpu.dot_dimension_numbers<[1], [0], [0], [1], [0, 0, 1, 1], [], []>} : vector<4x8xf32>, vector<8x32xf32>, vector<4x32xf32> -> vector<4x32xf32>
    %c376_534 = arith.constant 376 : index
    %c0_535 = arith.constant 0 : index
    %1394 = vector.load %arg3[%c376_534, %c0_535] : memref<1912x256xf32, #tpu.memory_space<vmem>>, vector<32x64xf32>
    %cst_536 = arith.constant dense<0.000000e+00> : vector<4x64xf32>
    %1395 = tpu.matmul %1393, %1394, %cst_536 {dimension_numbers = #tpu.dot_dimension_numbers<[1], [0], [0], [1], [0, 0, 1, 1], [], []>} : vector<4x32xf32>, vector<32x64xf32>, vector<4x64xf32> -> vector<4x64xf32>
    %1396 = arith.addf %1383, %1395 : vector<4x64xf32>
    %1397 = tpu.iota {dimensions = array<i32: 0>} : vector<4x8xi32>
    %1398 = tpu.iota {dimensions = array<i32: 1>} : vector<4x8xi32>
    %c2_i32_537 = arith.constant 2 : i32
    %1399 = vector.broadcast %c2_i32_537 : i32 to vector<4x8xi32>
    %1400 = arith.muli %1399, %1397 : vector<4x8xi32>
    %c1_i32_538 = arith.constant 1 : i32
    %1401 = vector.broadcast %c1_i32_538 : i32 to vector<4x8xi32>
    %1402 = arith.addi %1400, %1401 : vector<4x8xi32>
    %1403 = arith.cmpi eq, %1398, %1402 : vector<4x8xi32>
    %1404 = arith.extui %1403 : vector<4x8xi1> to vector<4x8xi32>
    %1405 = arith.sitofp %1404 : vector<4x8xi32> to vector<4x8xf32>
    %cst_539 = arith.constant dense<0.000000e+00> : vector<4x32xf32>
    %1406 = tpu.matmul %1405, %1330, %cst_539 {dimension_numbers = #tpu.dot_dimension_numbers<[1], [0], [0], [1], [0, 0, 1, 1], [], []>} : vector<4x8xf32>, vector<8x32xf32>, vector<4x32xf32> -> vector<4x32xf32>
    %c408_540 = arith.constant 408 : index
    %c0_541 = arith.constant 0 : index
    %1407 = vector.load %arg3[%c408_540, %c0_541] : memref<1912x256xf32, #tpu.memory_space<vmem>>, vector<32x64xf32>
    %cst_542 = arith.constant dense<0.000000e+00> : vector<4x64xf32>
    %1408 = tpu.matmul %1406, %1407, %cst_542 {dimension_numbers = #tpu.dot_dimension_numbers<[1], [0], [0], [1], [0, 0, 1, 1], [], []>} : vector<4x32xf32>, vector<32x64xf32>, vector<4x64xf32> -> vector<4x64xf32>
    %1409 = arith.addf %1396, %1408 : vector<4x64xf32>
    %1410 = vector.broadcast %1331 : vector<1x64xf32> to vector<4x64xf32>
    %1411 = arith.addf %1409, %1410 : vector<4x64xf32>
    %c59 = arith.constant 59 : index
    %c0_543 = arith.constant 0 : index
    %1412 = vector.load %arg2[%c59, %c0_543] : memref<120x256xf32, #tpu.memory_space<vmem>>, vector<1x64xf32>
    %1413 = vector.broadcast %1412 : vector<1x64xf32> to vector<4x64xf32>
    %1414 = arith.mulf %1371, %1413 : vector<4x64xf32>
    %c60 = arith.constant 60 : index
    %c0_544 = arith.constant 0 : index
    %1415 = vector.load %arg2[%c60, %c0_544] : memref<120x256xf32, #tpu.memory_space<vmem>>, vector<1x64xf32>
    %1416 = vector.broadcast %1415 : vector<1x64xf32> to vector<4x64xf32>
    %1417 = arith.addf %1414, %1416 : vector<4x64xf32>
    %c440 = arith.constant 440 : index
    %c0_545 = arith.constant 0 : index
    %1418 = vector.load %arg3[%c440, %c0_545] : memref<1912x256xf32, #tpu.memory_space<vmem>>, vector<64x64xf32>
    %cst_546 = arith.constant dense<0.000000e+00> : vector<4x64xf32>
    %1419 = tpu.matmul %1417, %1418, %cst_546 {dimension_numbers = #tpu.dot_dimension_numbers<[1], [0], [0], [1], [0, 0, 1, 1], [], []>} : vector<4x64xf32>, vector<64x64xf32>, vector<4x64xf32> -> vector<4x64xf32>
    %c61 = arith.constant 61 : index
    %c0_547 = arith.constant 0 : index
    %1420 = vector.load %arg2[%c61, %c0_547] : memref<120x256xf32, #tpu.memory_space<vmem>>, vector<1x64xf32>
    %1421 = vector.broadcast %1420 : vector<1x64xf32> to vector<4x64xf32>
    %1422 = arith.addf %1419, %1421 : vector<4x64xf32>
    %cst_548 = arith.constant 5.000000e-01 : f32
    %1423 = vector.broadcast %cst_548 : f32 to vector<4x64xf32>
    %1424 = arith.mulf %1423, %1422 : vector<4x64xf32>
    %cst_549 = arith.constant 0.707106769 : f32
    %1425 = vector.broadcast %cst_549 : f32 to vector<4x64xf32>
    %1426 = arith.mulf %1422, %1425 : vector<4x64xf32>
    %1427 = math.absf %1426 : vector<4x64xf32>
    %cst_550 = arith.constant 0.327591091 : f32
    %1428 = vector.broadcast %cst_550 : f32 to vector<4x64xf32>
    %1429 = arith.mulf %1428, %1427 : vector<4x64xf32>
    %cst_551 = arith.constant 1.000000e+00 : f32
    %1430 = vector.broadcast %cst_551 : f32 to vector<4x64xf32>
    %1431 = arith.addf %1430, %1429 : vector<4x64xf32>
    %1432 = tpu.reciprocal %1431 {approx = true} : vector<4x64xf32> -> vector<4x64xf32>
    %cst_552 = arith.constant 1.06140542 : f32
    %1433 = vector.broadcast %cst_552 : f32 to vector<4x64xf32>
    %1434 = arith.mulf %1433, %1432 : vector<4x64xf32>
    %cst_553 = arith.constant -1.45315206 : f32
    %1435 = vector.broadcast %cst_553 : f32 to vector<4x64xf32>
    %1436 = arith.addf %1434, %1435 : vector<4x64xf32>
    %1437 = arith.mulf %1436, %1432 : vector<4x64xf32>
    %cst_554 = arith.constant 1.42141378 : f32
    %1438 = vector.broadcast %cst_554 : f32 to vector<4x64xf32>
    %1439 = arith.addf %1437, %1438 : vector<4x64xf32>
    %1440 = arith.mulf %1439, %1432 : vector<4x64xf32>
    %cst_555 = arith.constant -0.284496725 : f32
    %1441 = vector.broadcast %cst_555 : f32 to vector<4x64xf32>
    %1442 = arith.addf %1440, %1441 : vector<4x64xf32>
    %1443 = arith.mulf %1442, %1432 : vector<4x64xf32>
    %cst_556 = arith.constant 0.254829586 : f32
    %1444 = vector.broadcast %cst_556 : f32 to vector<4x64xf32>
    %1445 = arith.addf %1443, %1444 : vector<4x64xf32>
    %1446 = arith.mulf %1445, %1432 : vector<4x64xf32>
    %cst_557 = arith.constant 0.000000e+00 : f32
    %1447 = vector.broadcast %cst_557 : f32 to vector<4x64xf32>
    %1448 = arith.subf %1447, %1427 : vector<4x64xf32>
    %1449 = arith.mulf %1448, %1427 : vector<4x64xf32>
    %1450 = math.exp %1449 : vector<4x64xf32>
    %1451 = arith.mulf %1446, %1450 : vector<4x64xf32>
    %cst_558 = arith.constant 1.000000e+00 : f32
    %1452 = vector.broadcast %cst_558 : f32 to vector<4x64xf32>
    %1453 = arith.subf %1452, %1451 : vector<4x64xf32>
    %cst_559 = arith.constant 0.000000e+00 : f32
    %1454 = vector.broadcast %cst_559 : f32 to vector<4x64xf32>
    %1455 = arith.cmpf oge, %1426, %1454 : vector<4x64xf32>
    %cst_560 = arith.constant 0.000000e+00 : f32
    %1456 = vector.broadcast %cst_560 : f32 to vector<4x64xf32>
    %1457 = arith.subf %1456, %1453 : vector<4x64xf32>
    %1458 = arith.select %1455, %1453, %1457 : vector<4x64xi1>, vector<4x64xf32>
    %cst_561 = arith.constant 1.000000e+00 : f32
    %1459 = vector.broadcast %cst_561 : f32 to vector<4x64xf32>
    %1460 = arith.addf %1459, %1458 : vector<4x64xf32>
    %1461 = arith.mulf %1424, %1460 : vector<4x64xf32>
    %1462 = tpu.iota {dimensions = array<i32: 0>} : vector<4x4xi32>
    %1463 = tpu.iota {dimensions = array<i32: 1>} : vector<4x4xi32>
    %c1_i32_562 = arith.constant 1 : i32
    %1464 = vector.broadcast %c1_i32_562 : i32 to vector<4x4xi32>
    %1465 = arith.muli %1464, %1462 : vector<4x4xi32>
    %c-2_i32_563 = arith.constant -2 : i32
    %1466 = vector.broadcast %c-2_i32_563 : i32 to vector<4x4xi32>
    %1467 = arith.addi %1465, %1466 : vector<4x4xi32>
    %1468 = arith.cmpi eq, %1463, %1467 : vector<4x4xi32>
    %1469 = arith.extui %1468 : vector<4x4xi1> to vector<4x4xi32>
    %1470 = arith.sitofp %1469 : vector<4x4xi32> to vector<4x4xf32>
    %cst_564 = arith.constant dense<0.000000e+00> : vector<4x64xf32>
    %1471 = tpu.matmul %1470, %1461, %cst_564 {dimension_numbers = #tpu.dot_dimension_numbers<[1], [0], [0], [1], [0, 0, 1, 1], [], []>} : vector<4x4xf32>, vector<4x64xf32>, vector<4x64xf32> -> vector<4x64xf32>
    %c62 = arith.constant 62 : index
    %c0_565 = arith.constant 0 : index
    %1472 = vector.load %arg2[%c62, %c0_565] : memref<120x256xf32, #tpu.memory_space<vmem>>, vector<1x64xf32>
    %1473 = vector.broadcast %1472 : vector<1x64xf32> to vector<4x64xf32>
    %1474 = arith.mulf %1471, %1473 : vector<4x64xf32>
    %1475 = tpu.iota {dimensions = array<i32: 0>} : vector<4x4xi32>
    %1476 = tpu.iota {dimensions = array<i32: 1>} : vector<4x4xi32>
    %c1_i32_566 = arith.constant 1 : i32
    %1477 = vector.broadcast %c1_i32_566 : i32 to vector<4x4xi32>
    %1478 = arith.muli %1477, %1475 : vector<4x4xi32>
    %c-1_i32_567 = arith.constant -1 : i32
    %1479 = vector.broadcast %c-1_i32_567 : i32 to vector<4x4xi32>
    %1480 = arith.addi %1478, %1479 : vector<4x4xi32>
    %1481 = arith.cmpi eq, %1476, %1480 : vector<4x4xi32>
    %1482 = arith.extui %1481 : vector<4x4xi1> to vector<4x4xi32>
    %1483 = arith.sitofp %1482 : vector<4x4xi32> to vector<4x4xf32>
    %cst_568 = arith.constant dense<0.000000e+00> : vector<4x64xf32>
    %1484 = tpu.matmul %1483, %1461, %cst_568 {dimension_numbers = #tpu.dot_dimension_numbers<[1], [0], [0], [1], [0, 0, 1, 1], [], []>} : vector<4x4xf32>, vector<4x64xf32>, vector<4x64xf32> -> vector<4x64xf32>
    %c63 = arith.constant 63 : index
    %c0_569 = arith.constant 0 : index
    %1485 = vector.load %arg2[%c63, %c0_569] : memref<120x256xf32, #tpu.memory_space<vmem>>, vector<1x64xf32>
    %1486 = vector.broadcast %1485 : vector<1x64xf32> to vector<4x64xf32>
    %1487 = arith.mulf %1484, %1486 : vector<4x64xf32>
    %1488 = arith.addf %1474, %1487 : vector<4x64xf32>
    %c64 = arith.constant 64 : index
    %c0_570 = arith.constant 0 : index
    %1489 = vector.load %arg2[%c64, %c0_570] : memref<120x256xf32, #tpu.memory_space<vmem>>, vector<1x64xf32>
    %1490 = vector.broadcast %1489 : vector<1x64xf32> to vector<4x64xf32>
    %1491 = arith.mulf %1461, %1490 : vector<4x64xf32>
    %1492 = arith.addf %1488, %1491 : vector<4x64xf32>
    %1493 = tpu.iota {dimensions = array<i32: 0>} : vector<4x4xi32>
    %1494 = tpu.iota {dimensions = array<i32: 1>} : vector<4x4xi32>
    %c1_i32_571 = arith.constant 1 : i32
    %1495 = vector.broadcast %c1_i32_571 : i32 to vector<4x4xi32>
    %1496 = arith.muli %1495, %1493 : vector<4x4xi32>
    %c1_i32_572 = arith.constant 1 : i32
    %1497 = vector.broadcast %c1_i32_572 : i32 to vector<4x4xi32>
    %1498 = arith.addi %1496, %1497 : vector<4x4xi32>
    %1499 = arith.cmpi eq, %1494, %1498 : vector<4x4xi32>
    %1500 = arith.extui %1499 : vector<4x4xi1> to vector<4x4xi32>
    %1501 = arith.sitofp %1500 : vector<4x4xi32> to vector<4x4xf32>
    %cst_573 = arith.constant dense<0.000000e+00> : vector<4x64xf32>
    %1502 = tpu.matmul %1501, %1461, %cst_573 {dimension_numbers = #tpu.dot_dimension_numbers<[1], [0], [0], [1], [0, 0, 1, 1], [], []>} : vector<4x4xf32>, vector<4x64xf32>, vector<4x64xf32> -> vector<4x64xf32>
    %c65 = arith.constant 65 : index
    %c0_574 = arith.constant 0 : index
    %1503 = vector.load %arg2[%c65, %c0_574] : memref<120x256xf32, #tpu.memory_space<vmem>>, vector<1x64xf32>
    %1504 = vector.broadcast %1503 : vector<1x64xf32> to vector<4x64xf32>
    %1505 = arith.mulf %1502, %1504 : vector<4x64xf32>
    %1506 = arith.addf %1492, %1505 : vector<4x64xf32>
    %1507 = tpu.iota {dimensions = array<i32: 0>} : vector<4x4xi32>
    %1508 = tpu.iota {dimensions = array<i32: 1>} : vector<4x4xi32>
    %c1_i32_575 = arith.constant 1 : i32
    %1509 = vector.broadcast %c1_i32_575 : i32 to vector<4x4xi32>
    %1510 = arith.muli %1509, %1507 : vector<4x4xi32>
    %c2_i32_576 = arith.constant 2 : i32
    %1511 = vector.broadcast %c2_i32_576 : i32 to vector<4x4xi32>
    %1512 = arith.addi %1510, %1511 : vector<4x4xi32>
    %1513 = arith.cmpi eq, %1508, %1512 : vector<4x4xi32>
    %1514 = arith.extui %1513 : vector<4x4xi1> to vector<4x4xi32>
    %1515 = arith.sitofp %1514 : vector<4x4xi32> to vector<4x4xf32>
    %cst_577 = arith.constant dense<0.000000e+00> : vector<4x64xf32>
    %1516 = tpu.matmul %1515, %1461, %cst_577 {dimension_numbers = #tpu.dot_dimension_numbers<[1], [0], [0], [1], [0, 0, 1, 1], [], []>} : vector<4x4xf32>, vector<4x64xf32>, vector<4x64xf32> -> vector<4x64xf32>
    %c66 = arith.constant 66 : index
    %c0_578 = arith.constant 0 : index
    %1517 = vector.load %arg2[%c66, %c0_578] : memref<120x256xf32, #tpu.memory_space<vmem>>, vector<1x64xf32>
    %1518 = vector.broadcast %1517 : vector<1x64xf32> to vector<4x64xf32>
    %1519 = arith.mulf %1516, %1518 : vector<4x64xf32>
    %1520 = arith.addf %1506, %1519 : vector<4x64xf32>
    %c67 = arith.constant 67 : index
    %c0_579 = arith.constant 0 : index
    %1521 = vector.load %arg2[%c67, %c0_579] : memref<120x256xf32, #tpu.memory_space<vmem>>, vector<1x64xf32>
    %1522 = vector.broadcast %1521 : vector<1x64xf32> to vector<4x64xf32>
    %1523 = arith.addf %1520, %1522 : vector<4x64xf32>
    %1524 = tpu.iota {dimensions = array<i32: 0>} : vector<4x4xi32>
    %1525 = tpu.iota {dimensions = array<i32: 1>} : vector<4x4xi32>
    %c1_i32_580 = arith.constant 1 : i32
    %1526 = vector.broadcast %c1_i32_580 : i32 to vector<4x4xi32>
    %1527 = arith.muli %1526, %1524 : vector<4x4xi32>
    %c-3_i32_581 = arith.constant -3 : i32
    %1528 = vector.broadcast %c-3_i32_581 : i32 to vector<4x4xi32>
    %1529 = arith.addi %1527, %1528 : vector<4x4xi32>
    %1530 = arith.cmpi eq, %1525, %1529 : vector<4x4xi32>
    %1531 = arith.extui %1530 : vector<4x4xi1> to vector<4x4xi32>
    %1532 = arith.sitofp %1531 : vector<4x4xi32> to vector<4x4xf32>
    %cst_582 = arith.constant dense<0.000000e+00> : vector<4x64xf32>
    %1533 = tpu.matmul %1532, %1523, %cst_582 {dimension_numbers = #tpu.dot_dimension_numbers<[1], [0], [0], [1], [0, 0, 1, 1], [], []>} : vector<4x4xf32>, vector<4x64xf32>, vector<4x64xf32> -> vector<4x64xf32>
    %c70 = arith.constant 70 : index
    %c0_583 = arith.constant 0 : index
    %1534 = vector.load %arg2[%c70, %c0_583] : memref<120x256xf32, #tpu.memory_space<vmem>>, vector<1x64xf32>
    %1535 = vector.broadcast %1534 : vector<1x64xf32> to vector<4x64xf32>
    %1536 = arith.mulf %1533, %1535 : vector<4x64xf32>
    %c71 = arith.constant 71 : index
    %c0_584 = arith.constant 0 : index
    %1537 = vector.load %arg2[%c71, %c0_584] : memref<120x256xf32, #tpu.memory_space<vmem>>, vector<1x64xf32>
    %1538 = vector.broadcast %1537 : vector<1x64xf32> to vector<4x64xf32>
    %1539 = arith.mulf %1523, %1538 : vector<4x64xf32>
    %1540 = arith.addf %1536, %1539 : vector<4x64xf32>
    %1541 = tpu.iota {dimensions = array<i32: 0>} : vector<4x4xi32>
    %1542 = tpu.iota {dimensions = array<i32: 1>} : vector<4x4xi32>
    %c1_i32_585 = arith.constant 1 : i32
    %1543 = vector.broadcast %c1_i32_585 : i32 to vector<4x4xi32>
    %1544 = arith.muli %1543, %1541 : vector<4x4xi32>
    %c3_i32_586 = arith.constant 3 : i32
    %1545 = vector.broadcast %c3_i32_586 : i32 to vector<4x4xi32>
    %1546 = arith.addi %1544, %1545 : vector<4x4xi32>
    %1547 = arith.cmpi eq, %1542, %1546 : vector<4x4xi32>
    %1548 = arith.extui %1547 : vector<4x4xi1> to vector<4x4xi32>
    %1549 = arith.sitofp %1548 : vector<4x4xi32> to vector<4x4xf32>
    %cst_587 = arith.constant dense<0.000000e+00> : vector<4x64xf32>
    %1550 = tpu.matmul %1549, %1523, %cst_587 {dimension_numbers = #tpu.dot_dimension_numbers<[1], [0], [0], [1], [0, 0, 1, 1], [], []>} : vector<4x4xf32>, vector<4x64xf32>, vector<4x64xf32> -> vector<4x64xf32>
    %c72_588 = arith.constant 72 : index
    %c0_589 = arith.constant 0 : index
    %1551 = vector.load %arg2[%c72_588, %c0_589] : memref<120x256xf32, #tpu.memory_space<vmem>>, vector<1x64xf32>
    %1552 = vector.broadcast %1551 : vector<1x64xf32> to vector<4x64xf32>
    %1553 = arith.mulf %1550, %1552 : vector<4x64xf32>
    %1554 = arith.addf %1540, %1553 : vector<4x64xf32>
    %c75 = arith.constant 75 : index
    %c0_590 = arith.constant 0 : index
    %1555 = vector.load %arg2[%c75, %c0_590] : memref<120x256xf32, #tpu.memory_space<vmem>>, vector<1x64xf32>
    %1556 = vector.broadcast %1555 : vector<1x64xf32> to vector<4x64xf32>
    %1557 = arith.addf %1554, %1556 : vector<4x64xf32>
    %c504 = arith.constant 504 : index
    %c0_591 = arith.constant 0 : index
    %1558 = vector.load %arg3[%c504, %c0_591] : memref<1912x256xf32, #tpu.memory_space<vmem>>, vector<64x64xf32>
    %cst_592 = arith.constant dense<0.000000e+00> : vector<4x64xf32>
    %1559 = tpu.matmul %1557, %1558, %cst_592 {dimension_numbers = #tpu.dot_dimension_numbers<[1], [0], [0], [1], [0, 0, 1, 1], [], []>} : vector<4x64xf32>, vector<64x64xf32>, vector<4x64xf32> -> vector<4x64xf32>
    %c76 = arith.constant 76 : index
    %c0_593 = arith.constant 0 : index
    %1560 = vector.load %arg2[%c76, %c0_593] : memref<120x256xf32, #tpu.memory_space<vmem>>, vector<1x64xf32>
    %1561 = vector.broadcast %1560 : vector<1x64xf32> to vector<4x64xf32>
    %1562 = arith.addf %1559, %1561 : vector<4x64xf32>
    %1563 = arith.mulf %1461, %1562 : vector<4x64xf32>
    %c568 = arith.constant 568 : index
    %c0_594 = arith.constant 0 : index
    %1564 = vector.load %arg3[%c568, %c0_594] : memref<1912x256xf32, #tpu.memory_space<vmem>>, vector<64x64xf32>
    %cst_595 = arith.constant dense<0.000000e+00> : vector<4x64xf32>
    %1565 = tpu.matmul %1563, %1564, %cst_595 {dimension_numbers = #tpu.dot_dimension_numbers<[1], [0], [0], [1], [0, 0, 1, 1], [], []>} : vector<4x64xf32>, vector<64x64xf32>, vector<4x64xf32> -> vector<4x64xf32>
    %c77 = arith.constant 77 : index
    %c0_596 = arith.constant 0 : index
    %1566 = vector.load %arg2[%c77, %c0_596] : memref<120x256xf32, #tpu.memory_space<vmem>>, vector<1x64xf32>
    %1567 = vector.broadcast %1566 : vector<1x64xf32> to vector<4x64xf32>
    %1568 = arith.addf %1565, %1567 : vector<4x64xf32>
    %1569 = arith.addf %1568, %1417 : vector<4x64xf32>
    %c78 = arith.constant 78 : index
    %c0_597 = arith.constant 0 : index
    %1570 = vector.load %arg2[%c78, %c0_597] : memref<120x256xf32, #tpu.memory_space<vmem>>, vector<1x64xf32>
    %1571 = vector.broadcast %1570 : vector<1x64xf32> to vector<4x64xf32>
    %1572 = arith.mulf %1571, %1569 : vector<4x64xf32>
    %1573 = arith.addf %1371, %1572 : vector<4x64xf32>
    %c632 = arith.constant 632 : index
    %c0_598 = arith.constant 0 : index
    %1574 = vector.load %arg3[%c632, %c0_598] : memref<1912x256xf32, #tpu.memory_space<vmem>>, vector<64x128xf32>
    %cst_599 = arith.constant dense<0.000000e+00> : vector<4x128xf32>
    %1575 = tpu.matmul %1573, %1574, %cst_599 {dimension_numbers = #tpu.dot_dimension_numbers<[1], [0], [0], [1], [0, 0, 1, 1], [], []>} : vector<4x64xf32>, vector<64x128xf32>, vector<4x128xf32> -> vector<4x128xf32>
    %c79 = arith.constant 79 : index
    %c0_600 = arith.constant 0 : index
    %1576 = vector.load %arg2[%c79, %c0_600] : memref<120x256xf32, #tpu.memory_space<vmem>>, vector<1x128xf32>
    %1577 = vector.broadcast %1576 : vector<1x128xf32> to vector<4x128xf32>
    %1578 = arith.addf %1575, %1577 : vector<4x128xf32>
    %1579 = tpu.iota {dimensions = array<i32: 0>} : vector<4x4xi32>
    %1580 = tpu.iota {dimensions = array<i32: 1>} : vector<4x4xi32>
    %c1_i32_601 = arith.constant 1 : i32
    %1581 = vector.broadcast %c1_i32_601 : i32 to vector<4x4xi32>
    %1582 = arith.muli %1581, %1579 : vector<4x4xi32>
    %c-1_i32_602 = arith.constant -1 : i32
    %1583 = vector.broadcast %c-1_i32_602 : i32 to vector<4x4xi32>
    %1584 = arith.addi %1582, %1583 : vector<4x4xi32>
    %1585 = arith.cmpi eq, %1580, %1584 : vector<4x4xi32>
    %1586 = arith.extui %1585 : vector<4x4xi1> to vector<4x4xi32>
    %1587 = arith.sitofp %1586 : vector<4x4xi32> to vector<4x4xf32>
    %cst_603 = arith.constant dense<0.000000e+00> : vector<4x128xf32>
    %1588 = tpu.matmul %1587, %1578, %cst_603 {dimension_numbers = #tpu.dot_dimension_numbers<[1], [0], [0], [1], [0, 0, 1, 1], [], []>} : vector<4x4xf32>, vector<4x128xf32>, vector<4x128xf32> -> vector<4x128xf32>
    %c80 = arith.constant 80 : index
    %c0_604 = arith.constant 0 : index
    %1589 = vector.load %arg2[%c80, %c0_604] : memref<120x256xf32, #tpu.memory_space<vmem>>, vector<1x128xf32>
    %1590 = vector.broadcast %1589 : vector<1x128xf32> to vector<4x128xf32>
    %1591 = arith.mulf %1588, %1590 : vector<4x128xf32>
    %c81 = arith.constant 81 : index
    %c0_605 = arith.constant 0 : index
    %1592 = vector.load %arg2[%c81, %c0_605] : memref<120x256xf32, #tpu.memory_space<vmem>>, vector<1x128xf32>
    %1593 = vector.broadcast %1592 : vector<1x128xf32> to vector<4x128xf32>
    %1594 = arith.mulf %1578, %1593 : vector<4x128xf32>
    %1595 = arith.addf %1591, %1594 : vector<4x128xf32>
    %1596 = tpu.iota {dimensions = array<i32: 0>} : vector<4x4xi32>
    %1597 = tpu.iota {dimensions = array<i32: 1>} : vector<4x4xi32>
    %c1_i32_606 = arith.constant 1 : i32
    %1598 = vector.broadcast %c1_i32_606 : i32 to vector<4x4xi32>
    %1599 = arith.muli %1598, %1596 : vector<4x4xi32>
    %c1_i32_607 = arith.constant 1 : i32
    %1600 = vector.broadcast %c1_i32_607 : i32 to vector<4x4xi32>
    %1601 = arith.addi %1599, %1600 : vector<4x4xi32>
    %1602 = arith.cmpi eq, %1597, %1601 : vector<4x4xi32>
    %1603 = arith.extui %1602 : vector<4x4xi1> to vector<4x4xi32>
    %1604 = arith.sitofp %1603 : vector<4x4xi32> to vector<4x4xf32>
    %cst_608 = arith.constant dense<0.000000e+00> : vector<4x128xf32>
    %1605 = tpu.matmul %1604, %1578, %cst_608 {dimension_numbers = #tpu.dot_dimension_numbers<[1], [0], [0], [1], [0, 0, 1, 1], [], []>} : vector<4x4xf32>, vector<4x128xf32>, vector<4x128xf32> -> vector<4x128xf32>
    %c82 = arith.constant 82 : index
    %c0_609 = arith.constant 0 : index
    %1606 = vector.load %arg2[%c82, %c0_609] : memref<120x256xf32, #tpu.memory_space<vmem>>, vector<1x128xf32>
    %1607 = vector.broadcast %1606 : vector<1x128xf32> to vector<4x128xf32>
    %1608 = arith.mulf %1605, %1607 : vector<4x128xf32>
    %1609 = arith.addf %1595, %1608 : vector<4x128xf32>
    %c83 = arith.constant 83 : index
    %c0_610 = arith.constant 0 : index
    %1610 = vector.load %arg2[%c83, %c0_610] : memref<120x256xf32, #tpu.memory_space<vmem>>, vector<1x128xf32>
    %1611 = vector.broadcast %1610 : vector<1x128xf32> to vector<4x128xf32>
    %1612 = arith.addf %1609, %1611 : vector<4x128xf32>
    %cst_611 = arith.constant 5.000000e-01 : f32
    %1613 = vector.broadcast %cst_611 : f32 to vector<4x128xf32>
    %1614 = arith.mulf %1613, %1612 : vector<4x128xf32>
    %cst_612 = arith.constant 0.707106769 : f32
    %1615 = vector.broadcast %cst_612 : f32 to vector<4x128xf32>
    %1616 = arith.mulf %1612, %1615 : vector<4x128xf32>
    %1617 = math.absf %1616 : vector<4x128xf32>
    %cst_613 = arith.constant 0.327591091 : f32
    %1618 = vector.broadcast %cst_613 : f32 to vector<4x128xf32>
    %1619 = arith.mulf %1618, %1617 : vector<4x128xf32>
    %cst_614 = arith.constant 1.000000e+00 : f32
    %1620 = vector.broadcast %cst_614 : f32 to vector<4x128xf32>
    %1621 = arith.addf %1620, %1619 : vector<4x128xf32>
    %1622 = tpu.reciprocal %1621 {approx = true} : vector<4x128xf32> -> vector<4x128xf32>
    %cst_615 = arith.constant 1.06140542 : f32
    %1623 = vector.broadcast %cst_615 : f32 to vector<4x128xf32>
    %1624 = arith.mulf %1623, %1622 : vector<4x128xf32>
    %cst_616 = arith.constant -1.45315206 : f32
    %1625 = vector.broadcast %cst_616 : f32 to vector<4x128xf32>
    %1626 = arith.addf %1624, %1625 : vector<4x128xf32>
    %1627 = arith.mulf %1626, %1622 : vector<4x128xf32>
    %cst_617 = arith.constant 1.42141378 : f32
    %1628 = vector.broadcast %cst_617 : f32 to vector<4x128xf32>
    %1629 = arith.addf %1627, %1628 : vector<4x128xf32>
    %1630 = arith.mulf %1629, %1622 : vector<4x128xf32>
    %cst_618 = arith.constant -0.284496725 : f32
    %1631 = vector.broadcast %cst_618 : f32 to vector<4x128xf32>
    %1632 = arith.addf %1630, %1631 : vector<4x128xf32>
    %1633 = arith.mulf %1632, %1622 : vector<4x128xf32>
    %cst_619 = arith.constant 0.254829586 : f32
    %1634 = vector.broadcast %cst_619 : f32 to vector<4x128xf32>
    %1635 = arith.addf %1633, %1634 : vector<4x128xf32>
    %1636 = arith.mulf %1635, %1622 : vector<4x128xf32>
    %cst_620 = arith.constant 0.000000e+00 : f32
    %1637 = vector.broadcast %cst_620 : f32 to vector<4x128xf32>
    %1638 = arith.subf %1637, %1617 : vector<4x128xf32>
    %1639 = arith.mulf %1638, %1617 : vector<4x128xf32>
    %1640 = math.exp %1639 : vector<4x128xf32>
    %1641 = arith.mulf %1636, %1640 : vector<4x128xf32>
    %cst_621 = arith.constant 1.000000e+00 : f32
    %1642 = vector.broadcast %cst_621 : f32 to vector<4x128xf32>
    %1643 = arith.subf %1642, %1641 : vector<4x128xf32>
    %cst_622 = arith.constant 0.000000e+00 : f32
    %1644 = vector.broadcast %cst_622 : f32 to vector<4x128xf32>
    %1645 = arith.cmpf oge, %1616, %1644 : vector<4x128xf32>
    %cst_623 = arith.constant 0.000000e+00 : f32
    %1646 = vector.broadcast %cst_623 : f32 to vector<4x128xf32>
    %1647 = arith.subf %1646, %1643 : vector<4x128xf32>
    %1648 = arith.select %1645, %1643, %1647 : vector<4x128xi1>, vector<4x128xf32>
    %cst_624 = arith.constant 1.000000e+00 : f32
    %1649 = vector.broadcast %cst_624 : f32 to vector<4x128xf32>
    %1650 = arith.addf %1649, %1648 : vector<4x128xf32>
    %1651 = arith.mulf %1614, %1650 : vector<4x128xf32>
    %c696 = arith.constant 696 : index
    %c0_625 = arith.constant 0 : index
    %1652 = vector.load %arg3[%c696, %c0_625] : memref<1912x256xf32, #tpu.memory_space<vmem>>, vector<128x64xf32>
    %cst_626 = arith.constant dense<0.000000e+00> : vector<4x64xf32>
    %1653 = tpu.matmul %1651, %1652, %cst_626 {dimension_numbers = #tpu.dot_dimension_numbers<[1], [0], [0], [1], [0, 0, 1, 1], [], []>} : vector<4x128xf32>, vector<128x64xf32>, vector<4x64xf32> -> vector<4x64xf32>
    %c84 = arith.constant 84 : index
    %c0_627 = arith.constant 0 : index
    %1654 = vector.load %arg2[%c84, %c0_627] : memref<120x256xf32, #tpu.memory_space<vmem>>, vector<1x64xf32>
    %1655 = vector.broadcast %1654 : vector<1x64xf32> to vector<4x64xf32>
    %1656 = arith.addf %1653, %1655 : vector<4x64xf32>
    %1657 = arith.addf %1573, %1656 : vector<4x64xf32>
    %c59_628 = arith.constant 59 : index
    %c0_629 = arith.constant 0 : index
    %1658 = vector.load %arg2[%c59_628, %c0_629] : memref<120x256xf32, #tpu.memory_space<vmem>>, vector<1x64xf32>
    %1659 = vector.broadcast %1658 : vector<1x64xf32> to vector<4x64xf32>
    %1660 = arith.mulf %1411, %1659 : vector<4x64xf32>
    %c60_630 = arith.constant 60 : index
    %c0_631 = arith.constant 0 : index
    %1661 = vector.load %arg2[%c60_630, %c0_631] : memref<120x256xf32, #tpu.memory_space<vmem>>, vector<1x64xf32>
    %1662 = vector.broadcast %1661 : vector<1x64xf32> to vector<4x64xf32>
    %1663 = arith.addf %1660, %1662 : vector<4x64xf32>
    %c440_632 = arith.constant 440 : index
    %c0_633 = arith.constant 0 : index
    %1664 = vector.load %arg3[%c440_632, %c0_633] : memref<1912x256xf32, #tpu.memory_space<vmem>>, vector<64x64xf32>
    %cst_634 = arith.constant dense<0.000000e+00> : vector<4x64xf32>
    %1665 = tpu.matmul %1663, %1664, %cst_634 {dimension_numbers = #tpu.dot_dimension_numbers<[1], [0], [0], [1], [0, 0, 1, 1], [], []>} : vector<4x64xf32>, vector<64x64xf32>, vector<4x64xf32> -> vector<4x64xf32>
    %c61_635 = arith.constant 61 : index
    %c0_636 = arith.constant 0 : index
    %1666 = vector.load %arg2[%c61_635, %c0_636] : memref<120x256xf32, #tpu.memory_space<vmem>>, vector<1x64xf32>
    %1667 = vector.broadcast %1666 : vector<1x64xf32> to vector<4x64xf32>
    %1668 = arith.addf %1665, %1667 : vector<4x64xf32>
    %cst_637 = arith.constant 5.000000e-01 : f32
    %1669 = vector.broadcast %cst_637 : f32 to vector<4x64xf32>
    %1670 = arith.mulf %1669, %1668 : vector<4x64xf32>
    %cst_638 = arith.constant 0.707106769 : f32
    %1671 = vector.broadcast %cst_638 : f32 to vector<4x64xf32>
    %1672 = arith.mulf %1668, %1671 : vector<4x64xf32>
    %1673 = math.absf %1672 : vector<4x64xf32>
    %cst_639 = arith.constant 0.327591091 : f32
    %1674 = vector.broadcast %cst_639 : f32 to vector<4x64xf32>
    %1675 = arith.mulf %1674, %1673 : vector<4x64xf32>
    %cst_640 = arith.constant 1.000000e+00 : f32
    %1676 = vector.broadcast %cst_640 : f32 to vector<4x64xf32>
    %1677 = arith.addf %1676, %1675 : vector<4x64xf32>
    %1678 = tpu.reciprocal %1677 {approx = true} : vector<4x64xf32> -> vector<4x64xf32>
    %cst_641 = arith.constant 1.06140542 : f32
    %1679 = vector.broadcast %cst_641 : f32 to vector<4x64xf32>
    %1680 = arith.mulf %1679, %1678 : vector<4x64xf32>
    %cst_642 = arith.constant -1.45315206 : f32
    %1681 = vector.broadcast %cst_642 : f32 to vector<4x64xf32>
    %1682 = arith.addf %1680, %1681 : vector<4x64xf32>
    %1683 = arith.mulf %1682, %1678 : vector<4x64xf32>
    %cst_643 = arith.constant 1.42141378 : f32
    %1684 = vector.broadcast %cst_643 : f32 to vector<4x64xf32>
    %1685 = arith.addf %1683, %1684 : vector<4x64xf32>
    %1686 = arith.mulf %1685, %1678 : vector<4x64xf32>
    %cst_644 = arith.constant -0.284496725 : f32
    %1687 = vector.broadcast %cst_644 : f32 to vector<4x64xf32>
    %1688 = arith.addf %1686, %1687 : vector<4x64xf32>
    %1689 = arith.mulf %1688, %1678 : vector<4x64xf32>
    %cst_645 = arith.constant 0.254829586 : f32
    %1690 = vector.broadcast %cst_645 : f32 to vector<4x64xf32>
    %1691 = arith.addf %1689, %1690 : vector<4x64xf32>
    %1692 = arith.mulf %1691, %1678 : vector<4x64xf32>
    %cst_646 = arith.constant 0.000000e+00 : f32
    %1693 = vector.broadcast %cst_646 : f32 to vector<4x64xf32>
    %1694 = arith.subf %1693, %1673 : vector<4x64xf32>
    %1695 = arith.mulf %1694, %1673 : vector<4x64xf32>
    %1696 = math.exp %1695 : vector<4x64xf32>
    %1697 = arith.mulf %1692, %1696 : vector<4x64xf32>
    %cst_647 = arith.constant 1.000000e+00 : f32
    %1698 = vector.broadcast %cst_647 : f32 to vector<4x64xf32>
    %1699 = arith.subf %1698, %1697 : vector<4x64xf32>
    %cst_648 = arith.constant 0.000000e+00 : f32
    %1700 = vector.broadcast %cst_648 : f32 to vector<4x64xf32>
    %1701 = arith.cmpf oge, %1672, %1700 : vector<4x64xf32>
    %cst_649 = arith.constant 0.000000e+00 : f32
    %1702 = vector.broadcast %cst_649 : f32 to vector<4x64xf32>
    %1703 = arith.subf %1702, %1699 : vector<4x64xf32>
    %1704 = arith.select %1701, %1699, %1703 : vector<4x64xi1>, vector<4x64xf32>
    %cst_650 = arith.constant 1.000000e+00 : f32
    %1705 = vector.broadcast %cst_650 : f32 to vector<4x64xf32>
    %1706 = arith.addf %1705, %1704 : vector<4x64xf32>
    %1707 = arith.mulf %1670, %1706 : vector<4x64xf32>
    %1708 = tpu.iota {dimensions = array<i32: 0>} : vector<4x4xi32>
    %1709 = tpu.iota {dimensions = array<i32: 1>} : vector<4x4xi32>
    %c1_i32_651 = arith.constant 1 : i32
    %1710 = vector.broadcast %c1_i32_651 : i32 to vector<4x4xi32>
    %1711 = arith.muli %1710, %1708 : vector<4x4xi32>
    %c-2_i32_652 = arith.constant -2 : i32
    %1712 = vector.broadcast %c-2_i32_652 : i32 to vector<4x4xi32>
    %1713 = arith.addi %1711, %1712 : vector<4x4xi32>
    %1714 = arith.cmpi eq, %1709, %1713 : vector<4x4xi32>
    %1715 = arith.extui %1714 : vector<4x4xi1> to vector<4x4xi32>
    %1716 = arith.sitofp %1715 : vector<4x4xi32> to vector<4x4xf32>
    %cst_653 = arith.constant dense<0.000000e+00> : vector<4x64xf32>
    %1717 = tpu.matmul %1716, %1707, %cst_653 {dimension_numbers = #tpu.dot_dimension_numbers<[1], [0], [0], [1], [0, 0, 1, 1], [], []>} : vector<4x4xf32>, vector<4x64xf32>, vector<4x64xf32> -> vector<4x64xf32>
    %c62_654 = arith.constant 62 : index
    %c0_655 = arith.constant 0 : index
    %1718 = vector.load %arg2[%c62_654, %c0_655] : memref<120x256xf32, #tpu.memory_space<vmem>>, vector<1x64xf32>
    %1719 = vector.broadcast %1718 : vector<1x64xf32> to vector<4x64xf32>
    %1720 = arith.mulf %1717, %1719 : vector<4x64xf32>
    %1721 = tpu.iota {dimensions = array<i32: 0>} : vector<4x4xi32>
    %1722 = tpu.iota {dimensions = array<i32: 1>} : vector<4x4xi32>
    %c1_i32_656 = arith.constant 1 : i32
    %1723 = vector.broadcast %c1_i32_656 : i32 to vector<4x4xi32>
    %1724 = arith.muli %1723, %1721 : vector<4x4xi32>
    %c-1_i32_657 = arith.constant -1 : i32
    %1725 = vector.broadcast %c-1_i32_657 : i32 to vector<4x4xi32>
    %1726 = arith.addi %1724, %1725 : vector<4x4xi32>
    %1727 = arith.cmpi eq, %1722, %1726 : vector<4x4xi32>
    %1728 = arith.extui %1727 : vector<4x4xi1> to vector<4x4xi32>
    %1729 = arith.sitofp %1728 : vector<4x4xi32> to vector<4x4xf32>
    %cst_658 = arith.constant dense<0.000000e+00> : vector<4x64xf32>
    %1730 = tpu.matmul %1729, %1707, %cst_658 {dimension_numbers = #tpu.dot_dimension_numbers<[1], [0], [0], [1], [0, 0, 1, 1], [], []>} : vector<4x4xf32>, vector<4x64xf32>, vector<4x64xf32> -> vector<4x64xf32>
    %c63_659 = arith.constant 63 : index
    %c0_660 = arith.constant 0 : index
    %1731 = vector.load %arg2[%c63_659, %c0_660] : memref<120x256xf32, #tpu.memory_space<vmem>>, vector<1x64xf32>
    %1732 = vector.broadcast %1731 : vector<1x64xf32> to vector<4x64xf32>
    %1733 = arith.mulf %1730, %1732 : vector<4x64xf32>
    %1734 = arith.addf %1720, %1733 : vector<4x64xf32>
    %c64_661 = arith.constant 64 : index
    %c0_662 = arith.constant 0 : index
    %1735 = vector.load %arg2[%c64_661, %c0_662] : memref<120x256xf32, #tpu.memory_space<vmem>>, vector<1x64xf32>
    %1736 = vector.broadcast %1735 : vector<1x64xf32> to vector<4x64xf32>
    %1737 = arith.mulf %1707, %1736 : vector<4x64xf32>
    %1738 = arith.addf %1734, %1737 : vector<4x64xf32>
    %1739 = tpu.iota {dimensions = array<i32: 0>} : vector<4x4xi32>
    %1740 = tpu.iota {dimensions = array<i32: 1>} : vector<4x4xi32>
    %c1_i32_663 = arith.constant 1 : i32
    %1741 = vector.broadcast %c1_i32_663 : i32 to vector<4x4xi32>
    %1742 = arith.muli %1741, %1739 : vector<4x4xi32>
    %c1_i32_664 = arith.constant 1 : i32
    %1743 = vector.broadcast %c1_i32_664 : i32 to vector<4x4xi32>
    %1744 = arith.addi %1742, %1743 : vector<4x4xi32>
    %1745 = arith.cmpi eq, %1740, %1744 : vector<4x4xi32>
    %1746 = arith.extui %1745 : vector<4x4xi1> to vector<4x4xi32>
    %1747 = arith.sitofp %1746 : vector<4x4xi32> to vector<4x4xf32>
    %cst_665 = arith.constant dense<0.000000e+00> : vector<4x64xf32>
    %1748 = tpu.matmul %1747, %1707, %cst_665 {dimension_numbers = #tpu.dot_dimension_numbers<[1], [0], [0], [1], [0, 0, 1, 1], [], []>} : vector<4x4xf32>, vector<4x64xf32>, vector<4x64xf32> -> vector<4x64xf32>
    %c65_666 = arith.constant 65 : index
    %c0_667 = arith.constant 0 : index
    %1749 = vector.load %arg2[%c65_666, %c0_667] : memref<120x256xf32, #tpu.memory_space<vmem>>, vector<1x64xf32>
    %1750 = vector.broadcast %1749 : vector<1x64xf32> to vector<4x64xf32>
    %1751 = arith.mulf %1748, %1750 : vector<4x64xf32>
    %1752 = arith.addf %1738, %1751 : vector<4x64xf32>
    %1753 = tpu.iota {dimensions = array<i32: 0>} : vector<4x4xi32>
    %1754 = tpu.iota {dimensions = array<i32: 1>} : vector<4x4xi32>
    %c1_i32_668 = arith.constant 1 : i32
    %1755 = vector.broadcast %c1_i32_668 : i32 to vector<4x4xi32>
    %1756 = arith.muli %1755, %1753 : vector<4x4xi32>
    %c2_i32_669 = arith.constant 2 : i32
    %1757 = vector.broadcast %c2_i32_669 : i32 to vector<4x4xi32>
    %1758 = arith.addi %1756, %1757 : vector<4x4xi32>
    %1759 = arith.cmpi eq, %1754, %1758 : vector<4x4xi32>
    %1760 = arith.extui %1759 : vector<4x4xi1> to vector<4x4xi32>
    %1761 = arith.sitofp %1760 : vector<4x4xi32> to vector<4x4xf32>
    %cst_670 = arith.constant dense<0.000000e+00> : vector<4x64xf32>
    %1762 = tpu.matmul %1761, %1707, %cst_670 {dimension_numbers = #tpu.dot_dimension_numbers<[1], [0], [0], [1], [0, 0, 1, 1], [], []>} : vector<4x4xf32>, vector<4x64xf32>, vector<4x64xf32> -> vector<4x64xf32>
    %c66_671 = arith.constant 66 : index
    %c0_672 = arith.constant 0 : index
    %1763 = vector.load %arg2[%c66_671, %c0_672] : memref<120x256xf32, #tpu.memory_space<vmem>>, vector<1x64xf32>
    %1764 = vector.broadcast %1763 : vector<1x64xf32> to vector<4x64xf32>
    %1765 = arith.mulf %1762, %1764 : vector<4x64xf32>
    %1766 = arith.addf %1752, %1765 : vector<4x64xf32>
    %c67_673 = arith.constant 67 : index
    %c0_674 = arith.constant 0 : index
    %1767 = vector.load %arg2[%c67_673, %c0_674] : memref<120x256xf32, #tpu.memory_space<vmem>>, vector<1x64xf32>
    %1768 = vector.broadcast %1767 : vector<1x64xf32> to vector<4x64xf32>
    %1769 = arith.addf %1766, %1768 : vector<4x64xf32>
    %1770 = tpu.iota {dimensions = array<i32: 0>} : vector<4x4xi32>
    %1771 = tpu.iota {dimensions = array<i32: 1>} : vector<4x4xi32>
    %c1_i32_675 = arith.constant 1 : i32
    %1772 = vector.broadcast %c1_i32_675 : i32 to vector<4x4xi32>
    %1773 = arith.muli %1772, %1770 : vector<4x4xi32>
    %c-3_i32_676 = arith.constant -3 : i32
    %1774 = vector.broadcast %c-3_i32_676 : i32 to vector<4x4xi32>
    %1775 = arith.addi %1773, %1774 : vector<4x4xi32>
    %1776 = arith.cmpi eq, %1771, %1775 : vector<4x4xi32>
    %1777 = arith.extui %1776 : vector<4x4xi1> to vector<4x4xi32>
    %1778 = arith.sitofp %1777 : vector<4x4xi32> to vector<4x4xf32>
    %cst_677 = arith.constant dense<0.000000e+00> : vector<4x64xf32>
    %1779 = tpu.matmul %1778, %1769, %cst_677 {dimension_numbers = #tpu.dot_dimension_numbers<[1], [0], [0], [1], [0, 0, 1, 1], [], []>} : vector<4x4xf32>, vector<4x64xf32>, vector<4x64xf32> -> vector<4x64xf32>
    %c70_678 = arith.constant 70 : index
    %c0_679 = arith.constant 0 : index
    %1780 = vector.load %arg2[%c70_678, %c0_679] : memref<120x256xf32, #tpu.memory_space<vmem>>, vector<1x64xf32>
    %1781 = vector.broadcast %1780 : vector<1x64xf32> to vector<4x64xf32>
    %1782 = arith.mulf %1779, %1781 : vector<4x64xf32>
    %c71_680 = arith.constant 71 : index
    %c0_681 = arith.constant 0 : index
    %1783 = vector.load %arg2[%c71_680, %c0_681] : memref<120x256xf32, #tpu.memory_space<vmem>>, vector<1x64xf32>
    %1784 = vector.broadcast %1783 : vector<1x64xf32> to vector<4x64xf32>
    %1785 = arith.mulf %1769, %1784 : vector<4x64xf32>
    %1786 = arith.addf %1782, %1785 : vector<4x64xf32>
    %1787 = tpu.iota {dimensions = array<i32: 0>} : vector<4x4xi32>
    %1788 = tpu.iota {dimensions = array<i32: 1>} : vector<4x4xi32>
    %c1_i32_682 = arith.constant 1 : i32
    %1789 = vector.broadcast %c1_i32_682 : i32 to vector<4x4xi32>
    %1790 = arith.muli %1789, %1787 : vector<4x4xi32>
    %c3_i32_683 = arith.constant 3 : i32
    %1791 = vector.broadcast %c3_i32_683 : i32 to vector<4x4xi32>
    %1792 = arith.addi %1790, %1791 : vector<4x4xi32>
    %1793 = arith.cmpi eq, %1788, %1792 : vector<4x4xi32>
    %1794 = arith.extui %1793 : vector<4x4xi1> to vector<4x4xi32>
    %1795 = arith.sitofp %1794 : vector<4x4xi32> to vector<4x4xf32>
    %cst_684 = arith.constant dense<0.000000e+00> : vector<4x64xf32>
    %1796 = tpu.matmul %1795, %1769, %cst_684 {dimension_numbers = #tpu.dot_dimension_numbers<[1], [0], [0], [1], [0, 0, 1, 1], [], []>} : vector<4x4xf32>, vector<4x64xf32>, vector<4x64xf32> -> vector<4x64xf32>
    %c72_685 = arith.constant 72 : index
    %c0_686 = arith.constant 0 : index
    %1797 = vector.load %arg2[%c72_685, %c0_686] : memref<120x256xf32, #tpu.memory_space<vmem>>, vector<1x64xf32>
    %1798 = vector.broadcast %1797 : vector<1x64xf32> to vector<4x64xf32>
    %1799 = arith.mulf %1796, %1798 : vector<4x64xf32>
    %1800 = arith.addf %1786, %1799 : vector<4x64xf32>
    %c75_687 = arith.constant 75 : index
    %c0_688 = arith.constant 0 : index
    %1801 = vector.load %arg2[%c75_687, %c0_688] : memref<120x256xf32, #tpu.memory_space<vmem>>, vector<1x64xf32>
    %1802 = vector.broadcast %1801 : vector<1x64xf32> to vector<4x64xf32>
    %1803 = arith.addf %1800, %1802 : vector<4x64xf32>
    %c504_689 = arith.constant 504 : index
    %c0_690 = arith.constant 0 : index
    %1804 = vector.load %arg3[%c504_689, %c0_690] : memref<1912x256xf32, #tpu.memory_space<vmem>>, vector<64x64xf32>
    %cst_691 = arith.constant dense<0.000000e+00> : vector<4x64xf32>
    %1805 = tpu.matmul %1803, %1804, %cst_691 {dimension_numbers = #tpu.dot_dimension_numbers<[1], [0], [0], [1], [0, 0, 1, 1], [], []>} : vector<4x64xf32>, vector<64x64xf32>, vector<4x64xf32> -> vector<4x64xf32>
    %c76_692 = arith.constant 76 : index
    %c0_693 = arith.constant 0 : index
    %1806 = vector.load %arg2[%c76_692, %c0_693] : memref<120x256xf32, #tpu.memory_space<vmem>>, vector<1x64xf32>
    %1807 = vector.broadcast %1806 : vector<1x64xf32> to vector<4x64xf32>
    %1808 = arith.addf %1805, %1807 : vector<4x64xf32>
    %1809 = arith.mulf %1707, %1808 : vector<4x64xf32>
    %c568_694 = arith.constant 568 : index
    %c0_695 = arith.constant 0 : index
    %1810 = vector.load %arg3[%c568_694, %c0_695] : memref<1912x256xf32, #tpu.memory_space<vmem>>, vector<64x64xf32>
    %cst_696 = arith.constant dense<0.000000e+00> : vector<4x64xf32>
    %1811 = tpu.matmul %1809, %1810, %cst_696 {dimension_numbers = #tpu.dot_dimension_numbers<[1], [0], [0], [1], [0, 0, 1, 1], [], []>} : vector<4x64xf32>, vector<64x64xf32>, vector<4x64xf32> -> vector<4x64xf32>
    %c77_697 = arith.constant 77 : index
    %c0_698 = arith.constant 0 : index
    %1812 = vector.load %arg2[%c77_697, %c0_698] : memref<120x256xf32, #tpu.memory_space<vmem>>, vector<1x64xf32>
    %1813 = vector.broadcast %1812 : vector<1x64xf32> to vector<4x64xf32>
    %1814 = arith.addf %1811, %1813 : vector<4x64xf32>
    %1815 = arith.addf %1814, %1663 : vector<4x64xf32>
    %c78_699 = arith.constant 78 : index
    %c0_700 = arith.constant 0 : index
    %1816 = vector.load %arg2[%c78_699, %c0_700] : memref<120x256xf32, #tpu.memory_space<vmem>>, vector<1x64xf32>
    %1817 = vector.broadcast %1816 : vector<1x64xf32> to vector<4x64xf32>
    %1818 = arith.mulf %1817, %1815 : vector<4x64xf32>
    %1819 = arith.addf %1411, %1818 : vector<4x64xf32>
    %c632_701 = arith.constant 632 : index
    %c0_702 = arith.constant 0 : index
    %1820 = vector.load %arg3[%c632_701, %c0_702] : memref<1912x256xf32, #tpu.memory_space<vmem>>, vector<64x128xf32>
    %cst_703 = arith.constant dense<0.000000e+00> : vector<4x128xf32>
    %1821 = tpu.matmul %1819, %1820, %cst_703 {dimension_numbers = #tpu.dot_dimension_numbers<[1], [0], [0], [1], [0, 0, 1, 1], [], []>} : vector<4x64xf32>, vector<64x128xf32>, vector<4x128xf32> -> vector<4x128xf32>
    %c79_704 = arith.constant 79 : index
    %c0_705 = arith.constant 0 : index
    %1822 = vector.load %arg2[%c79_704, %c0_705] : memref<120x256xf32, #tpu.memory_space<vmem>>, vector<1x128xf32>
    %1823 = vector.broadcast %1822 : vector<1x128xf32> to vector<4x128xf32>
    %1824 = arith.addf %1821, %1823 : vector<4x128xf32>
    %1825 = tpu.iota {dimensions = array<i32: 0>} : vector<4x4xi32>
    %1826 = tpu.iota {dimensions = array<i32: 1>} : vector<4x4xi32>
    %c1_i32_706 = arith.constant 1 : i32
    %1827 = vector.broadcast %c1_i32_706 : i32 to vector<4x4xi32>
    %1828 = arith.muli %1827, %1825 : vector<4x4xi32>
    %c-1_i32_707 = arith.constant -1 : i32
    %1829 = vector.broadcast %c-1_i32_707 : i32 to vector<4x4xi32>
    %1830 = arith.addi %1828, %1829 : vector<4x4xi32>
    %1831 = arith.cmpi eq, %1826, %1830 : vector<4x4xi32>
    %1832 = arith.extui %1831 : vector<4x4xi1> to vector<4x4xi32>
    %1833 = arith.sitofp %1832 : vector<4x4xi32> to vector<4x4xf32>
    %cst_708 = arith.constant dense<0.000000e+00> : vector<4x128xf32>
    %1834 = tpu.matmul %1833, %1824, %cst_708 {dimension_numbers = #tpu.dot_dimension_numbers<[1], [0], [0], [1], [0, 0, 1, 1], [], []>} : vector<4x4xf32>, vector<4x128xf32>, vector<4x128xf32> -> vector<4x128xf32>
    %c80_709 = arith.constant 80 : index
    %c0_710 = arith.constant 0 : index
    %1835 = vector.load %arg2[%c80_709, %c0_710] : memref<120x256xf32, #tpu.memory_space<vmem>>, vector<1x128xf32>
    %1836 = vector.broadcast %1835 : vector<1x128xf32> to vector<4x128xf32>
    %1837 = arith.mulf %1834, %1836 : vector<4x128xf32>
    %c81_711 = arith.constant 81 : index
    %c0_712 = arith.constant 0 : index
    %1838 = vector.load %arg2[%c81_711, %c0_712] : memref<120x256xf32, #tpu.memory_space<vmem>>, vector<1x128xf32>
    %1839 = vector.broadcast %1838 : vector<1x128xf32> to vector<4x128xf32>
    %1840 = arith.mulf %1824, %1839 : vector<4x128xf32>
    %1841 = arith.addf %1837, %1840 : vector<4x128xf32>
    %1842 = tpu.iota {dimensions = array<i32: 0>} : vector<4x4xi32>
    %1843 = tpu.iota {dimensions = array<i32: 1>} : vector<4x4xi32>
    %c1_i32_713 = arith.constant 1 : i32
    %1844 = vector.broadcast %c1_i32_713 : i32 to vector<4x4xi32>
    %1845 = arith.muli %1844, %1842 : vector<4x4xi32>
    %c1_i32_714 = arith.constant 1 : i32
    %1846 = vector.broadcast %c1_i32_714 : i32 to vector<4x4xi32>
    %1847 = arith.addi %1845, %1846 : vector<4x4xi32>
    %1848 = arith.cmpi eq, %1843, %1847 : vector<4x4xi32>
    %1849 = arith.extui %1848 : vector<4x4xi1> to vector<4x4xi32>
    %1850 = arith.sitofp %1849 : vector<4x4xi32> to vector<4x4xf32>
    %cst_715 = arith.constant dense<0.000000e+00> : vector<4x128xf32>
    %1851 = tpu.matmul %1850, %1824, %cst_715 {dimension_numbers = #tpu.dot_dimension_numbers<[1], [0], [0], [1], [0, 0, 1, 1], [], []>} : vector<4x4xf32>, vector<4x128xf32>, vector<4x128xf32> -> vector<4x128xf32>
    %c82_716 = arith.constant 82 : index
    %c0_717 = arith.constant 0 : index
    %1852 = vector.load %arg2[%c82_716, %c0_717] : memref<120x256xf32, #tpu.memory_space<vmem>>, vector<1x128xf32>
    %1853 = vector.broadcast %1852 : vector<1x128xf32> to vector<4x128xf32>
    %1854 = arith.mulf %1851, %1853 : vector<4x128xf32>
    %1855 = arith.addf %1841, %1854 : vector<4x128xf32>
    %c83_718 = arith.constant 83 : index
    %c0_719 = arith.constant 0 : index
    %1856 = vector.load %arg2[%c83_718, %c0_719] : memref<120x256xf32, #tpu.memory_space<vmem>>, vector<1x128xf32>
    %1857 = vector.broadcast %1856 : vector<1x128xf32> to vector<4x128xf32>
    %1858 = arith.addf %1855, %1857 : vector<4x128xf32>
    %cst_720 = arith.constant 5.000000e-01 : f32
    %1859 = vector.broadcast %cst_720 : f32 to vector<4x128xf32>
    %1860 = arith.mulf %1859, %1858 : vector<4x128xf32>
    %cst_721 = arith.constant 0.707106769 : f32
    %1861 = vector.broadcast %cst_721 : f32 to vector<4x128xf32>
    %1862 = arith.mulf %1858, %1861 : vector<4x128xf32>
    %1863 = math.absf %1862 : vector<4x128xf32>
    %cst_722 = arith.constant 0.327591091 : f32
    %1864 = vector.broadcast %cst_722 : f32 to vector<4x128xf32>
    %1865 = arith.mulf %1864, %1863 : vector<4x128xf32>
    %cst_723 = arith.constant 1.000000e+00 : f32
    %1866 = vector.broadcast %cst_723 : f32 to vector<4x128xf32>
    %1867 = arith.addf %1866, %1865 : vector<4x128xf32>
    %1868 = tpu.reciprocal %1867 {approx = true} : vector<4x128xf32> -> vector<4x128xf32>
    %cst_724 = arith.constant 1.06140542 : f32
    %1869 = vector.broadcast %cst_724 : f32 to vector<4x128xf32>
    %1870 = arith.mulf %1869, %1868 : vector<4x128xf32>
    %cst_725 = arith.constant -1.45315206 : f32
    %1871 = vector.broadcast %cst_725 : f32 to vector<4x128xf32>
    %1872 = arith.addf %1870, %1871 : vector<4x128xf32>
    %1873 = arith.mulf %1872, %1868 : vector<4x128xf32>
    %cst_726 = arith.constant 1.42141378 : f32
    %1874 = vector.broadcast %cst_726 : f32 to vector<4x128xf32>
    %1875 = arith.addf %1873, %1874 : vector<4x128xf32>
    %1876 = arith.mulf %1875, %1868 : vector<4x128xf32>
    %cst_727 = arith.constant -0.284496725 : f32
    %1877 = vector.broadcast %cst_727 : f32 to vector<4x128xf32>
    %1878 = arith.addf %1876, %1877 : vector<4x128xf32>
    %1879 = arith.mulf %1878, %1868 : vector<4x128xf32>
    %cst_728 = arith.constant 0.254829586 : f32
    %1880 = vector.broadcast %cst_728 : f32 to vector<4x128xf32>
    %1881 = arith.addf %1879, %1880 : vector<4x128xf32>
    %1882 = arith.mulf %1881, %1868 : vector<4x128xf32>
    %cst_729 = arith.constant 0.000000e+00 : f32
    %1883 = vector.broadcast %cst_729 : f32 to vector<4x128xf32>
    %1884 = arith.subf %1883, %1863 : vector<4x128xf32>
    %1885 = arith.mulf %1884, %1863 : vector<4x128xf32>
    %1886 = math.exp %1885 : vector<4x128xf32>
    %1887 = arith.mulf %1882, %1886 : vector<4x128xf32>
    %cst_730 = arith.constant 1.000000e+00 : f32
    %1888 = vector.broadcast %cst_730 : f32 to vector<4x128xf32>
    %1889 = arith.subf %1888, %1887 : vector<4x128xf32>
    %cst_731 = arith.constant 0.000000e+00 : f32
    %1890 = vector.broadcast %cst_731 : f32 to vector<4x128xf32>
    %1891 = arith.cmpf oge, %1862, %1890 : vector<4x128xf32>
    %cst_732 = arith.constant 0.000000e+00 : f32
    %1892 = vector.broadcast %cst_732 : f32 to vector<4x128xf32>
    %1893 = arith.subf %1892, %1889 : vector<4x128xf32>
    %1894 = arith.select %1891, %1889, %1893 : vector<4x128xi1>, vector<4x128xf32>
    %cst_733 = arith.constant 1.000000e+00 : f32
    %1895 = vector.broadcast %cst_733 : f32 to vector<4x128xf32>
    %1896 = arith.addf %1895, %1894 : vector<4x128xf32>
    %1897 = arith.mulf %1860, %1896 : vector<4x128xf32>
    %c696_734 = arith.constant 696 : index
    %c0_735 = arith.constant 0 : index
    %1898 = vector.load %arg3[%c696_734, %c0_735] : memref<1912x256xf32, #tpu.memory_space<vmem>>, vector<128x64xf32>
    %cst_736 = arith.constant dense<0.000000e+00> : vector<4x64xf32>
    %1899 = tpu.matmul %1897, %1898, %cst_736 {dimension_numbers = #tpu.dot_dimension_numbers<[1], [0], [0], [1], [0, 0, 1, 1], [], []>} : vector<4x128xf32>, vector<128x64xf32>, vector<4x64xf32> -> vector<4x64xf32>
    %c84_737 = arith.constant 84 : index
    %c0_738 = arith.constant 0 : index
    %1900 = vector.load %arg2[%c84_737, %c0_738] : memref<120x256xf32, #tpu.memory_space<vmem>>, vector<1x64xf32>
    %1901 = vector.broadcast %1900 : vector<1x64xf32> to vector<4x64xf32>
    %1902 = arith.addf %1899, %1901 : vector<4x64xf32>
    %1903 = arith.addf %1819, %1902 : vector<4x64xf32>
    %c85 = arith.constant 85 : index
    %c0_739 = arith.constant 0 : index
    %1904 = vector.load %arg2[%c85, %c0_739] : memref<120x256xf32, #tpu.memory_space<vmem>>, vector<1x64xf32>
    %c86 = arith.constant 86 : index
    %c0_740 = arith.constant 0 : index
    %1905 = vector.load %arg2[%c86, %c0_740] : memref<120x256xf32, #tpu.memory_space<vmem>>, vector<1x64xf32>
    %cst_741 = arith.constant dense<0.000000e+00> : vector<4xf32>
    %1906 = vector.multi_reduction <add>, %1657, %cst_741 [1] : vector<4x64xf32> to vector<4xf32>
    %1907 = vector.shape_cast %1906 : vector<4xf32> to vector<4x1xf32>
    %cst_742 = arith.constant 6.400000e+01 : f32
    %1908 = vector.broadcast %cst_742 : f32 to vector<4x1xf32>
    %1909 = arith.divf %1907, %1908 : vector<4x1xf32>
    %1910 = vector.broadcast %1909 : vector<4x1xf32> to vector<4x64xf32>
    %1911 = arith.subf %1657, %1910 : vector<4x64xf32>
    %1912 = arith.mulf %1911, %1911 : vector<4x64xf32>
    %cst_743 = arith.constant dense<0.000000e+00> : vector<4xf32>
    %1913 = vector.multi_reduction <add>, %1912, %cst_743 [1] : vector<4x64xf32> to vector<4xf32>
    %1914 = vector.shape_cast %1913 : vector<4xf32> to vector<4x1xf32>
    %cst_744 = arith.constant 6.400000e+01 : f32
    %1915 = vector.broadcast %cst_744 : f32 to vector<4x1xf32>
    %1916 = arith.divf %1914, %1915 : vector<4x1xf32>
    %cst_745 = arith.constant 9.99999974E-6 : f32
    %1917 = vector.broadcast %cst_745 : f32 to vector<4x1xf32>
    %1918 = arith.addf %1916, %1917 : vector<4x1xf32>
    %1919 = math.rsqrt %1918 : vector<4x1xf32>
    %1920 = vector.broadcast %1919 : vector<4x1xf32> to vector<4x64xf32>
    %1921 = arith.mulf %1911, %1920 : vector<4x64xf32>
    %1922 = vector.broadcast %1904 : vector<1x64xf32> to vector<4x64xf32>
    %1923 = arith.mulf %1921, %1922 : vector<4x64xf32>
    %1924 = vector.broadcast %1905 : vector<1x64xf32> to vector<4x64xf32>
    %1925 = arith.addf %1923, %1924 : vector<4x64xf32>
    %cst_746 = arith.constant dense<0.000000e+00> : vector<4xf32>
    %1926 = vector.multi_reduction <add>, %1903, %cst_746 [1] : vector<4x64xf32> to vector<4xf32>
    %1927 = vector.shape_cast %1926 : vector<4xf32> to vector<4x1xf32>
    %cst_747 = arith.constant 6.400000e+01 : f32
    %1928 = vector.broadcast %cst_747 : f32 to vector<4x1xf32>
    %1929 = arith.divf %1927, %1928 : vector<4x1xf32>
    %1930 = vector.broadcast %1929 : vector<4x1xf32> to vector<4x64xf32>
    %1931 = arith.subf %1903, %1930 : vector<4x64xf32>
    %1932 = arith.mulf %1931, %1931 : vector<4x64xf32>
    %cst_748 = arith.constant dense<0.000000e+00> : vector<4xf32>
    %1933 = vector.multi_reduction <add>, %1932, %cst_748 [1] : vector<4x64xf32> to vector<4xf32>
    %1934 = vector.shape_cast %1933 : vector<4xf32> to vector<4x1xf32>
    %cst_749 = arith.constant 6.400000e+01 : f32
    %1935 = vector.broadcast %cst_749 : f32 to vector<4x1xf32>
    %1936 = arith.divf %1934, %1935 : vector<4x1xf32>
    %cst_750 = arith.constant 9.99999974E-6 : f32
    %1937 = vector.broadcast %cst_750 : f32 to vector<4x1xf32>
    %1938 = arith.addf %1936, %1937 : vector<4x1xf32>
    %1939 = math.rsqrt %1938 : vector<4x1xf32>
    %1940 = vector.broadcast %1939 : vector<4x1xf32> to vector<4x64xf32>
    %1941 = arith.mulf %1931, %1940 : vector<4x64xf32>
    %1942 = vector.broadcast %1904 : vector<1x64xf32> to vector<4x64xf32>
    %1943 = arith.mulf %1941, %1942 : vector<4x64xf32>
    %1944 = vector.broadcast %1905 : vector<1x64xf32> to vector<4x64xf32>
    %1945 = arith.addf %1943, %1944 : vector<4x64xf32>
    %c87 = arith.constant 87 : index
    %c0_751 = arith.constant 0 : index
    %1946 = vector.load %arg2[%c87, %c0_751] : memref<120x256xf32, #tpu.memory_space<vmem>>, vector<1x128xf32>
    %1947 = tpu.iota {dimensions = array<i32: 0>} : vector<2x4xi32>
    %1948 = tpu.iota {dimensions = array<i32: 1>} : vector<2x4xi32>
    %c2_i32_752 = arith.constant 2 : i32
    %1949 = vector.broadcast %c2_i32_752 : i32 to vector<2x4xi32>
    %1950 = arith.muli %1949, %1947 : vector<2x4xi32>
    %c-1_i32_753 = arith.constant -1 : i32
    %1951 = vector.broadcast %c-1_i32_753 : i32 to vector<2x4xi32>
    %1952 = arith.addi %1950, %1951 : vector<2x4xi32>
    %1953 = arith.cmpi eq, %1948, %1952 : vector<2x4xi32>
    %1954 = arith.extui %1953 : vector<2x4xi1> to vector<2x4xi32>
    %1955 = arith.sitofp %1954 : vector<2x4xi32> to vector<2x4xf32>
    %cst_754 = arith.constant dense<0.000000e+00> : vector<2x64xf32>
    %1956 = tpu.matmul %1955, %1925, %cst_754 {dimension_numbers = #tpu.dot_dimension_numbers<[1], [0], [0], [1], [0, 0, 1, 1], [], []>} : vector<2x4xf32>, vector<4x64xf32>, vector<2x64xf32> -> vector<2x64xf32>
    %c824 = arith.constant 824 : index
    %c0_755 = arith.constant 0 : index
    %1957 = vector.load %arg3[%c824, %c0_755] : memref<1912x256xf32, #tpu.memory_space<vmem>>, vector<64x128xf32>
    %cst_756 = arith.constant dense<0.000000e+00> : vector<2x128xf32>
    %1958 = tpu.matmul %1956, %1957, %cst_756 {dimension_numbers = #tpu.dot_dimension_numbers<[1], [0], [0], [1], [0, 0, 1, 1], [], []>} : vector<2x64xf32>, vector<64x128xf32>, vector<2x128xf32> -> vector<2x128xf32>
    %1959 = tpu.iota {dimensions = array<i32: 0>} : vector<2x4xi32>
    %1960 = tpu.iota {dimensions = array<i32: 1>} : vector<2x4xi32>
    %c2_i32_757 = arith.constant 2 : i32
    %1961 = vector.broadcast %c2_i32_757 : i32 to vector<2x4xi32>
    %1962 = arith.muli %1961, %1959 : vector<2x4xi32>
    %c0_i32_758 = arith.constant 0 : i32
    %1963 = vector.broadcast %c0_i32_758 : i32 to vector<2x4xi32>
    %1964 = arith.addi %1962, %1963 : vector<2x4xi32>
    %1965 = arith.cmpi eq, %1960, %1964 : vector<2x4xi32>
    %1966 = arith.extui %1965 : vector<2x4xi1> to vector<2x4xi32>
    %1967 = arith.sitofp %1966 : vector<2x4xi32> to vector<2x4xf32>
    %cst_759 = arith.constant dense<0.000000e+00> : vector<2x64xf32>
    %1968 = tpu.matmul %1967, %1925, %cst_759 {dimension_numbers = #tpu.dot_dimension_numbers<[1], [0], [0], [1], [0, 0, 1, 1], [], []>} : vector<2x4xf32>, vector<4x64xf32>, vector<2x64xf32> -> vector<2x64xf32>
    %c888 = arith.constant 888 : index
    %c0_760 = arith.constant 0 : index
    %1969 = vector.load %arg3[%c888, %c0_760] : memref<1912x256xf32, #tpu.memory_space<vmem>>, vector<64x128xf32>
    %cst_761 = arith.constant dense<0.000000e+00> : vector<2x128xf32>
    %1970 = tpu.matmul %1968, %1969, %cst_761 {dimension_numbers = #tpu.dot_dimension_numbers<[1], [0], [0], [1], [0, 0, 1, 1], [], []>} : vector<2x64xf32>, vector<64x128xf32>, vector<2x128xf32> -> vector<2x128xf32>
    %1971 = arith.addf %1958, %1970 : vector<2x128xf32>
    %1972 = tpu.iota {dimensions = array<i32: 0>} : vector<2x4xi32>
    %1973 = tpu.iota {dimensions = array<i32: 1>} : vector<2x4xi32>
    %c2_i32_762 = arith.constant 2 : i32
    %1974 = vector.broadcast %c2_i32_762 : i32 to vector<2x4xi32>
    %1975 = arith.muli %1974, %1972 : vector<2x4xi32>
    %c1_i32_763 = arith.constant 1 : i32
    %1976 = vector.broadcast %c1_i32_763 : i32 to vector<2x4xi32>
    %1977 = arith.addi %1975, %1976 : vector<2x4xi32>
    %1978 = arith.cmpi eq, %1973, %1977 : vector<2x4xi32>
    %1979 = arith.extui %1978 : vector<2x4xi1> to vector<2x4xi32>
    %1980 = arith.sitofp %1979 : vector<2x4xi32> to vector<2x4xf32>
    %cst_764 = arith.constant dense<0.000000e+00> : vector<2x64xf32>
    %1981 = tpu.matmul %1980, %1925, %cst_764 {dimension_numbers = #tpu.dot_dimension_numbers<[1], [0], [0], [1], [0, 0, 1, 1], [], []>} : vector<2x4xf32>, vector<4x64xf32>, vector<2x64xf32> -> vector<2x64xf32>
    %c952 = arith.constant 952 : index
    %c0_765 = arith.constant 0 : index
    %1982 = vector.load %arg3[%c952, %c0_765] : memref<1912x256xf32, #tpu.memory_space<vmem>>, vector<64x128xf32>
    %cst_766 = arith.constant dense<0.000000e+00> : vector<2x128xf32>
    %1983 = tpu.matmul %1981, %1982, %cst_766 {dimension_numbers = #tpu.dot_dimension_numbers<[1], [0], [0], [1], [0, 0, 1, 1], [], []>} : vector<2x64xf32>, vector<64x128xf32>, vector<2x128xf32> -> vector<2x128xf32>
    %1984 = arith.addf %1971, %1983 : vector<2x128xf32>
    %1985 = vector.broadcast %1946 : vector<1x128xf32> to vector<2x128xf32>
    %1986 = arith.addf %1984, %1985 : vector<2x128xf32>
    %1987 = tpu.iota {dimensions = array<i32: 0>} : vector<2x4xi32>
    %1988 = tpu.iota {dimensions = array<i32: 1>} : vector<2x4xi32>
    %c2_i32_767 = arith.constant 2 : i32
    %1989 = vector.broadcast %c2_i32_767 : i32 to vector<2x4xi32>
    %1990 = arith.muli %1989, %1987 : vector<2x4xi32>
    %c-1_i32_768 = arith.constant -1 : i32
    %1991 = vector.broadcast %c-1_i32_768 : i32 to vector<2x4xi32>
    %1992 = arith.addi %1990, %1991 : vector<2x4xi32>
    %1993 = arith.cmpi eq, %1988, %1992 : vector<2x4xi32>
    %1994 = arith.extui %1993 : vector<2x4xi1> to vector<2x4xi32>
    %1995 = arith.sitofp %1994 : vector<2x4xi32> to vector<2x4xf32>
    %cst_769 = arith.constant dense<0.000000e+00> : vector<2x64xf32>
    %1996 = tpu.matmul %1995, %1945, %cst_769 {dimension_numbers = #tpu.dot_dimension_numbers<[1], [0], [0], [1], [0, 0, 1, 1], [], []>} : vector<2x4xf32>, vector<4x64xf32>, vector<2x64xf32> -> vector<2x64xf32>
    %c824_770 = arith.constant 824 : index
    %c0_771 = arith.constant 0 : index
    %1997 = vector.load %arg3[%c824_770, %c0_771] : memref<1912x256xf32, #tpu.memory_space<vmem>>, vector<64x128xf32>
    %cst_772 = arith.constant dense<0.000000e+00> : vector<2x128xf32>
    %1998 = tpu.matmul %1996, %1997, %cst_772 {dimension_numbers = #tpu.dot_dimension_numbers<[1], [0], [0], [1], [0, 0, 1, 1], [], []>} : vector<2x64xf32>, vector<64x128xf32>, vector<2x128xf32> -> vector<2x128xf32>
    %1999 = tpu.iota {dimensions = array<i32: 0>} : vector<2x4xi32>
    %2000 = tpu.iota {dimensions = array<i32: 1>} : vector<2x4xi32>
    %c2_i32_773 = arith.constant 2 : i32
    %2001 = vector.broadcast %c2_i32_773 : i32 to vector<2x4xi32>
    %2002 = arith.muli %2001, %1999 : vector<2x4xi32>
    %c0_i32_774 = arith.constant 0 : i32
    %2003 = vector.broadcast %c0_i32_774 : i32 to vector<2x4xi32>
    %2004 = arith.addi %2002, %2003 : vector<2x4xi32>
    %2005 = arith.cmpi eq, %2000, %2004 : vector<2x4xi32>
    %2006 = arith.extui %2005 : vector<2x4xi1> to vector<2x4xi32>
    %2007 = arith.sitofp %2006 : vector<2x4xi32> to vector<2x4xf32>
    %cst_775 = arith.constant dense<0.000000e+00> : vector<2x64xf32>
    %2008 = tpu.matmul %2007, %1945, %cst_775 {dimension_numbers = #tpu.dot_dimension_numbers<[1], [0], [0], [1], [0, 0, 1, 1], [], []>} : vector<2x4xf32>, vector<4x64xf32>, vector<2x64xf32> -> vector<2x64xf32>
    %c888_776 = arith.constant 888 : index
    %c0_777 = arith.constant 0 : index
    %2009 = vector.load %arg3[%c888_776, %c0_777] : memref<1912x256xf32, #tpu.memory_space<vmem>>, vector<64x128xf32>
    %cst_778 = arith.constant dense<0.000000e+00> : vector<2x128xf32>
    %2010 = tpu.matmul %2008, %2009, %cst_778 {dimension_numbers = #tpu.dot_dimension_numbers<[1], [0], [0], [1], [0, 0, 1, 1], [], []>} : vector<2x64xf32>, vector<64x128xf32>, vector<2x128xf32> -> vector<2x128xf32>
    %2011 = arith.addf %1998, %2010 : vector<2x128xf32>
    %2012 = tpu.iota {dimensions = array<i32: 0>} : vector<2x4xi32>
    %2013 = tpu.iota {dimensions = array<i32: 1>} : vector<2x4xi32>
    %c2_i32_779 = arith.constant 2 : i32
    %2014 = vector.broadcast %c2_i32_779 : i32 to vector<2x4xi32>
    %2015 = arith.muli %2014, %2012 : vector<2x4xi32>
    %c1_i32_780 = arith.constant 1 : i32
    %2016 = vector.broadcast %c1_i32_780 : i32 to vector<2x4xi32>
    %2017 = arith.addi %2015, %2016 : vector<2x4xi32>
    %2018 = arith.cmpi eq, %2013, %2017 : vector<2x4xi32>
    %2019 = arith.extui %2018 : vector<2x4xi1> to vector<2x4xi32>
    %2020 = arith.sitofp %2019 : vector<2x4xi32> to vector<2x4xf32>
    %cst_781 = arith.constant dense<0.000000e+00> : vector<2x64xf32>
    %2021 = tpu.matmul %2020, %1945, %cst_781 {dimension_numbers = #tpu.dot_dimension_numbers<[1], [0], [0], [1], [0, 0, 1, 1], [], []>} : vector<2x4xf32>, vector<4x64xf32>, vector<2x64xf32> -> vector<2x64xf32>
    %c952_782 = arith.constant 952 : index
    %c0_783 = arith.constant 0 : index
    %2022 = vector.load %arg3[%c952_782, %c0_783] : memref<1912x256xf32, #tpu.memory_space<vmem>>, vector<64x128xf32>
    %cst_784 = arith.constant dense<0.000000e+00> : vector<2x128xf32>
    %2023 = tpu.matmul %2021, %2022, %cst_784 {dimension_numbers = #tpu.dot_dimension_numbers<[1], [0], [0], [1], [0, 0, 1, 1], [], []>} : vector<2x64xf32>, vector<64x128xf32>, vector<2x128xf32> -> vector<2x128xf32>
    %2024 = arith.addf %2011, %2023 : vector<2x128xf32>
    %2025 = vector.broadcast %1946 : vector<1x128xf32> to vector<2x128xf32>
    %2026 = arith.addf %2024, %2025 : vector<2x128xf32>
    %c88 = arith.constant 88 : index
    %c0_785 = arith.constant 0 : index
    %2027 = vector.load %arg2[%c88, %c0_785] : memref<120x256xf32, #tpu.memory_space<vmem>>, vector<1x128xf32>
    %2028 = vector.broadcast %2027 : vector<1x128xf32> to vector<2x128xf32>
    %2029 = arith.mulf %1986, %2028 : vector<2x128xf32>
    %c89 = arith.constant 89 : index
    %c0_786 = arith.constant 0 : index
    %2030 = vector.load %arg2[%c89, %c0_786] : memref<120x256xf32, #tpu.memory_space<vmem>>, vector<1x128xf32>
    %2031 = vector.broadcast %2030 : vector<1x128xf32> to vector<2x128xf32>
    %2032 = arith.addf %2029, %2031 : vector<2x128xf32>
    %c1016 = arith.constant 1016 : index
    %c0_787 = arith.constant 0 : index
    %2033 = vector.load %arg3[%c1016, %c0_787] : memref<1912x256xf32, #tpu.memory_space<vmem>>, vector<128x128xf32>
    %cst_788 = arith.constant dense<0.000000e+00> : vector<2x128xf32>
    %2034 = tpu.matmul %2032, %2033, %cst_788 {dimension_numbers = #tpu.dot_dimension_numbers<[1], [0], [0], [1], [0, 0, 1, 1], [], []>} : vector<2x128xf32>, vector<128x128xf32>, vector<2x128xf32> -> vector<2x128xf32>
    %c90 = arith.constant 90 : index
    %c0_789 = arith.constant 0 : index
    %2035 = vector.load %arg2[%c90, %c0_789] : memref<120x256xf32, #tpu.memory_space<vmem>>, vector<1x128xf32>
    %2036 = vector.broadcast %2035 : vector<1x128xf32> to vector<2x128xf32>
    %2037 = arith.addf %2034, %2036 : vector<2x128xf32>
    %cst_790 = arith.constant 5.000000e-01 : f32
    %2038 = vector.broadcast %cst_790 : f32 to vector<2x128xf32>
    %2039 = arith.mulf %2038, %2037 : vector<2x128xf32>
    %cst_791 = arith.constant 0.707106769 : f32
    %2040 = vector.broadcast %cst_791 : f32 to vector<2x128xf32>
    %2041 = arith.mulf %2037, %2040 : vector<2x128xf32>
    %2042 = math.absf %2041 : vector<2x128xf32>
    %cst_792 = arith.constant 0.327591091 : f32
    %2043 = vector.broadcast %cst_792 : f32 to vector<2x128xf32>
    %2044 = arith.mulf %2043, %2042 : vector<2x128xf32>
    %cst_793 = arith.constant 1.000000e+00 : f32
    %2045 = vector.broadcast %cst_793 : f32 to vector<2x128xf32>
    %2046 = arith.addf %2045, %2044 : vector<2x128xf32>
    %2047 = tpu.reciprocal %2046 {approx = true} : vector<2x128xf32> -> vector<2x128xf32>
    %cst_794 = arith.constant 1.06140542 : f32
    %2048 = vector.broadcast %cst_794 : f32 to vector<2x128xf32>
    %2049 = arith.mulf %2048, %2047 : vector<2x128xf32>
    %cst_795 = arith.constant -1.45315206 : f32
    %2050 = vector.broadcast %cst_795 : f32 to vector<2x128xf32>
    %2051 = arith.addf %2049, %2050 : vector<2x128xf32>
    %2052 = arith.mulf %2051, %2047 : vector<2x128xf32>
    %cst_796 = arith.constant 1.42141378 : f32
    %2053 = vector.broadcast %cst_796 : f32 to vector<2x128xf32>
    %2054 = arith.addf %2052, %2053 : vector<2x128xf32>
    %2055 = arith.mulf %2054, %2047 : vector<2x128xf32>
    %cst_797 = arith.constant -0.284496725 : f32
    %2056 = vector.broadcast %cst_797 : f32 to vector<2x128xf32>
    %2057 = arith.addf %2055, %2056 : vector<2x128xf32>
    %2058 = arith.mulf %2057, %2047 : vector<2x128xf32>
    %cst_798 = arith.constant 0.254829586 : f32
    %2059 = vector.broadcast %cst_798 : f32 to vector<2x128xf32>
    %2060 = arith.addf %2058, %2059 : vector<2x128xf32>
    %2061 = arith.mulf %2060, %2047 : vector<2x128xf32>
    %cst_799 = arith.constant 0.000000e+00 : f32
    %2062 = vector.broadcast %cst_799 : f32 to vector<2x128xf32>
    %2063 = arith.subf %2062, %2042 : vector<2x128xf32>
    %2064 = arith.mulf %2063, %2042 : vector<2x128xf32>
    %2065 = math.exp %2064 : vector<2x128xf32>
    %2066 = arith.mulf %2061, %2065 : vector<2x128xf32>
    %cst_800 = arith.constant 1.000000e+00 : f32
    %2067 = vector.broadcast %cst_800 : f32 to vector<2x128xf32>
    %2068 = arith.subf %2067, %2066 : vector<2x128xf32>
    %cst_801 = arith.constant 0.000000e+00 : f32
    %2069 = vector.broadcast %cst_801 : f32 to vector<2x128xf32>
    %2070 = arith.cmpf oge, %2041, %2069 : vector<2x128xf32>
    %cst_802 = arith.constant 0.000000e+00 : f32
    %2071 = vector.broadcast %cst_802 : f32 to vector<2x128xf32>
    %2072 = arith.subf %2071, %2068 : vector<2x128xf32>
    %2073 = arith.select %2070, %2068, %2072 : vector<2x128xi1>, vector<2x128xf32>
    %cst_803 = arith.constant 1.000000e+00 : f32
    %2074 = vector.broadcast %cst_803 : f32 to vector<2x128xf32>
    %2075 = arith.addf %2074, %2073 : vector<2x128xf32>
    %2076 = arith.mulf %2039, %2075 : vector<2x128xf32>
    %2077 = tpu.iota {dimensions = array<i32: 0>} : vector<2x2xi32>
    %2078 = tpu.iota {dimensions = array<i32: 1>} : vector<2x2xi32>
    %c1_i32_804 = arith.constant 1 : i32
    %2079 = vector.broadcast %c1_i32_804 : i32 to vector<2x2xi32>
    %2080 = arith.muli %2079, %2077 : vector<2x2xi32>
    %c-1_i32_805 = arith.constant -1 : i32
    %2081 = vector.broadcast %c-1_i32_805 : i32 to vector<2x2xi32>
    %2082 = arith.addi %2080, %2081 : vector<2x2xi32>
    %2083 = arith.cmpi eq, %2078, %2082 : vector<2x2xi32>
    %2084 = arith.extui %2083 : vector<2x2xi1> to vector<2x2xi32>
    %2085 = arith.sitofp %2084 : vector<2x2xi32> to vector<2x2xf32>
    %cst_806 = arith.constant dense<0.000000e+00> : vector<2x128xf32>
    %2086 = tpu.matmul %2085, %2076, %cst_806 {dimension_numbers = #tpu.dot_dimension_numbers<[1], [0], [0], [1], [0, 0, 1, 1], [], []>} : vector<2x2xf32>, vector<2x128xf32>, vector<2x128xf32> -> vector<2x128xf32>
    %c92 = arith.constant 92 : index
    %c0_807 = arith.constant 0 : index
    %2087 = vector.load %arg2[%c92, %c0_807] : memref<120x256xf32, #tpu.memory_space<vmem>>, vector<1x128xf32>
    %2088 = vector.broadcast %2087 : vector<1x128xf32> to vector<2x128xf32>
    %2089 = arith.mulf %2086, %2088 : vector<2x128xf32>
    %c93 = arith.constant 93 : index
    %c0_808 = arith.constant 0 : index
    %2090 = vector.load %arg2[%c93, %c0_808] : memref<120x256xf32, #tpu.memory_space<vmem>>, vector<1x128xf32>
    %2091 = vector.broadcast %2090 : vector<1x128xf32> to vector<2x128xf32>
    %2092 = arith.mulf %2076, %2091 : vector<2x128xf32>
    %2093 = arith.addf %2089, %2092 : vector<2x128xf32>
    %2094 = tpu.iota {dimensions = array<i32: 0>} : vector<2x2xi32>
    %2095 = tpu.iota {dimensions = array<i32: 1>} : vector<2x2xi32>
    %c1_i32_809 = arith.constant 1 : i32
    %2096 = vector.broadcast %c1_i32_809 : i32 to vector<2x2xi32>
    %2097 = arith.muli %2096, %2094 : vector<2x2xi32>
    %c1_i32_810 = arith.constant 1 : i32
    %2098 = vector.broadcast %c1_i32_810 : i32 to vector<2x2xi32>
    %2099 = arith.addi %2097, %2098 : vector<2x2xi32>
    %2100 = arith.cmpi eq, %2095, %2099 : vector<2x2xi32>
    %2101 = arith.extui %2100 : vector<2x2xi1> to vector<2x2xi32>
    %2102 = arith.sitofp %2101 : vector<2x2xi32> to vector<2x2xf32>
    %cst_811 = arith.constant dense<0.000000e+00> : vector<2x128xf32>
    %2103 = tpu.matmul %2102, %2076, %cst_811 {dimension_numbers = #tpu.dot_dimension_numbers<[1], [0], [0], [1], [0, 0, 1, 1], [], []>} : vector<2x2xf32>, vector<2x128xf32>, vector<2x128xf32> -> vector<2x128xf32>
    %c94 = arith.constant 94 : index
    %c0_812 = arith.constant 0 : index
    %2104 = vector.load %arg2[%c94, %c0_812] : memref<120x256xf32, #tpu.memory_space<vmem>>, vector<1x128xf32>
    %2105 = vector.broadcast %2104 : vector<1x128xf32> to vector<2x128xf32>
    %2106 = arith.mulf %2103, %2105 : vector<2x128xf32>
    %2107 = arith.addf %2093, %2106 : vector<2x128xf32>
    %c96 = arith.constant 96 : index
    %c0_813 = arith.constant 0 : index
    %2108 = vector.load %arg2[%c96, %c0_813] : memref<120x256xf32, #tpu.memory_space<vmem>>, vector<1x128xf32>
    %2109 = vector.broadcast %2108 : vector<1x128xf32> to vector<2x128xf32>
    %2110 = arith.addf %2107, %2109 : vector<2x128xf32>
    %c100 = arith.constant 100 : index
    %c0_814 = arith.constant 0 : index
    %2111 = vector.load %arg2[%c100, %c0_814] : memref<120x256xf32, #tpu.memory_space<vmem>>, vector<1x128xf32>
    %2112 = vector.broadcast %2111 : vector<1x128xf32> to vector<2x128xf32>
    %2113 = arith.mulf %2110, %2112 : vector<2x128xf32>
    %c104_815 = arith.constant 104 : index
    %c0_816 = arith.constant 0 : index
    %2114 = vector.load %arg2[%c104_815, %c0_816] : memref<120x256xf32, #tpu.memory_space<vmem>>, vector<1x128xf32>
    %2115 = vector.broadcast %2114 : vector<1x128xf32> to vector<2x128xf32>
    %2116 = arith.addf %2113, %2115 : vector<2x128xf32>
    %c1144 = arith.constant 1144 : index
    %c0_817 = arith.constant 0 : index
    %2117 = vector.load %arg3[%c1144, %c0_817] : memref<1912x256xf32, #tpu.memory_space<vmem>>, vector<128x128xf32>
    %cst_818 = arith.constant dense<0.000000e+00> : vector<2x128xf32>
    %2118 = tpu.matmul %2116, %2117, %cst_818 {dimension_numbers = #tpu.dot_dimension_numbers<[1], [0], [0], [1], [0, 0, 1, 1], [], []>} : vector<2x128xf32>, vector<128x128xf32>, vector<2x128xf32> -> vector<2x128xf32>
    %c105 = arith.constant 105 : index
    %c0_819 = arith.constant 0 : index
    %2119 = vector.load %arg2[%c105, %c0_819] : memref<120x256xf32, #tpu.memory_space<vmem>>, vector<1x128xf32>
    %2120 = vector.broadcast %2119 : vector<1x128xf32> to vector<2x128xf32>
    %2121 = arith.addf %2118, %2120 : vector<2x128xf32>
    %2122 = arith.mulf %2076, %2121 : vector<2x128xf32>
    %c1272 = arith.constant 1272 : index
    %c0_820 = arith.constant 0 : index
    %2123 = vector.load %arg3[%c1272, %c0_820] : memref<1912x256xf32, #tpu.memory_space<vmem>>, vector<128x128xf32>
    %cst_821 = arith.constant dense<0.000000e+00> : vector<2x128xf32>
    %2124 = tpu.matmul %2122, %2123, %cst_821 {dimension_numbers = #tpu.dot_dimension_numbers<[1], [0], [0], [1], [0, 0, 1, 1], [], []>} : vector<2x128xf32>, vector<128x128xf32>, vector<2x128xf32> -> vector<2x128xf32>
    %c106 = arith.constant 106 : index
    %c0_822 = arith.constant 0 : index
    %2125 = vector.load %arg2[%c106, %c0_822] : memref<120x256xf32, #tpu.memory_space<vmem>>, vector<1x128xf32>
    %2126 = vector.broadcast %2125 : vector<1x128xf32> to vector<2x128xf32>
    %2127 = arith.addf %2124, %2126 : vector<2x128xf32>
    %2128 = arith.addf %2127, %2032 : vector<2x128xf32>
    %c107 = arith.constant 107 : index
    %c0_823 = arith.constant 0 : index
    %2129 = vector.load %arg2[%c107, %c0_823] : memref<120x256xf32, #tpu.memory_space<vmem>>, vector<1x128xf32>
    %2130 = vector.broadcast %2129 : vector<1x128xf32> to vector<2x128xf32>
    %2131 = arith.mulf %2130, %2128 : vector<2x128xf32>
    %2132 = arith.addf %1986, %2131 : vector<2x128xf32>
    %c1400 = arith.constant 1400 : index
    %c0_824 = arith.constant 0 : index
    %2133 = vector.load %arg3[%c1400, %c0_824] : memref<1912x256xf32, #tpu.memory_space<vmem>>, vector<128x256xf32>
    %cst_825 = arith.constant dense<0.000000e+00> : vector<2x256xf32>
    %2134 = tpu.matmul %2132, %2133, %cst_825 {dimension_numbers = #tpu.dot_dimension_numbers<[1], [0], [0], [1], [0, 0, 1, 1], [], []>} : vector<2x128xf32>, vector<128x256xf32>, vector<2x256xf32> -> vector<2x256xf32>
    %c108 = arith.constant 108 : index
    %c0_826 = arith.constant 0 : index
    %2135 = vector.load %arg2[%c108, %c0_826] : memref<120x256xf32, #tpu.memory_space<vmem>>, vector<1x256xf32>
    %2136 = vector.broadcast %2135 : vector<1x256xf32> to vector<2x256xf32>
    %2137 = arith.addf %2134, %2136 : vector<2x256xf32>
    %2138 = tpu.iota {dimensions = array<i32: 0>} : vector<2x2xi32>
    %2139 = tpu.iota {dimensions = array<i32: 1>} : vector<2x2xi32>
    %c1_i32_827 = arith.constant 1 : i32
    %2140 = vector.broadcast %c1_i32_827 : i32 to vector<2x2xi32>
    %2141 = arith.muli %2140, %2138 : vector<2x2xi32>
    %c-1_i32_828 = arith.constant -1 : i32
    %2142 = vector.broadcast %c-1_i32_828 : i32 to vector<2x2xi32>
    %2143 = arith.addi %2141, %2142 : vector<2x2xi32>
    %2144 = arith.cmpi eq, %2139, %2143 : vector<2x2xi32>
    %2145 = arith.extui %2144 : vector<2x2xi1> to vector<2x2xi32>
    %2146 = arith.sitofp %2145 : vector<2x2xi32> to vector<2x2xf32>
    %cst_829 = arith.constant dense<0.000000e+00> : vector<2x256xf32>
    %2147 = tpu.matmul %2146, %2137, %cst_829 {dimension_numbers = #tpu.dot_dimension_numbers<[1], [0], [0], [1], [0, 0, 1, 1], [], []>} : vector<2x2xf32>, vector<2x256xf32>, vector<2x256xf32> -> vector<2x256xf32>
    %c109 = arith.constant 109 : index
    %c0_830 = arith.constant 0 : index
    %2148 = vector.load %arg2[%c109, %c0_830] : memref<120x256xf32, #tpu.memory_space<vmem>>, vector<1x256xf32>
    %2149 = vector.broadcast %2148 : vector<1x256xf32> to vector<2x256xf32>
    %2150 = arith.mulf %2147, %2149 : vector<2x256xf32>
    %c110 = arith.constant 110 : index
    %c0_831 = arith.constant 0 : index
    %2151 = vector.load %arg2[%c110, %c0_831] : memref<120x256xf32, #tpu.memory_space<vmem>>, vector<1x256xf32>
    %2152 = vector.broadcast %2151 : vector<1x256xf32> to vector<2x256xf32>
    %2153 = arith.mulf %2137, %2152 : vector<2x256xf32>
    %2154 = arith.addf %2150, %2153 : vector<2x256xf32>
    %2155 = tpu.iota {dimensions = array<i32: 0>} : vector<2x2xi32>
    %2156 = tpu.iota {dimensions = array<i32: 1>} : vector<2x2xi32>
    %c1_i32_832 = arith.constant 1 : i32
    %2157 = vector.broadcast %c1_i32_832 : i32 to vector<2x2xi32>
    %2158 = arith.muli %2157, %2155 : vector<2x2xi32>
    %c1_i32_833 = arith.constant 1 : i32
    %2159 = vector.broadcast %c1_i32_833 : i32 to vector<2x2xi32>
    %2160 = arith.addi %2158, %2159 : vector<2x2xi32>
    %2161 = arith.cmpi eq, %2156, %2160 : vector<2x2xi32>
    %2162 = arith.extui %2161 : vector<2x2xi1> to vector<2x2xi32>
    %2163 = arith.sitofp %2162 : vector<2x2xi32> to vector<2x2xf32>
    %cst_834 = arith.constant dense<0.000000e+00> : vector<2x256xf32>
    %2164 = tpu.matmul %2163, %2137, %cst_834 {dimension_numbers = #tpu.dot_dimension_numbers<[1], [0], [0], [1], [0, 0, 1, 1], [], []>} : vector<2x2xf32>, vector<2x256xf32>, vector<2x256xf32> -> vector<2x256xf32>
    %c111 = arith.constant 111 : index
    %c0_835 = arith.constant 0 : index
    %2165 = vector.load %arg2[%c111, %c0_835] : memref<120x256xf32, #tpu.memory_space<vmem>>, vector<1x256xf32>
    %2166 = vector.broadcast %2165 : vector<1x256xf32> to vector<2x256xf32>
    %2167 = arith.mulf %2164, %2166 : vector<2x256xf32>
    %2168 = arith.addf %2154, %2167 : vector<2x256xf32>
    %c112 = arith.constant 112 : index
    %c0_836 = arith.constant 0 : index
    %2169 = vector.load %arg2[%c112, %c0_836] : memref<120x256xf32, #tpu.memory_space<vmem>>, vector<1x256xf32>
    %2170 = vector.broadcast %2169 : vector<1x256xf32> to vector<2x256xf32>
    %2171 = arith.addf %2168, %2170 : vector<2x256xf32>
    %cst_837 = arith.constant 5.000000e-01 : f32
    %2172 = vector.broadcast %cst_837 : f32 to vector<2x256xf32>
    %2173 = arith.mulf %2172, %2171 : vector<2x256xf32>
    %cst_838 = arith.constant 0.707106769 : f32
    %2174 = vector.broadcast %cst_838 : f32 to vector<2x256xf32>
    %2175 = arith.mulf %2171, %2174 : vector<2x256xf32>
    %2176 = math.absf %2175 : vector<2x256xf32>
    %cst_839 = arith.constant 0.327591091 : f32
    %2177 = vector.broadcast %cst_839 : f32 to vector<2x256xf32>
    %2178 = arith.mulf %2177, %2176 : vector<2x256xf32>
    %cst_840 = arith.constant 1.000000e+00 : f32
    %2179 = vector.broadcast %cst_840 : f32 to vector<2x256xf32>
    %2180 = arith.addf %2179, %2178 : vector<2x256xf32>
    %2181 = tpu.reciprocal %2180 {approx = true} : vector<2x256xf32> -> vector<2x256xf32>
    %cst_841 = arith.constant 1.06140542 : f32
    %2182 = vector.broadcast %cst_841 : f32 to vector<2x256xf32>
    %2183 = arith.mulf %2182, %2181 : vector<2x256xf32>
    %cst_842 = arith.constant -1.45315206 : f32
    %2184 = vector.broadcast %cst_842 : f32 to vector<2x256xf32>
    %2185 = arith.addf %2183, %2184 : vector<2x256xf32>
    %2186 = arith.mulf %2185, %2181 : vector<2x256xf32>
    %cst_843 = arith.constant 1.42141378 : f32
    %2187 = vector.broadcast %cst_843 : f32 to vector<2x256xf32>
    %2188 = arith.addf %2186, %2187 : vector<2x256xf32>
    %2189 = arith.mulf %2188, %2181 : vector<2x256xf32>
    %cst_844 = arith.constant -0.284496725 : f32
    %2190 = vector.broadcast %cst_844 : f32 to vector<2x256xf32>
    %2191 = arith.addf %2189, %2190 : vector<2x256xf32>
    %2192 = arith.mulf %2191, %2181 : vector<2x256xf32>
    %cst_845 = arith.constant 0.254829586 : f32
    %2193 = vector.broadcast %cst_845 : f32 to vector<2x256xf32>
    %2194 = arith.addf %2192, %2193 : vector<2x256xf32>
    %2195 = arith.mulf %2194, %2181 : vector<2x256xf32>
    %cst_846 = arith.constant 0.000000e+00 : f32
    %2196 = vector.broadcast %cst_846 : f32 to vector<2x256xf32>
    %2197 = arith.subf %2196, %2176 : vector<2x256xf32>
    %2198 = arith.mulf %2197, %2176 : vector<2x256xf32>
    %2199 = math.exp %2198 : vector<2x256xf32>
    %2200 = arith.mulf %2195, %2199 : vector<2x256xf32>
    %cst_847 = arith.constant 1.000000e+00 : f32
    %2201 = vector.broadcast %cst_847 : f32 to vector<2x256xf32>
    %2202 = arith.subf %2201, %2200 : vector<2x256xf32>
    %cst_848 = arith.constant 0.000000e+00 : f32
    %2203 = vector.broadcast %cst_848 : f32 to vector<2x256xf32>
    %2204 = arith.cmpf oge, %2175, %2203 : vector<2x256xf32>
    %cst_849 = arith.constant 0.000000e+00 : f32
    %2205 = vector.broadcast %cst_849 : f32 to vector<2x256xf32>
    %2206 = arith.subf %2205, %2202 : vector<2x256xf32>
    %2207 = arith.select %2204, %2202, %2206 : vector<2x256xi1>, vector<2x256xf32>
    %cst_850 = arith.constant 1.000000e+00 : f32
    %2208 = vector.broadcast %cst_850 : f32 to vector<2x256xf32>
    %2209 = arith.addf %2208, %2207 : vector<2x256xf32>
    %2210 = arith.mulf %2173, %2209 : vector<2x256xf32>
    %c1528 = arith.constant 1528 : index
    %c0_851 = arith.constant 0 : index
    %2211 = vector.load %arg3[%c1528, %c0_851] : memref<1912x256xf32, #tpu.memory_space<vmem>>, vector<256x128xf32>
    %cst_852 = arith.constant dense<0.000000e+00> : vector<2x128xf32>
    %2212 = tpu.matmul %2210, %2211, %cst_852 {dimension_numbers = #tpu.dot_dimension_numbers<[1], [0], [0], [1], [0, 0, 1, 1], [], []>} : vector<2x256xf32>, vector<256x128xf32>, vector<2x128xf32> -> vector<2x128xf32>
    %c113 = arith.constant 113 : index
    %c0_853 = arith.constant 0 : index
    %2213 = vector.load %arg2[%c113, %c0_853] : memref<120x256xf32, #tpu.memory_space<vmem>>, vector<1x128xf32>
    %2214 = vector.broadcast %2213 : vector<1x128xf32> to vector<2x128xf32>
    %2215 = arith.addf %2212, %2214 : vector<2x128xf32>
    %2216 = arith.addf %2132, %2215 : vector<2x128xf32>
    %c88_854 = arith.constant 88 : index
    %c0_855 = arith.constant 0 : index
    %2217 = vector.load %arg2[%c88_854, %c0_855] : memref<120x256xf32, #tpu.memory_space<vmem>>, vector<1x128xf32>
    %2218 = vector.broadcast %2217 : vector<1x128xf32> to vector<2x128xf32>
    %2219 = arith.mulf %2026, %2218 : vector<2x128xf32>
    %c89_856 = arith.constant 89 : index
    %c0_857 = arith.constant 0 : index
    %2220 = vector.load %arg2[%c89_856, %c0_857] : memref<120x256xf32, #tpu.memory_space<vmem>>, vector<1x128xf32>
    %2221 = vector.broadcast %2220 : vector<1x128xf32> to vector<2x128xf32>
    %2222 = arith.addf %2219, %2221 : vector<2x128xf32>
    %c1016_858 = arith.constant 1016 : index
    %c0_859 = arith.constant 0 : index
    %2223 = vector.load %arg3[%c1016_858, %c0_859] : memref<1912x256xf32, #tpu.memory_space<vmem>>, vector<128x128xf32>
    %cst_860 = arith.constant dense<0.000000e+00> : vector<2x128xf32>
    %2224 = tpu.matmul %2222, %2223, %cst_860 {dimension_numbers = #tpu.dot_dimension_numbers<[1], [0], [0], [1], [0, 0, 1, 1], [], []>} : vector<2x128xf32>, vector<128x128xf32>, vector<2x128xf32> -> vector<2x128xf32>
    %c90_861 = arith.constant 90 : index
    %c0_862 = arith.constant 0 : index
    %2225 = vector.load %arg2[%c90_861, %c0_862] : memref<120x256xf32, #tpu.memory_space<vmem>>, vector<1x128xf32>
    %2226 = vector.broadcast %2225 : vector<1x128xf32> to vector<2x128xf32>
    %2227 = arith.addf %2224, %2226 : vector<2x128xf32>
    %cst_863 = arith.constant 5.000000e-01 : f32
    %2228 = vector.broadcast %cst_863 : f32 to vector<2x128xf32>
    %2229 = arith.mulf %2228, %2227 : vector<2x128xf32>
    %cst_864 = arith.constant 0.707106769 : f32
    %2230 = vector.broadcast %cst_864 : f32 to vector<2x128xf32>
    %2231 = arith.mulf %2227, %2230 : vector<2x128xf32>
    %2232 = math.absf %2231 : vector<2x128xf32>
    %cst_865 = arith.constant 0.327591091 : f32
    %2233 = vector.broadcast %cst_865 : f32 to vector<2x128xf32>
    %2234 = arith.mulf %2233, %2232 : vector<2x128xf32>
    %cst_866 = arith.constant 1.000000e+00 : f32
    %2235 = vector.broadcast %cst_866 : f32 to vector<2x128xf32>
    %2236 = arith.addf %2235, %2234 : vector<2x128xf32>
    %2237 = tpu.reciprocal %2236 {approx = true} : vector<2x128xf32> -> vector<2x128xf32>
    %cst_867 = arith.constant 1.06140542 : f32
    %2238 = vector.broadcast %cst_867 : f32 to vector<2x128xf32>
    %2239 = arith.mulf %2238, %2237 : vector<2x128xf32>
    %cst_868 = arith.constant -1.45315206 : f32
    %2240 = vector.broadcast %cst_868 : f32 to vector<2x128xf32>
    %2241 = arith.addf %2239, %2240 : vector<2x128xf32>
    %2242 = arith.mulf %2241, %2237 : vector<2x128xf32>
    %cst_869 = arith.constant 1.42141378 : f32
    %2243 = vector.broadcast %cst_869 : f32 to vector<2x128xf32>
    %2244 = arith.addf %2242, %2243 : vector<2x128xf32>
    %2245 = arith.mulf %2244, %2237 : vector<2x128xf32>
    %cst_870 = arith.constant -0.284496725 : f32
    %2246 = vector.broadcast %cst_870 : f32 to vector<2x128xf32>
    %2247 = arith.addf %2245, %2246 : vector<2x128xf32>
    %2248 = arith.mulf %2247, %2237 : vector<2x128xf32>
    %cst_871 = arith.constant 0.254829586 : f32
    %2249 = vector.broadcast %cst_871 : f32 to vector<2x128xf32>
    %2250 = arith.addf %2248, %2249 : vector<2x128xf32>
    %2251 = arith.mulf %2250, %2237 : vector<2x128xf32>
    %cst_872 = arith.constant 0.000000e+00 : f32
    %2252 = vector.broadcast %cst_872 : f32 to vector<2x128xf32>
    %2253 = arith.subf %2252, %2232 : vector<2x128xf32>
    %2254 = arith.mulf %2253, %2232 : vector<2x128xf32>
    %2255 = math.exp %2254 : vector<2x128xf32>
    %2256 = arith.mulf %2251, %2255 : vector<2x128xf32>
    %cst_873 = arith.constant 1.000000e+00 : f32
    %2257 = vector.broadcast %cst_873 : f32 to vector<2x128xf32>
    %2258 = arith.subf %2257, %2256 : vector<2x128xf32>
    %cst_874 = arith.constant 0.000000e+00 : f32
    %2259 = vector.broadcast %cst_874 : f32 to vector<2x128xf32>
    %2260 = arith.cmpf oge, %2231, %2259 : vector<2x128xf32>
    %cst_875 = arith.constant 0.000000e+00 : f32
    %2261 = vector.broadcast %cst_875 : f32 to vector<2x128xf32>
    %2262 = arith.subf %2261, %2258 : vector<2x128xf32>
    %2263 = arith.select %2260, %2258, %2262 : vector<2x128xi1>, vector<2x128xf32>
    %cst_876 = arith.constant 1.000000e+00 : f32
    %2264 = vector.broadcast %cst_876 : f32 to vector<2x128xf32>
    %2265 = arith.addf %2264, %2263 : vector<2x128xf32>
    %2266 = arith.mulf %2229, %2265 : vector<2x128xf32>
    %2267 = tpu.iota {dimensions = array<i32: 0>} : vector<2x2xi32>
    %2268 = tpu.iota {dimensions = array<i32: 1>} : vector<2x2xi32>
    %c1_i32_877 = arith.constant 1 : i32
    %2269 = vector.broadcast %c1_i32_877 : i32 to vector<2x2xi32>
    %2270 = arith.muli %2269, %2267 : vector<2x2xi32>
    %c-1_i32_878 = arith.constant -1 : i32
    %2271 = vector.broadcast %c-1_i32_878 : i32 to vector<2x2xi32>
    %2272 = arith.addi %2270, %2271 : vector<2x2xi32>
    %2273 = arith.cmpi eq, %2268, %2272 : vector<2x2xi32>
    %2274 = arith.extui %2273 : vector<2x2xi1> to vector<2x2xi32>
    %2275 = arith.sitofp %2274 : vector<2x2xi32> to vector<2x2xf32>
    %cst_879 = arith.constant dense<0.000000e+00> : vector<2x128xf32>
    %2276 = tpu.matmul %2275, %2266, %cst_879 {dimension_numbers = #tpu.dot_dimension_numbers<[1], [0], [0], [1], [0, 0, 1, 1], [], []>} : vector<2x2xf32>, vector<2x128xf32>, vector<2x128xf32> -> vector<2x128xf32>
    %c92_880 = arith.constant 92 : index
    %c0_881 = arith.constant 0 : index
    %2277 = vector.load %arg2[%c92_880, %c0_881] : memref<120x256xf32, #tpu.memory_space<vmem>>, vector<1x128xf32>
    %2278 = vector.broadcast %2277 : vector<1x128xf32> to vector<2x128xf32>
    %2279 = arith.mulf %2276, %2278 : vector<2x128xf32>
    %c93_882 = arith.constant 93 : index
    %c0_883 = arith.constant 0 : index
    %2280 = vector.load %arg2[%c93_882, %c0_883] : memref<120x256xf32, #tpu.memory_space<vmem>>, vector<1x128xf32>
    %2281 = vector.broadcast %2280 : vector<1x128xf32> to vector<2x128xf32>
    %2282 = arith.mulf %2266, %2281 : vector<2x128xf32>
    %2283 = arith.addf %2279, %2282 : vector<2x128xf32>
    %2284 = tpu.iota {dimensions = array<i32: 0>} : vector<2x2xi32>
    %2285 = tpu.iota {dimensions = array<i32: 1>} : vector<2x2xi32>
    %c1_i32_884 = arith.constant 1 : i32
    %2286 = vector.broadcast %c1_i32_884 : i32 to vector<2x2xi32>
    %2287 = arith.muli %2286, %2284 : vector<2x2xi32>
    %c1_i32_885 = arith.constant 1 : i32
    %2288 = vector.broadcast %c1_i32_885 : i32 to vector<2x2xi32>
    %2289 = arith.addi %2287, %2288 : vector<2x2xi32>
    %2290 = arith.cmpi eq, %2285, %2289 : vector<2x2xi32>
    %2291 = arith.extui %2290 : vector<2x2xi1> to vector<2x2xi32>
    %2292 = arith.sitofp %2291 : vector<2x2xi32> to vector<2x2xf32>
    %cst_886 = arith.constant dense<0.000000e+00> : vector<2x128xf32>
    %2293 = tpu.matmul %2292, %2266, %cst_886 {dimension_numbers = #tpu.dot_dimension_numbers<[1], [0], [0], [1], [0, 0, 1, 1], [], []>} : vector<2x2xf32>, vector<2x128xf32>, vector<2x128xf32> -> vector<2x128xf32>
    %c94_887 = arith.constant 94 : index
    %c0_888 = arith.constant 0 : index
    %2294 = vector.load %arg2[%c94_887, %c0_888] : memref<120x256xf32, #tpu.memory_space<vmem>>, vector<1x128xf32>
    %2295 = vector.broadcast %2294 : vector<1x128xf32> to vector<2x128xf32>
    %2296 = arith.mulf %2293, %2295 : vector<2x128xf32>
    %2297 = arith.addf %2283, %2296 : vector<2x128xf32>
    %c96_889 = arith.constant 96 : index
    %c0_890 = arith.constant 0 : index
    %2298 = vector.load %arg2[%c96_889, %c0_890] : memref<120x256xf32, #tpu.memory_space<vmem>>, vector<1x128xf32>
    %2299 = vector.broadcast %2298 : vector<1x128xf32> to vector<2x128xf32>
    %2300 = arith.addf %2297, %2299 : vector<2x128xf32>
    %c100_891 = arith.constant 100 : index
    %c0_892 = arith.constant 0 : index
    %2301 = vector.load %arg2[%c100_891, %c0_892] : memref<120x256xf32, #tpu.memory_space<vmem>>, vector<1x128xf32>
    %2302 = vector.broadcast %2301 : vector<1x128xf32> to vector<2x128xf32>
    %2303 = arith.mulf %2300, %2302 : vector<2x128xf32>
    %c104_893 = arith.constant 104 : index
    %c0_894 = arith.constant 0 : index
    %2304 = vector.load %arg2[%c104_893, %c0_894] : memref<120x256xf32, #tpu.memory_space<vmem>>, vector<1x128xf32>
    %2305 = vector.broadcast %2304 : vector<1x128xf32> to vector<2x128xf32>
    %2306 = arith.addf %2303, %2305 : vector<2x128xf32>
    %c1144_895 = arith.constant 1144 : index
    %c0_896 = arith.constant 0 : index
    %2307 = vector.load %arg3[%c1144_895, %c0_896] : memref<1912x256xf32, #tpu.memory_space<vmem>>, vector<128x128xf32>
    %cst_897 = arith.constant dense<0.000000e+00> : vector<2x128xf32>
    %2308 = tpu.matmul %2306, %2307, %cst_897 {dimension_numbers = #tpu.dot_dimension_numbers<[1], [0], [0], [1], [0, 0, 1, 1], [], []>} : vector<2x128xf32>, vector<128x128xf32>, vector<2x128xf32> -> vector<2x128xf32>
    %c105_898 = arith.constant 105 : index
    %c0_899 = arith.constant 0 : index
    %2309 = vector.load %arg2[%c105_898, %c0_899] : memref<120x256xf32, #tpu.memory_space<vmem>>, vector<1x128xf32>
    %2310 = vector.broadcast %2309 : vector<1x128xf32> to vector<2x128xf32>
    %2311 = arith.addf %2308, %2310 : vector<2x128xf32>
    %2312 = arith.mulf %2266, %2311 : vector<2x128xf32>
    %c1272_900 = arith.constant 1272 : index
    %c0_901 = arith.constant 0 : index
    %2313 = vector.load %arg3[%c1272_900, %c0_901] : memref<1912x256xf32, #tpu.memory_space<vmem>>, vector<128x128xf32>
    %cst_902 = arith.constant dense<0.000000e+00> : vector<2x128xf32>
    %2314 = tpu.matmul %2312, %2313, %cst_902 {dimension_numbers = #tpu.dot_dimension_numbers<[1], [0], [0], [1], [0, 0, 1, 1], [], []>} : vector<2x128xf32>, vector<128x128xf32>, vector<2x128xf32> -> vector<2x128xf32>
    %c106_903 = arith.constant 106 : index
    %c0_904 = arith.constant 0 : index
    %2315 = vector.load %arg2[%c106_903, %c0_904] : memref<120x256xf32, #tpu.memory_space<vmem>>, vector<1x128xf32>
    %2316 = vector.broadcast %2315 : vector<1x128xf32> to vector<2x128xf32>
    %2317 = arith.addf %2314, %2316 : vector<2x128xf32>
    %2318 = arith.addf %2317, %2222 : vector<2x128xf32>
    %c107_905 = arith.constant 107 : index
    %c0_906 = arith.constant 0 : index
    %2319 = vector.load %arg2[%c107_905, %c0_906] : memref<120x256xf32, #tpu.memory_space<vmem>>, vector<1x128xf32>
    %2320 = vector.broadcast %2319 : vector<1x128xf32> to vector<2x128xf32>
    %2321 = arith.mulf %2320, %2318 : vector<2x128xf32>
    %2322 = arith.addf %2026, %2321 : vector<2x128xf32>
    %c1400_907 = arith.constant 1400 : index
    %c0_908 = arith.constant 0 : index
    %2323 = vector.load %arg3[%c1400_907, %c0_908] : memref<1912x256xf32, #tpu.memory_space<vmem>>, vector<128x256xf32>
    %cst_909 = arith.constant dense<0.000000e+00> : vector<2x256xf32>
    %2324 = tpu.matmul %2322, %2323, %cst_909 {dimension_numbers = #tpu.dot_dimension_numbers<[1], [0], [0], [1], [0, 0, 1, 1], [], []>} : vector<2x128xf32>, vector<128x256xf32>, vector<2x256xf32> -> vector<2x256xf32>
    %c108_910 = arith.constant 108 : index
    %c0_911 = arith.constant 0 : index
    %2325 = vector.load %arg2[%c108_910, %c0_911] : memref<120x256xf32, #tpu.memory_space<vmem>>, vector<1x256xf32>
    %2326 = vector.broadcast %2325 : vector<1x256xf32> to vector<2x256xf32>
    %2327 = arith.addf %2324, %2326 : vector<2x256xf32>
    %2328 = tpu.iota {dimensions = array<i32: 0>} : vector<2x2xi32>
    %2329 = tpu.iota {dimensions = array<i32: 1>} : vector<2x2xi32>
    %c1_i32_912 = arith.constant 1 : i32
    %2330 = vector.broadcast %c1_i32_912 : i32 to vector<2x2xi32>
    %2331 = arith.muli %2330, %2328 : vector<2x2xi32>
    %c-1_i32_913 = arith.constant -1 : i32
    %2332 = vector.broadcast %c-1_i32_913 : i32 to vector<2x2xi32>
    %2333 = arith.addi %2331, %2332 : vector<2x2xi32>
    %2334 = arith.cmpi eq, %2329, %2333 : vector<2x2xi32>
    %2335 = arith.extui %2334 : vector<2x2xi1> to vector<2x2xi32>
    %2336 = arith.sitofp %2335 : vector<2x2xi32> to vector<2x2xf32>
    %cst_914 = arith.constant dense<0.000000e+00> : vector<2x256xf32>
    %2337 = tpu.matmul %2336, %2327, %cst_914 {dimension_numbers = #tpu.dot_dimension_numbers<[1], [0], [0], [1], [0, 0, 1, 1], [], []>} : vector<2x2xf32>, vector<2x256xf32>, vector<2x256xf32> -> vector<2x256xf32>
    %c109_915 = arith.constant 109 : index
    %c0_916 = arith.constant 0 : index
    %2338 = vector.load %arg2[%c109_915, %c0_916] : memref<120x256xf32, #tpu.memory_space<vmem>>, vector<1x256xf32>
    %2339 = vector.broadcast %2338 : vector<1x256xf32> to vector<2x256xf32>
    %2340 = arith.mulf %2337, %2339 : vector<2x256xf32>
    %c110_917 = arith.constant 110 : index
    %c0_918 = arith.constant 0 : index
    %2341 = vector.load %arg2[%c110_917, %c0_918] : memref<120x256xf32, #tpu.memory_space<vmem>>, vector<1x256xf32>
    %2342 = vector.broadcast %2341 : vector<1x256xf32> to vector<2x256xf32>
    %2343 = arith.mulf %2327, %2342 : vector<2x256xf32>
    %2344 = arith.addf %2340, %2343 : vector<2x256xf32>
    %2345 = tpu.iota {dimensions = array<i32: 0>} : vector<2x2xi32>
    %2346 = tpu.iota {dimensions = array<i32: 1>} : vector<2x2xi32>
    %c1_i32_919 = arith.constant 1 : i32
    %2347 = vector.broadcast %c1_i32_919 : i32 to vector<2x2xi32>
    %2348 = arith.muli %2347, %2345 : vector<2x2xi32>
    %c1_i32_920 = arith.constant 1 : i32
    %2349 = vector.broadcast %c1_i32_920 : i32 to vector<2x2xi32>
    %2350 = arith.addi %2348, %2349 : vector<2x2xi32>
    %2351 = arith.cmpi eq, %2346, %2350 : vector<2x2xi32>
    %2352 = arith.extui %2351 : vector<2x2xi1> to vector<2x2xi32>
    %2353 = arith.sitofp %2352 : vector<2x2xi32> to vector<2x2xf32>
    %cst_921 = arith.constant dense<0.000000e+00> : vector<2x256xf32>
    %2354 = tpu.matmul %2353, %2327, %cst_921 {dimension_numbers = #tpu.dot_dimension_numbers<[1], [0], [0], [1], [0, 0, 1, 1], [], []>} : vector<2x2xf32>, vector<2x256xf32>, vector<2x256xf32> -> vector<2x256xf32>
    %c111_922 = arith.constant 111 : index
    %c0_923 = arith.constant 0 : index
    %2355 = vector.load %arg2[%c111_922, %c0_923] : memref<120x256xf32, #tpu.memory_space<vmem>>, vector<1x256xf32>
    %2356 = vector.broadcast %2355 : vector<1x256xf32> to vector<2x256xf32>
    %2357 = arith.mulf %2354, %2356 : vector<2x256xf32>
    %2358 = arith.addf %2344, %2357 : vector<2x256xf32>
    %c112_924 = arith.constant 112 : index
    %c0_925 = arith.constant 0 : index
    %2359 = vector.load %arg2[%c112_924, %c0_925] : memref<120x256xf32, #tpu.memory_space<vmem>>, vector<1x256xf32>
    %2360 = vector.broadcast %2359 : vector<1x256xf32> to vector<2x256xf32>
    %2361 = arith.addf %2358, %2360 : vector<2x256xf32>
    %cst_926 = arith.constant 5.000000e-01 : f32
    %2362 = vector.broadcast %cst_926 : f32 to vector<2x256xf32>
    %2363 = arith.mulf %2362, %2361 : vector<2x256xf32>
    %cst_927 = arith.constant 0.707106769 : f32
    %2364 = vector.broadcast %cst_927 : f32 to vector<2x256xf32>
    %2365 = arith.mulf %2361, %2364 : vector<2x256xf32>
    %2366 = math.absf %2365 : vector<2x256xf32>
    %cst_928 = arith.constant 0.327591091 : f32
    %2367 = vector.broadcast %cst_928 : f32 to vector<2x256xf32>
    %2368 = arith.mulf %2367, %2366 : vector<2x256xf32>
    %cst_929 = arith.constant 1.000000e+00 : f32
    %2369 = vector.broadcast %cst_929 : f32 to vector<2x256xf32>
    %2370 = arith.addf %2369, %2368 : vector<2x256xf32>
    %2371 = tpu.reciprocal %2370 {approx = true} : vector<2x256xf32> -> vector<2x256xf32>
    %cst_930 = arith.constant 1.06140542 : f32
    %2372 = vector.broadcast %cst_930 : f32 to vector<2x256xf32>
    %2373 = arith.mulf %2372, %2371 : vector<2x256xf32>
    %cst_931 = arith.constant -1.45315206 : f32
    %2374 = vector.broadcast %cst_931 : f32 to vector<2x256xf32>
    %2375 = arith.addf %2373, %2374 : vector<2x256xf32>
    %2376 = arith.mulf %2375, %2371 : vector<2x256xf32>
    %cst_932 = arith.constant 1.42141378 : f32
    %2377 = vector.broadcast %cst_932 : f32 to vector<2x256xf32>
    %2378 = arith.addf %2376, %2377 : vector<2x256xf32>
    %2379 = arith.mulf %2378, %2371 : vector<2x256xf32>
    %cst_933 = arith.constant -0.284496725 : f32
    %2380 = vector.broadcast %cst_933 : f32 to vector<2x256xf32>
    %2381 = arith.addf %2379, %2380 : vector<2x256xf32>
    %2382 = arith.mulf %2381, %2371 : vector<2x256xf32>
    %cst_934 = arith.constant 0.254829586 : f32
    %2383 = vector.broadcast %cst_934 : f32 to vector<2x256xf32>
    %2384 = arith.addf %2382, %2383 : vector<2x256xf32>
    %2385 = arith.mulf %2384, %2371 : vector<2x256xf32>
    %cst_935 = arith.constant 0.000000e+00 : f32
    %2386 = vector.broadcast %cst_935 : f32 to vector<2x256xf32>
    %2387 = arith.subf %2386, %2366 : vector<2x256xf32>
    %2388 = arith.mulf %2387, %2366 : vector<2x256xf32>
    %2389 = math.exp %2388 : vector<2x256xf32>
    %2390 = arith.mulf %2385, %2389 : vector<2x256xf32>
    %cst_936 = arith.constant 1.000000e+00 : f32
    %2391 = vector.broadcast %cst_936 : f32 to vector<2x256xf32>
    %2392 = arith.subf %2391, %2390 : vector<2x256xf32>
    %cst_937 = arith.constant 0.000000e+00 : f32
    %2393 = vector.broadcast %cst_937 : f32 to vector<2x256xf32>
    %2394 = arith.cmpf oge, %2365, %2393 : vector<2x256xf32>
    %cst_938 = arith.constant 0.000000e+00 : f32
    %2395 = vector.broadcast %cst_938 : f32 to vector<2x256xf32>
    %2396 = arith.subf %2395, %2392 : vector<2x256xf32>
    %2397 = arith.select %2394, %2392, %2396 : vector<2x256xi1>, vector<2x256xf32>
    %cst_939 = arith.constant 1.000000e+00 : f32
    %2398 = vector.broadcast %cst_939 : f32 to vector<2x256xf32>
    %2399 = arith.addf %2398, %2397 : vector<2x256xf32>
    %2400 = arith.mulf %2363, %2399 : vector<2x256xf32>
    %c1528_940 = arith.constant 1528 : index
    %c0_941 = arith.constant 0 : index
    %2401 = vector.load %arg3[%c1528_940, %c0_941] : memref<1912x256xf32, #tpu.memory_space<vmem>>, vector<256x128xf32>
    %cst_942 = arith.constant dense<0.000000e+00> : vector<2x128xf32>
    %2402 = tpu.matmul %2400, %2401, %cst_942 {dimension_numbers = #tpu.dot_dimension_numbers<[1], [0], [0], [1], [0, 0, 1, 1], [], []>} : vector<2x256xf32>, vector<256x128xf32>, vector<2x128xf32> -> vector<2x128xf32>
    %c113_943 = arith.constant 113 : index
    %c0_944 = arith.constant 0 : index
    %2403 = vector.load %arg2[%c113_943, %c0_944] : memref<120x256xf32, #tpu.memory_space<vmem>>, vector<1x128xf32>
    %2404 = vector.broadcast %2403 : vector<1x128xf32> to vector<2x128xf32>
    %2405 = arith.addf %2402, %2404 : vector<2x128xf32>
    %2406 = arith.addf %2322, %2405 : vector<2x128xf32>
    %c114 = arith.constant 114 : index
    %c0_945 = arith.constant 0 : index
    %2407 = vector.load %arg2[%c114, %c0_945] : memref<120x256xf32, #tpu.memory_space<vmem>>, vector<1x128xf32>
    %c115 = arith.constant 115 : index
    %c0_946 = arith.constant 0 : index
    %2408 = vector.load %arg2[%c115, %c0_946] : memref<120x256xf32, #tpu.memory_space<vmem>>, vector<1x128xf32>
    %cst_947 = arith.constant dense<0.000000e+00> : vector<2xf32>
    %2409 = vector.multi_reduction <add>, %2216, %cst_947 [1] : vector<2x128xf32> to vector<2xf32>
    %2410 = vector.shape_cast %2409 : vector<2xf32> to vector<2x1xf32>
    %cst_948 = arith.constant 1.280000e+02 : f32
    %2411 = vector.broadcast %cst_948 : f32 to vector<2x1xf32>
    %2412 = arith.divf %2410, %2411 : vector<2x1xf32>
    %2413 = vector.broadcast %2412 : vector<2x1xf32> to vector<2x128xf32>
    %2414 = arith.subf %2216, %2413 : vector<2x128xf32>
    %2415 = arith.mulf %2414, %2414 : vector<2x128xf32>
    %cst_949 = arith.constant dense<0.000000e+00> : vector<2xf32>
    %2416 = vector.multi_reduction <add>, %2415, %cst_949 [1] : vector<2x128xf32> to vector<2xf32>
    %2417 = vector.shape_cast %2416 : vector<2xf32> to vector<2x1xf32>
    %cst_950 = arith.constant 1.280000e+02 : f32
    %2418 = vector.broadcast %cst_950 : f32 to vector<2x1xf32>
    %2419 = arith.divf %2417, %2418 : vector<2x1xf32>
    %cst_951 = arith.constant 9.99999974E-6 : f32
    %2420 = vector.broadcast %cst_951 : f32 to vector<2x1xf32>
    %2421 = arith.addf %2419, %2420 : vector<2x1xf32>
    %2422 = math.rsqrt %2421 : vector<2x1xf32>
    %2423 = vector.broadcast %2422 : vector<2x1xf32> to vector<2x128xf32>
    %2424 = arith.mulf %2414, %2423 : vector<2x128xf32>
    %2425 = vector.broadcast %2407 : vector<1x128xf32> to vector<2x128xf32>
    %2426 = arith.mulf %2424, %2425 : vector<2x128xf32>
    %2427 = vector.broadcast %2408 : vector<1x128xf32> to vector<2x128xf32>
    %2428 = arith.addf %2426, %2427 : vector<2x128xf32>
    %cst_952 = arith.constant dense<0.000000e+00> : vector<2xf32>
    %2429 = vector.multi_reduction <add>, %2406, %cst_952 [1] : vector<2x128xf32> to vector<2xf32>
    %2430 = vector.shape_cast %2429 : vector<2xf32> to vector<2x1xf32>
    %cst_953 = arith.constant 1.280000e+02 : f32
    %2431 = vector.broadcast %cst_953 : f32 to vector<2x1xf32>
    %2432 = arith.divf %2430, %2431 : vector<2x1xf32>
    %2433 = vector.broadcast %2432 : vector<2x1xf32> to vector<2x128xf32>
    %2434 = arith.subf %2406, %2433 : vector<2x128xf32>
    %2435 = arith.mulf %2434, %2434 : vector<2x128xf32>
    %cst_954 = arith.constant dense<0.000000e+00> : vector<2xf32>
    %2436 = vector.multi_reduction <add>, %2435, %cst_954 [1] : vector<2x128xf32> to vector<2xf32>
    %2437 = vector.shape_cast %2436 : vector<2xf32> to vector<2x1xf32>
    %cst_955 = arith.constant 1.280000e+02 : f32
    %2438 = vector.broadcast %cst_955 : f32 to vector<2x1xf32>
    %2439 = arith.divf %2437, %2438 : vector<2x1xf32>
    %cst_956 = arith.constant 9.99999974E-6 : f32
    %2440 = vector.broadcast %cst_956 : f32 to vector<2x1xf32>
    %2441 = arith.addf %2439, %2440 : vector<2x1xf32>
    %2442 = math.rsqrt %2441 : vector<2x1xf32>
    %2443 = vector.broadcast %2442 : vector<2x1xf32> to vector<2x128xf32>
    %2444 = arith.mulf %2434, %2443 : vector<2x128xf32>
    %2445 = vector.broadcast %2407 : vector<1x128xf32> to vector<2x128xf32>
    %2446 = arith.mulf %2444, %2445 : vector<2x128xf32>
    %2447 = vector.broadcast %2408 : vector<1x128xf32> to vector<2x128xf32>
    %2448 = arith.addf %2446, %2447 : vector<2x128xf32>
    %c1784 = arith.constant 1784 : index
    %c0_957 = arith.constant 0 : index
    %2449 = vector.load %arg3[%c1784, %c0_957] : memref<1912x256xf32, #tpu.memory_space<vmem>>, vector<128x8xf32>
    %c116 = arith.constant 116 : index
    %c0_958 = arith.constant 0 : index
    %2450 = vector.load %arg2[%c116, %c0_958] : memref<120x256xf32, #tpu.memory_space<vmem>>, vector<1x8xf32>
    %cst_959 = arith.constant dense<0.000000e+00> : vector<128xf32>
    %2451 = vector.multi_reduction <add>, %2428, %cst_959 [0] : vector<2x128xf32> to vector<128xf32>
    %2452 = vector.shape_cast %2451 : vector<128xf32> to vector<1x128xf32>
    %cst_960 = arith.constant 2.000000e+00 : f32
    %2453 = vector.broadcast %cst_960 : f32 to vector<1x128xf32>
    %2454 = arith.divf %2452, %2453 : vector<1x128xf32>
    %cst_961 = arith.constant dense<0.000000e+00> : vector<1x8xf32>
    %2455 = tpu.matmul %2454, %2449, %cst_961 {dimension_numbers = #tpu.dot_dimension_numbers<[1], [0], [0], [1], [0, 0, 1, 1], [], []>} : vector<1x128xf32>, vector<128x8xf32>, vector<1x8xf32> -> vector<1x8xf32>
    %2456 = arith.addf %2455, %2450 : vector<1x8xf32>
    %cst_962 = arith.constant 0.000000e+00 : f32
    %2457 = vector.broadcast %cst_962 : f32 to vector<1x8xf32>
    %2458 = arith.maximumf %2456, %2457 : vector<1x8xf32>
    %c0_963 = arith.constant 0 : index
    %c0_964 = arith.constant 0 : index
    %2459 = vector.load %arg4[%c0_963, %c0_964] : memref<2x8xf32, #tpu.memory_space<vmem>>, vector<1x8xf32>
    tpu.vector_store %arg4[%c0_963, %c0_964], %2458 {strides = array<i32>} : memref<2x8xf32, #tpu.memory_space<vmem>>, vector<1x8xf32>,
    %cst_965 = arith.constant dense<0.000000e+00> : vector<128xf32>
    %2460 = vector.multi_reduction <add>, %2448, %cst_965 [0] : vector<2x128xf32> to vector<128xf32>
    %2461 = vector.shape_cast %2460 : vector<128xf32> to vector<1x128xf32>
    %cst_966 = arith.constant 2.000000e+00 : f32
    %2462 = vector.broadcast %cst_966 : f32 to vector<1x128xf32>
    %2463 = arith.divf %2461, %2462 : vector<1x128xf32>
    %cst_967 = arith.constant dense<0.000000e+00> : vector<1x8xf32>
    %2464 = tpu.matmul %2463, %2449, %cst_967 {dimension_numbers = #tpu.dot_dimension_numbers<[1], [0], [0], [1], [0, 0, 1, 1], [], []>} : vector<1x128xf32>, vector<128x8xf32>, vector<1x8xf32> -> vector<1x8xf32>
    %2465 = arith.addf %2464, %2450 : vector<1x8xf32>
    %cst_968 = arith.constant 0.000000e+00 : f32
    %2466 = vector.broadcast %cst_968 : f32 to vector<1x8xf32>
    %2467 = arith.maximumf %2465, %2466 : vector<1x8xf32>
    %c1_969 = arith.constant 1 : index
    %c0_970 = arith.constant 0 : index
    %2468 = vector.load %arg4[%c1_969, %c0_970] : memref<2x8xf32, #tpu.memory_space<vmem>>, vector<1x8xf32>
    tpu.vector_store %arg4[%c1_969, %c0_970], %2467 {strides = array<i32>} : memref<2x8xf32, #tpu.memory_space<vmem>>, vector<1x8xf32>,
    return
  }
  func.func @transform_0(%arg0: i32) -> (i32, i32, i32) {
    %c0_i32 = arith.constant 0 : i32
    %c0_i32_0 = arith.constant 0 : i32
    %c0_i32_1 = arith.constant 0 : i32
    %c0_i32_2 = arith.constant 0 : i32
    return %c0_i32, %c0_i32_0, %c0_i32_1 : i32, i32, i32
  }
  func.func @transform_1(%arg0: i32) -> (i32, i32) {
    %c0_i32 = arith.constant 0 : i32
    %c0_i32_0 = arith.constant 0 : i32
    %c0_i32_1 = arith.constant 0 : i32
    return %c0_i32, %c0_i32_0 : i32, i32
  }
  func.func @transform_2(%arg0: i32) -> (i32, i32) {
    %c0_i32 = arith.constant 0 : i32
    %c0_i32_0 = arith.constant 0 : i32
    %c0_i32_1 = arith.constant 0 : i32
    return %c0_i32, %c0_i32_0 : i32, i32
  }
  func.func @transform_3(%arg0: i32) -> (i32, i32) {
    %c0_i32 = arith.constant 0 : i32
    %c0_i32_0 = arith.constant 0 : i32
    %c0_i32_1 = arith.constant 0 : i32
    return %c0_i32, %c0_i32_0 : i32, i32
  }
}

</mosaic_0001>

<bundles_post_ra>
// kernel: van_forward.1
= control target key start
LH: loop header
LB: loop body
LE: loop exit
PB: predicated region body
PF: predicated region fallthrough
CT: control target
= control target key end

     0   :  { %8 = vsyncpa [#allocation3], 0  ;;  %s7931_s0 = inlined_call_operand.vmem [shape: f32[2,16,7], index: 0, kind: input, shape index: {}]   ;;  %s7932_s1 = inlined_call_operand.hbm [shape: f32[120,256], index: 1, kind: input, shape index: {}]   ;;  %s7933_s2 = inlined_call_operand.hbm [shape: f32[1912,256], index: 2, kind: input, shape index: {}]   ;;  %s7934_s3 = inlined_call_operand.hbm [shape: f32[2,8], index: 3, kind: output, shape index: {}]  }
   0x1   :  { %9 = vsyncpa [#allocation6], 0 }
   0x2   :  { %10 = vsyncpa [#allocation4], 0  ;;  %s17_s14 = sshll.u32 %s7932_s1, 4  ;;  %s5777_s15 = smov [#allocation2]   ;;  %s18_s14 = int_to_ptr.hbm [resolvable:$true] %s17_s14 }
   0x3   :  { %s19_s16 = sshll.u32 %s5777_s15, 4  ;;  %s30_s19 = sshll.u32 %s7933_s2, 4  ;;  %s20_s16 = int_to_ptr.vmem [resolvable:$true] %s19_s16  ;;  %s31_s19 = int_to_ptr.hbm [resolvable:$true] %s30_s19 }
   0x4   :  { %s5778_s20 = smov 256   ;;  %s5779_s21 = smov 16  }
   0x5   :  { %25 = dma.hbm_to_vmem [thread:$0]  %s18_s14, 3840, %s20_s16, [#allocation3], %s5778_s20, %s5778_s20, %s5779_s21  }
   0x6   :  { %s5780_s22 = smov [#allocation5]  }
   0x7   :  { %s32_s23 = sshll.u32 %s5780_s22, 4  ;;  %s33_s23 = int_to_ptr.vmem [resolvable:$true] %s32_s23 }
   0x8   :  { %38 = dma.hbm_to_vmem [thread:$0]  %s31_s19, 61184, %s33_s23, [#allocation6], %s5778_s20, %s5778_s20, %s5779_s21  }
   0x9   :  { %5771 = dma.done.wait [#allocation3], 3840  }
   0xa   :  { %5772 = vsyncadd [#allocation3], 4294963456 }
   0xb   :  { %5773 = dma.done.wait [#allocation6], 61184  }
   0xc   :  { %5774 = vsyncadd [#allocation6], 4294906112  ;;  %vm58_vm0 = vcmask 1046528   ;;  %vm51_vm1 = vcmask 56320   ;;  %v49_v0 = vld [vmem:[#allocation5] sm:$0x7f]  ;;  %v208_v59 = vlaneseq }
   0xd   :  { %v47_v1 = vld [vmem:[%s7931_s0] sm:$0xff]  ;;  %5338 = vmatpush.msk.msra.mxu0 %vm58_vm0, %v49_v0  ;;  %5343 = vmatpush.msk.msra.mxu1 %vm58_vm0, %v49_v0  ;;  %v48_v2 = vld [vmem:[%s7931_s0 + $0x8] sm:$0xff]  ;;  %v5822_v3 = vld [vmem:[#allocation5 + $0x20] sm:$0xff]  ;;  %vm126_vm2 = vcmask 130048   ;;  %s5327_s6 = sshll.u32 %s7934_s3, 4  ;;  %s5328_s6 = int_to_ptr.hbm [resolvable:$true] %s5327_s6 }
   0xe   :  { %5339 = vmatmul.msk.f32.vlgmr.msra.gmra.mxu0 %vm51_vm1, %v47_v1  ;;  %v5824_v4 = vld [vmem:[#allocation5 + $0x10] sm:$0xff]  ;;  %147 = vmatpush.msra.mxu2 %v5822_v3  ;;  %v5341_v32 = vld [vmem:[%s7931_s0 + $0x10] sm:$0xff]  ;;  %v5342_v42 = vld [vmem:[%s7931_s0 + $0x18] sm:$0xff]  ;;  %v5869_v0 = vshrl.u32 %v208_v59, 7  ;;  %s5787_s0 = smov [#allocation7]  }
   0xf   :  { %v5828_v5 = vld [vmem:[#allocation2] ss:$0 sm:$0xff]  ;;  %v5830_v7 = vld [vmem:[#allocation2 + $0x1] ss:$0 sm:$0xff]  ;;  %v5835_v9 = vld [vmem:[#allocation2 + $0x2] ss:$0 sm:$0xff]  ;;  %5344 = vmatmul.msk.f32.vlgmr.msra.gmra.mxu1 %vm51_vm1, %v5341_v32 }
  0x10   :  { %148 = vmatpush.msra.mxu2 %v5824_v4  ;;  %v5854_v16 = vld [vmem:[#allocation2 + $0x3] ss:$0 sm:$0xff]  ;;  %8049 = vst [vmem:[#allocation11_spill] sm:$0xff] %v5869_v0  ;;  %s5325_s30 = sshll.u32 %s5787_s0, 4  ;;  %s5326_s30 = int_to_ptr.vmem [resolvable:$true] %s5325_s30 }
  0x16   :  { %5340 = vmatmul.msk.f32.gmra.mxu0 %vm51_vm1, %v48_v2 }
  0x17   :  { %5345 = vmatmul.msk.f32.gmra.mxu1 %vm51_vm1, %v5342_v42 }
  0x8b   :  { %v79_v6 = vpop.f32.mrf.mxu0 }
  0x8c   :  { %v5833_v8 = vadd.f32 %v79_v6, %v5828_v5 }
  0x8e   :  { %v118_v10 = vmul.f32 %v5830_v7, %v5833_v8 }
  0x90   :  { %v5840_v11 = vadd.f32 %v5835_v9, %v118_v10  ;;  %v5871_v10 = vand.u32 127, %v208_v59 }
  0x92   :  { %5346 = vmatmul.msk.f32.vlgmr.msra.gmra.mxu2 %vm126_vm2, %v5840_v11  ;;  %8050 = vst [vmem:[#allocation12_spill] sm:$0xff] %v5871_v10 }
  0x93   :  { %v82_v12 = vpop.f32.mrf.mxu0 }
  0x94   :  { %v5845_v13 = vadd.f32 %v82_v12, %v5828_v5  ;;  %v213_v12 = vadd.s32 4294967294, %v5869_v0 }
  0x96   :  { %v119_v14 = vmul.f32 %v5830_v7, %v5845_v13  ;;  %vm215_vm5 = vcmp.eq.s32.totalorder %v5871_v10, %v213_v12 }
  0x98   :  { %v5850_v15 = vadd.f32 %v5835_v9, %v119_v14  ;;  %v253_v14 = vadd.s32 4294967295, %v5869_v0 }
  0x9a   :  { %5347 = vmatmul.msk.f32.gmra.mxu2 %vm126_vm2, %v5850_v15  ;;  %vm255_vm6 = vcmp.eq.s32.totalorder %v5871_v10, %v253_v14 }
 0x115   :  { %v150_v17 = vpop.f32.mrf.mxu2 }
 0x116   :  { %v5857_v18 = vadd.f32 %v150_v17, %v5854_v16 }
 0x118   :  { %v158_v19 = vmul.f32 0.70710677, %v5857_v18 }
 0x11a   :  { %v160_v20 = vand.u32 2147483647, %v158_v19  ;;  %vm198_vm3 = vcmp.ge.f32.partialorder %v158_v19, 0.0 }
 0x11c   :  { %v162_v21 = vmul.f32 0.3275911, %v160_v20  ;;  %v186_v29 = vsub.f32 0.0, %v160_v20 }
 0x11d   :  { %v153_v22 = vpop.f32.mrf.mxu2 }
 0x11e   :  { %v164_v23 = vadd.f32 1.0, %v162_v21  ;;  %v154_v24 = vadd.f32 %v153_v22, %v5854_v16  ;;  %v188_v34 = vmul.f32 %v186_v29, %v160_v20  ;;  %v342_v20 = vadd.s32 2, %v5869_v0 }
 0x11f   :  { %v300_v21 = vadd.s32 1, %v5869_v0 }
 0x120   :  { %5581 = vrcp.f32 %v164_v23  ;;  %v159_v25 = vmul.f32 0.70710677, %v154_v24  ;;  %v190_v38 = vmul.f32 1.442695, %v188_v34  ;;  %v157_v23 = vmul.f32 0.5, %v154_v24 }
 0x121   :  { %vm344_vm7 = vcmp.eq.s32.totalorder %v5871_v10, %v342_v20  ;;  %vm302_vm8 = vcmp.eq.s32.totalorder %v5871_v10, %v300_v21  ;;  %v427_v21 = vadd.s32 4294967290, %v5869_v0 }
 0x122   :  { %v161_v26 = vand.u32 2147483647, %v159_v25  ;;  %vm199_vm4 = vcmp.ge.f32.partialorder %v159_v25, 0.0  ;;  %v5883_v25 = vadd.s32 8, %v5869_v0 }
 0x123   :  { %vm429_vm13 = vcmp.eq.s32.totalorder %v5871_v10, %v427_v21 }
 0x124   :  { %v163_v27 = vmul.f32 0.3275911, %v161_v26  ;;  %v187_v39 = vsub.f32 0.0, %v161_v26  ;;  %v343_v34 = vadd.s32 2, %v5883_v25 }
 0x126   :  { %v5582_v28 = vpop.eup %5581  ;;  %v165_v30 = vadd.f32 1.0, %v163_v27  ;;  %v189_v45 = vmul.f32 %v187_v39, %v161_v26  ;;  %v156_v27 = vmul.f32 0.5, %v5857_v18  ;;  %v7935_v18 = vmov 0.0  }
 0x127   :  { %v168_v31 = vmul.f32 1.0614054, %v5582_v28  ;;  %v5894_v24 = vsel %vm215_vm5, 1.0, %v7935_v18  ;;  %v5897_v29 = vsel %vm255_vm6, 1.0, %v7935_v18  ;;  %v5906_v32 = vsel %vm302_vm8, 1.0, %v7935_v18 }
 0x128   :  { %5583 = vrcp.f32 %v165_v30  ;;  %v192_v50 = vmul.f32 1.442695, %v189_v45  ;;  %8051 = vst [vmem:[#allocation13_spill] sm:$0xff] %v5894_v24  ;;  %v5902_v30 = vsel %vm344_vm7, 1.0, %v7935_v18  ;;  %vm345_vm11 = vcmp.eq.s32.totalorder %v5871_v10, %v343_v34 }
 0x129   :  { %v170_v33 = vadd.f32 -1.4531521, %v168_v31  ;;  %5585 = vpow2.f32 %v190_v38  ;;  %8052 = vst [vmem:[#allocation14_spill] sm:$0xff] %v5897_v29  ;;  %v214_v31 = vadd.s32 4294967294, %v5883_v25  ;;  %v5932_v38 = vsel %vm345_vm11, 1.0, %v7935_v18 }
 0x12a   :  { %5587 = vpow2.f32 %v192_v50  ;;  %8053 = vst [vmem:[#allocation15_spill] sm:$0xff] %v5902_v30  ;;  %v5955_v50 = vld [vmem:[#allocation2 + $0x6] ss:$0 sm:$0xff] }
 0x12b   :  { %v172_v35 = vmul.f32 %v5582_v28, %v170_v33  ;;  %8054 = vst [vmem:[#allocation16_spill] sm:$0xff] %v5906_v32  ;;  %v254_v33 = vadd.s32 4294967295, %v5883_v25  ;;  %vm216_vm9 = vcmp.eq.s32.totalorder %v5871_v10, %v214_v31  ;;  %v469_v31 = vadd.s32 4294967293, %v5869_v0 }
 0x12d   :  { %v174_v36 = vadd.f32 1.4214138, %v172_v35  ;;  %v301_v35 = vadd.s32 1, %v5883_v25  ;;  %vm256_vm10 = vcmp.eq.s32.totalorder %v5871_v10, %v254_v33  ;;  %vm471_vm15 = vcmp.eq.s32.totalorder %v5871_v10, %v469_v31 }
 0x12e   :  { %v5584_v37 = vpop.eup %5583 }
 0x12f   :  { %v176_v40 = vmul.f32 %v5582_v28, %v174_v36  ;;  %v169_v41 = vmul.f32 1.0614054, %v5584_v37  ;;  %v5586_v53 = vpop.eup %5585  ;;  %vm303_vm12 = vcmp.eq.s32.totalorder %v5871_v10, %v301_v35  ;;  %v5926_v36 = vsel %vm216_vm9, 1.0, %v7935_v18 }
 0x130   :  { %v5588_v61 = vpop.eup %5587  ;;  %v5935_v39 = vsel %vm303_vm12, 1.0, %v7935_v18  ;;  %v5992_v35 = vsel %vm429_vm13, 1.0, %v7935_v18  ;;  %vm869_vm12 = vcmask 261120  }
 0x131   :  { %v178_v43 = vadd.f32 -0.28449672, %v176_v40  ;;  %v171_v44 = vadd.f32 -1.4531521, %v169_v41  ;;  %v5945_v40 = vpop.f32.mrf.mxu1 }
 0x133   :  { %v180_v46 = vmul.f32 %v5582_v28, %v178_v43  ;;  %v173_v47 = vmul.f32 %v5584_v37, %v171_v44  ;;  %v5949_v43 = vld [vmem:[#allocation2 + $0x4] ss:$0 sm:$0xff]  ;;  %v5951_v44 = vld [vmem:[#allocation2 + $0x5] ss:$0 sm:$0xff] }
 0x135   :  { %v182_v48 = vadd.f32 0.2548296, %v180_v46  ;;  %v175_v49 = vadd.f32 1.4214138, %v173_v47 }
 0x137   :  { %v184_v51 = vmul.f32 %v5582_v28, %v182_v48  ;;  %v177_v52 = vmul.f32 %v5584_v37, %v175_v49 }
 0x139   :  { %v194_v54 = vmul.f32 %v5586_v53, %v184_v51  ;;  %v179_v55 = vadd.f32 -0.28449672, %v177_v52  ;;  %v5947_v41 = vpop.f32.mrf.mxu1  ;;  %v5957_v53 = vld [vmem:[#allocation2 + $0x7] ss:$0 sm:$0xff] }
 0x13b   :  { %v181_v56 = vmul.f32 %v5584_v37, %v179_v55  ;;  %v196_v57 = vsub.f32 1.0, %v194_v54 }
 0x13d   :  { %v183_v58 = vadd.f32 0.2548296, %v181_v56  ;;  %v200_v62 = vsub.f32 0.0, %v196_v57 }
 0x13f   :  { %v185_v60 = vmul.f32 %v5584_v37, %v183_v58  ;;  %v202_v2 = vsel %vm198_vm3, %v196_v57, %v200_v62  ;;  %v5929_v37 = vsel %vm256_vm10, 1.0, %v7935_v18 }
 0x140   :  { %v204_v22 = vadd.f32 1.0, %v202_v2 }
 0x141   :  { %v195_v63 = vmul.f32 %v5588_v61, %v185_v60  ;;  %v5964_v61 = vld [vmem:[#allocation2 + $0x10] ss:$0 sm:$0xff] }
 0x142   :  { %v5887_v28 = vmul.f32 %v204_v22, %v156_v27  ;;  %v5973_v27 = vld [vmem:[#allocation2 + $0x11] ss:$0 sm:$0xff] }
 0x143   :  { %v197_v1 = vsub.f32 1.0, %v195_v63 }
 0x144   :  { %v296_v54 = vmul.f32 %v5955_v50, %v5887_v28 }
 0x145   :  { %v201_v6 = vsub.f32 0.0, %v197_v1 }
 0x147   :  { %v203_v17 = vsel %vm199_vm4, %v197_v1, %v201_v6 }
 0x148   :  { %v205_v26 = vadd.f32 1.0, %v203_v17 }
 0x14a   :  { %v5879_v19 = vmul.f32 %v205_v26, %v157_v23  ;;  %v516_v26 = vadd.s32 3, %v5869_v0 }
 0x14c   :  { %241 = vmatpush.msra.mxu3 %v5879_v19  ;;  %281 = vmatpush.msrb.mxu0 %v5879_v19  ;;  %v297_v1 = vmul.f32 %v5955_v50, %v5879_v19  ;;  %vm518_vm14 = vcmp.eq.s32.totalorder %v5871_v10, %v516_v26 }
 0x14d   :  { %328 = vmatpush.msrb.mxu1 %v5879_v19  ;;  %370 = vmatpush.msrb.mxu2 %v5879_v19 }
 0x14e   :  { %242 = vmatpush.msra.mxu3 %v5887_v28  ;;  %282 = vmatpush.msrb.mxu0 %v5887_v28 }
 0x14f   :  { %329 = vmatpush.msrb.mxu1 %v5887_v28  ;;  %371 = vmatpush.msrb.mxu2 %v5887_v28 }
 0x150   :  { %5350 = vmatmul.msk.f32.vlgmr.msra.gmra.mxu3 %vm126_vm2, %v5894_v24  ;;  %5354 = vmatmul.msk.f32.vlgmr.msrb.gmra.mxu0 %vm126_vm2, %v5897_v29 }
 0x151   :  { %5362 = vmatmul.msk.f32.vlgmr.msrb.gmra.mxu2 %vm126_vm2, %v5902_v30  ;;  %5358 = vmatmul.msk.f32.vlgmr.msrb.gmra.mxu1 %vm126_vm2, %v5906_v32 }
 0x158   :  { %5351 = vmatmul.msk.f32.gmra.mxu3 %vm126_vm2, %v5926_v36  ;;  %5355 = vmatmul.msk.f32.gmra.mxu0 %vm126_vm2, %v5929_v37 }
 0x159   :  { %5363 = vmatmul.msk.f32.gmra.mxu2 %vm126_vm2, %v5932_v38  ;;  %5359 = vmatmul.msk.f32.gmra.mxu1 %vm126_vm2, %v5935_v39 }
 0x1cd   :  { %v284_v42 = vpop.f32.mrf.mxu0 }
 0x1ce   :  { %v331_v45 = vpop.f32.mrf.mxu1  ;;  %v291_v48 = vmul.f32 %v5951_v44, %v284_v42  ;;  %v388_v42 = vadd.s32 4294967287, %v5883_v25 }
 0x1cf   :  { %v338_v59 = vmul.f32 %v5957_v53, %v331_v45  ;;  %v5998_v45 = vsel %vm518_vm14, 1.0, %v7935_v18 }
 0x1d0   :  { %vm390_vm0 = vcmp.eq.s32.totalorder %v5871_v10, %v388_v42 }
 0x1d3   :  { %v244_v46 = vpop.f32.mrf.mxu3 }
 0x1d4   :  { %v251_v47 = vmul.f32 %v5949_v43, %v244_v46  ;;  %v373_v49 = vpop.f32.mrf.mxu2  ;;  %v428_v46 = vadd.s32 4294967290, %v5883_v25 }
 0x1d5   :  { %v287_v51 = vpop.f32.mrf.mxu0  ;;  %v380_v12 = vmul.f32 %v5964_v61, %v373_v49  ;;  %v470_v49 = vadd.s32 4294967293, %v5883_v25 }
 0x1d6   :  { %v293_v52 = vadd.f32 %v291_v48, %v251_v47  ;;  %v292_v55 = vmul.f32 %v5951_v44, %v287_v51  ;;  %v334_v57 = vpop.f32.mrf.mxu1  ;;  %v6004_v47 = vsel %vm471_vm15, 1.0, %v7935_v18  ;;  %v517_v48 = vadd.s32 3, %v5883_v25 }
 0x1d7   :  { %v339_v2 = vmul.f32 %v5957_v53, %v334_v57  ;;  %vm430_vm1 = vcmp.eq.s32.totalorder %v5871_v10, %v428_v46  ;;  %v6021_v51 = vsel %vm390_vm0, 1.0, %v7935_v18  ;;  %vm472_vm4 = vcmp.eq.s32.totalorder %v5871_v10, %v470_v49  ;;  %v6084_v46 = vld [vmem:[#allocation2 + $0x15] ss:$0 sm:$0xff] }
 0x1d8   :  { %v298_v58 = vadd.f32 %v296_v54, %v293_v52  ;;  %vm519_vm3 = vcmp.eq.s32.totalorder %v5871_v10, %v517_v48  ;;  %v6025_v52 = vsel %vm430_vm1, 1.0, %v7935_v18  ;;  %v558_v54 = vadd.s32 6, %v5869_v0  ;;  %8062 = vst [vmem:[#allocation24_spill] sm:$0xff] %v6084_v46 }
 0x1d9   :  { %v6035_v57 = vsel %vm472_vm4, 1.0, %v7935_v18 }
 0x1da   :  { %v340_v6 = vadd.f32 %v338_v59, %v298_v58  ;;  %vm560_vm5 = vcmp.eq.s32.totalorder %v5871_v10, %v558_v54  ;;  %v559_v59 = vadd.s32 6, %v5883_v25 }
 0x1db   :  { %v247_v56 = vpop.f32.mrf.mxu3  ;;  %v6046_v58 = vsel %vm560_vm5, 1.0, %v7935_v18 }
 0x1dc   :  { %v252_v60 = vmul.f32 %v5949_v43, %v247_v56  ;;  %v376_v62 = vpop.f32.mrf.mxu2  ;;  %v382_v22 = vadd.f32 %v380_v12, %v340_v6  ;;  %v600_v56 = vadd.s32 9, %v5869_v0  ;;  %8055 = vst [vmem:[#allocation17_spill] sm:$0xff] %v6046_v58  ;;  %vm561_vm7 = vcmp.eq.s32.totalorder %v5871_v10, %v559_v59  ;;  %v6075_v12 = vld [vmem:[#allocation2 + $0x12] ss:$0 sm:$0xff]  ;;  %v6094_v0 = vld [vmem:[#allocation2 + $0x17] ss:$0 sm:$0xff] }
 0x1dd   :  { %v381_v17 = vmul.f32 %v5964_v61, %v376_v62  ;;  %v601_v62 = vadd.s32 9, %v5883_v25  ;;  %v6069_v25 = vld [vmem:[#allocation5 + $0x40] sm:$0xff]  ;;  %8059 = vst [vmem:[#allocation21_spill] sm:$0xff] %v6075_v12 }
 0x1de   :  { %v294_v63 = vadd.f32 %v292_v55, %v252_v60  ;;  %v5981_v34 = vadd.f32 %v5973_v27, %v382_v22  ;;  %v6029_v55 = vsel %vm519_vm3, 1.0, %v7935_v18  ;;  %vm602_vm6 = vcmp.eq.s32.totalorder %v5871_v10, %v600_v56  ;;  %8064 = vst [vmem:[#allocation26_spill] sm:$0xff] %v6094_v0 }
 0x1df   :  { %v6050_v60 = vsel %vm602_vm6, 1.0, %v7935_v18  ;;  %vm603_vm8 = vcmp.eq.s32.totalorder %v5871_v10, %v601_v62  ;;  %v6088_v62 = vld [vmem:[#allocation2 + $0x16] ss:$0 sm:$0xff] }
 0x1e0   :  { %v299_v14 = vadd.f32 %v297_v1, %v294_v63  ;;  %8056 = vst [vmem:[#allocation18_spill] sm:$0xff] %v6050_v60  ;;  %v6060_v63 = vsel %vm561_vm7, 1.0, %v7935_v18  ;;  %v6063_v1 = vsel %vm603_vm8, 1.0, %v7935_v18 }
 0x1e1   :  { %8057 = vst [vmem:[#allocation19_spill] sm:$0xff] %v6060_v63 }
 0x1e2   :  { %v341_v20 = vadd.f32 %v339_v2, %v299_v14  ;;  %8058 = vst [vmem:[#allocation20_spill] sm:$0xff] %v6063_v1  ;;  %v6072_v2 = vld [vmem:[#allocation5 + $0x30] sm:$0xff]  ;;  %v6077_v14 = vld [vmem:[#allocation2 + $0x13] ss:$0 sm:$0xff] }
 0x1e3   :  { %8060 = vst [vmem:[#allocation22_spill] sm:$0xff] %v6077_v14 }
 0x1e4   :  { %v383_v23 = vadd.f32 %v381_v17, %v341_v20  ;;  %8063 = vst [vmem:[#allocation25_spill] sm:$0xff] %v6088_v62 }
 0x1e6   :  { %v5977_v33 = vadd.f32 %v5973_v27, %v383_v23  ;;  %v6081_v23 = vld [vmem:[#allocation2 + $0x14] ss:$0 sm:$0xff] }
 0x1e7   :  { %8061 = vst [vmem:[#allocation23_spill] sm:$0xff] %v6081_v23 }
 0x1e8   :  { %415 = vmatpush.msrb.mxu3 %v5977_v33  ;;  %455 = vmatpush.msra.mxu0 %v5977_v33 }
 0x1e9   :  { %497 = vmatpush.msra.mxu1 %v5977_v33  ;;  %544 = vmatpush.msra.mxu2 %v5977_v33 }
 0x1ea   :  { %416 = vmatpush.msrb.mxu3 %v5981_v34  ;;  %456 = vmatpush.msra.mxu0 %v5981_v34 }
 0x1eb   :  { %498 = vmatpush.msra.mxu1 %v5981_v34  ;;  %545 = vmatpush.msra.mxu2 %v5981_v34 }
 0x1ec   :  { %417 = vmatmul.f32.vlgmr.msrb.gmra.mxu3 %v7935_v18  ;;  %628 = vmatpush.msrb.mxu0 %v5977_v33 }
 0x1ed   :  { %586 = vmatpush.msra.mxu3 %v5977_v33  ;;  %5368 = vmatmul.msk.f32.vlgmr.msra.gmra.mxu0 %vm126_vm2, %v5992_v35 }
 0x1ee   :  { %629 = vmatpush.msrb.mxu0 %v5981_v34  ;;  %5376 = vmatmul.msk.f32.vlgmr.msra.gmra.mxu2 %vm126_vm2, %v5998_v45 }
 0x1ef   :  { %587 = vmatpush.msra.mxu3 %v5981_v34  ;;  %5372 = vmatmul.msk.f32.vlgmr.msra.gmra.mxu1 %vm126_vm2, %v6004_v47 }
 0x1f0   :  { %668 = vmatpush.msrb.mxu1 %v6069_v25 }
 0x1f2   :  { %669 = vmatpush.msrb.mxu1 %v6072_v2 }
 0x1f4   :  { %5365 = vmatmul.msk.f32.gmra.mxu3 %vm126_vm2, %v6021_v51 }
 0x1f5   :  { %5369 = vmatmul.msk.f32.gmra.mxu0 %vm126_vm2, %v6025_v52 }
 0x1f6   :  { %5377 = vmatmul.msk.f32.gmra.mxu2 %vm126_vm2, %v6029_v55 }
 0x1f7   :  { %5373 = vmatmul.msk.f32.gmra.mxu1 %vm126_vm2, %v6035_v57 }
 0x1fc   :  { %5380 = vmatmul.msk.f32.vlgmr.msra.gmra.mxu3 %vm126_vm2, %v6046_v58 }
 0x1fd   :  { %5384 = vmatmul.msk.f32.vlgmr.msrb.gmra.mxu0 %vm126_vm2, %v6050_v60 }
 0x204   :  { %5381 = vmatmul.msk.f32.gmra.mxu3 %vm126_vm2, %v6060_v63 }
 0x205   :  { %5385 = vmatmul.msk.f32.gmra.mxu0 %vm126_vm2, %v6063_v1 }
 0x26a   :  { %v458_v6 = vpop.f32.mrf.mxu0 }
 0x26b   :  { %v465_v22 = vmul.f32 %v6077_v14, %v458_v6  ;;  %v512_v6 = vmul.f32 %v6084_v46, %v5981_v34  ;;  %v513_v34 = vmul.f32 %v6084_v46, %v5977_v33 }
 0x26c   :  { %v500_v20 = vpop.f32.mrf.mxu1 }
 0x26d   :  { %v507_v42 = vmul.f32 %v6081_v23, %v500_v20 }
 0x26f   :  { %v418_v17 = vpop.f32.mrf.mxu3 }
 0x270   :  { %v425_v21 = vmul.f32 %v6075_v12, %v418_v17 }
 0x271   :  { %v547_v48 = vpop.f32.mrf.mxu2 }
 0x272   :  { %v461_v26 = vpop.f32.mrf.mxu0  ;;  %v467_v31 = vadd.f32 %v465_v22, %v425_v21  ;;  %v554_v21 = vmul.f32 %v6088_v62, %v547_v48  ;;  %v6102_v48 = vld [vmem:[#allocation2 + $0x21] ss:$0 sm:$0xff] }
 0x273   :  { %v466_v59 = vmul.f32 %v6077_v14, %v461_v26  ;;  %8066 = vst [vmem:[#allocation28_spill] sm:$0xff] %v6102_v48 }
 0x274   :  { %v509_v54 = vadd.f32 %v507_v42, %v467_v31  ;;  %v503_v17 = vpop.f32.mrf.mxu1  ;;  %v6096_v31 = vld [vmem:[#allocation2 + $0x20] ss:$0 sm:$0xff] }
 0x275   :  { %v508_v22 = vmul.f32 %v6081_v23, %v503_v17  ;;  %8065 = vst [vmem:[#allocation27_spill] sm:$0xff] %v6096_v31 }
 0x276   :  { %v514_v10 = vadd.f32 %v512_v6, %v509_v54 }
 0x277   :  { %v421_v49 = vpop.f32.mrf.mxu3 }
 0x278   :  { %v426_v56 = vmul.f32 %v6075_v12, %v421_v49  ;;  %v556_v49 = vadd.f32 %v554_v21, %v514_v10 }
 0x279   :  { %v550_v1 = vpop.f32.mrf.mxu2 }
 0x27a   :  { %v631_v18 = vpop.f32.mrf.mxu0  ;;  %v468_v20 = vadd.f32 %v466_v59, %v426_v56  ;;  %v555_v59 = vmul.f32 %v6088_v62, %v550_v1  ;;  %v6114_v1 = vld [vmem:[#allocation5 + $0x50] sm:$0xff] }
 0x27b   :  { %v638_v12 = vmul.f32 %v6096_v31, %v631_v18 }
 0x27c   :  { %v510_v26 = vadd.f32 %v508_v22, %v468_v20 }
 0x27e   :  { %v515_v56 = vadd.f32 %v513_v34, %v510_v26 }
 0x27f   :  { %v589_v42 = vpop.f32.mrf.mxu3 }
 0x280   :  { %v596_v14 = vmul.f32 %v6094_v0, %v589_v42  ;;  %v557_v21 = vadd.f32 %v555_v59, %v515_v56  ;;  %v6111_v42 = vld [vmem:[#allocation5 + $0x60] sm:$0xff] }
 0x281   :  { %702 = vmatpush.msrb.mxu2 %v6111_v42  ;;  %v6125_v59 = vld [vmem:[#allocation5 + $0x80] sm:$0xff] }
 0x282   :  { %v598_v54 = vadd.f32 %v596_v14, %v556_v49  ;;  %v634_v6 = vpop.f32.mrf.mxu0  ;;  %741 = vmatpush.msrb.mxu3 %v6125_v59 }
 0x283   :  { %v639_v18 = vmul.f32 %v6096_v31, %v634_v6  ;;  %703 = vmatpush.msrb.mxu2 %v6114_v1 }
 0x284   :  { %v640_v17 = vadd.f32 %v638_v12, %v598_v54  ;;  %v6117_v12 = vld [vmem:[#allocation2 + $0x22] ss:$0 sm:$0xff] }
 0x285   :  { %8067 = vst [vmem:[#allocation29_spill] sm:$0xff] %v6117_v12 }
 0x286   :  { %v643_v23 = vadd.f32 %v6102_v48, %v640_v17  ;;  %v6128_v17 = vld [vmem:[#allocation5 + $0x70] sm:$0xff] }
 0x287   :  { %v592_v10 = vpop.f32.mrf.mxu3  ;;  %742 = vmatpush.msrb.mxu3 %v6128_v17 }
 0x288   :  { %v597_v20 = vmul.f32 %v6094_v0, %v592_v10  ;;  %5386 = vmatmul.msk.f32.vlgmr.msrb.gmra.mxu1 %vm126_vm2, %v643_v23 }
 0x289   :  { %925 = vmatpush.msra.mxu3 %v5822_v3 }
 0x28a   :  { %v599_v22 = vadd.f32 %v597_v20, %v557_v21 }
 0x28b   :  { %926 = vmatpush.msra.mxu3 %v5824_v4 }
 0x28c   :  { %v641_v33 = vadd.f32 %v639_v18, %v599_v22 }
 0x28e   :  { %v644_v14 = vadd.f32 %v6102_v48, %v641_v33 }
 0x290   :  { %5387 = vmatmul.msk.f32.gmra.mxu1 %vm126_vm2, %v644_v14  ;;  %v6150_v14 = vadd.f32 %v5945_v40, %v5828_v5 }
 0x292   :  { %8070 = vst [vmem:[#allocation32_spill] sm:$0xff] %v6150_v14 }
 0x305   :  { %v671_v49 = vpop.f32.mrf.mxu1 }
 0x306   :  { %v672_v23 = vadd.f32 %v671_v49, %v6117_v12 }
 0x308   :  { %v677_v26 = vmul.f32 %v672_v23, %v5887_v28  ;;  %v6133_v28 = vld [vmem:[#allocation2 + $0x23] ss:$0 sm:$0xff] }
 0x309   :  { %8068 = vst [vmem:[#allocation30_spill] sm:$0xff] %v6133_v28 }
 0x30a   :  { %5388 = vmatmul.msk.f32.vlgmr.msrb.gmra.mxu2 %vm126_vm2, %v677_v26  ;;  %v6175_v26 = vld [vmem:[#allocation2 + $0x25] ss:$0 sm:$0xff] }
 0x30b   :  { %8074 = vst [vmem:[#allocation36_spill] sm:$0xff] %v6175_v26 }
 0x30d   :  { %v674_v34 = vpop.f32.mrf.mxu1 }
 0x30e   :  { %v675_v54 = vadd.f32 %v674_v34, %v6117_v12 }
 0x310   :  { %v678_v56 = vmul.f32 %v675_v54, %v5879_v19  ;;  %v6136_v19 = vld [vmem:[#allocation2 + $0x24] ss:$0 sm:$0xff] }
 0x311   :  { %8069 = vst [vmem:[#allocation31_spill] sm:$0xff] %v6136_v19 }
 0x312   :  { %5389 = vmatmul.msk.f32.gmra.mxu2 %vm126_vm2, %v678_v56 }
 0x38d   :  { %v705_v6 = vpop.f32.mrf.mxu2 }
 0x38e   :  { %v706_v10 = vadd.f32 %v705_v6, %v6133_v28 }
 0x390   :  { %v711_v21 = vadd.f32 %v706_v10, %v5840_v11 }
 0x392   :  { %v714_v20 = vmul.f32 %v6136_v19, %v711_v21 }
 0x394   :  { %v6141_v18 = vadd.f32 %v714_v20, %v5833_v8  ;;  %v901_v8 = vmul.f32 %v5830_v7, %v6150_v14 }
 0x395   :  { %v708_v22 = vpop.f32.mrf.mxu2 }
 0x396   :  { %v709_v33 = vadd.f32 %v708_v22, %v6133_v28  ;;  %5390 = vmatmul.msk.f32.vlgmr.msrb.gmra.mxu3 %vm126_vm2, %v6141_v18  ;;  %v6160_v49 = vadd.f32 %v901_v8, %v5835_v9 }
 0x398   :  { %v712_v3 = vadd.f32 %v709_v33, %v5850_v15  ;;  %8071 = vst [vmem:[#allocation33_spill] sm:$0xff] %v6160_v49  ;;  %v6164_v15 = vadd.f32 %v5947_v41, %v5828_v5 }
 0x39a   :  { %v715_v4 = vmul.f32 %v6136_v19, %v712_v3  ;;  %8072 = vst [vmem:[#allocation34_spill] sm:$0xff] %v6164_v15 }
 0x39c   :  { %v6153_v11 = vadd.f32 %v715_v4, %v5845_v13  ;;  %v902_v13 = vmul.f32 %v5830_v7, %v6164_v15  ;;  %v6200_v4 = vld [vmem:[#allocation5 + $0xc0] sm:$0xff] }
 0x39d   :  { %888 = vmatpush.msra.mxu2 %v6200_v4 }
 0x39e   :  { %5391 = vmatmul.msk.f32.gmra.mxu3 %vm126_vm2, %v6153_v11  ;;  %v6171_v40 = vadd.f32 %v902_v13, %v5835_v9 }
 0x3a0   :  { %8073 = vst [vmem:[#allocation35_spill] sm:$0xff] %v6171_v40 }
 0x3a6   :  { %5398 = vmatmul.msk.f32.vlgmr.msra.gmra.mxu3 %vm126_vm2, %v6160_v49 }
 0x3ae   :  { %5399 = vmatmul.msk.f32.gmra.mxu3 %vm126_vm2, %v6171_v40 }
 0x419   :  { %v744_v23 = vpop.f32.mrf.mxu3 }
 0x41a   :  { %v6181_v5 = vadd.f32 %v744_v23, %v6175_v26 }
 0x421   :  { %v747_v34 = vpop.f32.mrf.mxu3 }
 0x422   :  { %v6178_v54 = vadd.f32 %v747_v34, %v6175_v26  ;;  %v6206_v26 = vld [vmem:[#allocation5 + $0xa0] sm:$0xff] }
 0x424   :  { %764 = vmatpush.msra.mxu0 %v6178_v54  ;;  %795 = vmatpush.msra.mxu1 %v6178_v54 }
 0x426   :  { %765 = vmatpush.msra.mxu0 %v6181_v5  ;;  %796 = vmatpush.msra.mxu1 %v6181_v5 }
 0x427   :  { %5392 = vmatmul.msk.f32.vlgmr.msra.gmra.mxu0 %vm126_vm2, %v5897_v29  ;;  %5394 = vmatmul.msk.f32.vlgmr.msra.gmra.mxu1 %vm126_vm2, %v5906_v32 }
 0x429   :  { %v928_v7 = vpop.f32.mrf.mxu3 }
 0x42a   :  { %v6192_v9 = vadd.f32 %v928_v7, %v5854_v16  ;;  %v6203_v7 = vld [vmem:[#allocation5 + $0xb0] sm:$0xff] }
 0x42b   :  { %889 = vmatpush.msra.mxu2 %v6203_v7 }
 0x42c   :  { %v936_v41 = vmul.f32 0.70710677, %v6192_v9 }
 0x42d   :  { %890 = vmatpush.msra.mxu2 %v6206_v26 }
 0x42e   :  { %v938_v56 = vand.u32 2147483647, %v936_v41  ;;  %vm976_vm9 = vcmp.ge.f32.partialorder %v936_v41, 0.0 }
 0x42f   :  { %5393 = vmatmul.msk.f32.gmra.mxu0 %vm126_vm2, %v5929_v37  ;;  %5395 = vmatmul.msk.f32.gmra.mxu1 %vm126_vm2, %v5935_v39 }
 0x430   :  { %v940_v6 = vmul.f32 0.3275911, %v938_v56  ;;  %v964_v13 = vsub.f32 0.0, %v938_v56 }
 0x431   :  { %v931_v10 = vpop.f32.mrf.mxu3 }
 0x432   :  { %v942_v21 = vadd.f32 1.0, %v940_v6  ;;  %v932_v20 = vadd.f32 %v931_v10, %v5854_v16  ;;  %v966_v16 = vmul.f32 %v964_v13, %v938_v56  ;;  %v6209_v10 = vld [vmem:[#allocation5 + $0x90] sm:$0xff] }
 0x433   :  { %891 = vmatpush.msra.mxu2 %v6209_v10 }
 0x434   :  { %5589 = vrcp.f32 %v942_v21  ;;  %v937_v22 = vmul.f32 0.70710677, %v932_v20  ;;  %v968_v40 = vmul.f32 1.442695, %v966_v16 }
 0x436   :  { %v939_v33 = vand.u32 2147483647, %v937_v22  ;;  %vm977_vm10 = vcmp.ge.f32.partialorder %v937_v22, 0.0  ;;  %v6247_v22 = vld [vmem:[#allocation2 + $0x31] ss:$0 sm:$0xff] }
 0x438   :  { %v941_v3 = vmul.f32 0.3275911, %v939_v33  ;;  %v965_v14 = vsub.f32 0.0, %v939_v33 }
 0x43a   :  { %v5590_v8 = vpop.eup %5589  ;;  %v943_v23 = vadd.f32 1.0, %v941_v3 }
 0x43b   :  { %v946_v34 = vmul.f32 1.0614054, %v5590_v8 }
 0x43c   :  { %5591 = vrcp.f32 %v943_v23 }
 0x43d   :  { %v948_v6 = vadd.f32 -1.4531521, %v946_v34  ;;  %5593 = vpow2.f32 %v968_v40  ;;  %v967_v34 = vmul.f32 %v965_v14, %v939_v33  ;;  %v935_v33 = vmul.f32 0.5, %v932_v20 }
 0x43f   :  { %v950_v21 = vmul.f32 %v5590_v8, %v948_v6  ;;  %v970_v31 = vmul.f32 1.442695, %v967_v34 }
 0x441   :  { %v952_v3 = vadd.f32 1.4214138, %v950_v21  ;;  %5595 = vpow2.f32 %v970_v31 }
 0x442   :  { %v5592_v15 = vpop.eup %5591 }
 0x443   :  { %v954_v19 = vmul.f32 %v5590_v8, %v952_v3  ;;  %v947_v49 = vmul.f32 1.0614054, %v5592_v15  ;;  %v5594_v6 = vpop.eup %5593 }
 0x445   :  { %v956_v23 = vadd.f32 -0.28449672, %v954_v19  ;;  %v949_v28 = vadd.f32 -1.4531521, %v947_v49 }
 0x447   :  { %v958_v12 = vmul.f32 %v5590_v8, %v956_v23  ;;  %v951_v48 = vmul.f32 %v5592_v15, %v949_v28  ;;  %v5596_v58 = vpop.eup %5595 }
 0x449   :  { %v960_v56 = vadd.f32 0.2548296, %v958_v12  ;;  %v953_v13 = vadd.f32 1.4214138, %v951_v48 }
 0x44b   :  { %v962_v0 = vmul.f32 %v5590_v8, %v960_v56  ;;  %v955_v62 = vmul.f32 %v5592_v15, %v953_v13 }
 0x44d   :  { %v972_v46 = vmul.f32 %v5594_v6, %v962_v0  ;;  %v957_v63 = vadd.f32 -0.28449672, %v955_v62  ;;  %v934_v0 = vmul.f32 0.5, %v6192_v9 }
 0x44f   :  { %v959_v21 = vmul.f32 %v5592_v15, %v957_v63  ;;  %v974_v16 = vsub.f32 1.0, %v972_v46  ;;  %v6241_v46 = vld [vmem:[#allocation2 + $0x30] ss:$0 sm:$0xff] }
 0x451   :  { %v961_v60 = vadd.f32 0.2548296, %v959_v21  ;;  %v978_v19 = vsub.f32 0.0, %v974_v16 }
 0x453   :  { %v963_v3 = vmul.f32 %v5592_v15, %v961_v60  ;;  %v980_v14 = vsel %vm976_vm9, %v974_v16, %v978_v19  ;;  %v6239_v60 = vld [vmem:[#allocation2 + $0x27] ss:$0 sm:$0xff] }
 0x454   :  { %v982_v12 = vadd.f32 1.0, %v980_v14  ;;  %v777_v41 = vmul.f32 %v6239_v60, %v6181_v5  ;;  %v778_v21 = vmul.f32 %v6239_v60, %v6178_v54 }
 0x455   :  { %v973_v49 = vmul.f32 %v5596_v58, %v963_v3  ;;  %v6237_v58 = vld [vmem:[#allocation2 + $0x26] ss:$0 sm:$0xff] }
 0x456   :  { %v6215_v63 = vmul.f32 %v982_v12, %v934_v0 }
 0x457   :  { %v975_v40 = vsub.f32 1.0, %v973_v49 }
 0x459   :  { %v979_v28 = vsub.f32 0.0, %v975_v40 }
 0x45b   :  { %v981_v48 = vsel %vm977_vm10, %v975_v40, %v979_v28 }
 0x45c   :  { %v983_v8 = vadd.f32 1.0, %v981_v48 }
 0x45e   :  { %v6213_v62 = vmul.f32 %v983_v8, %v935_v33 }
 0x460   :  { %1000 = vmatpush.msrb.mxu0 %v6213_v62  ;;  %1025 = vmatpush.msrb.mxu1 %v6213_v62 }
 0x461   :  { %1056 = vmatpush.msrb.mxu2 %v6213_v62  ;;  %1083 = vmatpush.msrb.mxu3 %v6213_v62 }
 0x462   :  { %1001 = vmatpush.msrb.mxu0 %v6215_v63  ;;  %1026 = vmatpush.msrb.mxu1 %v6215_v63 }
 0x463   :  { %1057 = vmatpush.msrb.mxu2 %v6215_v63  ;;  %1084 = vmatpush.msrb.mxu3 %v6215_v63 }
 0x464   :  { %5400 = vmatmul.msk.f32.vlgmr.msrb.gmra.mxu0 %vm126_vm2, %v5894_v24  ;;  %5402 = vmatmul.msk.f32.vlgmr.msrb.gmra.mxu1 %vm126_vm2, %v5897_v29 }
 0x465   :  { %5406 = vmatmul.msk.f32.vlgmr.msrb.gmra.mxu3 %vm126_vm2, %v5902_v30 }
 0x46c   :  { %5401 = vmatmul.msk.f32.gmra.mxu0 %vm126_vm2, %v5926_v36  ;;  %5403 = vmatmul.msk.f32.gmra.mxu1 %vm126_vm2, %v5929_v37 }
 0x46d   :  { %5407 = vmatmul.msk.f32.gmra.mxu3 %vm126_vm2, %v5932_v38 }
 0x4a4   :  { %v767_v31 = vpop.f32.mrf.mxu0  ;;  %v798_v15 = vpop.f32.mrf.mxu1 }
 0x4a5   :  { %v774_v9 = vmul.f32 %v6237_v58, %v767_v31  ;;  %v805_v36 = vmul.f32 %v6241_v46, %v798_v15 }
 0x4a7   :  { %v779_v20 = vadd.f32 %v777_v41, %v774_v9 }
 0x4a9   :  { %v807_v23 = vadd.f32 %v805_v36, %v779_v20 }
 0x4ab   :  { %v810_v38 = vadd.f32 %v6247_v22, %v807_v23 }
 0x4ac   :  { %v770_v34 = vpop.f32.mrf.mxu0  ;;  %v801_v56 = vpop.f32.mrf.mxu1 }
 0x4ad   :  { %v814_v13 = vmul.f32 0.70710677, %v810_v38  ;;  %v775_v6 = vmul.f32 %v6237_v58, %v770_v34  ;;  %v806_v16 = vmul.f32 %v6241_v46, %v801_v56 }
 0x4af   :  { %v816_v3 = vand.u32 2147483647, %v814_v13  ;;  %v780_v5 = vadd.f32 %v778_v21, %v775_v6  ;;  %vm854_vm11 = vcmp.ge.f32.partialorder %v814_v13, 0.0 }
 0x4b1   :  { %v818_v19 = vmul.f32 0.3275911, %v816_v3  ;;  %v808_v49 = vadd.f32 %v806_v16, %v780_v5  ;;  %v842_v8 = vsub.f32 0.0, %v816_v3 }
 0x4b3   :  { %v820_v40 = vadd.f32 1.0, %v818_v19  ;;  %v811_v14 = vadd.f32 %v6247_v22, %v808_v49  ;;  %v844_v54 = vmul.f32 %v842_v8, %v816_v3 }
 0x4b5   :  { %5597 = vrcp.f32 %v820_v40  ;;  %v815_v28 = vmul.f32 0.70710677, %v811_v14  ;;  %v846_v20 = vmul.f32 1.442695, %v844_v54 }
 0x4b7   :  { %v817_v48 = vand.u32 2147483647, %v815_v28  ;;  %vm855_vm13 = vcmp.ge.f32.partialorder %v815_v28, 0.0 }
 0x4b9   :  { %v819_v12 = vmul.f32 0.3275911, %v817_v48  ;;  %v843_v23 = vsub.f32 0.0, %v817_v48 }
 0x4bb   :  { %v5598_v33 = vpop.eup %5597  ;;  %v821_v0 = vadd.f32 1.0, %v819_v12  ;;  %v845_v16 = vmul.f32 %v843_v23, %v817_v48  ;;  %v812_v48 = vmul.f32 0.5, %v810_v38 }
 0x4bc   :  { %v824_v31 = vmul.f32 1.0614054, %v5598_v33 }
 0x4bd   :  { %5599 = vrcp.f32 %v821_v0  ;;  %v848_v12 = vmul.f32 1.442695, %v845_v16 }
 0x4be   :  { %v826_v15 = vadd.f32 -1.4531521, %v824_v31  ;;  %5601 = vpow2.f32 %v846_v20 }
 0x4bf   :  { %5603 = vpow2.f32 %v848_v12 }
 0x4c0   :  { %v828_v9 = vmul.f32 %v5598_v33, %v826_v15 }
 0x4c2   :  { %v830_v41 = vadd.f32 1.4214138, %v828_v9 }
 0x4c3   :  { %v5600_v36 = vpop.eup %5599 }
 0x4c4   :  { %v832_v34 = vmul.f32 %v5598_v33, %v830_v41  ;;  %v825_v56 = vmul.f32 1.0614054, %v5600_v36  ;;  %v5602_v31 = vpop.eup %5601 }
 0x4c5   :  { %v5604_v20 = vpop.eup %5603 }
 0x4c6   :  { %v834_v6 = vadd.f32 -0.28449672, %v832_v34  ;;  %v827_v21 = vadd.f32 -1.4531521, %v825_v56 }
 0x4c8   :  { %v836_v5 = vmul.f32 %v5598_v33, %v834_v6  ;;  %v829_v19 = vmul.f32 %v5600_v36, %v827_v21 }
 0x4ca   :  { %v838_v49 = vadd.f32 0.2548296, %v836_v5  ;;  %v831_v40 = vadd.f32 1.4214138, %v829_v19  ;;  %v813_v5 = vmul.f32 0.5, %v811_v14 }
 0x4cc   :  { %v840_v30 = vmul.f32 %v5598_v33, %v838_v49  ;;  %v833_v0 = vmul.f32 %v5600_v36, %v831_v40  ;;  %v6261_v40 = vld [vmem:[#allocation2 + $0x32] ss:$0 sm:$0xff] }
 0x4ce   :  { %v850_v3 = vmul.f32 %v5602_v31, %v840_v30  ;;  %v835_v8 = vadd.f32 -0.28449672, %v833_v0 }
 0x4d0   :  { %v852_v15 = vsub.f32 1.0, %v850_v3  ;;  %v837_v54 = vmul.f32 %v5600_v36, %v835_v8 }
 0x4d2   :  { %v856_v9 = vsub.f32 0.0, %v852_v15  ;;  %v839_v41 = vadd.f32 0.2548296, %v837_v54 }
 0x4d4   :  { %v858_v34 = vsel %vm854_vm11, %v852_v15, %v856_v9  ;;  %v841_v56 = vmul.f32 %v5600_v36, %v839_v41 }
 0x4d5   :  { %v860_v23 = vadd.f32 1.0, %v858_v34 }
 0x4d6   :  { %v851_v6 = vmul.f32 %v5604_v20, %v841_v56 }
 0x4d7   :  { %v862_v21 = vmul.f32 %v860_v23, %v812_v48  ;;  %v1038_v23 = vmul.f32 %v6215_v63, %v5955_v50 }
 0x4d8   :  { %v853_v16 = vsub.f32 1.0, %v851_v6 }
 0x4d9   :  { %5396 = vmatmul.msk.f32.vlgmr.msra.gmra.mxu2 %vm869_vm12, %v862_v21 }
 0x4da   :  { %v857_v33 = vsub.f32 0.0, %v853_v16 }
 0x4dc   :  { %v859_v30 = vsel %vm855_vm13, %v853_v16, %v857_v33 }
 0x4dd   :  { %v861_v19 = vadd.f32 1.0, %v859_v30 }
 0x4df   :  { %v863_v49 = vmul.f32 %v861_v19, %v813_v5 }
 0x4e1   :  { %5397 = vmatmul.msk.f32.gmra.mxu2 %vm869_vm12, %v863_v49  ;;  %v1003_v13 = vpop.f32.mrf.mxu0  ;;  %v1028_v36 = vpop.f32.mrf.mxu1 }
 0x4e2   :  { %v1009_v54 = vmul.f32 %v1003_v13, %v5949_v43  ;;  %v1034_v9 = vmul.f32 %v1028_v36, %v5951_v44 }
 0x4e4   :  { %v1036_v20 = vadd.f32 %v1034_v9, %v1009_v54  ;;  %v8080_v54 = vld [vmem:[#allocation21_spill] sm:$0xff] }
 0x4e8   :  { %v1086_v0 = vpop.f32.mrf.mxu3 }
 0x4e9   :  { %5404 = vmatmul.msk.f32.vlgmr.msrb.gmra.mxu2 %vm126_vm2, %v5906_v32  ;;  %v1006_v31 = vpop.f32.mrf.mxu0  ;;  %v1031_v3 = vpop.f32.mrf.mxu1  ;;  %v1092_v5 = vmul.f32 %v1086_v0, %v5964_v61 }
 0x4ea   :  { %v1010_v41 = vmul.f32 %v1006_v31, %v5949_v43  ;;  %v1035_v34 = vmul.f32 %v1031_v3, %v5951_v44  ;;  %v1039_v43 = vmul.f32 %v6213_v62, %v5955_v50  ;;  %v1040_v44 = vadd.f32 %v1038_v23, %v1036_v20 }
 0x4eb   :  { %v8075_v50 = vmov 0.0  }
 0x4ec   :  { %v1037_v48 = vadd.f32 %v1035_v34, %v1010_v41  ;;  %v8081_v41 = vld [vmem:[#allocation22_spill] sm:$0xff] }
 0x4ee   :  { %v1041_v33 = vadd.f32 %v1039_v43, %v1037_v48  ;;  %v8082_v48 = vld [vmem:[#allocation23_spill] sm:$0xff] }
 0x4f0   :  { %v1089_v16 = vpop.f32.mrf.mxu3 }
 0x4f1   :  { %5405 = vmatmul.msk.f32.gmra.mxu2 %vm126_vm2, %v5935_v39  ;;  %v1093_v49 = vmul.f32 %v1089_v16, %v5964_v61  ;;  %v8077_v61 = vld [vmem:[#allocation18_spill] sm:$0xff]  ;;  %v8083_v16 = vld [vmem:[#allocation24_spill] sm:$0xff] }
 0x55c   :  { %v893_v38 = vpop.f32.mrf.mxu2 }
 0x55d   :  { %v894_v8 = vadd.f32 %v893_v38, %v6261_v40 }
 0x564   :  { %v896_v12 = vpop.f32.mrf.mxu2 }
 0x565   :  { %v897_v28 = vadd.f32 %v896_v12, %v6261_v40 }
 0x567   :  { %v6265_v14 = vadd.f32 %v897_v28, %v6153_v11  ;;  %v6275_v11 = vadd.f32 %v894_v8, %v6141_v18 }
 0x569   :  { %v1505_v15 = vsel %vm126_vm2, %v6265_v14, 0.0  ;;  %v1502_v21 = vsel %vm126_vm2, %v6275_v11, 0.0 }
 0x56a   :  { %1506 = vadd.xlane.f32.xlu0 %v1505_v15 }
 0x56c   :  { %v1059_v56 = vpop.f32.mrf.mxu2 }
 0x56d   :  { %v1065_v6 = vmul.f32 %v1059_v56, %v5957_v53 }
 0x56f   :  { %v1067_v18 = vadd.f32 %v1065_v6, %v1040_v44 }
 0x571   :  { %v1094_v13 = vadd.f32 %v1092_v5, %v1067_v18  ;;  %v8084_v5 = vld [vmem:[#allocation25_spill] sm:$0xff] }
 0x572   :  { %1503 = vadd.xlane.f32.xlu0 %v1502_v21 }
 0x573   :  { %v6291_v28 = vadd.f32 %v1094_v13, %v5973_v27 }
 0x574   :  { %v1062_v30 = vpop.f32.mrf.mxu2 }
 0x575   :  { %v1066_v19 = vmul.f32 %v1062_v30, %v5957_v53  ;;  %v8076_v53 = vld [vmem:[#allocation17_spill] sm:$0xff]  ;;  %v1177_v44 = vmul.f32 %v6291_v28, %v8083_v16 }
 0x577   :  { %v1068_v38 = vadd.f32 %v1066_v19, %v1041_v33 }
 0x579   :  { %v1095_v36 = vadd.f32 %v1093_v49, %v1068_v38 }
 0x57b   :  { %v6288_v12 = vadd.f32 %v1095_v36, %v5973_v27  ;;  %v8078_v27 = vld [vmem:[#allocation19_spill] sm:$0xff] }
 0x57d   :  { %1112 = vmatpush.msra.mxu0 %v6288_v12  ;;  %1137 = vmatpush.msra.mxu1 %v6288_v12 }
 0x57e   :  { %1164 = vmatpush.msra.mxu2 %v6288_v12  ;;  %1195 = vmatpush.msra.mxu3 %v6288_v12 }
 0x57f   :  { %1113 = vmatpush.msra.mxu0 %v6291_v28  ;;  %1138 = vmatpush.msra.mxu1 %v6291_v28 }
 0x580   :  { %1165 = vmatpush.msra.mxu2 %v6291_v28  ;;  %1196 = vmatpush.msra.mxu3 %v6291_v28 }
 0x581   :  { %1114 = vmatmul.f32.vlgmr.msra.gmra.mxu0 %v8075_v50  ;;  %5409 = vmatmul.msk.f32.vlgmr.msra.gmra.mxu1 %vm126_vm2, %v5992_v35 }
 0x582   :  { %5411 = vmatmul.msk.f32.vlgmr.msra.gmra.mxu2 %vm126_vm2, %v6004_v47  ;;  %1222 = vmatpush.msrb.mxu0 %v6288_v12 }
 0x583   :  { %1249 = vmatpush.msrb.mxu1 %v6288_v12  ;;  %5413 = vmatmul.msk.f32.vlgmr.msra.gmra.mxu3 %vm126_vm2, %v5998_v45 }
 0x584   :  { %1223 = vmatpush.msrb.mxu0 %v6291_v28  ;;  %1284 = vmatpush.msrb.mxu2 %v6069_v25 }
 0x585   :  { %1250 = vmatpush.msrb.mxu1 %v6291_v28  ;;  %1315 = vmatpush.msrb.mxu3 %v6111_v42 }
 0x586   :  { %1350 = vmatpush.msra.mxu0 %v6125_v59  ;;  %1285 = vmatpush.msrb.mxu2 %v6072_v2 }
 0x587   :  { %1316 = vmatpush.msrb.mxu3 %v6114_v1 }
 0x588   :  { %1351 = vmatpush.msra.mxu0 %v6128_v17 }
 0x589   :  { %5408 = vmatmul.msk.f32.gmra.mxu0 %vm126_vm2, %v6021_v51  ;;  %5410 = vmatmul.msk.f32.gmra.mxu1 %vm126_vm2, %v6025_v52  ;;  %v8079_v51 = vld [vmem:[#allocation20_spill] sm:$0xff]  ;;  %v5782_v52 = vmov 16.0  }
 0x58a   :  { %5412 = vmatmul.msk.f32.gmra.mxu2 %vm126_vm2, %v6035_v57  ;;  %1487 = vmatpush.msra.mxu3 %v6200_v4  ;;  %5605 = vrcp.f32 %v5782_v52 }
 0x58b   :  { %5414 = vmatmul.msk.f32.gmra.mxu3 %vm126_vm2, %v6029_v55 }
 0x58c   :  { %1488 = vmatpush.msra.mxu3 %v6203_v7 }
 0x58e   :  { %1489 = vmatpush.msra.mxu3 %v6206_v26 }
 0x590   :  { %1490 = vmatpush.msra.mxu3 %v6209_v10  ;;  %v5606_v55 = vpop.eup %5605 }
 0x591   :  { %5415 = vmatmul.msk.f32.vlgmr.msrb.gmra.mxu0 %vm126_vm2, %v8076_v53  ;;  %5417 = vmatmul.msk.f32.vlgmr.msrb.gmra.mxu1 %vm126_vm2, %v8077_v61  ;;  %v1509_v57 = vmul.f32 16.0, %v5606_v55  ;;  %vm1513_vm14 = vweird.f32 %v5606_v55 }
 0x593   :  { %v1510_v25 = vsub.f32 1.0, %v1509_v57 }
 0x595   :  { %v1511_v2 = vmul.f32 %v5606_v55, %v1510_v25 }
 0x597   :  { %v1512_v42 = vadd.f32 %v5606_v55, %v1511_v2 }
 0x599   :  { %5416 = vmatmul.msk.f32.gmra.mxu0 %vm126_vm2, %v8078_v27  ;;  %5418 = vmatmul.msk.f32.gmra.mxu1 %vm126_vm2, %v8079_v51  ;;  %v6338_v1 = vsel %vm1513_vm14, %v5606_v55, %v1512_v42  ;;  %v8085_v51 = vld [vmem:[#allocation26_spill] sm:$0xff]  ;;  %v8086_v55 = vld [vmem:[#allocation27_spill] sm:$0xff]  ;;  %v1178_v42 = vmul.f32 %v6288_v12, %v8083_v16 }
 0x5dd   :  { %v1507_v59 = vpop.xlane.xlu0 %1506 }
 0x5de   :  { %v1516_v17 = vmul.f32 %v6338_v1, %v1507_v59 }
 0x5e0   :  { %v6342_v26 = vsub.f32 %v6265_v14, %v1516_v17 }
 0x5e2   :  { %v1520_v4 = vmul.f32 %v6342_v26, %v6342_v26 }
 0x5e4   :  { %v1524_v7 = vsel %vm126_vm2, %v1520_v4, 0.0 }
 0x5e5   :  { %1525 = vadd.xlane.f32.xlu1 %v1524_v7  ;;  %v1504_v10 = vpop.xlane.xlu0 %1503  ;;  %v8087_v7 = vld [vmem:[#allocation28_spill] sm:$0xff] }
 0x5e6   :  { %v1515_v0 = vmul.f32 %v6338_v1, %v1504_v10 }
 0x5e8   :  { %v6349_v31 = vsub.f32 %v6275_v11, %v1515_v0 }
 0x5ea   :  { %v1519_v3 = vmul.f32 %v6349_v31, %v6349_v31 }
 0x5ec   :  { %v1521_v8 = vsel %vm126_vm2, %v1519_v3, 0.0 }
 0x5ed   :  { %1522 = vadd.xlane.f32.xlu1 %v1521_v8 }
 0x5fe   :  { %v1115_v14 = vpop.f32.mrf.mxu0  ;;  %v1140_v15 = vpop.f32.mrf.mxu1 }
 0x5ff   :  { %v1121_v9 = vmul.f32 %v1115_v14, %v8080_v54  ;;  %v1146_v34 = vmul.f32 %v1140_v15, %v8081_v41 }
 0x601   :  { %v1148_v20 = vadd.f32 %v1146_v34, %v1121_v9 }
 0x605   :  { %v1167_v56 = vpop.f32.mrf.mxu2 }
 0x606   :  { %v1173_v23 = vmul.f32 %v1167_v56, %v8082_v48  ;;  %v1118_v6 = vpop.f32.mrf.mxu0  ;;  %v1143_v21 = vpop.f32.mrf.mxu1 }
 0x607   :  { %v1198_v11 = vpop.f32.mrf.mxu3  ;;  %v1122_v33 = vmul.f32 %v1118_v6, %v8080_v54  ;;  %v1147_v30 = vmul.f32 %v1143_v21, %v8081_v41 }
 0x608   :  { %v1175_v43 = vadd.f32 %v1173_v23, %v1148_v20  ;;  %v1204_v19 = vmul.f32 %v1198_v11, %v8084_v5 }
 0x609   :  { %v1149_v38 = vadd.f32 %v1147_v30, %v1122_v33 }
 0x60a   :  { %v1179_v18 = vadd.f32 %v1177_v44, %v1175_v43 }
 0x60c   :  { %v1206_v27 = vadd.f32 %v1204_v19, %v1179_v18  ;;  %v6376_v19 = vld [vmem:[#allocation2 + $0x33] ss:$0 sm:$0xff] }
 0x60d   :  { %v1170_v49 = vpop.f32.mrf.mxu2 }
 0x60e   :  { %v1174_v13 = vmul.f32 %v1170_v49, %v8082_v48  ;;  %v1225_v36 = vpop.f32.mrf.mxu0  ;;  %v1252_v61 = vpop.f32.mrf.mxu1 }
 0x60f   :  { %v1231_v52 = vmul.f32 %v1225_v36, %v8085_v51  ;;  %v1258_v57 = vmul.f32 %v1252_v61, %v8086_v55  ;;  %v1201_v28 = vpop.f32.mrf.mxu3 }
 0x610   :  { %v1176_v25 = vadd.f32 %v1174_v13, %v1149_v38  ;;  %v1205_v17 = vmul.f32 %v1201_v28, %v8084_v5  ;;  %v6379_v13 = vld [vmem:[#allocation2 + $0x34] ss:$0 sm:$0xff] }
 0x611   :  { %v1233_v2 = vadd.f32 %v1231_v52, %v1206_v27  ;;  %v8088_v28 = vld [vmem:[#allocation29_spill] sm:$0xff] }
 0x612   :  { %v1180_v59 = vadd.f32 %v1178_v42, %v1176_v25 }
 0x613   :  { %v1260_v4 = vadd.f32 %v1258_v57, %v1233_v2 }
 0x614   :  { %v1207_v8 = vadd.f32 %v1205_v17, %v1180_v59 }
 0x615   :  { %v1262_v10 = vadd.f32 %v1260_v4, %v8087_v7 }
 0x616   :  { %v1228_v0 = vpop.f32.mrf.mxu0  ;;  %v1255_v3 = vpop.f32.mrf.mxu1 }
 0x617   :  { %v1232_v14 = vmul.f32 %v1228_v0, %v8085_v51  ;;  %5419 = vmatmul.msk.f32.vlgmr.msrb.gmra.mxu2 %vm126_vm2, %v1262_v10  ;;  %v1259_v15 = vmul.f32 %v1255_v3, %v8086_v55  ;;  %v8090_v0 = vld [vmem:[#allocation33_spill] sm:$0xff] }
 0x619   :  { %v1234_v54 = vadd.f32 %v1232_v14, %v1207_v8  ;;  %v8091_v8 = vld [vmem:[#allocation31_spill] sm:$0xff] }
 0x61b   :  { %v1261_v9 = vadd.f32 %v1259_v15, %v1234_v54  ;;  %v8092_v15 = vld [vmem:[#allocation32_spill] sm:$0xff] }
 0x61d   :  { %v1263_v41 = vadd.f32 %v1261_v9, %v8087_v7  ;;  %v8089_v7 = vld [vmem:[#allocation30_spill] sm:$0xff] }
 0x61f   :  { %5420 = vmatmul.msk.f32.gmra.mxu2 %vm126_vm2, %v1263_v41 }
 0x658   :  { %v1526_v12 = vpop.xlane.xlu1 %1525 }
 0x659   :  { %v1528_v34 = vmul.f32 %v1526_v12, %v6338_v1 }
 0x65b   :  { %v1530_v56 = vadd.f32 1e-05, %v1528_v34  ;;  %v8094_v34 = vld [vmem:[#allocation34_spill] sm:$0xff] }
 0x65d   :  { %5607 = vrsqrt.f32 %v1530_v56  ;;  %vm1547_vm0 = vweird.f32 %v1530_v56 }
 0x660   :  { %v1523_v20 = vpop.xlane.xlu1 %1522 }
 0x661   :  { %v1527_v48 = vmul.f32 %v1523_v20, %v6338_v1 }
 0x663   :  { %v5608_v23 = vpop.eup %5607  ;;  %v1529_v6 = vadd.f32 1e-05, %v1527_v48 }
 0x664   :  { %v1542_v21 = vmul.f32 %v5608_v23, %v1530_v56  ;;  %vm1548_vm15 = vweird.f32 %v5608_v23 }
 0x665   :  { %5609 = vrsqrt.f32 %v1529_v6  ;;  %vm1549_vm1 = vmor %vm1547_vm0, %vm1548_vm15  ;;  %vm1537_vm4 = vweird.f32 %v1529_v6 }
 0x666   :  { %v1543_v11 = vmul.f32 %v5608_v23, %v1542_v21 }
 0x668   :  { %v1544_v43 = vmul.f32 0.5, %v1543_v11 }
 0x66a   :  { %v1545_v16 = vsub.f32 1.5, %v1544_v43 }
 0x66b   :  { %v5610_v44 = vpop.eup %5609 }
 0x66c   :  { %v1546_v33 = vmul.f32 %v5608_v23, %v1545_v16  ;;  %v1532_v30 = vmul.f32 %v5610_v44, %v1529_v6  ;;  %vm1538_vm3 = vweird.f32 %v5610_v44 }
 0x66d   :  { %vm1539_vm5 = vmor %vm1537_vm4, %vm1538_vm3  ;;  %vm1953_vm3 = vcmask 64512  }
 0x66e   :  { %v1550_v18 = vsel %vm1549_vm1, %v5608_v23, %v1546_v33  ;;  %v1533_v5 = vmul.f32 %v5610_v44, %v1532_v30  ;;  %v8095_v23 = vld [vmem:[#allocation36_spill] sm:$0xff] }
 0x66f   :  { %v1552_v49 = vmul.f32 %v1550_v18, %v6342_v26 }
 0x670   :  { %v1534_v38 = vmul.f32 0.5, %v1533_v5 }
 0x671   :  { %v1554_v36 = vmul.f32 %v1552_v49, %v6376_v19 }
 0x672   :  { %v1535_v61 = vsub.f32 1.5, %v1534_v38 }
 0x673   :  { %v1556_v27 = vadd.f32 %v1554_v36, %v6379_v13 }
 0x674   :  { %v1536_v51 = vmul.f32 %v5610_v44, %v1535_v61 }
 0x675   :  { %1628 = vmatpush.msrb.mxu0 %v1556_v27 }
 0x676   :  { %v1540_v52 = vsel %vm1539_vm5, %v5610_v44, %v1536_v51 }
 0x677   :  { %v1551_v55 = vmul.f32 %v1540_v52, %v6349_v31 }
 0x679   :  { %v1553_v57 = vmul.f32 %v1551_v55, %v6376_v19 }
 0x67b   :  { %v1555_v26 = vadd.f32 %v1553_v57, %v6379_v13 }
 0x67d   :  { %1629 = vmatpush.msrb.mxu0 %v1555_v26 }
 0x69a   :  { %v1287_v25 = vpop.f32.mrf.mxu2 }
 0x69b   :  { %v1288_v2 = vadd.f32 %v1287_v25, %v8088_v28 }
 0x69d   :  { %v1293_v42 = vmul.f32 %v1288_v2, %v6215_v63 }
 0x69f   :  { %5421 = vmatmul.msk.f32.vlgmr.msrb.gmra.mxu3 %vm126_vm2, %v1293_v42 }
 0x6a2   :  { %v1290_v59 = vpop.f32.mrf.mxu2 }
 0x6a3   :  { %v1291_v17 = vadd.f32 %v1290_v59, %v8088_v28 }
 0x6a5   :  { %v1294_v4 = vmul.f32 %v1291_v17, %v6213_v62  ;;  %v8093_v62 = vld [vmem:[#allocation35_spill] sm:$0xff] }
 0x6a7   :  { %5422 = vmatmul.msk.f32.gmra.mxu3 %vm126_vm2, %v1294_v4 }
 0x722   :  { %v1318_v31 = vpop.f32.mrf.mxu3 }
 0x723   :  { %v1319_v10 = vadd.f32 %v1318_v31, %v8089_v7 }
 0x725   :  { %v1324_v3 = vadd.f32 %v1319_v10, %v8090_v0 }
 0x727   :  { %v1326_v14 = vmul.f32 %v1324_v3, %v8091_v8 }
 0x729   :  { %v6396_v54 = vadd.f32 %v1326_v14, %v8092_v15 }
 0x72a   :  { %v1321_v63 = vpop.f32.mrf.mxu3 }
 0x72b   :  { %v1322_v9 = vadd.f32 %v1321_v63, %v8089_v7  ;;  %5423 = vmatmul.msk.f32.vlgmr.msra.gmra.mxu0 %vm126_vm2, %v6396_v54 }
 0x72c   :  { %1731 = vmatpush.msra.mxu0 %v1556_v27 }
 0x72d   :  { %v1325_v41 = vadd.f32 %v1322_v9, %v8093_v62 }
 0x72e   :  { %1732 = vmatpush.msra.mxu0 %v1555_v26 }
 0x72f   :  { %v1327_v12 = vmul.f32 %v1325_v41, %v8091_v8 }
 0x731   :  { %v6404_v56 = vadd.f32 %v1327_v12, %v8094_v34 }
 0x733   :  { %5424 = vmatmul.msk.f32.gmra.mxu0 %vm126_vm2, %v6404_v56 }
 0x7a8   :  { %v1353_v20 = vpop.f32.mrf.mxu0 }
 0x7a9   :  { %v1354_v21 = vadd.f32 %v1353_v20, %v8095_v23 }
 0x7ab   :  { %v1384_v16 = vmul.f32 %v1354_v21, %v6239_v60 }
 0x7b0   :  { %v1356_v48 = vpop.f32.mrf.mxu0 }
 0x7b1   :  { %v1357_v6 = vadd.f32 %v1356_v48, %v8095_v23 }
 0x7b3   :  { %1373 = vmatpush.msra.mxu1 %v1357_v6  ;;  %1402 = vmatpush.msra.mxu2 %v1357_v6 }
 0x7b5   :  { %1374 = vmatpush.msra.mxu1 %v1354_v21  ;;  %1403 = vmatpush.msra.mxu2 %v1354_v21 }
 0x7b6   :  { %5425 = vmatmul.msk.f32.vlgmr.msra.gmra.mxu1 %vm126_vm2, %v5897_v29  ;;  %5427 = vmatmul.msk.f32.vlgmr.msra.gmra.mxu2 %vm126_vm2, %v5906_v32 }
 0x7b7   :  { %1656 = vmatpush.msrb.mxu1 %v1556_v27 }
 0x7b9   :  { %1657 = vmatpush.msrb.mxu1 %v1555_v26 }
 0x7be   :  { %5426 = vmatmul.msk.f32.gmra.mxu1 %vm126_vm2, %v5929_v37  ;;  %5428 = vmatmul.msk.f32.gmra.mxu2 %vm126_vm2, %v5935_v39  ;;  %v1385_v37 = vmul.f32 %v1357_v6, %v6239_v60 }
 0x833   :  { %v1376_v11 = vpop.f32.mrf.mxu1 }
 0x834   :  { %v1382_v43 = vmul.f32 %v1376_v11, %v6237_v58 }
 0x836   :  { %v1386_v33 = vadd.f32 %v1384_v16, %v1382_v43 }
 0x839   :  { %v1405_v44 = vpop.f32.mrf.mxu2 }
 0x83a   :  { %v1411_v30 = vmul.f32 %v1405_v44, %v6241_v46 }
 0x83b   :  { %v1379_v18 = vpop.f32.mrf.mxu1 }
 0x83c   :  { %v1413_v5 = vadd.f32 %v1411_v30, %v1386_v33  ;;  %v1383_v38 = vmul.f32 %v1379_v18, %v6237_v58 }
 0x83e   :  { %v1415_v49 = vadd.f32 %v1413_v5, %v6247_v22  ;;  %v1387_v27 = vadd.f32 %v1385_v37, %v1383_v38 }
 0x840   :  { %v1419_v36 = vmul.f32 0.70710677, %v1415_v49  ;;  %v1417_v18 = vmul.f32 0.5, %v1415_v49 }
 0x841   :  { %v1408_v61 = vpop.f32.mrf.mxu2 }
 0x842   :  { %v1421_v39 = vand.u32 2147483647, %v1419_v36  ;;  %v1412_v51 = vmul.f32 %v1408_v61, %v6241_v46  ;;  %vm1459_vm6 = vcmp.ge.f32.partialorder %v1419_v36, 0.0 }
 0x844   :  { %v1423_v52 = vmul.f32 0.3275911, %v1421_v39  ;;  %v1414_v55 = vadd.f32 %v1412_v51, %v1387_v27  ;;  %v1447_v59 = vsub.f32 0.0, %v1421_v39 }
 0x846   :  { %v1425_v57 = vadd.f32 1.0, %v1423_v52  ;;  %v1416_v26 = vadd.f32 %v1414_v55, %v6247_v22  ;;  %v1449_v4 = vmul.f32 %v1447_v59, %v1421_v39 }
 0x848   :  { %5611 = vrcp.f32 %v1425_v57  ;;  %v1420_v25 = vmul.f32 0.70710677, %v1416_v26  ;;  %v1451_v46 = vmul.f32 1.442695, %v1449_v4  ;;  %v1418_v51 = vmul.f32 0.5, %v1416_v26  ;;  %v8096_v26 = vld [vmem:[#allocation11_spill] sm:$0xff] }
 0x84a   :  { %v1422_v28 = vand.u32 2147483647, %v1420_v25  ;;  %vm1460_vm7 = vcmp.ge.f32.partialorder %v1420_v25, 0.0 }
 0x84c   :  { %v1424_v2 = vmul.f32 0.3275911, %v1422_v28  ;;  %v1448_v0 = vsub.f32 0.0, %v1422_v28 }
 0x84e   :  { %v5612_v42 = vpop.eup %5611  ;;  %v1426_v58 = vadd.f32 1.0, %v1424_v2  ;;  %v1450_v15 = vmul.f32 %v1448_v0, %v1422_v28 }
 0x84f   :  { %v1429_v17 = vmul.f32 1.0614054, %v5612_v42 }
 0x850   :  { %5613 = vrcp.f32 %v1426_v58  ;;  %v1453_v12 = vmul.f32 1.442695, %v1450_v15  ;;  %v1606_v58 = vmul.u32 2, %v8096_v26 }
 0x851   :  { %v1431_v60 = vadd.f32 -1.4531521, %v1429_v17  ;;  %5615 = vpow2.f32 %v1451_v46 }
 0x852   :  { %5617 = vpow2.f32 %v1453_v12  ;;  %v1607_v17 = vadd.s32 4294967295, %v1606_v58 }
 0x853   :  { %v1433_v31 = vmul.f32 %v5612_v42, %v1431_v60  ;;  %v8097_v60 = vld [vmem:[#allocation12_spill] sm:$0xff] }
 0x854   :  { %vm1636_vm8 = vcmp.eq.s32.totalorder %v8097_v60, %v1606_v58  ;;  %vm1608_vm9 = vcmp.eq.s32.totalorder %v8097_v60, %v1607_v17 }
 0x855   :  { %v1435_v7 = vadd.f32 1.4214138, %v1433_v31  ;;  %v6437_v4 = vsel %vm1636_vm8, 1.0, %v8075_v50 }
 0x856   :  { %v5614_v10 = vpop.eup %5613  ;;  %8098 = vst [vmem:[#allocation17_spill] sm:$0xff] %v6437_v4  ;;  %5434 = vmatmul.msk.f32.vlgmr.msrb.gmra.mxu1 %vm126_vm2, %v6437_v4 }
 0x857   :  { %v1437_v3 = vmul.f32 %v5612_v42, %v1435_v7  ;;  %v1430_v8 = vmul.f32 1.0614054, %v5614_v10  ;;  %v5616_v48 = vpop.eup %5615 }
 0x858   :  { %v5618_v30 = vpop.eup %5617 }
 0x859   :  { %v1439_v14 = vadd.f32 -0.28449672, %v1437_v3  ;;  %v1432_v22 = vadd.f32 -1.4531521, %v1430_v8 }
 0x85b   :  { %v1441_v63 = vmul.f32 %v5612_v42, %v1439_v14  ;;  %v1434_v9 = vmul.f32 %v5614_v10, %v1432_v22 }
 0x85d   :  { %v1443_v62 = vadd.f32 0.2548296, %v1441_v63  ;;  %v1436_v41 = vadd.f32 1.4214138, %v1434_v9  ;;  %v1635_v63 = vld [vmem:[#allocation5 + $0xe0] sm:$0xff]  ;;  %v1662_v9 = vld [vmem:[#allocation5 + $0xf0] sm:$0xff] }
 0x85e   :  { %1704 = vmatpush.msrb.mxu3 %v1635_v63 }
 0x85f   :  { %v1445_v34 = vmul.f32 %v5612_v42, %v1443_v62  ;;  %v1438_v20 = vmul.f32 %v5614_v10, %v1436_v41  ;;  %v1634_v62 = vld [vmem:[#allocation5 + $0xd0] sm:$0xff] }
 0x860   :  { %1705 = vmatpush.msrb.mxu3 %v1634_v62 }
 0x861   :  { %v1455_v23 = vmul.f32 %v5616_v48, %v1445_v34  ;;  %v1440_v6 = vadd.f32 -0.28449672, %v1438_v20 }
 0x863   :  { %v1457_v21 = vsub.f32 1.0, %v1455_v23  ;;  %v1442_v11 = vmul.f32 %v5614_v10, %v1440_v6  ;;  %v1738_v23 = vld [vmem:[#allocation5 + $0x120] sm:$0xff]  ;;  %v1737_v6 = vld [vmem:[#allocation5 + $0x110] sm:$0xff] }
 0x864   :  { %1756 = vmatpush.msra.mxu1 %v1738_v23 }
 0x865   :  { %v1461_v43 = vsub.f32 0.0, %v1457_v21  ;;  %v1444_v16 = vadd.f32 0.2548296, %v1442_v11 }
 0x866   :  { %1757 = vmatpush.msra.mxu1 %v1737_v6 }
 0x867   :  { %v1463_v44 = vsel %vm1459_vm6, %v1457_v21, %v1461_v43  ;;  %v1446_v33 = vmul.f32 %v5614_v10, %v1444_v16  ;;  %vm2336_vm6 = vcmask 523264  }
 0x868   :  { %v1465_v5 = vadd.f32 1.0, %v1463_v44  ;;  %1844 = vmatpush.msrb.mxu1 %v1635_v63 }
 0x869   :  { %v1456_v38 = vmul.f32 %v5618_v30, %v1446_v33 }
 0x86a   :  { %v1467_v37 = vmul.f32 %v1465_v5, %v1417_v18  ;;  %1845 = vmatpush.msrb.mxu1 %v1634_v62 }
 0x86b   :  { %v1458_v61 = vsub.f32 1.0, %v1456_v38 }
 0x86c   :  { %5429 = vmatmul.msk.f32.vlgmr.msra.gmra.mxu3 %vm869_vm12, %v1467_v37 }
 0x86d   :  { %v1462_v39 = vsub.f32 0.0, %v1458_v61 }
 0x86f   :  { %v1464_v27 = vsel %vm1460_vm7, %v1458_v61, %v1462_v39 }
 0x870   :  { %v1466_v52 = vadd.f32 1.0, %v1464_v27 }
 0x872   :  { %v1468_v55 = vmul.f32 %v1466_v52, %v1418_v51 }
 0x874   :  { %5430 = vmatmul.msk.f32.gmra.mxu3 %vm869_vm12, %v1468_v55 }
 0x8d3   :  { %v1659_v12 = vpop.f32.mrf.mxu1 }
 0x8ef   :  { %v1492_v57 = vpop.f32.mrf.mxu3 }
 0x8f0   :  { %v1493_v2 = vadd.f32 %v1492_v57, %v6261_v40 }
 0x8f2   :  { %v1498_v59 = vadd.f32 %v1493_v2, %v6396_v54 }
 0x8f4   :  { %v1557_v25 = vsel %vm126_vm2, %v1498_v59, 0.0 }
 0x8f7   :  { %v1495_v36 = vpop.f32.mrf.mxu3 }
 0x8f8   :  { %v1496_v28 = vadd.f32 %v1495_v36, %v6261_v40  ;;  %v1710_v40 = vadd.s32 1, %v1606_v58 }
 0x8fa   :  { %v1499_v49 = vadd.f32 %v1496_v28, %v6404_v56  ;;  %v6443_v56 = vsel %vm1608_vm9, 1.0, %v8075_v50  ;;  %vm1711_vm10 = vcmp.eq.s32.totalorder %v8097_v60, %v1710_v40 }
 0x8fb   :  { %8099 = vst [vmem:[#allocation18_spill] sm:$0xff] %v6443_v56  ;;  %5432 = vmatmul.msk.f32.vlgmr.msrb.gmra.mxu0 %vm126_vm2, %v6443_v56  ;;  %v6449_v54 = vsel %vm1711_vm10, 1.0, %v8075_v50  ;;  %v1663_v50 = vld [vmem:[#allocation5 + $0x100] sm:$0xff] }
 0x8fc   :  { %v1560_v42 = vsel %vm126_vm2, %v1499_v49, 0.0  ;;  %8100 = vst [vmem:[#allocation19_spill] sm:$0xff] %v6449_v54  ;;  %1681 = vmatpush.msrb.mxu2 %v1663_v50  ;;  %1821 = vmatpush.msrb.mxu0 %v1663_v50  ;;  %v6505_v50 = vld [vmem:[#allocation2 + $0x40] ss:$0 sm:$0xff] }
 0x8fd   :  { %1561 = vadd.xlane.f32.xlu2 %v1560_v42 }
 0x8fe   :  { %1682 = vmatpush.msrb.mxu2 %v1662_v9  ;;  %1822 = vmatpush.msrb.mxu0 %v1662_v9 }
 0x8ff   :  { %5435 = vmatmul.msk.f32.vlgmr.msrb.gmra.mxu2 %vm126_vm2, %v1659_v12 }
 0x903   :  { %5438 = vmatmul.msk.f32.vlgmr.msra.gmra.mxu0 %vm126_vm2, %v6449_v54 }
 0x905   :  { %1558 = vadd.xlane.f32.xlu2 %v1557_v25  ;;  %v6481_v25 = vld [vmem:[#allocation5 + $0x130] sm:$0xff] }
 0x970   :  { %v1562_v31 = vpop.xlane.xlu2 %1561 }
 0x971   :  { %v1564_v7 = vmul.f32 %v1562_v31, %v6338_v1  ;;  %v6484_v31 = vld [vmem:[#allocation2 + $0x35] ss:$0 sm:$0xff] }
 0x973   :  { %v1566_v10 = vsub.f32 %v1499_v49, %v1564_v7 }
 0x975   :  { %v1568_v46 = vmul.f32 %v1566_v10, %v1566_v10 }
 0x977   :  { %v1572_v0 = vsel %vm126_vm2, %v1568_v46, 0.0 }
 0x978   :  { %v1559_v3 = vpop.xlane.xlu2 %1558  ;;  %1573 = vadd.xlane.f32.xlu0 %v1572_v0  ;;  %v1631_v41 = vpop.f32.mrf.mxu0 }
 0x979   :  { %v1563_v8 = vmul.f32 %v1559_v3, %v6338_v1  ;;  %5436 = vmatmul.msk.f32.vlgmr.msrb.gmra.mxu3 %vm126_vm2, %v1631_v41 }
 0x97b   :  { %v1565_v14 = vsub.f32 %v1498_v59, %v1563_v8  ;;  %v6472_v59 = vld [vmem:[#allocation5 + $0x160] sm:$0xff] }
 0x97c   :  { %1919 = vmatpush.msra.mxu0 %v6472_v59  ;;  %v6495_v8 = vld [vmem:[#allocation2 + $0x37] ss:$0 sm:$0xff] }
 0x97d   :  { %v1567_v22 = vmul.f32 %v1565_v14, %v1565_v14 }
 0x97f   :  { %v1569_v15 = vsel %vm126_vm2, %v1567_v22, 0.0 }
 0x980   :  { %1570 = vadd.xlane.f32.xlu1 %v1569_v15  ;;  %v1734_v21 = vpop.f32.mrf.mxu0 }
 0x981   :  { %5439 = vmatmul.msk.f32.vlgmr.msra.gmra.mxu1 %vm126_vm2, %v1734_v21 }
 0x982   :  { %v1684_v26 = vpop.f32.mrf.mxu2 }
 0x9eb   :  { %v1574_v34 = vpop.xlane.xlu0 %1573 }
 0x9ec   :  { %v1576_v20 = vmul.f32 %v1574_v34, %v6338_v1 }
 0x9ee   :  { %v1578_v48 = vadd.f32 1e-05, %v1576_v20 }
 0x9f0   :  { %5619 = vrsqrt.f32 %v1578_v48  ;;  %vm1595_vm13 = vweird.f32 %v1578_v48 }
 0x9f3   :  { %v1571_v11 = vpop.xlane.xlu1 %1570 }
 0x9f4   :  { %v1575_v43 = vmul.f32 %v1571_v11, %v6338_v1 }
 0x9f6   :  { %v5620_v16 = vpop.eup %5619  ;;  %v1577_v44 = vadd.f32 1e-05, %v1575_v43 }
 0x9f7   :  { %v1590_v33 = vmul.f32 %v5620_v16, %v1578_v48  ;;  %vm1596_vm11 = vweird.f32 %v5620_v16 }
 0x9f8   :  { %5621 = vrsqrt.f32 %v1577_v44  ;;  %vm1597_vm14 = vmor %vm1595_vm13, %vm1596_vm11  ;;  %vm1585_vm0 = vweird.f32 %v1577_v44 }
 0x9f9   :  { %v1591_v30 = vmul.f32 %v5620_v16, %v1590_v33 }
 0x9fb   :  { %v1592_v18 = vmul.f32 0.5, %v1591_v30 }
 0x9fc   :  { %v1707_v58 = vpop.f32.mrf.mxu3 }
 0x9fd   :  { %v1593_v5 = vsub.f32 1.5, %v1592_v18  ;;  %v1708_v17 = vadd.f32 %v1707_v58, %v1684_v26  ;;  %v6531_v58 = vld [vmem:[#allocation2 + $0x43] ss:$0 sm:$0xff] }
 0x9fe   :  { %v5622_v38 = vpop.eup %5621  ;;  %v1759_v60 = vpop.f32.mrf.mxu1 }
 0x9ff   :  { %v1594_v37 = vmul.f32 %v5620_v16, %v1593_v5  ;;  %v1580_v61 = vmul.f32 %v5622_v38, %v1577_v44  ;;  %vm1586_vm15 = vweird.f32 %v5622_v38  ;;  %v1762_v40 = vadd.f32 %v1759_v60, %v1708_v17  ;;  %v6533_v60 = vld [vmem:[#allocation2 + $0x44] ss:$0 sm:$0xff] }
 0xa00   :  { %vm1587_vm1 = vmor %vm1585_vm0, %vm1586_vm15  ;;  %vm3164_vm0 = vcmask 1043456  }
 0xa01   :  { %v1598_v39 = vsel %vm1597_vm14, %v5620_v16, %v1594_v37  ;;  %v1581_v27 = vmul.f32 %v5622_v38, %v1580_v61  ;;  %v6487_v7 = vadd.f32 %v1762_v40, %v6484_v31 }
 0xa02   :  { %v1600_v51 = vmul.f32 %v1598_v39, %v1566_v10  ;;  %v6489_v10 = vld [vmem:[#allocation2 + $0x36] ss:$0 sm:$0xff] }
 0xa03   :  { %v1582_v52 = vmul.f32 0.5, %v1581_v27  ;;  %v1896_v3 = vmul.f32 %v6489_v10, %v6487_v7 }
 0xa04   :  { %v1602_v1 = vmul.f32 %v1600_v51, %v6376_v19 }
 0xa05   :  { %v1583_v55 = vsub.f32 1.5, %v1582_v52 }
 0xa06   :  { %v1604_v57 = vadd.f32 %v1602_v1, %v6379_v13 }
 0xa07   :  { %v1584_v36 = vmul.f32 %v5622_v38, %v1583_v55  ;;  %v8101_v55 = vld [vmem:[#allocation15_spill] sm:$0xff] }
 0xa08   :  { %1778 = vmatpush.msra.mxu2 %v1604_v57  ;;  %1798 = vmatpush.msra.mxu3 %v1604_v57 }
 0xa09   :  { %v1588_v28 = vsel %vm1587_vm1, %v5622_v38, %v1584_v36  ;;  %vm3161_vm1 = vcmask 31744  }
 0xa0a   :  { %v1599_v49 = vmul.f32 %v1588_v28, %v1565_v14  ;;  %v6498_v14 = vadd.f32 %v6495_v8, %v1896_v3 }
 0xa0c   :  { %v1601_v2 = vmul.f32 %v1599_v49, %v6376_v19  ;;  %v6474_v19 = vld [vmem:[#allocation5 + $0x150] sm:$0xff] }
 0xa0d   :  { %1920 = vmatpush.msra.mxu0 %v6474_v19  ;;  %v6526_v49 = vld [vmem:[#allocation2 + $0x41] ss:$0 sm:$0xff] }
 0xa0e   :  { %v1603_v42 = vadd.f32 %v1601_v2, %v6379_v13  ;;  %v6477_v13 = vld [vmem:[#allocation5 + $0x140] sm:$0xff]  ;;  %v6528_v2 = vld [vmem:[#allocation2 + $0x42] ss:$0 sm:$0xff] }
 0xa0f   :  { %1921 = vmatpush.msra.mxu0 %v6477_v13 }
 0xa10   :  { %1779 = vmatpush.msra.mxu2 %v1603_v42  ;;  %1799 = vmatpush.msra.mxu3 %v1603_v42 }
 0xa11   :  { %5440 = vmatmul.msk.f32.vlgmr.msra.gmra.mxu2 %vm126_vm2, %v6443_v56  ;;  %5441 = vmatmul.msk.f32.vlgmr.msra.gmra.mxu3 %vm126_vm2, %v6437_v4 }
 0xa12   :  { %1864 = vmatpush.msrb.mxu2 %v1604_v57  ;;  %1887 = vmatpush.msrb.mxu3 %v1738_v23 }
 0xa13   :  { %1922 = vmatpush.msra.mxu0 %v6481_v25 }
 0xa14   :  { %1865 = vmatpush.msrb.mxu2 %v1603_v42  ;;  %1888 = vmatpush.msrb.mxu3 %v1737_v6 }
 0xa19   :  { %5444 = vmatmul.msk.f32.vlgmr.msrb.gmra.mxu2 %vm126_vm2, %v6449_v54 }
 0xa94   :  { %v1781_v46 = vpop.f32.mrf.mxu2  ;;  %v1801_v0 = vpop.f32.mrf.mxu3 }
 0xa95   :  { %5442 = vmatmul.msk.f32.vlgmr.msrb.gmra.mxu0 %vm126_vm2, %v1801_v0  ;;  %5443 = vmatmul.msk.f32.vlgmr.msrb.gmra.mxu1 %vm126_vm2, %v1781_v46  ;;  %v6536_v0 = vld [vmem:[#allocation2 + $0x45] ss:$0 sm:$0xff] }
 0xa9c   :  { %v1867_v22 = vpop.f32.mrf.mxu2 }
 0xa9d   :  { %5445 = vmatmul.msk.f32.vlgmr.msrb.gmra.mxu3 %vm126_vm2, %v1867_v22  ;;  %5446 = vmatmul.msk.f32.vlgmr.msra.gmra.mxu0 %vm869_vm12, %v6498_v14 }
 0xb12   :  { %v6503_v15 = vpop.f32.mrf.mxu0  ;;  %v6522_v57 = vpop.f32.mrf.mxu1 }
 0xb1a   :  { %v1924_v63 = vpop.f32.mrf.mxu0 }
 0xb1b   :  { %v1925_v9 = vadd.f32 %v1924_v63, %v6505_v50 }
 0xb1d   :  { %v1928_v62 = vmul.f32 0.70710677, %v1925_v9  ;;  %v1927_v51 = vmul.f32 0.5, %v1925_v9 }
 0xb1f   :  { %v1929_v41 = vand.u32 2147483647, %v1928_v62  ;;  %vm1948_vm2 = vcmp.ge.f32.partialorder %v1928_v62, 0.0 }
 0xb20   :  { %v6524_v36 = vpop.f32.mrf.mxu3 }
 0xb21   :  { %v1930_v12 = vmul.f32 0.3275911, %v1929_v41  ;;  %v1942_v48 = vsub.f32 0.0, %v1929_v41 }
 0xb23   :  { %v1931_v34 = vadd.f32 1.0, %v1930_v12  ;;  %v1943_v21 = vmul.f32 %v1942_v48, %v1929_v41  ;;  %v6542_v12 = vld [vmem:[#allocation2 + $0x46] ss:$0 sm:$0xff]  ;;  %v6553_v48 = vld [vmem:[#allocation5 + $0x1a0] sm:$0xff] }
 0xb25   :  { %5623 = vrcp.f32 %v1931_v34  ;;  %v1944_v16 = vmul.f32 1.442695, %v1943_v21  ;;  %v6562_v21 = vld [vmem:[#allocation5 + $0x170] sm:$0xff] }
 0xb27   :  { %5625 = vpow2.f32 %v1944_v16  ;;  %v6568_v16 = vld [vmem:[#allocation2 + $0x50] ss:$0 sm:$0xff] }
 0xb2b   :  { %v5624_v20 = vpop.eup %5623 }
 0xb2c   :  { %v1933_v23 = vmul.f32 1.0614054, %v5624_v20 }
 0xb2d   :  { %v5626_v38 = vpop.eup %5625 }
 0xb2e   :  { %v1934_v6 = vadd.f32 -1.4531521, %v1933_v23  ;;  %v6556_v23 = vld [vmem:[#allocation5 + $0x190] sm:$0xff] }
 0xb30   :  { %v1935_v11 = vmul.f32 %v5624_v20, %v1934_v6  ;;  %v6559_v6 = vld [vmem:[#allocation5 + $0x180] sm:$0xff] }
 0xb32   :  { %v1936_v43 = vadd.f32 1.4214138, %v1935_v11  ;;  %v6565_v11 = vld [vmem:[#allocation5 + $0x1e0] sm:$0xff] }
 0xb34   :  { %v1937_v44 = vmul.f32 %v5624_v20, %v1936_v43 }
 0xb36   :  { %v1938_v33 = vadd.f32 -0.28449672, %v1937_v44  ;;  %v6570_v44 = vld [vmem:[#allocation2 + $0x51] ss:$0 sm:$0xff] }
 0xb38   :  { %v1939_v30 = vmul.f32 %v5624_v20, %v1938_v33 }
 0xb3a   :  { %v1940_v18 = vadd.f32 0.2548296, %v1939_v30 }
 0xb3c   :  { %v1941_v5 = vmul.f32 %v5624_v20, %v1940_v18  ;;  %v6573_v18 = vld [vmem:[#allocation2 + $0x52] ss:$0 sm:$0xff] }
 0xb3e   :  { %v1946_v37 = vmul.f32 %v5626_v38, %v1941_v5  ;;  %v6575_v38 = vld [vmem:[#allocation2 + $0x53] ss:$0 sm:$0xff] }
 0xb40   :  { %v1947_v61 = vsub.f32 1.0, %v1946_v37 }
 0xb42   :  { %v1949_v39 = vsub.f32 0.0, %v1947_v61 }
 0xb44   :  { %v1950_v27 = vsel %vm1948_vm2, %v1947_v61, %v1949_v39  ;;  %v6578_v39 = vld [vmem:[#allocation2 + $0x54] ss:$0 sm:$0xff] }
 0xb45   :  { %v1951_v52 = vadd.f32 1.0, %v1950_v27 }
 0xb47   :  { %v6508_v1 = vmul.f32 %v1951_v52, %v1927_v51 }
 0xb49   :  { %1971 = vmatpush.msra.mxu1 %v6508_v1  ;;  %1995 = vmatpush.msra.mxu2 %v6508_v1  ;;  %v2004_v22 = vmul.f32 %v6531_v58, %v6508_v1 }
 0xb4a   :  { %2023 = vmatpush.msra.mxu3 %v6508_v1  ;;  %2048 = vmatpush.msrb.mxu0 %v6508_v1 }
 0xb4b   :  { %5448 = vmatmul.msk.f32.vlgmr.msra.gmra.mxu2 %vm1953_vm3, %v5897_v29  ;;  %5449 = vmatmul.msk.f32.vlgmr.msra.gmra.mxu3 %vm1953_vm3, %v5906_v32 }
 0xb4c   :  { %5447 = vmatmul.msk.f32.vlgmr.msra.gmra.mxu1 %vm1953_vm3, %v5894_v24  ;;  %5450 = vmatmul.msk.f32.vlgmr.msrb.gmra.mxu0 %vm1953_vm3, %v8101_v55 }
 0xbc9   :  { %v1973_v28 = vpop.f32.mrf.mxu1  ;;  %v2050_v46 = vpop.f32.mrf.mxu0 }
 0xbca   :  { %v1977_v42 = vmul.f32 %v6526_v49, %v1973_v28  ;;  %v2054_v62 = vmul.f32 %v6536_v0, %v2050_v46 }
 0xbce   :  { %v1997_v26 = vpop.f32.mrf.mxu2  ;;  %v2025_v17 = vpop.f32.mrf.mxu3 }
 0xbcf   :  { %v2001_v40 = vmul.f32 %v6528_v2, %v1997_v26  ;;  %v2029_v63 = vmul.f32 %v6533_v60, %v2025_v17  ;;  %v6583_v17 = vld [vmem:[#allocation2 + $0x56] ss:$0 sm:$0xff] }
 0xbd1   :  { %v2002_v3 = vadd.f32 %v2001_v40, %v1977_v42 }
 0xbd3   :  { %v2005_v9 = vadd.f32 %v2004_v22, %v2002_v3  ;;  %v6587_v3 = vld [vmem:[#allocation5 + $0x1d0] sm:$0xff]  ;;  %v6590_v22 = vld [vmem:[#allocation5 + $0x1c0] sm:$0xff] }
 0xbd5   :  { %v2030_v41 = vadd.f32 %v2029_v63, %v2005_v9  ;;  %v6593_v63 = vld [vmem:[#allocation5 + $0x1b0] sm:$0xff]  ;;  %v6596_v9 = vld [vmem:[#allocation2 + $0x57] ss:$0 sm:$0xff] }
 0xbd7   :  { %v2055_v34 = vadd.f32 %v2054_v62, %v2030_v41 }
 0xbd9   :  { %v2057_v20 = vadd.f32 %v6542_v12, %v2055_v34 }
 0xbdb   :  { %2075 = vmatpush.msrb.mxu1 %v2057_v20  ;;  %2099 = vmatpush.msrb.mxu2 %v2057_v20  ;;  %v2108_v51 = vmul.f32 %v6573_v18, %v2057_v20 }
 0xbdc   :  { %2127 = vmatpush.msrb.mxu3 %v2057_v20  ;;  %2152 = vmatpush.msra.mxu0 %v2057_v20  ;;  %v6601_v20 = vld [vmem:[#allocation5 + $0x220] sm:$0xff] }
 0xbdd   :  { %5452 = vmatmul.msk.f32.vlgmr.msrb.gmra.mxu2 %vm1953_vm3, %v6004_v47  ;;  %5453 = vmatmul.msk.f32.vlgmr.msrb.gmra.mxu3 %vm1953_vm3, %v5998_v45 }
 0xbde   :  { %5451 = vmatmul.msk.f32.vlgmr.msrb.gmra.mxu1 %vm1953_vm3, %v5992_v35  ;;  %5454 = vmatmul.msk.f32.vlgmr.msra.gmra.mxu0 %vm1953_vm3, %v8076_v53 }
 0xbdf   :  { %2182 = vmatpush.msra.mxu1 %v6553_v48  ;;  %2211 = vmatpush.msra.mxu2 %v6565_v11 }
 0xbe0   :  { %2243 = vmatpush.msra.mxu3 %v6601_v20 }
 0xbe1   :  { %2183 = vmatpush.msra.mxu1 %v6556_v23  ;;  %2212 = vmatpush.msra.mxu2 %v6587_v3 }
 0xbe3   :  { %2184 = vmatpush.msra.mxu1 %v6559_v6  ;;  %2213 = vmatpush.msra.mxu2 %v6590_v22 }
 0xbe5   :  { %2185 = vmatpush.msra.mxu1 %v6562_v21  ;;  %2214 = vmatpush.msra.mxu2 %v6593_v63 }
 0xc5b   :  { %v2077_v43 = vpop.f32.mrf.mxu1  ;;  %v2154_v61 = vpop.f32.mrf.mxu0 }
 0xc5c   :  { %v2081_v33 = vmul.f32 %v6568_v16, %v2077_v43  ;;  %v2158_v42 = vmul.f32 %v6578_v39, %v2154_v61  ;;  %v6604_v43 = vld [vmem:[#allocation5 + $0x210] sm:$0xff] }
 0xc5d   :  { %2244 = vmatpush.msra.mxu3 %v6604_v43 }
 0xc60   :  { %v2101_v30 = vpop.f32.mrf.mxu2  ;;  %v2129_v5 = vpop.f32.mrf.mxu3 }
 0xc61   :  { %v2105_v37 = vmul.f32 %v6570_v44, %v2101_v30  ;;  %v2133_v52 = vmul.f32 %v6575_v38, %v2129_v5  ;;  %v6610_v30 = vld [vmem:[#allocation5 + $0x1f0] sm:$0xff] }
 0xc63   :  { %v2106_v27 = vadd.f32 %v2105_v37, %v2081_v33  ;;  %v6607_v33 = vld [vmem:[#allocation5 + $0x200] sm:$0xff]  ;;  %v1848_v37 = vadd.f32 %v6522_v57, %v6503_v15 }
 0xc64   :  { %2245 = vmatpush.msra.mxu3 %v6607_v33 }
 0xc65   :  { %v2109_v28 = vadd.f32 %v2108_v51, %v2106_v27  ;;  %v6622_v27 = vld [vmem:[#allocation2 + $0x61] ss:$0 sm:$0xff]  ;;  %v1893_v51 = vadd.f32 %v6524_v36, %v1848_v37 }
 0xc66   :  { %2246 = vmatpush.msra.mxu3 %v6610_v30  ;;  %8102 = vst [vmem:[#allocation20_spill] sm:$0xff] %v6622_v27 }
 0xc67   :  { %v2134_v26 = vadd.f32 %v2133_v52, %v2109_v28 }
 0xc68   :  { %2378 = vmatpush.msrb.mxu3 %v6472_v59 }
 0xc69   :  { %v2159_v40 = vadd.f32 %v2158_v42, %v2134_v26 }
 0xc6a   :  { %2379 = vmatpush.msrb.mxu3 %v6474_v19 }
 0xc6b   :  { %v2161_v46 = vadd.f32 %v6583_v17, %v2159_v40 }
 0xc6c   :  { %2380 = vmatpush.msrb.mxu3 %v6477_v13  ;;  %v6628_v13 = vadd.f32 %v1893_v51, %v6484_v31 }
 0xc6d   :  { %5455 = vmatmul.msk.f32.vlgmr.msra.gmra.mxu1 %vm869_vm12, %v2161_v46 }
 0xc6e   :  { %2381 = vmatpush.msrb.mxu3 %v6481_v25  ;;  %8103 = vst [vmem:[#allocation21_spill] sm:$0xff] %v6628_v13  ;;  %v2361_v15 = vmul.f32 %v6489_v10, %v6628_v13 }
 0xc70   :  { %v6638_v57 = vadd.f32 %v2361_v15, %v6495_v8 }
 0xcea   :  { %v2187_v62 = vpop.f32.mrf.mxu1 }
 0xceb   :  { %v2188_v41 = vadd.f32 %v2187_v62, %v6596_v9 }
 0xced   :  { %v2190_v34 = vmul.f32 %v2188_v41, %v6508_v1  ;;  %v6617_v1 = vld [vmem:[#allocation2 + $0x60] ss:$0 sm:$0xff] }
 0xcef   :  { %5456 = vmatmul.msk.f32.vlgmr.msra.gmra.mxu2 %vm869_vm12, %v2190_v34 }
 0xd72   :  { %v2216_v5 = vpop.f32.mrf.mxu2 }
 0xd73   :  { %v2217_v61 = vadd.f32 %v2216_v5, %v6617_v1 }
 0xd75   :  { %v2219_v59 = vadd.f32 %v2217_v61, %v6498_v14  ;;  %v6642_v14 = vld [vmem:[#allocation2 + $0x62] ss:$0 sm:$0xff] }
 0xd76   :  { %8104 = vst [vmem:[#allocation22_spill] sm:$0xff] %v6642_v14 }
 0xd77   :  { %v2221_v19 = vmul.f32 %v6622_v27, %v2219_v59 }
 0xd79   :  { %v6631_v25 = vadd.f32 %v2221_v19, %v6487_v7 }
 0xd7b   :  { %5457 = vmatmul.msk.f32.vlgmr.msra.gmra.mxu3 %vm869_vm12, %v6631_v25 }
 0xd83   :  { %5461 = vmatmul.msk.f32.vlgmr.msrb.gmra.mxu3 %vm869_vm12, %v6638_v57 }
 0xdfe   :  { %v2248_v36 = vpop.f32.mrf.mxu3 }
 0xdff   :  { %v2249_v31 = vadd.f32 %v2248_v36, %v6642_v14 }
 0xe01   :  { %2266 = vmatpush.msrb.mxu0 %v2249_v31  ;;  %2291 = vmatpush.msrb.mxu1 %v2249_v31 }
 0xe02   :  { %5458 = vmatmul.msk.f32.vlgmr.msrb.gmra.mxu0 %vm1953_vm3, %v5897_v29  ;;  %5459 = vmatmul.msk.f32.vlgmr.msrb.gmra.mxu1 %vm1953_vm3, %v5906_v32 }
 0xe06   :  { %v2383_v7 = vpop.f32.mrf.mxu3 }
 0xe07   :  { %v2384_v10 = vadd.f32 %v2383_v7, %v6505_v50 }
 0xe09   :  { %v2387_v8 = vmul.f32 0.70710677, %v2384_v10 }
 0xe0b   :  { %v2388_v52 = vand.u32 2147483647, %v2387_v8  ;;  %vm2407_vm4 = vcmp.ge.f32.partialorder %v2387_v8, 0.0 }
 0xe0d   :  { %v2389_v28 = vmul.f32 0.3275911, %v2388_v52  ;;  %v2401_v40 = vsub.f32 0.0, %v2388_v52 }
 0xe0f   :  { %v2390_v42 = vadd.f32 1.0, %v2389_v28  ;;  %v2402_v41 = vmul.f32 %v2401_v40, %v2388_v52 }
 0xe11   :  { %5627 = vrcp.f32 %v2390_v42  ;;  %v2403_v37 = vmul.f32 1.442695, %v2402_v41  ;;  %v2386_v42 = vmul.f32 0.5, %v2384_v10  ;;  %v6668_v10 = vld [vmem:[#allocation2 + $0x65] ss:$0 sm:$0xff] }
 0xe12   :  { %8107 = vst [vmem:[#allocation25_spill] sm:$0xff] %v6668_v10  ;;  %v6673_v41 = vld [vmem:[#allocation2 + $0x66] ss:$0 sm:$0xff] }
 0xe13   :  { %5629 = vpow2.f32 %v2403_v37  ;;  %8108 = vst [vmem:[#allocation26_spill] sm:$0xff] %v6673_v41  ;;  %v6676_v37 = vld [vmem:[#allocation5 + $0x2a0] sm:$0xff] }
 0xe14   :  { %2348 = vmatpush.msrb.mxu2 %v6676_v37 }
 0xe17   :  { %v5628_v26 = vpop.eup %5627 }
 0xe18   :  { %v2392_v46 = vmul.f32 1.0614054, %v5628_v26 }
 0xe19   :  { %v5630_v50 = vpop.eup %5629 }
 0xe1a   :  { %v2393_v62 = vadd.f32 -1.4531521, %v2392_v46 }
 0xe1c   :  { %v2394_v34 = vmul.f32 %v5628_v26, %v2393_v62 }
 0xe1e   :  { %v2395_v5 = vadd.f32 1.4214138, %v2394_v34 }
 0xe20   :  { %v2396_v61 = vmul.f32 %v5628_v26, %v2395_v5 }
 0xe22   :  { %v2397_v51 = vadd.f32 -0.28449672, %v2396_v61 }
 0xe24   :  { %v2398_v59 = vmul.f32 %v5628_v26, %v2397_v51  ;;  %v6679_v51 = vld [vmem:[#allocation5 + $0x290] sm:$0xff] }
 0xe25   :  { %2349 = vmatpush.msrb.mxu2 %v6679_v51 }
 0xe26   :  { %v2399_v19 = vadd.f32 0.2548296, %v2398_v59 }
 0xe28   :  { %v2400_v15 = vmul.f32 %v5628_v26, %v2399_v19  ;;  %v6682_v19 = vld [vmem:[#allocation5 + $0x280] sm:$0xff] }
 0xe29   :  { %2350 = vmatpush.msrb.mxu2 %v6682_v19 }
 0xe2a   :  { %v2405_v36 = vmul.f32 %v5630_v50, %v2400_v15  ;;  %v6685_v15 = vld [vmem:[#allocation5 + $0x270] sm:$0xff] }
 0xe2b   :  { %2351 = vmatpush.msrb.mxu2 %v6685_v15 }
 0xe2c   :  { %v2406_v7 = vsub.f32 1.0, %v2405_v36  ;;  %v6688_v36 = vld [vmem:[#allocation5 + $0x260] sm:$0xff] }
 0xe2d   :  { %2352 = vmatpush.msrb.mxu2 %v6688_v36 }
 0xe2e   :  { %v2408_v54 = vsub.f32 0.0, %v2406_v7 }
 0xe30   :  { %v2409_v28 = vsel %vm2407_vm4, %v2406_v7, %v2408_v54  ;;  %v6666_v54 = vld [vmem:[#allocation2 + $0x64] ss:$0 sm:$0xff]  ;;  %vm3909_vm4 = vcmask 519168  }
 0xe31   :  { %v2410_v4 = vadd.f32 1.0, %v2409_v28  ;;  %8106 = vst [vmem:[#allocation24_spill] sm:$0xff] %v6666_v54  ;;  %v2274_v40 = vmul.f32 %v6666_v54, %v2249_v31  ;;  %v6691_v7 = vld [vmem:[#allocation5 + $0x250] sm:$0xff]  ;;  %v6694_v28 = vld [vmem:[#allocation5 + $0x240] sm:$0xff] }
 0xe32   :  { %2353 = vmatpush.msrb.mxu2 %v6691_v7 }
 0xe33   :  { %v6650_v14 = vmul.f32 %v2410_v4, %v2386_v42  ;;  %v6664_v4 = vld [vmem:[#allocation2 + $0x63] ss:$0 sm:$0xff] }
 0xe34   :  { %8105 = vst [vmem:[#allocation23_spill] sm:$0xff] %v6664_v4  ;;  %v6696_v42 = vld [vmem:[#allocation5 + $0x230] sm:$0xff]  ;;  %2354 = vmatpush.msrb.mxu2 %v6694_v28 }
 0xe35   :  { %2427 = vmatpush.msra.mxu0 %v6650_v14  ;;  %2448 = vmatpush.msra.mxu1 %v6650_v14 }
 0xe36   :  { %2472 = vmatpush.msra.mxu3 %v6650_v14  ;;  %5462 = vmatmul.msk.f32.vlgmr.msra.gmra.mxu0 %vm1953_vm3, %v5894_v24 }
 0xe37   :  { %5463 = vmatmul.msk.f32.vlgmr.msra.gmra.mxu1 %vm1953_vm3, %v5897_v29  ;;  %5464 = vmatmul.msk.f32.vlgmr.msra.gmra.mxu3 %vm1953_vm3, %v5906_v32 }
 0xe38   :  { %2494 = vmatpush.msrb.mxu0 %v6650_v14  ;;  %2355 = vmatpush.msrb.mxu2 %v6696_v42 }
 0xe3e   :  { %5465 = vmatmul.msk.f32.vlgmr.msrb.gmra.mxu0 %vm1953_vm3, %v8101_v55 }
 0xe7f   :  { %v2268_v8 = vpop.f32.mrf.mxu0  ;;  %v2293_v52 = vpop.f32.mrf.mxu1 }
 0xe80   :  { %v2272_v26 = vmul.f32 %v6664_v4, %v2268_v8  ;;  %v2297_v46 = vmul.f32 %v6668_v10, %v2293_v52 }
 0xe82   :  { %v2275_v62 = vadd.f32 %v2274_v40, %v2272_v26 }
 0xe84   :  { %v2298_v34 = vadd.f32 %v2297_v46, %v2275_v62 }
 0xe86   :  { %v2300_v5 = vadd.f32 %v6673_v41, %v2298_v34 }
 0xe88   :  { %v2302_v61 = vmul.f32 0.70710677, %v2300_v5  ;;  %v2301_v13 = vmul.f32 0.5, %v2300_v5 }
 0xe8a   :  { %v2303_v59 = vand.u32 2147483647, %v2302_v61  ;;  %vm2322_vm5 = vcmp.ge.f32.partialorder %v2302_v61, 0.0 }
 0xe8c   :  { %v2304_v31 = vmul.f32 0.3275911, %v2303_v59  ;;  %v2316_v52 = vsub.f32 0.0, %v2303_v59 }
 0xe8e   :  { %v2305_v50 = vadd.f32 1.0, %v2304_v31  ;;  %v2317_v46 = vmul.f32 %v2316_v52, %v2303_v59 }
 0xe90   :  { %5631 = vrcp.f32 %v2305_v50  ;;  %v2318_v31 = vmul.f32 1.442695, %v2317_v46 }
 0xe92   :  { %5633 = vpow2.f32 %v2318_v31 }
 0xe96   :  { %v5632_v8 = vpop.eup %5631 }
 0xe97   :  { %v2307_v26 = vmul.f32 1.0614054, %v5632_v8 }
 0xe98   :  { %v5634_v54 = vpop.eup %5633 }
 0xe99   :  { %v2308_v40 = vadd.f32 -1.4531521, %v2307_v26 }
 0xe9b   :  { %v2309_v62 = vmul.f32 %v5632_v8, %v2308_v40 }
 0xe9d   :  { %v2310_v34 = vadd.f32 1.4214138, %v2309_v62 }
 0xe9f   :  { %v2311_v50 = vmul.f32 %v5632_v8, %v2310_v34 }
 0xea1   :  { %v2312_v55 = vadd.f32 -0.28449672, %v2311_v50 }
 0xea3   :  { %v2313_v24 = vmul.f32 %v5632_v8, %v2312_v55 }
 0xea5   :  { %v2314_v41 = vadd.f32 0.2548296, %v2313_v24 }
 0xea7   :  { %v2315_v10 = vmul.f32 %v5632_v8, %v2314_v41 }
 0xea9   :  { %v2320_v4 = vmul.f32 %v5634_v54, %v2315_v10  ;;  %v2455_v54 = vmul.f32 %v6650_v14, %v6531_v58 }
 0xeab   :  { %v2321_v32 = vsub.f32 1.0, %v2320_v4 }
 0xead   :  { %v2323_v29 = vsub.f32 0.0, %v2321_v32 }
 0xeaf   :  { %v2324_v56 = vsel %vm2322_vm5, %v2321_v32, %v2323_v29 }
 0xeb0   :  { %v2325_v27 = vadd.f32 1.0, %v2324_v56 }
 0xeb2   :  { %v2326_v26 = vmul.f32 %v2325_v27, %v2301_v13 }
 0xeb3   :  { %v2429_v59 = vpop.f32.mrf.mxu0 }
 0xeb4   :  { %v2432_v52 = vmul.f32 %v2429_v59, %v6526_v49  ;;  %v2450_v40 = vpop.f32.mrf.mxu1  ;;  %5460 = vmatmul.msk.f32.vlgmr.msrb.gmra.mxu2 %vm2336_vm6, %v2326_v26  ;;  %v6758_v59 = vld [vmem:[#allocation2 + $0x71] ss:$0 sm:$0xff] }
 0xeb5   :  { %v2453_v55 = vmul.f32 %v2450_v40, %v6528_v2 }
 0xeb7   :  { %v2454_v24 = vadd.f32 %v2453_v55, %v2432_v52 }
 0xeb9   :  { %v2456_v10 = vadd.f32 %v2455_v54, %v2454_v24 }
 0xeba   :  { %v2474_v4 = vpop.f32.mrf.mxu3 }
 0xebb   :  { %v2477_v29 = vmul.f32 %v2474_v4, %v6533_v60  ;;  %v2496_v32 = vpop.f32.mrf.mxu0  ;;  %v8109_v4 = vld [vmem:[#allocation20_spill] sm:$0xff] }
 0xebc   :  { %v2499_v56 = vmul.f32 %v2496_v32, %v6536_v0 }
 0xebd   :  { %v2478_v27 = vadd.f32 %v2477_v29, %v2456_v10  ;;  %v8110_v29 = vld [vmem:[#allocation21_spill] sm:$0xff] }
 0xebf   :  { %v2500_v13 = vadd.f32 %v2499_v56, %v2478_v27  ;;  %v8111_v56 = vld [vmem:[#allocation18_spill] sm:$0xff] }
 0xec1   :  { %v2501_v49 = vadd.f32 %v2500_v13, %v6542_v12  ;;  %v8112_v13 = vld [vmem:[#allocation22_spill] sm:$0xff] }
 0xec3   :  { %2517 = vmatpush.msrb.mxu1 %v2501_v49  ;;  %2538 = vmatpush.msra.mxu2 %v2501_v49 }
 0xec4   :  { %2562 = vmatpush.msrb.mxu3 %v2501_v49  ;;  %2584 = vmatpush.msra.mxu0 %v2501_v49 }
 0xec5   :  { %5467 = vmatmul.msk.f32.vlgmr.msra.gmra.mxu2 %vm1953_vm3, %v6004_v47  ;;  %5468 = vmatmul.msk.f32.vlgmr.msrb.gmra.mxu3 %vm1953_vm3, %v5998_v45 }
 0xec6   :  { %5466 = vmatmul.msk.f32.vlgmr.msrb.gmra.mxu1 %vm1953_vm3, %v5992_v35  ;;  %5469 = vmatmul.msk.f32.vlgmr.msra.gmra.mxu0 %vm1953_vm3, %v8076_v53  ;;  %v6736_v35 = vld [vmem:[#allocation2 + $0x67] ss:$0 sm:$0xff] }
 0xec7   :  { %2607 = vmatpush.msra.mxu1 %v6553_v48  ;;  %2631 = vmatpush.msrb.mxu2 %v6565_v11 }
 0xec8   :  { %2657 = vmatpush.msra.mxu3 %v6601_v20 }
 0xec9   :  { %2608 = vmatpush.msra.mxu1 %v6556_v23  ;;  %2632 = vmatpush.msrb.mxu2 %v6587_v3  ;;  %v2545_v3 = vmul.f32 %v2501_v49, %v6573_v18 }
 0xeca   :  { %2658 = vmatpush.msra.mxu3 %v6604_v43 }
 0xecb   :  { %2609 = vmatpush.msra.mxu1 %v6559_v6  ;;  %2633 = vmatpush.msrb.mxu2 %v6590_v22 }
 0xecc   :  { %2659 = vmatpush.msra.mxu3 %v6607_v33 }
 0xecd   :  { %2610 = vmatpush.msra.mxu1 %v6562_v21  ;;  %2634 = vmatpush.msrb.mxu2 %v6593_v63 }
 0xece   :  { %2660 = vmatpush.msra.mxu3 %v6610_v30 }
 0xecf   :  { %2748 = vmatpush.msra.mxu2 %v6676_v37 }
 0xed1   :  { %2749 = vmatpush.msra.mxu2 %v6679_v51 }
 0xed3   :  { %2750 = vmatpush.msra.mxu2 %v6682_v19 }
 0xed5   :  { %2751 = vmatpush.msra.mxu2 %v6685_v15 }
 0xed7   :  { %2752 = vmatpush.msra.mxu2 %v6688_v36 }
 0xed9   :  { %2753 = vmatpush.msra.mxu2 %v6691_v7 }
 0xedb   :  { %2754 = vmatpush.msra.mxu2 %v6694_v28 }
 0xedd   :  { %2755 = vmatpush.msra.mxu2 %v6696_v42 }
 0xf37   :  { %v2357_v53 = vpop.f32.mrf.mxu2 }
 0xf38   :  { %v2358_v2 = vadd.f32 %v2357_v53, %v6736_v35  ;;  %v8113_v53 = vld [vmem:[#allocation14_spill] sm:$0xff] }
 0xf3a   :  { %v2360_v58 = vadd.f32 %v2358_v2, %v6631_v25  ;;  %v8116_v2 = vld [vmem:[#allocation19_spill] sm:$0xff] }
 0xf3c   :  { %v2763_v60 = vsel %vm869_vm12, %v2360_v58, 0.0 }
 0xf3d   :  { %2764 = vadd.xlane.f32.xlu2 %v2763_v60 }
 0xf43   :  { %v2519_v0 = vpop.f32.mrf.mxu1  ;;  %v2586_v21 = vpop.f32.mrf.mxu0 }
 0xf44   :  { %v2522_v12 = vmul.f32 %v2519_v0, %v6568_v16  ;;  %v2589_v20 = vmul.f32 %v2586_v21, %v6578_v39  ;;  %v5783_v16 = vmov 32.0   ;;  %v8117_v0 = vld [vmem:[#allocation23_spill] sm:$0xff] }
 0xf45   :  { %5635 = vrcp.f32 %v5783_v16 }
 0xf48   :  { %v2540_v48 = vpop.f32.mrf.mxu2  ;;  %v2564_v23 = vpop.f32.mrf.mxu3 }
 0xf49   :  { %v2543_v6 = vmul.f32 %v2540_v48, %v6570_v44  ;;  %v2567_v22 = vmul.f32 %v2564_v23, %v6575_v38  ;;  %v8118_v48 = vld [vmem:[#allocation24_spill] sm:$0xff] }
 0xf4b   :  { %v2544_v11 = vadd.f32 %v2543_v6, %v2522_v12  ;;  %v5636_v25 = vpop.eup %5635  ;;  %v8119_v6 = vld [vmem:[#allocation25_spill] sm:$0xff] }
 0xf4c   :  { %v2767_v41 = vmul.f32 32.0, %v5636_v25  ;;  %vm2771_vm7 = vweird.f32 %v5636_v25 }
 0xf4d   :  { %v2546_v63 = vadd.f32 %v2545_v3, %v2544_v11 }
 0xf4e   :  { %v2768_v44 = vsub.f32 1.0, %v2767_v41 }
 0xf4f   :  { %v2568_v43 = vadd.f32 %v2567_v22, %v2546_v63  ;;  %v8120_v22 = vld [vmem:[#allocation26_spill] sm:$0xff] }
 0xf50   :  { %v2769_v5 = vmul.f32 %v5636_v25, %v2768_v44 }
 0xf51   :  { %v2590_v33 = vadd.f32 %v2589_v20, %v2568_v43 }
 0xf52   :  { %v2770_v37 = vadd.f32 %v5636_v25, %v2769_v5 }
 0xf53   :  { %v2591_v30 = vadd.f32 %v2590_v33, %v6583_v17 }
 0xf54   :  { %v6748_v18 = vsel %vm2771_vm7, %v5636_v25, %v2770_v37 }
 0xf55   :  { %5470 = vmatmul.msk.f32.vlgmr.msra.gmra.mxu1 %vm869_vm12, %v2591_v30 }
 0xfb0   :  { %v2765_v38 = vpop.xlane.xlu2 %2764 }
 0xfb1   :  { %v2773_v61 = vmul.f32 %v6748_v18, %v2765_v38 }
 0xfb3   :  { %v2774_v39 = vsub.f32 %v2360_v58, %v2773_v61 }
 0xfb5   :  { %v2775_v51 = vmul.f32 %v2774_v39, %v2774_v39 }
 0xfb7   :  { %v2776_v19 = vsel %vm869_vm12, %v2775_v51, 0.0 }
 0xfb8   :  { %2777 = vadd.xlane.f32.xlu0 %v2776_v19 }
 0xfd2   :  { %v2612_v17 = vpop.f32.mrf.mxu1 }
 0xfd3   :  { %v2613_v15 = vadd.f32 %v2612_v17, %v6596_v9  ;;  %v6756_v9 = vld [vmem:[#allocation2 + $0x70] ss:$0 sm:$0xff] }
 0xfd5   :  { %v2615_v36 = vmul.f32 %v2613_v15, %v6650_v14 }
 0xfd7   :  { %5471 = vmatmul.msk.f32.vlgmr.msrb.gmra.mxu2 %vm869_vm12, %v2615_v36 }
0x102b   :  { %v2778_v7 = vpop.xlane.xlu0 %2777 }
0x102c   :  { %v2779_v28 = vmul.f32 %v2778_v7, %v6748_v18 }
0x102e   :  { %v2780_v42 = vadd.f32 1e-05, %v2779_v28 }
0x1030   :  { %5637 = vrsqrt.f32 %v2780_v42  ;;  %vm2787_vm9 = vweird.f32 %v2780_v42 }
0x1036   :  { %v5638_v8 = vpop.eup %5637 }
0x1037   :  { %v2782_v46 = vmul.f32 %v5638_v8, %v2780_v42  ;;  %vm2788_vm8 = vweird.f32 %v5638_v8 }
0x1038   :  { %vm2789_vm10 = vmor %vm2787_vm9, %vm2788_vm8 }
0x1039   :  { %v2783_v62 = vmul.f32 %v5638_v8, %v2782_v46 }
0x103b   :  { %v2784_v34 = vmul.f32 0.5, %v2783_v62 }
0x103d   :  { %v2785_v31 = vsub.f32 1.5, %v2784_v34 }
0x103f   :  { %v2786_v50 = vmul.f32 %v5638_v8, %v2785_v31 }
0x1041   :  { %v2790_v26 = vsel %vm2789_vm10, %v5638_v8, %v2786_v50 }
0x1042   :  { %v2791_v14 = vmul.f32 %v2790_v26, %v2774_v39 }
0x1044   :  { %v2792_v52 = vmul.f32 %v2791_v14, %v6756_v9 }
0x1046   :  { %v2793_v40 = vadd.f32 %v2792_v52, %v6758_v59 }
0x1048   :  { %2836 = vmatpush.msrb.mxu3 %v2793_v40 }
0x105a   :  { %v2636_v55 = vpop.f32.mrf.mxu2 }
0x105b   :  { %v2637_v24 = vadd.f32 %v2636_v55, %v6617_v1  ;;  %v8114_v1 = vld [vmem:[#allocation16_spill] sm:$0xff] }
0x105d   :  { %v2639_v54 = vadd.f32 %v2637_v24, %v6638_v57  ;;  %v8115_v57 = vld [vmem:[#allocation17_spill] sm:$0xff] }
0x105f   :  { %v2640_v10 = vmul.f32 %v2639_v54, %v8109_v4  ;;  %v2844_v4 = vld [vmem:[#allocation5 + $0x2e0] sm:$0xff] }
0x1061   :  { %v2641_v32 = vadd.f32 %v2640_v10, %v8110_v29  ;;  %v2870_v10 = vld [vmem:[#allocation5 + $0x320] sm:$0xff]  ;;  %v2843_v29 = vld [vmem:[#allocation5 + $0x2d0] sm:$0xff] }
0x1063   :  { %5472 = vmatmul.msk.f32.vlgmr.msra.gmra.mxu3 %vm869_vm12, %v2641_v32 }
0x1064   :  { %2909 = vmatpush.msra.mxu3 %v2844_v4 }
0x1066   :  { %2910 = vmatpush.msra.mxu3 %v2843_v29 }
0x106b   :  { %5476 = vmatmul.msk.f32.vlgmr.msrb.gmra.mxu3 %vm1953_vm3, %v8111_v56 }
0x10e6   :  { %v2662_v27 = vpop.f32.mrf.mxu3 }
0x10e7   :  { %v2663_v49 = vadd.f32 %v2662_v27, %v8112_v13  ;;  %v2869_v27 = vld [vmem:[#allocation5 + $0x310] sm:$0xff] }
0x10e8   :  { %v2841_v13 = vld [vmem:[#allocation5 + $0x2b0] sm:$0xff] }
0x10e9   :  { %2680 = vmatpush.msrb.mxu0 %v2663_v49  ;;  %2703 = vmatpush.msrb.mxu1 %v2663_v49  ;;  %v2686_v23 = vmul.f32 %v2663_v49, %v8118_v48  ;;  %v2867_v49 = vld [vmem:[#allocation5 + $0x2f0] sm:$0xff]  ;;  %v2940_v48 = vld [vmem:[#allocation5 + $0x340] sm:$0xff] }
0x10ea   :  { %5473 = vmatmul.msk.f32.vlgmr.msrb.gmra.mxu0 %vm1953_vm3, %v8113_v53  ;;  %5474 = vmatmul.msk.f32.vlgmr.msrb.gmra.mxu1 %vm1953_vm3, %v8114_v1 }
0x10eb   :  { %2862 = vmatpush.msra.mxu0 %v2793_v40  ;;  %2886 = vmatpush.msra.mxu1 %v2870_v10 }
0x10ed   :  { %2934 = vmatpush.msrb.mxu0 %v2793_v40  ;;  %2887 = vmatpush.msra.mxu1 %v2869_v27 }
0x10f2   :  { %5477 = vmatmul.msk.f32.vlgmr.msra.gmra.mxu0 %vm1953_vm3, %v8115_v57 }
0x10f3   :  { %3023 = vmatpush.msra.mxu0 %v2870_v10 }
0x10f5   :  { %3024 = vmatpush.msra.mxu0 %v2869_v27 }
0x10fa   :  { %5480 = vmatmul.msk.f32.vlgmr.msrb.gmra.mxu0 %vm1953_vm3, %v8116_v2 }
0x1167   :  { %v2682_v58 = vpop.f32.mrf.mxu0  ;;  %v2705_v60 = vpop.f32.mrf.mxu1 }
0x1168   :  { %v2685_v12 = vmul.f32 %v2682_v58, %v8117_v0  ;;  %v2708_v21 = vmul.f32 %v2705_v60, %v8119_v6  ;;  %v2838_v58 = vpop.f32.mrf.mxu3  ;;  %v2942_v0 = vld [vmem:[#allocation5 + $0x360] sm:$0xff] }
0x116a   :  { %v2687_v11 = vadd.f32 %v2686_v23, %v2685_v12  ;;  %v2941_v12 = vld [vmem:[#allocation5 + $0x350] sm:$0xff] }
0x116b   :  { %v2939_v23 = vld [vmem:[#allocation5 + $0x330] sm:$0xff] }
0x116c   :  { %v2709_v3 = vadd.f32 %v2708_v21, %v2687_v11 }
0x116e   :  { %v2710_v63 = vadd.f32 %v2709_v3, %v8120_v22 }
0x116f   :  { %v2864_v60 = vpop.f32.mrf.mxu0 }
0x1170   :  { %v2712_v20 = vmul.f32 0.70710677, %v2710_v63  ;;  %v2711_v46 = vmul.f32 0.5, %v2710_v63 }
0x1172   :  { %v2713_v43 = vand.u32 2147483647, %v2712_v20  ;;  %vm2732_vm11 = vcmp.ge.f32.partialorder %v2712_v20, 0.0 }
0x1174   :  { %v2714_v33 = vmul.f32 0.3275911, %v2713_v43  ;;  %v2726_v25 = vsub.f32 0.0, %v2713_v43 }
0x1176   :  { %v2715_v30 = vadd.f32 1.0, %v2714_v33  ;;  %v2727_v5 = vmul.f32 %v2726_v25, %v2713_v43 }
0x1177   :  { %v2936_v6 = vpop.f32.mrf.mxu0 }
0x1178   :  { %5639 = vrcp.f32 %v2715_v30  ;;  %v2728_v61 = vmul.f32 1.442695, %v2727_v5  ;;  %v6808_v5 = vld [vmem:[#allocation5 + $0x3b0] sm:$0xff] }
0x117a   :  { %5641 = vpow2.f32 %v2728_v61  ;;  %v6816_v61 = vld [vmem:[#allocation5 + $0x380] sm:$0xff] }
0x117e   :  { %v5640_v16 = vpop.eup %5639 }
0x117f   :  { %v2717_v41 = vmul.f32 1.0614054, %v5640_v16 }
0x1180   :  { %v5642_v36 = vpop.eup %5641 }
0x1181   :  { %v2718_v44 = vadd.f32 -1.4531521, %v2717_v41 }
0x1183   :  { %v2719_v37 = vmul.f32 %v5640_v16, %v2718_v44  ;;  %v6799_v44 = vld [vmem:[#allocation5 + $0x3e0] sm:$0xff] }
0x1185   :  { %v2720_v38 = vadd.f32 1.4214138, %v2719_v37  ;;  %v6811_v37 = vld [vmem:[#allocation5 + $0x3a0] sm:$0xff] }
0x1187   :  { %v2721_v39 = vmul.f32 %v5640_v16, %v2720_v38  ;;  %v6813_v38 = vld [vmem:[#allocation5 + $0x390] sm:$0xff] }
0x1189   :  { %v2722_v51 = vadd.f32 -0.28449672, %v2721_v39  ;;  %v6820_v39 = vld [vmem:[#allocation5 + $0x370] sm:$0xff] }
0x118b   :  { %v2723_v19 = vmul.f32 %v5640_v16, %v2722_v51 }
0x118d   :  { %v2724_v17 = vadd.f32 0.2548296, %v2723_v19 }
0x118f   :  { %v2725_v15 = vmul.f32 %v5640_v16, %v2724_v17 }
0x1191   :  { %v2730_v7 = vmul.f32 %v5642_v36, %v2725_v15 }
0x1193   :  { %v2731_v28 = vsub.f32 1.0, %v2730_v7  ;;  %v6823_v7 = vld [vmem:[#allocation2 + $0x72] ss:$0 sm:$0xff] }
0x1195   :  { %v2733_v42 = vsub.f32 0.0, %v2731_v28 }
0x1197   :  { %v2734_v8 = vsel %vm2732_vm11, %v2731_v28, %v2733_v42  ;;  %v6828_v42 = vld [vmem:[#allocation2 + $0x73] ss:$0 sm:$0xff] }
0x1198   :  { %v2735_v62 = vadd.f32 1.0, %v2734_v8 }
0x119a   :  { %v2736_v34 = vmul.f32 %v2735_v62, %v2711_v46 }
0x119c   :  { %5475 = vmatmul.msk.f32.vlgmr.msra.gmra.mxu2 %vm2336_vm6, %v2736_v34  ;;  %v6834_v34 = vld [vmem:[#allocation2 + $0x74] ss:$0 sm:$0xff] }
0x121f   :  { %v2757_v31 = vpop.f32.mrf.mxu2 }
0x1220   :  { %v2758_v50 = vadd.f32 %v2757_v31, %v6736_v35  ;;  %v2842_v35 = vld [vmem:[#allocation5 + $0x2c0] sm:$0xff] }
0x1221   :  { %2911 = vmatpush.msra.mxu3 %v2842_v35 }
0x1222   :  { %v2760_v26 = vadd.f32 %v2758_v50, %v2641_v32  ;;  %v2868_v32 = vld [vmem:[#allocation5 + $0x300] sm:$0xff] }
0x1223   :  { %2888 = vmatpush.msra.mxu1 %v2868_v32  ;;  %3025 = vmatpush.msra.mxu0 %v2868_v32 }
0x1224   :  { %v2794_v14 = vsel %vm869_vm12, %v2760_v26, 0.0  ;;  %2912 = vmatpush.msra.mxu3 %v2841_v13 }
0x1225   :  { %2795 = vadd.xlane.f32.xlu1 %v2794_v14  ;;  %2889 = vmatpush.msra.mxu1 %v2867_v49  ;;  %v6844_v14 = vld [vmem:[#allocation2 + $0x75] ss:$0 sm:$0xff] }
0x1226   :  { %5479 = vmatmul.msk.f32.vlgmr.msra.gmra.mxu3 %vm869_vm12, %v2838_v58  ;;  %5478 = vmatmul.msk.f32.vlgmr.msra.gmra.mxu1 %vm869_vm12, %v2864_v60 }
0x1227   :  { %2958 = vmatpush.msrb.mxu1 %v2942_v0  ;;  %3026 = vmatpush.msra.mxu0 %v2867_v49 }
0x1229   :  { %2959 = vmatpush.msrb.mxu1 %v2941_v12  ;;  %3123 = vmatpush.msrb.mxu0 %v6799_v44 }
0x122b   :  { %2960 = vmatpush.msrb.mxu1 %v2940_v48 }
0x122d   :  { %2961 = vmatpush.msrb.mxu1 %v2939_v23 }
0x122e   :  { %5481 = vmatmul.msk.f32.vlgmr.msrb.gmra.mxu1 %vm869_vm12, %v2936_v6 }
0x122f   :  { %3046 = vmatpush.msra.mxu1 %v2844_v4 }
0x1231   :  { %3047 = vmatpush.msra.mxu1 %v2843_v29 }
0x1233   :  { %3048 = vmatpush.msra.mxu1 %v2842_v35 }
0x1235   :  { %3049 = vmatpush.msra.mxu1 %v2841_v13 }
0x1298   :  { %v2796_v52 = vpop.xlane.xlu1 %2795 }
0x1299   :  { %v2797_v40 = vmul.f32 %v2796_v52, %v6748_v18 }
0x129b   :  { %v2798_v55 = vsub.f32 %v2760_v26, %v2797_v40 }
0x129d   :  { %v2799_v24 = vmul.f32 %v2798_v55, %v2798_v55 }
0x129f   :  { %v2800_v54 = vsel %vm869_vm12, %v2799_v24, 0.0 }
0x12a0   :  { %2801 = vadd.xlane.f32.xlu2 %v2800_v54 }
0x12a3   :  { %v2891_v51 = vpop.f32.mrf.mxu1 }
0x12a9   :  { %v2914_v19 = vpop.f32.mrf.mxu3 }
0x12aa   :  { %v2915_v17 = vadd.f32 %v2914_v19, %v2891_v51 }
0x12ab   :  { %v2963_v15 = vpop.f32.mrf.mxu1 }
0x12ac   :  { %v2966_v36 = vadd.f32 %v2963_v15, %v2915_v17  ;;  %v6878_v17 = vld [vmem:[#allocation2 + $0x76] ss:$0 sm:$0xff]  ;;  %v6880_v15 = vld [vmem:[#allocation2 + $0x77] ss:$0 sm:$0xff] }
0x12ae   :  { %v6826_v28 = vadd.f32 %v2966_v36, %v6823_v7 }
0x12b0   :  { %v3100_v62 = vmul.f32 %v6828_v42, %v6826_v28 }
0x12b2   :  { %v6837_v31 = vadd.f32 %v6834_v34, %v3100_v62 }
0x1313   :  { %v2802_v21 = vpop.xlane.xlu2 %2801 }
0x1314   :  { %v2803_v11 = vmul.f32 %v2802_v21, %v6748_v18 }
0x1316   :  { %v2804_v3 = vadd.f32 1e-05, %v2803_v11 }
0x1318   :  { %5643 = vrsqrt.f32 %v2804_v3  ;;  %vm2811_vm14 = vweird.f32 %v2804_v3 }
0x131e   :  { %v5644_v22 = vpop.eup %5643 }
0x131f   :  { %v2806_v63 = vmul.f32 %v5644_v22, %v2804_v3  ;;  %vm2812_vm13 = vweird.f32 %v5644_v22 }
0x1320   :  { %vm2813_vm15 = vmor %vm2811_vm14, %vm2812_vm13 }
0x1321   :  { %v2807_v20 = vmul.f32 %v5644_v22, %v2806_v63 }
0x1323   :  { %v2808_v43 = vmul.f32 0.5, %v2807_v20 }
0x1325   :  { %v2809_v33 = vsub.f32 1.5, %v2808_v43 }
0x1327   :  { %v2810_v30 = vmul.f32 %v5644_v22, %v2809_v33  ;;  %v8121_v33 = vld [vmem:[#allocation13_spill] sm:$0xff] }
0x1329   :  { %v2814_v16 = vsel %vm2813_vm15, %v5644_v22, %v2810_v30  ;;  %v8122_v30 = vld [vmem:[#allocation15_spill] sm:$0xff]  ;;  %vm4334_vm15 = vcmask 1041408  }
0x132a   :  { %v2815_v25 = vmul.f32 %v2814_v16, %v2798_v55  ;;  %v6865_v16 = vld [vmem:[#allocation5 + $0x460] sm:$0xff] }
0x132c   :  { %v2816_v41 = vmul.f32 %v2815_v25, %v6756_v9  ;;  %v6801_v9 = vld [vmem:[#allocation5 + $0x3d0] sm:$0xff] }
0x132d   :  { %3124 = vmatpush.msrb.mxu0 %v6801_v9  ;;  %v6867_v25 = vld [vmem:[#allocation5 + $0x450] sm:$0xff] }
0x132e   :  { %v2817_v18 = vadd.f32 %v2816_v41, %v6758_v59  ;;  %v6804_v59 = vld [vmem:[#allocation5 + $0x3c0] sm:$0xff] }
0x132f   :  { %3125 = vmatpush.msrb.mxu0 %v6804_v59  ;;  %v6870_v41 = vld [vmem:[#allocation5 + $0x440] sm:$0xff] }
0x1330   :  { %2983 = vmatpush.msrb.mxu2 %v2817_v18  ;;  %3003 = vmatpush.msrb.mxu3 %v2817_v18 }
0x1331   :  { %5482 = vmatmul.msk.f32.vlgmr.msrb.gmra.mxu2 %vm1953_vm3, %v8111_v56  ;;  %5483 = vmatmul.msk.f32.vlgmr.msrb.gmra.mxu3 %vm1953_vm3, %v8115_v57 }
0x1332   :  { %3069 = vmatpush.msra.mxu2 %v2817_v18  ;;  %3089 = vmatpush.msra.mxu3 %v2942_v0 }
0x1333   :  { %3126 = vmatpush.msrb.mxu0 %v6808_v5 }
0x1334   :  { %3090 = vmatpush.msra.mxu3 %v2941_v12 }
0x1335   :  { %3127 = vmatpush.msrb.mxu0 %v6811_v37 }
0x1336   :  { %3091 = vmatpush.msra.mxu3 %v2940_v48 }
0x1337   :  { %3128 = vmatpush.msrb.mxu0 %v6813_v38 }
0x1338   :  { %3092 = vmatpush.msra.mxu3 %v2939_v23 }
0x1339   :  { %5486 = vmatmul.msk.f32.vlgmr.msra.gmra.mxu2 %vm1953_vm3, %v8116_v2  ;;  %3129 = vmatpush.msrb.mxu0 %v6816_v61 }
0x133b   :  { %3130 = vmatpush.msrb.mxu0 %v6820_v39 }
0x13b4   :  { %v2985_v8 = vpop.f32.mrf.mxu2  ;;  %v3005_v46 = vpop.f32.mrf.mxu3 }
0x13b5   :  { %5484 = vmatmul.msk.f32.vlgmr.msra.gmra.mxu0 %vm869_vm12, %v3005_v46  ;;  %5485 = vmatmul.msk.f32.vlgmr.msra.gmra.mxu1 %vm869_vm12, %v2985_v8  ;;  %v6882_v8 = vld [vmem:[#allocation2 + $0x80] ss:$0 sm:$0xff]  ;;  %v6884_v46 = vld [vmem:[#allocation2 + $0x81] ss:$0 sm:$0xff] }
0x13b6   :  { %3347 = vmatpush.msra.mxu0 %v6865_v16 }
0x13b8   :  { %3348 = vmatpush.msra.mxu0 %v6867_v25 }
0x13ba   :  { %3349 = vmatpush.msra.mxu0 %v6870_v41 }
0x13bc   :  { %v3071_v50 = vpop.f32.mrf.mxu2 }
0x13bd   :  { %5487 = vmatmul.msk.f32.vlgmr.msra.gmra.mxu3 %vm869_vm12, %v3071_v50  ;;  %5488 = vmatmul.msk.f32.vlgmr.msrb.gmra.mxu0 %vm2336_vm6, %v6837_v31 }
0x1432   :  { %v6842_v26 = vpop.f32.mrf.mxu0  ;;  %v6874_v18 = vpop.f32.mrf.mxu1 }
0x143a   :  { %v3132_v52 = vpop.f32.mrf.mxu0 }
0x143b   :  { %v3133_v40 = vadd.f32 %v3132_v52, %v6844_v14 }
0x143d   :  { %v3136_v55 = vmul.f32 0.70710677, %v3133_v40  ;;  %v3135_v63 = vmul.f32 0.5, %v3133_v40  ;;  %v6888_v40 = vld [vmem:[#allocation2 + $0x82] ss:$0 sm:$0xff] }
0x143f   :  { %v3137_v24 = vand.u32 2147483647, %v3136_v55  ;;  %vm3156_vm12 = vcmp.ge.f32.partialorder %v3136_v55, 0.0 }
0x1440   :  { %v6876_v51 = vpop.f32.mrf.mxu3 }
0x1441   :  { %v3138_v54 = vmul.f32 0.3275911, %v3137_v24  ;;  %v3150_v29 = vsub.f32 0.0, %v3137_v24 }
0x1443   :  { %v3139_v4 = vadd.f32 1.0, %v3138_v54  ;;  %v3151_v32 = vmul.f32 %v3150_v29, %v3137_v24 }
0x1445   :  { %5645 = vrcp.f32 %v3139_v4  ;;  %v3152_v58 = vmul.f32 1.442695, %v3151_v32 }
0x1447   :  { %5647 = vpow2.f32 %v3152_v58  ;;  %v6906_v58 = vld [vmem:[#allocation5 + $0x420] sm:$0xff] }
0x144b   :  { %v5646_v10 = vpop.eup %5645 }
0x144c   :  { %v3141_v27 = vmul.f32 1.0614054, %v5646_v10 }
0x144d   :  { %v5648_v6 = vpop.eup %5647 }
0x144e   :  { %v3142_v35 = vadd.f32 -1.4531521, %v3141_v27 }
0x1450   :  { %v3143_v13 = vmul.f32 %v5646_v10, %v3142_v35  ;;  %v6894_v35 = vld [vmem:[#allocation2 + $0x83] ss:$0 sm:$0xff] }
0x1452   :  { %v3144_v49 = vadd.f32 1.4214138, %v3143_v13 }
0x1454   :  { %v3145_v60 = vmul.f32 %v5646_v10, %v3144_v49  ;;  %v6903_v49 = vld [vmem:[#allocation5 + $0x430] sm:$0xff] }
0x1455   :  { %3350 = vmatpush.msra.mxu0 %v6903_v49 }
0x1456   :  { %v3146_v0 = vadd.f32 -0.28449672, %v3145_v60  ;;  %v6909_v60 = vld [vmem:[#allocation5 + $0x410] sm:$0xff] }
0x1457   :  { %3351 = vmatpush.msra.mxu0 %v6906_v58 }
0x1458   :  { %v3147_v12 = vmul.f32 %v5646_v10, %v3146_v0  ;;  %v6912_v0 = vld [vmem:[#allocation5 + $0x400] sm:$0xff] }
0x1459   :  { %3352 = vmatpush.msra.mxu0 %v6909_v60 }
0x145a   :  { %v3148_v48 = vadd.f32 0.2548296, %v3147_v12  ;;  %v6915_v12 = vld [vmem:[#allocation5 + $0x3f0] sm:$0xff] }
0x145b   :  { %3353 = vmatpush.msra.mxu0 %v6912_v0 }
0x145c   :  { %v3149_v23 = vmul.f32 %v5646_v10, %v3148_v48  ;;  %v6918_v48 = vld [vmem:[#allocation5 + $0x4e0] sm:$0xff] }
0x145d   :  { %3354 = vmatpush.msra.mxu0 %v6915_v12 }
0x145e   :  { %v3154_v21 = vmul.f32 %v5648_v6, %v3149_v23  ;;  %v6920_v23 = vld [vmem:[#allocation5 + $0x4d0] sm:$0xff]  ;;  %v6923_v6 = vld [vmem:[#allocation5 + $0x4c0] sm:$0xff] }
0x1460   :  { %v3155_v11 = vsub.f32 1.0, %v3154_v21  ;;  %v6926_v21 = vld [vmem:[#allocation5 + $0x4b0] sm:$0xff] }
0x1462   :  { %v3157_v3 = vsub.f32 0.0, %v3155_v11 }
0x1464   :  { %v3158_v22 = vsel %vm3156_vm12, %v3155_v11, %v3157_v3  ;;  %v6929_v11 = vld [vmem:[#allocation5 + $0x4a0] sm:$0xff]  ;;  %v6932_v3 = vld [vmem:[#allocation5 + $0x490] sm:$0xff]  ;;  %vm4331_vm12 = vcmask 15360  }
0x1465   :  { %v3159_v20 = vadd.f32 1.0, %v3158_v22  ;;  %v6935_v22 = vld [vmem:[#allocation5 + $0x480] sm:$0xff] }
0x1467   :  { %v6847_v43 = vmul.f32 %v3159_v20, %v3135_v63  ;;  %v6938_v63 = vld [vmem:[#allocation5 + $0x470] sm:$0xff] }
0x1468   :  { %v6945_v20 = vld [vmem:[#allocation2 + $0x86] ss:$0 sm:$0xff] }
0x1469   :  { %5489 = vmatpush.msk.msrb.mxu1 %vm3164_vm0, %v6847_v43  ;;  %5491 = vmatpush.msk.msrb.mxu2 %vm3164_vm0, %v6847_v43  ;;  %v3216_v24 = vmul.f32 %v6882_v8, %v6847_v43 }
0x146a   :  { %5493 = vmatpush.msk.msrb.mxu3 %vm3164_vm0, %v6847_v43  ;;  %5492 = vmatmul.msk.f32.vlgmr.msrb.gmra.mxu2 %vm3161_vm1, %v8113_v53 }
0x146b   :  { %5495 = vmatpush.msk.msra.mxu1 %vm3164_vm0, %v6847_v43  ;;  %5494 = vmatmul.msk.f32.vlgmr.msrb.gmra.mxu3 %vm3161_vm1, %v8114_v1 }
0x146c   :  { %5490 = vmatmul.msk.f32.vlgmr.msrb.gmra.mxu1 %vm3161_vm1, %v8121_v33 }
0x146d   :  { %3380 = vmatpush.msrb.mxu1 %v6918_v48 }
0x146f   :  { %3381 = vmatpush.msrb.mxu1 %v6920_v23 }
0x1471   :  { %3382 = vmatpush.msrb.mxu1 %v6923_v6 }
0x1473   :  { %3383 = vmatpush.msrb.mxu1 %v6926_v21 }
0x1474   :  { %5496 = vmatmul.msk.f32.vlgmr.msra.gmra.mxu1 %vm3161_vm1, %v8122_v30 }
0x1475   :  { %3384 = vmatpush.msrb.mxu1 %v6929_v11 }
0x1477   :  { %3385 = vmatpush.msrb.mxu1 %v6932_v3 }
0x1479   :  { %3386 = vmatpush.msrb.mxu1 %v6935_v22 }
0x147b   :  { %3387 = vmatpush.msrb.mxu1 %v6938_v63 }
0x147d   :  { %3558 = vmatpush.msra.mxu1 %v6799_v44 }
0x147f   :  { %3559 = vmatpush.msra.mxu1 %v6801_v9 }
0x1481   :  { %3560 = vmatpush.msra.mxu1 %v6804_v59  ;;  %v6957_v59 = vld [vmem:[#allocation2 + $0x93] ss:$0 sm:$0xff] }
0x1483   :  { %3561 = vmatpush.msra.mxu1 %v6808_v5 }
0x1485   :  { %3562 = vmatpush.msra.mxu1 %v6811_v37  ;;  %v6968_v37 = vld [vmem:[#allocation5 + $0x540] sm:$0xff] }
0x1487   :  { %3563 = vmatpush.msra.mxu1 %v6813_v38  ;;  %v3052_v38 = vadd.f32 %v6874_v18, %v6842_v26  ;;  %v6990_v26 = vld [vmem:[#allocation5 + $0x530] sm:$0xff]  ;;  %v6993_v18 = vld [vmem:[#allocation5 + $0x520] sm:$0xff] }
0x1489   :  { %3564 = vmatpush.msra.mxu1 %v6816_v61  ;;  %v6974_v61 = vld [vmem:[#allocation2 + $0x94] ss:$0 sm:$0xff] }
0x148a   :  { %8123 = vst [vmem:[#allocation27_spill] sm:$0xff] %v6974_v61 }
0x148b   :  { %3565 = vmatpush.msra.mxu1 %v6820_v39  ;;  %v3097_v39 = vadd.f32 %v6876_v51, %v3052_v38 }
0x14e9   :  { %v3185_v19 = vpop.f32.mrf.mxu1 }
0x14ea   :  { %v3189_v62 = vmul.f32 %v6878_v17, %v3185_v19  ;;  %v6947_v19 = vld [vmem:[#allocation2 + $0x87] ss:$0 sm:$0xff] }
0x14ed   :  { %v3209_v36 = vpop.f32.mrf.mxu2 }
0x14ee   :  { %v3213_v50 = vmul.f32 %v6880_v15, %v3209_v36  ;;  %v3237_v52 = vpop.f32.mrf.mxu3  ;;  %v6949_v36 = vld [vmem:[#allocation2 + $0x90] ss:$0 sm:$0xff] }
0x14ef   :  { %v3241_v54 = vmul.f32 %v6884_v46, %v3237_v52 }
0x14f0   :  { %v3214_v55 = vadd.f32 %v3213_v50, %v3189_v62 }
0x14f1   :  { %v3262_v4 = vpop.f32.mrf.mxu1 }
0x14f2   :  { %v3217_v10 = vadd.f32 %v3216_v24, %v3214_v55  ;;  %v3266_v29 = vmul.f32 %v6888_v40, %v3262_v4  ;;  %v6965_v4 = vld [vmem:[#allocation5 + $0x550] sm:$0xff] }
0x14f4   :  { %v3242_v27 = vadd.f32 %v3241_v54, %v3217_v10  ;;  %v6963_v54 = vld [vmem:[#allocation5 + $0x560] sm:$0xff] }
0x14f6   :  { %v3267_v32 = vadd.f32 %v3266_v29, %v3242_v27  ;;  %v6979_v27 = vadd.f32 %v3097_v39, %v6823_v7  ;;  %v6996_v7 = vld [vmem:[#allocation5 + $0x510] sm:$0xff] }
0x14f8   :  { %v3269_v13 = vadd.f32 %v6894_v35, %v3267_v32  ;;  %8124 = vst [vmem:[#allocation28_spill] sm:$0xff] %v6979_v27 }
0x14fa   :  { %5497 = vmatpush.msk.msra.mxu2 %vm3164_vm0, %v3269_v13  ;;  %5499 = vmatpush.msk.msra.mxu3 %vm3164_vm0, %v3269_v13  ;;  %v3298_v55 = vmul.f32 %v6947_v19, %v3269_v13  ;;  %v3545_v13 = vmul.f32 %v6828_v42, %v6979_v27  ;;  %v7002_v42 = vld [vmem:[#allocation5 + $0x4f0] sm:$0xff] }
0x14fb   :  { %5498 = vmatmul.msk.f32.vlgmr.msra.gmra.mxu2 %vm3161_vm1, %v6004_v47  ;;  %5500 = vmatmul.msk.f32.vlgmr.msra.gmra.mxu3 %vm3161_vm1, %v5998_v45 }
0x14fc   :  { %3416 = vmatpush.msrb.mxu2 %v6963_v54 }
0x14fe   :  { %3417 = vmatpush.msrb.mxu2 %v6965_v4 }
0x1500   :  { %3418 = vmatpush.msrb.mxu2 %v6968_v37 }
0x1502   :  { %3419 = vmatpush.msrb.mxu2 %v6990_v26 }
0x1504   :  { %3420 = vmatpush.msrb.mxu2 %v6993_v18 }
0x1506   :  { %3421 = vmatpush.msrb.mxu2 %v6996_v7 }
0x157e   :  { %v3292_v62 = vpop.f32.mrf.mxu2  ;;  %v3319_v50 = vpop.f32.mrf.mxu3 }
0x157f   :  { %v3296_v52 = vmul.f32 %v6945_v20, %v3292_v62  ;;  %v3323_v44 = vmul.f32 %v6949_v36, %v3319_v50  ;;  %v6986_v62 = vadd.f32 %v3545_v13, %v6834_v34  ;;  %v7005_v34 = vld [vmem:[#allocation2 + $0x95] ss:$0 sm:$0xff] }
0x1580   :  { %8126 = vst [vmem:[#allocation30_spill] sm:$0xff] %v7005_v34 }
0x1581   :  { %v3299_v9 = vadd.f32 %v3298_v55, %v3296_v52  ;;  %8125 = vst [vmem:[#allocation29_spill] sm:$0xff] %v6986_v62  ;;  %v7008_v52 = vld [vmem:[#allocation2 + $0x96] ss:$0 sm:$0xff] }
0x1582   :  { %8127 = vst [vmem:[#allocation33_spill] sm:$0xff] %v7008_v52 }
0x1583   :  { %v3324_v24 = vadd.f32 %v3323_v44, %v3299_v9 }
0x1585   :  { %v3326_v5 = vadd.f32 %v6957_v59, %v3324_v24 }
0x1587   :  { %5501 = vmatmul.msk.f32.vlgmr.msra.gmra.mxu0 %vm2336_vm6, %v3326_v5 }
0x1604   :  { %v3356_v10 = vpop.f32.mrf.mxu0 }
0x1605   :  { %v3357_v29 = vadd.f32 %v3356_v10, %v6974_v61 }
0x1607   :  { %v3359_v32 = vmul.f32 %v3357_v29, %v6847_v43  ;;  %v6999_v43 = vld [vmem:[#allocation5 + $0x500] sm:$0xff] }
0x1608   :  { %3422 = vmatpush.msrb.mxu2 %v6999_v43 }
0x1609   :  { %5502 = vmatmul.msk.f32.vlgmr.msrb.gmra.mxu1 %vm2336_vm6, %v3359_v32 }
0x160a   :  { %3423 = vmatpush.msrb.mxu2 %v7002_v42 }
0x1611   :  { %5508 = vmatmul.msk.f32.vlgmr.msra.gmra.mxu1 %vm2336_vm6, %v6986_v62 }
0x1686   :  { %v3389_v51 = vpop.f32.mrf.mxu1 }
0x1687   :  { %v3390_v50 = vadd.f32 %v3389_v51, %v7005_v34 }
0x1689   :  { %v3392_v55 = vadd.f32 %v3390_v50, %v6837_v31 }
0x168b   :  { %v3394_v44 = vmul.f32 %v7008_v52, %v3392_v55 }
0x168d   :  { %v7013_v9 = vadd.f32 %v3394_v44, %v6826_v28 }
0x168e   :  { %v3567_v24 = vpop.f32.mrf.mxu1 }
0x168f   :  { %8128 = vst [vmem:[#allocation31_spill] sm:$0xff] %v7013_v9  ;;  %v3568_v5 = vadd.f32 %v3567_v24, %v6844_v14  ;;  %5503 = vmatmul.msk.f32.vlgmr.msrb.gmra.mxu2 %vm2336_vm6, %v7013_v9 }
0x1691   :  { %v3571_v38 = vmul.f32 0.70710677, %v3568_v5 }
0x1693   :  { %v3572_v39 = vand.u32 2147483647, %v3571_v38  ;;  %vm3591_vm2 = vcmp.ge.f32.partialorder %v3571_v38, 0.0 }
0x1695   :  { %v3573_v10 = vmul.f32 0.3275911, %v3572_v39  ;;  %v3585_v13 = vsub.f32 0.0, %v3572_v39 }
0x1697   :  { %v3574_v29 = vadd.f32 1.0, %v3573_v10  ;;  %v3586_v50 = vmul.f32 %v3585_v13, %v3572_v39  ;;  %v7083_v39 = vld [vmem:[#allocation2 + $0xa3] ss:$0 sm:$0xff] }
0x1699   :  { %5649 = vrcp.f32 %v3574_v29  ;;  %v3587_v28 = vmul.f32 1.442695, %v3586_v50  ;;  %v3570_v29 = vmul.f32 0.5, %v3568_v5  ;;  %v7094_v50 = vld [vmem:[#allocation5 + $0x5d0] sm:$0xff] }
0x169b   :  { %5651 = vpow2.f32 %v3587_v28 }
0x169f   :  { %v5650_v32 = vpop.eup %5649 }
0x16a0   :  { %v3576_v51 = vmul.f32 1.0614054, %v5650_v32 }
0x16a1   :  { %v5652_v27 = vpop.eup %5651 }
0x16a2   :  { %v3577_v31 = vadd.f32 -1.4531521, %v3576_v51  ;;  %v7088_v51 = vld [vmem:[#allocation5 + $0x5e0] sm:$0xff] }
0x16a4   :  { %v3578_v55 = vmul.f32 %v5650_v32, %v3577_v31 }
0x16a6   :  { %v3579_v2 = vadd.f32 1.4214138, %v3578_v55 }
0x16a8   :  { %v3580_v44 = vmul.f32 %v5650_v32, %v3579_v2 }
0x16aa   :  { %v3581_v57 = vadd.f32 -0.28449672, %v3580_v44  ;;  %v7100_v44 = vld [vmem:[#allocation5 + $0x5c0] sm:$0xff] }
0x16ac   :  { %v3582_v14 = vmul.f32 %v5650_v32, %v3581_v57 }
0x16ae   :  { %v3583_v24 = vadd.f32 0.2548296, %v3582_v14 }
0x16b0   :  { %v3584_v56 = vmul.f32 %v5650_v32, %v3583_v24  ;;  %v7085_v32 = vld [vmem:[#allocation5 + $0x5f0] sm:$0xff] }
0x16b2   :  { %v3589_v52 = vmul.f32 %v5652_v27, %v3584_v56  ;;  %v7028_v56 = vld [vmem:[#allocation2 + $0x97] ss:$0 sm:$0xff] }
0x16b4   :  { %v3590_v62 = vsub.f32 1.0, %v3589_v52  ;;  %v7079_v52 = vld [vmem:[#allocation5 + $0x600] sm:$0xff] }
0x16b6   :  { %v3592_v34 = vsub.f32 0.0, %v3590_v62 }
0x16b8   :  { %v3593_v10 = vsel %vm3591_vm2, %v3590_v62, %v3592_v34 }
0x16b9   :  { %v3594_v61 = vadd.f32 1.0, %v3593_v10 }
0x16bb   :  { %v7018_v9 = vmul.f32 %v3594_v61, %v3570_v29  ;;  %v7075_v61 = vld [vmem:[#allocation5 + $0x610] sm:$0xff] }
0x16bd   :  { %5509 = vmatpush.msk.msra.mxu2 %vm3164_vm0, %v7018_v9 }
0x16be   :  { %5510 = vmatmul.msk.f32.vlgmr.msra.gmra.mxu2 %vm3161_vm1, %v8121_v33  ;;  %v7053_v33 = vld [vmem:[#allocation5 + $0x660] sm:$0xff] }
0x16bf   :  { %5513 = vmatpush.msk.msrb.mxu2 %vm3164_vm0, %v7018_v9  ;;  %3524 = vmatpush.msrb.mxu0 %v7053_v33 }
0x16c6   :  { %5514 = vmatmul.msk.f32.vlgmr.msrb.gmra.mxu2 %vm3161_vm1, %v8114_v1 }
0x1712   :  { %v3425_v57 = vpop.f32.mrf.mxu2 }
0x1713   :  { %v3426_v2 = vadd.f32 %v3425_v57, %v7028_v56  ;;  %v7106_v57 = vld [vmem:[#allocation5 + $0x5b0] sm:$0xff] }
0x1715   :  { %5504 = vmatpush.msk.msrb.mxu3 %vm3164_vm0, %v3426_v2 }
0x1716   :  { %5505 = vmatmul.msk.f32.vlgmr.msrb.gmra.mxu3 %vm3161_vm1, %v8113_v53 }
0x1717   :  { %5506 = vmatpush.msk.msra.mxu3 %vm3164_vm0, %v3426_v2 }
0x1719   :  { %5511 = vmatpush.msk.msrb.mxu3 %vm3164_vm0, %v7018_v9 }
0x171e   :  { %5507 = vmatmul.msk.f32.vlgmr.msra.gmra.mxu3 %vm3161_vm1, %v8114_v1 }
0x171f   :  { %5515 = vmatpush.msk.msra.mxu3 %vm3164_vm0, %v7018_v9 }
0x1726   :  { %5512 = vmatmul.msk.f32.vlgmr.msrb.gmra.mxu3 %vm3161_vm1, %v8113_v53 }
0x1727   :  { %3749 = vmatpush.msrb.mxu3 %v6865_v16  ;;  %v7056_v16 = vld [vmem:[#allocation5 + $0x650] sm:$0xff] }
0x1728   :  { %3525 = vmatpush.msrb.mxu0 %v7056_v16 }
0x1729   :  { %3750 = vmatpush.msrb.mxu3 %v6867_v25 }
0x172b   :  { %3751 = vmatpush.msrb.mxu3 %v6870_v41  ;;  %v7059_v41 = vld [vmem:[#allocation5 + $0x640] sm:$0xff] }
0x172c   :  { %3526 = vmatpush.msrb.mxu0 %v7059_v41 }
0x172d   :  { %3752 = vmatpush.msrb.mxu3 %v6903_v49  ;;  %v7064_v49 = vld [vmem:[#allocation5 + $0x630] sm:$0xff] }
0x172e   :  { %5516 = vmatmul.msk.f32.vlgmr.msra.gmra.mxu3 %vm3161_vm1, %v8122_v30  ;;  %v7062_v30 = vld [vmem:[#allocation2 + $0xa0] ss:$0 sm:$0xff]  ;;  %3527 = vmatpush.msrb.mxu0 %v7064_v49 }
0x172f   :  { %3753 = vmatpush.msrb.mxu3 %v6906_v58  ;;  %v7067_v58 = vld [vmem:[#allocation2 + $0xa1] ss:$0 sm:$0xff] }
0x1730   :  { %v3454_v27 = vmul.f32 %v7067_v58, %v3426_v2 }
0x1731   :  { %3754 = vmatpush.msrb.mxu3 %v6909_v60  ;;  %v7069_v60 = vld [vmem:[#allocation5 + $0x620] sm:$0xff] }
0x1732   :  { %3528 = vmatpush.msrb.mxu0 %v7069_v60 }
0x1733   :  { %3755 = vmatpush.msrb.mxu3 %v6912_v0 }
0x1734   :  { %3529 = vmatpush.msrb.mxu0 %v7075_v61 }
0x1735   :  { %3756 = vmatpush.msrb.mxu3 %v6915_v12  ;;  %v7073_v12 = vld [vmem:[#allocation2 + $0xa2] ss:$0 sm:$0xff] }
0x1736   :  { %3530 = vmatpush.msrb.mxu0 %v7079_v52 }
0x1738   :  { %3531 = vmatpush.msrb.mxu0 %v7085_v32 }
0x173a   :  { %3532 = vmatpush.msrb.mxu0 %v7088_v51 }
0x173c   :  { %3533 = vmatpush.msrb.mxu0 %v7094_v50 }
0x173e   :  { %3534 = vmatpush.msrb.mxu0 %v7100_v44 }
0x1740   :  { %3535 = vmatpush.msrb.mxu0 %v7106_v57 }
0x1741   :  { %v3616_v34 = vpop.f32.mrf.mxu2 }
0x1742   :  { %v3619_v24 = vmul.f32 %v3616_v34, %v6878_v17 }
0x1749   :  { %v3661_v29 = vpop.f32.mrf.mxu2 }
0x174a   :  { %v3664_v17 = vmul.f32 %v3661_v29, %v6884_v46 }
0x1799   :  { %v3448_v25 = vpop.f32.mrf.mxu3 }
0x179a   :  { %v3452_v0 = vmul.f32 %v7062_v30, %v3448_v25 }
0x179c   :  { %v3455_v5 = vadd.f32 %v3454_v27, %v3452_v0  ;;  %v3642_v0 = vmul.f32 %v7018_v9, %v6882_v8  ;;  %v7111_v27 = vld [vmem:[#allocation5 + $0x5a0] sm:$0xff] }
0x179d   :  { %3536 = vmatpush.msrb.mxu0 %v7111_v27 }
0x17a1   :  { %v3473_v62 = vpop.f32.mrf.mxu3 }
0x17a2   :  { %v3477_v38 = vmul.f32 %v7073_v12, %v3473_v62 }
0x17a4   :  { %v3478_v13 = vadd.f32 %v3477_v38, %v3455_v5  ;;  %v7118_v38 = vld [vmem:[#allocation5 + $0x580] sm:$0xff] }
0x17a6   :  { %v7091_v31 = vadd.f32 %v7083_v39, %v3478_v13 }
0x17a8   :  { %v7097_v55 = vmul.f32 0.70710677, %v7091_v31 }
0x17a9   :  { %v3637_v28 = vpop.f32.mrf.mxu3 }
0x17aa   :  { %v3483_v14 = vand.u32 2147483647, %v7097_v55  ;;  %v3640_v10 = vmul.f32 %v3637_v28, %v6880_v15  ;;  %v7115_v15 = vld [vmem:[#allocation5 + $0x590] sm:$0xff]  ;;  %vm3502_vm3 = vcmp.ge.f32.partialorder %v7097_v55, 0.0 }
0x17ab   :  { %3537 = vmatpush.msrb.mxu0 %v7115_v15  ;;  %v7122_v28 = vld [vmem:[#allocation5 + $0x570] sm:$0xff] }
0x17ac   :  { %v3484_v2 = vmul.f32 0.3275911, %v3483_v14  ;;  %v3641_v25 = vadd.f32 %v3640_v10, %v3619_v24  ;;  %v3496_v10 = vsub.f32 0.0, %v3483_v14  ;;  %v7155_v55 = vld [vmem:[#allocation2 + $0xa4] ss:$0 sm:$0xff] }
0x17ad   :  { %3538 = vmatpush.msrb.mxu0 %v7118_v38 }
0x17ae   :  { %v3485_v62 = vadd.f32 1.0, %v3484_v2  ;;  %v3643_v5 = vadd.f32 %v3642_v0, %v3641_v25 }
0x17af   :  { %3539 = vmatpush.msrb.mxu0 %v7122_v28 }
0x17b0   :  { %5653 = vrcp.f32 %v3485_v62  ;;  %v3665_v13 = vadd.f32 %v3664_v17, %v3643_v5 }
0x17b1   :  { %v3683_v34 = vpop.f32.mrf.mxu3 }
0x17b2   :  { %v3686_v8 = vmul.f32 %v3683_v34, %v6888_v40  ;;  %v3497_v40 = vmul.f32 %v3496_v10, %v3483_v14 }
0x17b4   :  { %v3687_v24 = vadd.f32 %v3686_v8, %v3665_v13  ;;  %v3498_v62 = vmul.f32 1.442695, %v3497_v40  ;;  %v8129_v13 = vld [vmem:[#allocation31_spill] sm:$0xff] }
0x17b6   :  { %v5654_v46 = vpop.eup %5653  ;;  %v3688_v29 = vadd.f32 %v3687_v24, %v6894_v35  ;;  %5655 = vpow2.f32 %v3498_v62 }
0x17b7   :  { %v3487_v2 = vmul.f32 1.0614054, %v5654_v46 }
0x17b8   :  { %5517 = vmatpush.msk.msrb.mxu1 %vm3164_vm0, %v3688_v29  ;;  %5519 = vmatpush.msk.msra.mxu2 %vm3164_vm0, %v3688_v29 }
0x17b9   :  { %v3488_v25 = vadd.f32 -1.4531521, %v3487_v2  ;;  %5518 = vmatmul.msk.f32.vlgmr.msrb.gmra.mxu1 %vm3161_vm1, %v6004_v47  ;;  %5520 = vmatmul.msk.f32.vlgmr.msra.gmra.mxu2 %vm3161_vm1, %v5998_v45  ;;  %v8130_v2 = vld [vmem:[#allocation27_spill] sm:$0xff] }
0x17ba   :  { %3773 = vmatpush.msra.mxu1 %v6918_v48  ;;  %3799 = vmatpush.msrb.mxu2 %v6963_v54 }
0x17bb   :  { %v3489_v0 = vmul.f32 %v5654_v46, %v3488_v25 }
0x17bc   :  { %3774 = vmatpush.msra.mxu1 %v6920_v23  ;;  %3800 = vmatpush.msrb.mxu2 %v6965_v4 }
0x17bd   :  { %v3490_v35 = vadd.f32 1.4214138, %v3489_v0 }
0x17be   :  { %3775 = vmatpush.msra.mxu1 %v6923_v6  ;;  %3801 = vmatpush.msrb.mxu2 %v6968_v37 }
0x17bf   :  { %v3491_v47 = vmul.f32 %v5654_v46, %v3490_v35 }
0x17c0   :  { %3776 = vmatpush.msra.mxu1 %v6926_v21  ;;  %3802 = vmatpush.msrb.mxu2 %v6990_v26  ;;  %v5656_v21 = vpop.eup %5655 }
0x17c1   :  { %v3492_v45 = vadd.f32 -0.28449672, %v3491_v47 }
0x17c2   :  { %3777 = vmatpush.msra.mxu1 %v6929_v11  ;;  %3803 = vmatpush.msrb.mxu2 %v6993_v18 }
0x17c3   :  { %v3493_v48 = vmul.f32 %v5654_v46, %v3492_v45 }
0x17c4   :  { %3778 = vmatpush.msra.mxu1 %v6932_v3  ;;  %3804 = vmatpush.msrb.mxu2 %v6996_v7  ;;  %v3481_v3 = vmul.f32 0.5, %v7091_v31 }
0x17c5   :  { %v3494_v23 = vadd.f32 0.2548296, %v3493_v48 }
0x17c6   :  { %3779 = vmatpush.msra.mxu1 %v6935_v22  ;;  %3805 = vmatpush.msrb.mxu2 %v6999_v43  ;;  %v3713_v43 = vmul.f32 %v3688_v29, %v6947_v19  ;;  %v5784_v19 = vmov 64.0  }
0x17c7   :  { %v3495_v6 = vmul.f32 %v5654_v46, %v3494_v23  ;;  %5657 = vrcp.f32 %v5784_v19  ;;  %v8135_v19 = vld [vmem:[#allocation18_spill] sm:$0xff] }
0x17c8   :  { %3780 = vmatpush.msra.mxu1 %v6938_v63  ;;  %3806 = vmatpush.msrb.mxu2 %v7002_v42 }
0x17c9   :  { %v3500_v54 = vmul.f32 %v5656_v21, %v3495_v6 }
0x17cb   :  { %v3501_v11 = vsub.f32 1.0, %v3500_v54 }
0x17cd   :  { %v3503_v4 = vsub.f32 0.0, %v3501_v11  ;;  %v5658_v24 = vpop.eup %5657 }
0x17ce   :  { %vm3918_vm5 = vweird.f32 %v5658_v24 }
0x17cf   :  { %v3504_v37 = vsel %vm3502_vm3, %v3501_v11, %v3503_v4  ;;  %v8131_v11 = vld [vmem:[#allocation30_spill] sm:$0xff] }
0x17d0   :  { %v3505_v26 = vadd.f32 1.0, %v3504_v37  ;;  %v8132_v37 = vld [vmem:[#allocation29_spill] sm:$0xff] }
0x17d2   :  { %v3506_v18 = vmul.f32 %v3505_v26, %v3481_v3  ;;  %v8133_v3 = vld [vmem:[#allocation33_spill] sm:$0xff] }
0x17d4   :  { %3540 = vmatmul.f32.vlgmr.msrb.gmra.mxu0 %v3506_v18  ;;  %v8134_v18 = vld [vmem:[#allocation28_spill] sm:$0xff] }
0x1836   :  { %v3709_v22 = vpop.f32.mrf.mxu1 }
0x1837   :  { %v3712_v7 = vmul.f32 %v3709_v22, %v6945_v20 }
0x1839   :  { %v3714_v63 = vadd.f32 %v3713_v43, %v3712_v7 }
0x183c   :  { %v3732_v14 = vpop.f32.mrf.mxu2 }
0x183d   :  { %v3735_v42 = vmul.f32 %v3732_v14, %v6949_v36  ;;  %v3914_v36 = vmul.f32 64.0, %v5658_v24 }
0x183f   :  { %v3736_v5 = vadd.f32 %v3735_v42, %v3714_v63  ;;  %v3915_v46 = vsub.f32 1.0, %v3914_v36  ;;  %v8137_v36 = vld [vmem:[#allocation19_spill] sm:$0xff] }
0x1841   :  { %v3737_v17 = vadd.f32 %v3736_v5, %v6957_v59  ;;  %v3916_v10 = vmul.f32 %v5658_v24, %v3915_v46 }
0x1843   :  { %5521 = vmatmul.msk.f32.vlgmr.msrb.gmra.mxu3 %vm2336_vm6, %v3737_v17  ;;  %v3917_v59 = vadd.f32 %v5658_v24, %v3916_v10  ;;  %v7176_v17 = vld [vmem:[#allocation2 + $0xa5] ss:$0 sm:$0xff] }
0x1845   :  { %v7161_v40 = vsel %vm3918_vm5, %v5658_v24, %v3917_v59  ;;  %v8136_v24 = vld [vmem:[#allocation17_spill] sm:$0xff] }
0x1851   :  { %v3541_v31 = vpop.f32.mrf.mxu0 }
0x1852   :  { %v3542_v34 = vadd.f32 %v3541_v31, %v7155_v55 }
0x1854   :  { %v3544_v8 = vadd.f32 %v3542_v34, %v8129_v13  ;;  %v7178_v13 = vld [vmem:[#allocation2 + $0xa6] ss:$0 sm:$0xff] }
0x1856   :  { %v3910_v20 = vsel %vm3909_vm4, %v3544_v8, 0.0 }
0x1857   :  { %3911 = vadd.xlane.f32.xlu0 %v3910_v20 }
0x18c6   :  { %v3758_v29 = vpop.f32.mrf.mxu3 }
0x18c7   :  { %v3759_v25 = vadd.f32 %v3758_v29, %v8130_v2 }
0x18c9   :  { %v3761_v0 = vmul.f32 %v3759_v25, %v7018_v9 }
0x18ca   :  { %v3912_v35 = vpop.xlane.xlu0 %3911 }
0x18cb   :  { %v3920_v62 = vmul.f32 %v7161_v40, %v3912_v35  ;;  %5522 = vmatmul.msk.f32.vlgmr.msra.gmra.mxu1 %vm2336_vm6, %v3761_v0 }
0x18cd   :  { %v3921_v47 = vsub.f32 %v3544_v8, %v3920_v62 }
0x18cf   :  { %v3922_v45 = vmul.f32 %v3921_v47, %v3921_v47 }
0x18d1   :  { %v3923_v48 = vsel %vm3909_vm4, %v3922_v45, 0.0 }
0x18d2   :  { %3924 = vadd.xlane.f32.xlu1 %v3923_v48 }
0x1945   :  { %v3925_v23 = vpop.xlane.xlu1 %3924 }
0x1946   :  { %v3926_v6 = vmul.f32 %v3925_v23, %v7161_v40 }
0x1948   :  { %v3927_v21 = vadd.f32 1e-05, %v3926_v6  ;;  %v3782_v54 = vpop.f32.mrf.mxu1 }
0x1949   :  { %v3783_v4 = vadd.f32 %v3782_v54, %v8131_v11 }
0x194a   :  { %5659 = vrsqrt.f32 %v3927_v21  ;;  %vm3934_vm8 = vweird.f32 %v3927_v21 }
0x194b   :  { %v3785_v9 = vadd.f32 %v3783_v4, %v8132_v37  ;;  %v7224_v37 = vld [vmem:[#allocation5 + $0x760] sm:$0xff] }
0x194d   :  { %v3786_v26 = vmul.f32 %v3785_v9, %v8133_v3  ;;  %v7226_v9 = vld [vmem:[#allocation5 + $0x750] sm:$0xff]  ;;  %v4104_v3 = vld [vmem:[#allocation5 + $0x7e0] sm:$0xff] }
0x194f   :  { %v7172_v22 = vadd.f32 %v3786_v26, %v8134_v18  ;;  %v4103_v26 = vld [vmem:[#allocation5 + $0x7d0] sm:$0xff]  ;;  %v7229_v18 = vld [vmem:[#allocation5 + $0x740] sm:$0xff] }
0x1950   :  { %v5660_v7 = vpop.eup %5659 }
0x1951   :  { %v3929_v43 = vmul.f32 %v5660_v7, %v3927_v21  ;;  %5523 = vmatmul.msk.f32.vlgmr.msrb.gmra.mxu2 %vm2336_vm6, %v7172_v22  ;;  %vm3935_vm7 = vweird.f32 %v5660_v7 }
0x1952   :  { %vm3936_vm9 = vmor %vm3934_vm8, %vm3935_vm7 }
0x1953   :  { %v3930_v14 = vmul.f32 %v5660_v7, %v3929_v43  ;;  %v3997_v43 = vld [vmem:[#allocation5 + $0x6d0] sm:$0xff] }
0x1955   :  { %v3931_v63 = vmul.f32 0.5, %v3930_v14  ;;  %v7232_v14 = vld [vmem:[#allocation5 + $0x730] sm:$0xff] }
0x1957   :  { %v3932_v42 = vsub.f32 1.5, %v3931_v63  ;;  %v4101_v63 = vld [vmem:[#allocation5 + $0x7b0] sm:$0xff] }
0x1959   :  { %v3933_v5 = vmul.f32 %v5660_v7, %v3932_v42  ;;  %v3996_v42 = vld [vmem:[#allocation5 + $0x6c0] sm:$0xff] }
0x195b   :  { %v3937_v31 = vsel %vm3936_vm9, %v5660_v7, %v3933_v5  ;;  %v3998_v7 = vld [vmem:[#allocation5 + $0x6e0] sm:$0xff]  ;;  %vm5288_vm9 = vcmask 57344  }
0x195c   :  { %v3938_v34 = vmul.f32 %v3937_v31, %v3921_v47  ;;  %v7235_v5 = vld [vmem:[#allocation5 + $0x720] sm:$0xff] }
0x195d   :  { %v4100_v31 = vld [vmem:[#allocation5 + $0x7a0] sm:$0xff] }
0x195e   :  { %v3939_v8 = vmul.f32 %v3938_v34, %v7176_v17  ;;  %v3995_v34 = vld [vmem:[#allocation5 + $0x6b0] sm:$0xff] }
0x1960   :  { %v3940_v20 = vadd.f32 %v3939_v8, %v7178_v13  ;;  %v7238_v8 = vld [vmem:[#allocation5 + $0x710] sm:$0xff] }
0x1962   :  { %5528 = vmatpush.msk.msrb.mxu1 %vm3164_vm0, %v3940_v20  ;;  %5530 = vmatpush.msk.msra.mxu2 %vm3164_vm0, %v3940_v20 }
0x1963   :  { %5529 = vmatmul.msk.f32.vlgmr.msrb.gmra.mxu1 %vm3161_vm1, %v8135_v19  ;;  %5531 = vmatmul.msk.f32.vlgmr.msra.gmra.mxu2 %vm3161_vm1, %v8136_v24 }
0x1964   :  { %5534 = vmatpush.msk.msrb.mxu2 %vm3164_vm0, %v3940_v20  ;;  %4063 = vmatpush.msra.mxu1 %v3998_v7  ;;  %v4099_v20 = vld [vmem:[#allocation5 + $0x790] sm:$0xff] }
0x1966   :  { %4116 = vmatpush.msra.mxu2 %v4104_v3  ;;  %4064 = vmatpush.msra.mxu1 %v3997_v43 }
0x1968   :  { %4117 = vmatpush.msra.mxu2 %v4103_v26  ;;  %4065 = vmatpush.msra.mxu1 %v3996_v42 }
0x196a   :  { %4066 = vmatpush.msra.mxu1 %v3995_v34 }
0x196b   :  { %5535 = vmatmul.msk.f32.vlgmr.msrb.gmra.mxu2 %vm3161_vm1, %v8137_v36 }
0x19d4   :  { %v3808_v46 = vpop.f32.mrf.mxu2 }
0x19d5   :  { %v3809_v10 = vadd.f32 %v3808_v46, %v7028_v56  ;;  %v3994_v46 = vld [vmem:[#allocation5 + $0x6a0] sm:$0xff] }
0x19d6   :  { %4067 = vmatpush.msra.mxu1 %v3994_v46 }
0x19d7   :  { %5524 = vmatpush.msk.msra.mxu0 %vm3164_vm0, %v3809_v10  ;;  %5526 = vmatpush.msk.msra.mxu3 %vm3164_vm0, %v3809_v10 }
0x19d8   :  { %5525 = vmatmul.msk.f32.vlgmr.msra.gmra.mxu0 %vm3161_vm1, %v8113_v53  ;;  %5527 = vmatmul.msk.f32.vlgmr.msra.gmra.mxu3 %vm3161_vm1, %v8114_v1 }
0x19d9   :  { %3886 = vmatpush.msrb.mxu0 %v7053_v33  ;;  %4040 = vmatpush.msrb.mxu3 %v7224_v37 }
0x19db   :  { %3887 = vmatpush.msrb.mxu0 %v7056_v16  ;;  %v3835_v16 = vmul.f32 %v3809_v10, %v7067_v58  ;;  %4041 = vmatpush.msrb.mxu3 %v7226_v9  ;;  %v7241_v10 = vld [vmem:[#allocation5 + $0x700] sm:$0xff] }
0x19dd   :  { %3888 = vmatpush.msrb.mxu0 %v7059_v41  ;;  %4042 = vmatpush.msrb.mxu3 %v7229_v18 }
0x19df   :  { %3889 = vmatpush.msrb.mxu0 %v7064_v49  ;;  %4043 = vmatpush.msrb.mxu3 %v7232_v14 }
0x19e1   :  { %3890 = vmatpush.msrb.mxu0 %v7069_v60  ;;  %4044 = vmatpush.msrb.mxu3 %v7235_v5 }
0x19e3   :  { %3891 = vmatpush.msrb.mxu0 %v7075_v61  ;;  %4045 = vmatpush.msrb.mxu3 %v7238_v8 }
0x19e5   :  { %3892 = vmatpush.msrb.mxu0 %v7079_v52  ;;  %4046 = vmatpush.msrb.mxu3 %v7241_v10 }
0x19e7   :  { %3893 = vmatpush.msrb.mxu0 %v7085_v32 }
0x19e9   :  { %3894 = vmatpush.msrb.mxu0 %v7088_v51 }
0x19eb   :  { %3895 = vmatpush.msrb.mxu0 %v7094_v50 }
0x19ed   :  { %3896 = vmatpush.msrb.mxu0 %v7100_v44 }
0x19ef   :  { %3897 = vmatpush.msrb.mxu0 %v7106_v57 }
0x19f1   :  { %3898 = vmatpush.msrb.mxu0 %v7111_v27 }
0x19f3   :  { %3899 = vmatpush.msrb.mxu0 %v7115_v15 }
0x19f5   :  { %3900 = vmatpush.msrb.mxu0 %v7118_v38 }
0x19f7   :  { %3901 = vmatpush.msrb.mxu0 %v7122_v28 }
0x19f9   :  { %4207 = vmatpush.msra.mxu0 %v3998_v7 }
0x19fb   :  { %4208 = vmatpush.msra.mxu0 %v3997_v43  ;;  %v7329_v43 = vld [vmem:[#allocation5 + $0x7f0] sm:$0xff] }
0x19fd   :  { %4209 = vmatpush.msra.mxu0 %v3996_v42 }
0x19ff   :  { %4210 = vmatpush.msra.mxu0 %v3995_v34 }
0x1a01   :  { %4211 = vmatpush.msra.mxu0 %v3994_v46 }
0x1a55   :  { %v3831_v56 = vpop.f32.mrf.mxu0 }
0x1a56   :  { %v3834_v33 = vmul.f32 %v3831_v56, %v7062_v30  ;;  %v4098_v56 = vld [vmem:[#allocation5 + $0x780] sm:$0xff] }
0x1a58   :  { %v3836_v49 = vadd.f32 %v3835_v16, %v3834_v33  ;;  %v3993_v33 = vld [vmem:[#allocation5 + $0x690] sm:$0xff] }
0x1a59   :  { %v7244_v16 = vld [vmem:[#allocation5 + $0x6f0] sm:$0xff]  ;;  %4068 = vmatpush.msra.mxu1 %v3993_v33  ;;  %4212 = vmatpush.msra.mxu0 %v3993_v33 }
0x1a5a   :  { %4047 = vmatpush.msrb.mxu3 %v7244_v16 }
0x1a5b   :  { %v3854_v41 = vpop.f32.mrf.mxu3 }
0x1a5c   :  { %v3857_v60 = vmul.f32 %v3854_v41, %v7073_v12  ;;  %v4097_v41 = vld [vmem:[#allocation5 + $0x770] sm:$0xff] }
0x1a5e   :  { %v3858_v61 = vadd.f32 %v3857_v60, %v3836_v49  ;;  %v3992_v60 = vld [vmem:[#allocation5 + $0x680] sm:$0xff] }
0x1a5f   :  { %4069 = vmatpush.msra.mxu1 %v3992_v60  ;;  %4213 = vmatpush.msra.mxu0 %v3992_v60 }
0x1a60   :  { %v3859_v52 = vadd.f32 %v3858_v61, %v7083_v39  ;;  %v3991_v61 = vld [vmem:[#allocation5 + $0x670] sm:$0xff] }
0x1a61   :  { %4070 = vmatpush.msra.mxu1 %v3991_v61  ;;  %4214 = vmatpush.msra.mxu0 %v3991_v61 }
0x1a62   :  { %v3861_v32 = vmul.f32 0.70710677, %v3859_v52  ;;  %v3860_v48 = vmul.f32 0.5, %v3859_v52  ;;  %v3988_v52 = vpop.f32.mrf.mxu1 }
0x1a63   :  { %5533 = vmatmul.msk.f32.vlgmr.msra.gmra.mxu1 %vm2336_vm6, %v3988_v52 }
0x1a64   :  { %v3862_v51 = vand.u32 2147483647, %v3861_v32  ;;  %vm3881_vm10 = vcmp.ge.f32.partialorder %v3861_v32, 0.0 }
0x1a66   :  { %v3863_v50 = vmul.f32 0.3275911, %v3862_v51  ;;  %v3875_v27 = vsub.f32 0.0, %v3862_v51 }
0x1a68   :  { %v3864_v44 = vadd.f32 1.0, %v3863_v50  ;;  %v3876_v28 = vmul.f32 %v3875_v27, %v3862_v51 }
0x1a6a   :  { %5661 = vrcp.f32 %v3864_v44  ;;  %v3877_v58 = vmul.f32 1.442695, %v3876_v28 }
0x1a6c   :  { %5663 = vpow2.f32 %v3877_v58 }
0x1a70   :  { %v5662_v57 = vpop.eup %5661 }
0x1a71   :  { %v3866_v15 = vmul.f32 1.0614054, %v5662_v57 }
0x1a72   :  { %v5664_v39 = vpop.eup %5663 }
0x1a73   :  { %v3867_v38 = vadd.f32 -1.4531521, %v3866_v15 }
0x1a75   :  { %v3868_v30 = vmul.f32 %v5662_v57, %v3867_v38 }
0x1a77   :  { %v3869_v59 = vadd.f32 1.4214138, %v3868_v30 }
0x1a79   :  { %v3870_v29 = vmul.f32 %v5662_v57, %v3869_v59 }
0x1a7b   :  { %v3871_v2 = vadd.f32 -0.28449672, %v3870_v29 }
0x1a7d   :  { %v3872_v12 = vmul.f32 %v5662_v57, %v3871_v2 }
0x1a7f   :  { %v3873_v25 = vadd.f32 0.2548296, %v3872_v12 }
0x1a81   :  { %v3874_v0 = vmul.f32 %v5662_v57, %v3873_v25 }
0x1a83   :  { %v3879_v35 = vmul.f32 %v5664_v39, %v3874_v0 }
0x1a85   :  { %v3880_v62 = vsub.f32 1.0, %v3879_v35  ;;  %v7266_v35 = vld [vmem:[#allocation5 + $0x8d0] sm:$0xff] }
0x1a87   :  { %v3882_v47 = vsub.f32 0.0, %v3880_v62 }
0x1a89   :  { %v3883_v45 = vsel %vm3881_vm10, %v3880_v62, %v3882_v47  ;;  %v7288_v62 = vld [vmem:[#allocation5 + $0x880] sm:$0xff] }
0x1a8a   :  { %v3884_v23 = vadd.f32 1.0, %v3883_v45 }
0x1a8c   :  { %v3885_v6 = vmul.f32 %v3884_v23, %v3860_v48  ;;  %v7292_v48 = vld [vmem:[#allocation5 + $0x870] sm:$0xff] }
0x1a8e   :  { %3902 = vmatmul.f32.vlgmr.msrb.gmra.mxu0 %v3885_v6 }
0x1ae0   :  { %v4072_v45 = vpop.f32.mrf.mxu1 }
0x1b0b   :  { %v3903_v21 = vpop.f32.mrf.mxu0 }
0x1b0c   :  { %v3904_v54 = vadd.f32 %v3903_v21, %v7155_v55  ;;  %v4102_v55 = vld [vmem:[#allocation5 + $0x7c0] sm:$0xff]  ;;  %v7300_v21 = vld [vmem:[#allocation5 + $0x850] sm:$0xff] }
0x1b0d   :  { %4118 = vmatpush.msra.mxu2 %v4102_v55 }
0x1b0e   :  { %v7220_v11 = vadd.f32 %v3904_v54, %v7172_v22  ;;  %v4018_v22 = vpop.f32.mrf.mxu2  ;;  %v7303_v54 = vld [vmem:[#allocation5 + $0x840] sm:$0xff] }
0x1b0f   :  { %4119 = vmatpush.msra.mxu2 %v4101_v63  ;;  %5532 = vmatmul.msk.f32.vlgmr.msrb.gmra.mxu3 %vm2336_vm6, %v4018_v22  ;;  %v7326_v22 = vld [vmem:[#allocation2 + $0xb1] ss:$0 sm:$0xff] }
0x1b10   :  { %v3941_v4 = vsel %vm3909_vm4, %v7220_v11, 0.0 }
0x1b11   :  { %3942 = vadd.xlane.f32.xlu2 %v3941_v4  ;;  %4120 = vmatpush.msra.mxu2 %v4100_v31  ;;  %v7306_v4 = vld [vmem:[#allocation2 + $0xa7] ss:$0 sm:$0xff] }
0x1b13   :  { %4121 = vmatpush.msra.mxu2 %v4099_v20 }
0x1b15   :  { %4122 = vmatpush.msra.mxu2 %v4098_v56 }
0x1b16   :  { %v4094_v49 = vpop.f32.mrf.mxu2 }
0x1b17   :  { %4123 = vmatpush.msra.mxu2 %v4097_v41 }
0x1b18   :  { %5536 = vmatmul.msk.f32.vlgmr.msra.gmra.mxu2 %vm2336_vm6, %v4094_v49 }
0x1b19   :  { %4250 = vmatpush.msrb.mxu2 %v4104_v3  ;;  %v7314_v3 = vld [vmem:[#allocation5 + $0x820] sm:$0xff] }
0x1b1b   :  { %4251 = vmatpush.msrb.mxu2 %v4103_v26  ;;  %v7316_v26 = vld [vmem:[#allocation2 + $0xb0] ss:$0 sm:$0xff] }
0x1b1d   :  { %4252 = vmatpush.msrb.mxu2 %v4102_v55  ;;  %v7324_v55 = vld [vmem:[#allocation5 + $0x800] sm:$0xff] }
0x1b1f   :  { %4253 = vmatpush.msrb.mxu2 %v4101_v63 }
0x1b21   :  { %4254 = vmatpush.msrb.mxu2 %v4100_v31  ;;  %v7340_v31 = vld [vmem:[#allocation2 + $0xb2] ss:$0 sm:$0xff] }
0x1b23   :  { %4255 = vmatpush.msrb.mxu2 %v4099_v20 }
0x1b25   :  { %4256 = vmatpush.msrb.mxu2 %v4098_v56 }
0x1b27   :  { %4257 = vmatpush.msrb.mxu2 %v4097_v41 }
0x1b84   :  { %v3943_v32 = vpop.xlane.xlu2 %3942 }
0x1b85   :  { %v3944_v51 = vmul.f32 %v3943_v32, %v7161_v40 }
0x1b87   :  { %v3945_v50 = vsub.f32 %v7220_v11, %v3944_v51 }
0x1b89   :  { %v3946_v44 = vmul.f32 %v3945_v50, %v3945_v50 }
0x1b8b   :  { %v3947_v57 = vsel %vm3909_vm4, %v3946_v44, 0.0 }
0x1b8c   :  { %3948 = vadd.xlane.f32.xlu0 %v3947_v57 }
0x1b92   :  { %v4049_v47 = vpop.f32.mrf.mxu3 }
0x1b93   :  { %v4073_v23 = vadd.f32 %v4072_v45, %v4049_v47  ;;  %v7364_v47 = vld [vmem:[#allocation5 + $0x9a0] sm:$0xff]  ;;  %v7367_v45 = vld [vmem:[#allocation5 + $0x990] sm:$0xff] }
0x1b94   :  { %8142 = vst [vmem:[#allocation11_spill] sm:$0xff] %v7364_v47 }
0x1b95   :  { %8143 = vst [vmem:[#allocation12_spill] sm:$0xff] %v7367_v45 }
0x1b9b   :  { %v4125_v6 = vpop.f32.mrf.mxu2 }
0x1b9c   :  { %v4128_v11 = vadd.f32 %v4125_v6, %v4073_v23  ;;  %v7370_v23 = vld [vmem:[#allocation5 + $0x980] sm:$0xff]  ;;  %v7373_v6 = vld [vmem:[#allocation5 + $0x970] sm:$0xff] }
0x1b9d   :  { %8144 = vst [vmem:[#allocation20_spill] sm:$0xff] %v7370_v23 }
0x1b9e   :  { %8145 = vst [vmem:[#allocation21_spill] sm:$0xff] %v7373_v6 }
0x1bff   :  { %v3949_v27 = vpop.xlane.xlu0 %3948 }
0x1c00   :  { %v3950_v15 = vmul.f32 %v3949_v27, %v7161_v40  ;;  %v7259_v40 = vld [vmem:[#allocation5 + $0x8e0] sm:$0xff] }
0x1c02   :  { %v3951_v38 = vadd.f32 1e-05, %v3950_v15 }
0x1c04   :  { %5665 = vrsqrt.f32 %v3951_v38  ;;  %vm3958_vm13 = vweird.f32 %v3951_v38 }
0x1c0a   :  { %v5666_v28 = vpop.eup %5665 }
0x1c0b   :  { %v3953_v30 = vmul.f32 %v5666_v28, %v3951_v38  ;;  %vm3959_vm11 = vweird.f32 %v5666_v28 }
0x1c0c   :  { %vm3960_vm14 = vmor %vm3958_vm13, %vm3959_vm11 }
0x1c0d   :  { %v3954_v59 = vmul.f32 %v5666_v28, %v3953_v30 }
0x1c0f   :  { %v3955_v58 = vmul.f32 0.5, %v3954_v59 }
0x1c11   :  { %v3956_v29 = vsub.f32 1.5, %v3955_v58 }
0x1c13   :  { %v3957_v2 = vmul.f32 %v5666_v28, %v3956_v29 }
0x1c15   :  { %v3961_v12 = vsel %vm3960_vm14, %v5666_v28, %v3957_v2 }
0x1c16   :  { %v3962_v25 = vmul.f32 %v3961_v12, %v3945_v50  ;;  %v7353_v12 = vld [vmem:[#allocation5 + $0x9e0] sm:$0xff] }
0x1c17   :  { %8138 = vst [vmem:[#allocation32_spill] sm:$0xff] %v7353_v12  ;;  %4411 = vmatpush.msra.mxu2 %v7353_v12  ;;  %v7530_v12 = vld [vmem:[#allocation5 + $0xb40] sm:$0xff] }
0x1c18   :  { %v3963_v0 = vmul.f32 %v3962_v25, %v7176_v17  ;;  %v7270_v17 = vld [vmem:[#allocation5 + $0x8c0] sm:$0xff]  ;;  %v7355_v25 = vld [vmem:[#allocation5 + $0x9d0] sm:$0xff]  ;;  %8175 = vst [vmem:[#allocation48_spill] sm:$0xff] %v7530_v12 }
0x1c19   :  { %8139 = vst [vmem:[#allocation35_spill] sm:$0xff] %v7355_v25  ;;  %4412 = vmatpush.msra.mxu2 %v7355_v25  ;;  %v7526_v25 = vld [vmem:[#allocation5 + $0xb58] sm:$0xff] }
0x1c1a   :  { %v3964_v39 = vadd.f32 %v3963_v0, %v7178_v13  ;;  %v7274_v13 = vld [vmem:[#allocation5 + $0x8b0] sm:$0xff]  ;;  %v7358_v0 = vld [vmem:[#allocation5 + $0x9c0] sm:$0xff] }
0x1c1b   :  { %8140 = vst [vmem:[#allocation34_spill] sm:$0xff] %v7358_v0  ;;  %4413 = vmatpush.msra.mxu2 %v7358_v0  ;;  %v7524_v0 = vld [vmem:[#allocation5 + $0xb50] sm:$0xff] }
0x1c1c   :  { %5537 = vmatpush.msk.msra.mxu3 %vm3164_vm0, %v3964_v39  ;;  %5539 = vmatpush.msk.msrb.mxu1 %vm3164_vm0, %v3964_v39  ;;  %8174 = vst [vmem:[#allocation47_spill] sm:$0xff] %v7524_v0 }
0x1c1d   :  { %5538 = vmatmul.msk.f32.vlgmr.msra.gmra.mxu3 %vm3161_vm1, %v8135_v19  ;;  %5540 = vmatmul.msk.f32.vlgmr.msrb.gmra.mxu1 %vm3161_vm1, %v8136_v24  ;;  %v7278_v19 = vld [vmem:[#allocation5 + $0x8a0] sm:$0xff]  ;;  %v7284_v24 = vld [vmem:[#allocation5 + $0x890] sm:$0xff] }
0x1c1e   :  { %5543 = vmatpush.msk.msra.mxu1 %vm3164_vm0, %v3964_v39  ;;  %4184 = vmatpush.msrb.mxu3 %v7224_v37  ;;  %v7308_v37 = vld [vmem:[#allocation5 + $0x830] sm:$0xff] }
0x1c1f   :  { %v7361_v39 = vld [vmem:[#allocation5 + $0x9b0] sm:$0xff] }
0x1c20   :  { %4285 = vmatpush.msrb.mxu1 %v7259_v40  ;;  %4185 = vmatpush.msrb.mxu3 %v7226_v9  ;;  %v7312_v9 = vadd.f32 %v4128_v11, %v7306_v4  ;;  %8141 = vst [vmem:[#allocation36_spill] sm:$0xff] %v7361_v39  ;;  %v7376_v11 = vld [vmem:[#allocation5 + $0x960] sm:$0xff] }
0x1c21   :  { %4414 = vmatpush.msra.mxu2 %v7361_v39  ;;  %8146 = vst [vmem:[#allocation22_spill] sm:$0xff] %v7376_v11  ;;  %v7520_v39 = vld [vmem:[#allocation5 + $0xb68] sm:$0xff] }
0x1c22   :  { %4286 = vmatpush.msrb.mxu1 %v7266_v35  ;;  %4186 = vmatpush.msrb.mxu3 %v7229_v18  ;;  %v7319_v18 = vld [vmem:[#allocation5 + $0x810] sm:$0xff]  ;;  %v4265_v7 = vmul.f32 %v7316_v26, %v7312_v9 }
0x1c23   :  { %4415 = vmatpush.msra.mxu2 %v7364_v47  ;;  %v7518_v47 = vld [vmem:[#allocation5 + $0xb60] sm:$0xff] }
0x1c24   :  { %4287 = vmatpush.msrb.mxu1 %v7270_v17  ;;  %4187 = vmatpush.msrb.mxu3 %v7232_v14  ;;  %v7333_v14 = vadd.f32 %v7326_v22, %v4265_v7  ;;  %v7380_v7 = vld [vmem:[#allocation5 + $0x950] sm:$0xff]  ;;  %8173 = vst [vmem:[#allocation46_spill] sm:$0xff] %v7518_v47 }
0x1c25   :  { %5544 = vmatmul.msk.f32.vlgmr.msra.gmra.mxu1 %vm3161_vm1, %v8137_v36  ;;  %v7296_v36 = vld [vmem:[#allocation5 + $0x860] sm:$0xff]  ;;  %4416 = vmatpush.msra.mxu2 %v7367_v45  ;;  %8147 = vst [vmem:[#allocation14_spill] sm:$0xff] %v7380_v7  ;;  %v7514_v45 = vld [vmem:[#allocation5 + $0xb78] sm:$0xff] }
0x1c26   :  { %4288 = vmatpush.msrb.mxu1 %v7274_v13  ;;  %4188 = vmatpush.msrb.mxu3 %v7235_v5 }
0x1c27   :  { %4417 = vmatpush.msra.mxu2 %v7370_v23  ;;  %v7512_v23 = vld [vmem:[#allocation5 + $0xb70] sm:$0xff] }
0x1c28   :  { %4289 = vmatpush.msrb.mxu1 %v7278_v19  ;;  %4189 = vmatpush.msrb.mxu3 %v7238_v8  ;;  %8172 = vst [vmem:[#allocation45_spill] sm:$0xff] %v7512_v23 }
0x1c29   :  { %4418 = vmatpush.msra.mxu2 %v7373_v6  ;;  %v7508_v6 = vld [vmem:[#allocation5 + $0xb88] sm:$0xff] }
0x1c2a   :  { %4290 = vmatpush.msrb.mxu1 %v7284_v24  ;;  %4190 = vmatpush.msrb.mxu3 %v7241_v10 }
0x1c2b   :  { %4419 = vmatpush.msra.mxu2 %v7376_v11  ;;  %v7506_v11 = vld [vmem:[#allocation5 + $0xb80] sm:$0xff] }
0x1c2c   :  { %4291 = vmatpush.msrb.mxu1 %v7288_v62  ;;  %4191 = vmatpush.msrb.mxu3 %v7244_v16  ;;  %8171 = vst [vmem:[#allocation44_spill] sm:$0xff] %v7506_v11 }
0x1c2d   :  { %4420 = vmatpush.msra.mxu2 %v7380_v7  ;;  %v7502_v7 = vld [vmem:[#allocation5 + $0xb98] sm:$0xff] }
0x1c2e   :  { %4292 = vmatpush.msrb.mxu1 %v7292_v48 }
0x1c30   :  { %4293 = vmatpush.msrb.mxu1 %v7296_v36 }
0x1c32   :  { %4294 = vmatpush.msrb.mxu1 %v7300_v21 }
0x1c34   :  { %4295 = vmatpush.msrb.mxu1 %v7303_v54 }
0x1c36   :  { %4296 = vmatpush.msrb.mxu1 %v7308_v37 }
0x1c38   :  { %4297 = vmatpush.msrb.mxu1 %v7314_v3 }
0x1c3a   :  { %4298 = vmatpush.msrb.mxu1 %v7319_v18 }
0x1c3c   :  { %4299 = vmatpush.msrb.mxu1 %v7324_v55 }
0x1c3e   :  { %4300 = vmatpush.msrb.mxu1 %v7329_v43 }
0x1c3f   :  { %4301 = vmatmul.f32.vlgmr.msrb.gmra.mxu1 %v7333_v14 }
0x1c9a   :  { %v4170_v63 = vpop.f32.mrf.mxu1 }
0x1c9b   :  { %5541 = vmatmul.msk.f32.vlgmr.msrb.gmra.mxu3 %vm2336_vm6, %v4170_v63  ;;  %v7383_v63 = vld [vmem:[#allocation5 + $0x940] sm:$0xff] }
0x1c9c   :  { %8148 = vst [vmem:[#allocation16_spill] sm:$0xff] %v7383_v63  ;;  %4421 = vmatpush.msra.mxu2 %v7383_v63  ;;  %v7500_v63 = vld [vmem:[#allocation5 + $0xb90] sm:$0xff] }
0x1c9d   :  { %8170 = vst [vmem:[#allocation43_spill] sm:$0xff] %v7500_v63 }
0x1ca0   :  { %v4150_v42 = vpop.f32.mrf.mxu3 }
0x1ca1   :  { %5542 = vmatmul.msk.f32.vlgmr.msra.gmra.mxu0 %vm2336_vm6, %v4150_v42  ;;  %v7386_v42 = vld [vmem:[#allocation5 + $0x930] sm:$0xff] }
0x1ca2   :  { %v4236_v5 = vpop.f32.mrf.mxu1  ;;  %8149 = vst [vmem:[#allocation23_spill] sm:$0xff] %v7386_v42  ;;  %4422 = vmatpush.msra.mxu2 %v7386_v42  ;;  %v7496_v42 = vld [vmem:[#allocation5 + $0xba8] sm:$0xff] }
0x1ca3   :  { %5545 = vmatmul.msk.f32.vlgmr.msrb.gmra.mxu2 %vm2336_vm6, %v4236_v5  ;;  %v7389_v5 = vld [vmem:[#allocation5 + $0x920] sm:$0xff] }
0x1ca4   :  { %8150 = vst [vmem:[#allocation24_spill] sm:$0xff] %v7389_v5  ;;  %4423 = vmatpush.msra.mxu2 %v7389_v5  ;;  %v7455_v5 = vld [vmem:[#allocation2 + $0xc4] ss:$0 sm:$0xff] }
0x1ca5   :  { %8164 = vst [vmem:[#allocation37_spill] sm:$0xff] %v7455_v5 }
0x1cbc   :  { %v4302_v34 = vpop.f32.mrf.mxu1 }
0x1cbd   :  { %v4303_v8 = vadd.f32 %v4302_v34, %v7340_v31  ;;  %v7392_v34 = vld [vmem:[#allocation5 + $0x910] sm:$0xff] }
0x1cbe   :  { %8151 = vst [vmem:[#allocation25_spill] sm:$0xff] %v7392_v34  ;;  %4424 = vmatpush.msra.mxu2 %v7392_v34 }
0x1cbf   :  { %v4306_v20 = vmul.f32 0.70710677, %v4303_v8  ;;  %v4305_v58 = vmul.f32 0.5, %v4303_v8  ;;  %v7395_v8 = vld [vmem:[#allocation5 + $0x900] sm:$0xff] }
0x1cc0   :  { %8152 = vst [vmem:[#allocation26_spill] sm:$0xff] %v7395_v8  ;;  %4425 = vmatpush.msra.mxu2 %v7395_v8  ;;  %v7452_v8 = vld [vmem:[#allocation2 + $0xc0] ss:$0 sm:$0xff] }
0x1cc1   :  { %v4307_v46 = vand.u32 2147483647, %v4306_v20  ;;  %vm4326_vm6 = vcmp.ge.f32.partialorder %v4306_v20, 0.0  ;;  %v7398_v20 = vld [vmem:[#allocation5 + $0x8f0] sm:$0xff]  ;;  %8163 = vst [vmem:[#allocation19_spill] sm:$0xff] %v7452_v8 }
0x1cc2   :  { %8153 = vst [vmem:[#allocation13_spill] sm:$0xff] %v7398_v20  ;;  %4426 = vmatpush.msra.mxu2 %v7398_v20  ;;  %v7450_v20 = vld [vmem:[#allocation5 + $0xa20] sm:$0xff] }
0x1cc3   :  { %v4308_v10 = vmul.f32 0.3275911, %v4307_v46  ;;  %v4320_v16 = vsub.f32 0.0, %v4307_v46  ;;  %8162 = vst [vmem:[#allocation17_spill] sm:$0xff] %v7450_v20 }
0x1cc5   :  { %v4309_v56 = vadd.f32 1.0, %v4308_v10  ;;  %v4321_v60 = vmul.f32 %v4320_v16, %v4307_v46  ;;  %v7401_v46 = vld [vmem:[#allocation5 + $0xae0] sm:$0xff]  ;;  %v7403_v10 = vld [vmem:[#allocation5 + $0xad0] sm:$0xff] }
0x1cc6   :  { %v7412_v16 = vld [vmem:[#allocation5 + $0xaa0] sm:$0xff] }
0x1cc7   :  { %5667 = vrcp.f32 %v4309_v56  ;;  %v4322_v32 = vmul.f32 1.442695, %v4321_v60  ;;  %v7406_v56 = vld [vmem:[#allocation5 + $0xac0] sm:$0xff] }
0x1cc8   :  { %v7420_v60 = vld [vmem:[#allocation5 + $0xa80] sm:$0xff] }
0x1cc9   :  { %5669 = vpow2.f32 %v4322_v32  ;;  %v7428_v32 = vld [vmem:[#allocation5 + $0xa60] sm:$0xff] }
0x1cca   :  { %8155 = vst [vmem:[#allocation31_spill] sm:$0xff] %v7428_v32 }
0x1ccd   :  { %v5668_v33 = vpop.eup %5667 }
0x1cce   :  { %v4311_v41 = vmul.f32 1.0614054, %v5668_v33 }
0x1ccf   :  { %v5670_v15 = vpop.eup %5669 }
0x1cd0   :  { %v4312_v49 = vadd.f32 -1.4531521, %v4311_v41  ;;  %v7415_v41 = vld [vmem:[#allocation5 + $0xa90] sm:$0xff] }
0x1cd2   :  { %v4313_v61 = vmul.f32 %v5668_v33, %v4312_v49 }
0x1cd4   :  { %v4314_v52 = vadd.f32 1.4214138, %v4313_v61 }
0x1cd6   :  { %v4315_v51 = vmul.f32 %v5668_v33, %v4314_v52  ;;  %v7425_v52 = vld [vmem:[#allocation5 + $0xa70] sm:$0xff] }
0x1cd7   :  { %8154 = vst [vmem:[#allocation15_spill] sm:$0xff] %v7425_v52 }
0x1cd8   :  { %v4316_v50 = vadd.f32 -0.28449672, %v4315_v51  ;;  %v7431_v51 = vld [vmem:[#allocation5 + $0xa50] sm:$0xff] }
0x1cd9   :  { %8156 = vst [vmem:[#allocation27_spill] sm:$0xff] %v7431_v51 }
0x1cda   :  { %v4317_v44 = vmul.f32 %v5668_v33, %v4316_v50  ;;  %v7433_v50 = vld [vmem:[#allocation2 + $0xb4] ss:$0 sm:$0xff] }
0x1cdb   :  { %8157 = vst [vmem:[#allocation30_spill] sm:$0xff] %v7433_v50 }
0x1cdc   :  { %v4318_v57 = vadd.f32 0.2548296, %v4317_v44  ;;  %v7435_v44 = vld [vmem:[#allocation2 + $0xb5] ss:$0 sm:$0xff] }
0x1cdd   :  { %8158 = vst [vmem:[#allocation29_spill] sm:$0xff] %v7435_v44 }
0x1cde   :  { %v4319_v27 = vmul.f32 %v5668_v33, %v4318_v57  ;;  %v7409_v33 = vld [vmem:[#allocation5 + $0xab0] sm:$0xff] }
0x1ce0   :  { %v4324_v38 = vmul.f32 %v5670_v15, %v4319_v27  ;;  %v7437_v27 = vld [vmem:[#allocation2 + $0xb6] ss:$0 sm:$0xff] }
0x1ce1   :  { %8159 = vst [vmem:[#allocation33_spill] sm:$0xff] %v7437_v27  ;;  %v7440_v15 = vld [vmem:[#allocation5 + $0xa40] sm:$0xff] }
0x1ce2   :  { %v4325_v28 = vsub.f32 1.0, %v4324_v38  ;;  %8160 = vst [vmem:[#allocation28_spill] sm:$0xff] %v7440_v15 }
0x1ce4   :  { %v4327_v30 = vsub.f32 0.0, %v4325_v28 }
0x1ce6   :  { %v4328_v59 = vsel %vm4326_vm6, %v4325_v28, %v4327_v30 }
0x1ce7   :  { %v4329_v29 = vadd.f32 1.0, %v4328_v59 }
0x1ce9   :  { %v7343_v2 = vmul.f32 %v4329_v29, %v4305_v58  ;;  %v7447_v58 = vld [vmem:[#allocation5 + $0xa30] sm:$0xff] }
0x1cea   :  { %8161 = vst [vmem:[#allocation18_spill] sm:$0xff] %v7447_v58 }
0x1ceb   :  { %5546 = vmatpush.msk.msra.mxu3 %vm4334_vm15, %v7343_v2  ;;  %5548 = vmatpush.msk.msrb.mxu0 %vm4334_vm15, %v7343_v2  ;;  %v4361_v30 = vmul.f32 %v7435_v44, %v7343_v2  ;;  %v7459_v44 = vld [vmem:[#allocation2 + $0xd0] ss:$0 sm:$0xff] }
0x1cec   :  { %5547 = vmatmul.msk.f32.vlgmr.msra.gmra.mxu3 %vm4331_vm12, %v8113_v53  ;;  %5549 = vmatmul.msk.f32.vlgmr.msrb.gmra.mxu0 %vm4331_vm12, %v8114_v1  ;;  %8165 = vst [vmem:[#allocation38_spill] sm:$0xff] %v7459_v44 }
0x1ced   :  { %4449 = vmatpush.msrb.mxu3 %v7401_v46 }
0x1cef   :  { %4450 = vmatpush.msrb.mxu3 %v7403_v10 }
0x1cf1   :  { %4451 = vmatpush.msrb.mxu3 %v7406_v56 }
0x1cf3   :  { %4452 = vmatpush.msrb.mxu3 %v7409_v33 }
0x1cf5   :  { %4453 = vmatpush.msrb.mxu3 %v7412_v16 }
0x1cf7   :  { %4454 = vmatpush.msrb.mxu3 %v7415_v41 }
0x1cf9   :  { %4455 = vmatpush.msrb.mxu3 %v7420_v60 }
0x1cfb   :  { %4456 = vmatpush.msrb.mxu3 %v7425_v52 }
0x1cfd   :  { %4457 = vmatpush.msrb.mxu3 %v7428_v32 }
0x1cff   :  { %4458 = vmatpush.msrb.mxu3 %v7431_v51  ;;  %v7577_v51 = vld [vmem:[#allocation2 + $0xd3] ss:$0 sm:$0xff] }
0x1d01   :  { %4459 = vmatpush.msrb.mxu3 %v7440_v15  ;;  %v7546_v15 = vld [vmem:[#allocation5 + $0xb38] sm:$0xff] }
0x1d03   :  { %4460 = vmatpush.msrb.mxu3 %v7447_v58 }
0x1d05   :  { %4461 = vmatpush.msrb.mxu3 %v7450_v20 }
0x1d1e   :  { %v7417_v49 = vpop.f32.mrf.mxu0  ;;  %v7422_v61 = vpop.f32.mrf.mxu3 }
0x1d69   :  { %v4382_v57 = vpop.f32.mrf.mxu0 }
0x1d6a   :  { %v4386_v59 = vmul.f32 %v7437_v27, %v4382_v57 }
0x1d6f   :  { %v4355_v38 = vpop.f32.mrf.mxu3 }
0x1d70   :  { %v4359_v28 = vmul.f32 %v7433_v50, %v4355_v38  ;;  %v7494_v50 = vld [vmem:[#allocation5 + $0xba0] sm:$0xff] }
0x1d71   :  { %8169 = vst [vmem:[#allocation42_spill] sm:$0xff] %v7494_v50 }
0x1d72   :  { %v4362_v29 = vadd.f32 %v4361_v30, %v4359_v28  ;;  %v7463_v28 = vld [vmem:[#allocation5 + $0xa10] sm:$0xff]  ;;  %v7466_v30 = vld [vmem:[#allocation5 + $0xa00] sm:$0xff] }
0x1d73   :  { %8166 = vst [vmem:[#allocation39_spill] sm:$0xff] %v7463_v28  ;;  %4462 = vmatpush.msrb.mxu3 %v7463_v28  ;;  %v7540_v28 = vld [vmem:[#allocation2 + $0xd1] ss:$0 sm:$0xff] }
0x1d74   :  { %v4387_v34 = vadd.f32 %v4386_v59, %v4362_v29  ;;  %8167 = vst [vmem:[#allocation40_spill] sm:$0xff] %v7466_v30  ;;  %v7469_v59 = vld [vmem:[#allocation5 + $0x9f0] sm:$0xff]  ;;  %v7474_v29 = vld [vmem:[#allocation5 + $0xbe8] sm:$0xff] }
0x1d75   :  { %4463 = vmatpush.msrb.mxu3 %v7466_v30  ;;  %8168 = vst [vmem:[#allocation41_spill] sm:$0xff] %v7469_v59  ;;  %4532 = vmatpush.msra.mxu1 %v7474_v29  ;;  %v7534_v30 = vpop.f32.mrf.mxu2 }
0x1d76   :  { %v4389_v38 = vadd.f32 %v7452_v8, %v4387_v34  ;;  %v7472_v34 = vld [vmem:[#allocation5 + $0xbe0] sm:$0xff]  ;;  %v7490_v8 = vld [vmem:[#allocation5 + $0xbb8] sm:$0xff]  ;;  %8176 = vst [vmem:[#allocation49_spill] sm:$0xff] %v7540_v28 }
0x1d77   :  { %4464 = vmatpush.msrb.mxu3 %v7469_v59  ;;  %4512 = vmatpush.msra.mxu0 %v7472_v34  ;;  %v7532_v59 = vld [vmem:[#allocation5 + $0xb48] sm:$0xff] }
0x1d78   :  { %v4391_v57 = vmul.f32 %v7455_v5, %v4389_v38  ;;  %v7476_v38 = vld [vmem:[#allocation5 + $0xbd0] sm:$0xff] }
0x1d79   :  { %4513 = vmatpush.msra.mxu0 %v7476_v38  ;;  %v7488_v5 = vld [vmem:[#allocation5 + $0xbb0] sm:$0xff] }
0x1d7a   :  { %v4393_v27 = vadd.f32 %v7459_v44, %v4391_v57  ;;  %v7482_v57 = vld [vmem:[#allocation5 + $0xbc0] sm:$0xff]  ;;  %v7484_v44 = vld [vmem:[#allocation5 + $0xbc8] sm:$0xff] }
0x1d7b   :  { %4514 = vmatpush.msra.mxu0 %v7482_v57 }
0x1d7c   :  { %4427 = vmatmul.f32.vlgmr.msra.gmra.mxu2 %v4393_v27  ;;  %v7480_v27 = vld [vmem:[#allocation5 + $0xbd8] sm:$0xff] }
0x1d7d   :  { %4533 = vmatpush.msra.mxu1 %v7480_v27  ;;  %4515 = vmatpush.msra.mxu0 %v7488_v5 }
0x1d7f   :  { %4534 = vmatpush.msra.mxu1 %v7484_v44  ;;  %4516 = vmatpush.msra.mxu0 %v7494_v50 }
0x1d81   :  { %4535 = vmatpush.msra.mxu1 %v7490_v8  ;;  %4517 = vmatpush.msra.mxu0 %v7500_v63 }
0x1d83   :  { %4536 = vmatpush.msra.mxu1 %v7496_v42  ;;  %4518 = vmatpush.msra.mxu0 %v7506_v11 }
0x1d85   :  { %4537 = vmatpush.msra.mxu1 %v7502_v7  ;;  %4519 = vmatpush.msra.mxu0 %v7512_v23  ;;  %v7544_v23 = vld [vmem:[#allocation5 + $0xb30] sm:$0xff] }
0x1d86   :  { %8177 = vst [vmem:[#allocation50_spill] sm:$0xff] %v7544_v23 }
0x1d87   :  { %4538 = vmatpush.msra.mxu1 %v7508_v6  ;;  %4520 = vmatpush.msra.mxu0 %v7518_v47 }
0x1d89   :  { %4539 = vmatpush.msra.mxu1 %v7514_v45  ;;  %4521 = vmatpush.msra.mxu0 %v7524_v0  ;;  %v7550_v0 = vld [vmem:[#allocation5 + $0xb20] sm:$0xff] }
0x1d8a   :  { %8178 = vst [vmem:[#allocation51_spill] sm:$0xff] %v7550_v0 }
0x1d8b   :  { %4540 = vmatpush.msra.mxu1 %v7520_v39  ;;  %4522 = vmatpush.msra.mxu0 %v7530_v12  ;;  %v7552_v12 = vld [vmem:[#allocation5 + $0xb28] sm:$0xff] }
0x1d8d   :  { %4541 = vmatpush.msra.mxu1 %v7526_v25  ;;  %4523 = vmatpush.msra.mxu0 %v7544_v23  ;;  %v7574_v23 = vld [vmem:[#allocation2 + $0xd2] ss:$0 sm:$0xff] }
0x1d8e   :  { %8182 = vst [vmem:[#allocation55_spill] sm:$0xff] %v7574_v23 }
0x1d8f   :  { %4542 = vmatpush.msra.mxu1 %v7532_v59  ;;  %4524 = vmatpush.msra.mxu0 %v7550_v0  ;;  %v7570_v0 = vld [vmem:[#allocation5 + $0xaf8] sm:$0xff] }
0x1d91   :  { %4543 = vmatpush.msra.mxu1 %v7546_v15 }
0x1d93   :  { %4544 = vmatpush.msra.mxu1 %v7552_v12 }
0x1dff   :  { %v4428_v20 = vpop.f32.mrf.mxu2 }
0x1e00   :  { %v4429_v47 = vadd.f32 %v4428_v20, %v7540_v28  ;;  %v7556_v20 = vld [vmem:[#allocation5 + $0xb10] sm:$0xff] }
0x1e01   :  { %8179 = vst [vmem:[#allocation52_spill] sm:$0xff] %v7556_v20  ;;  %4525 = vmatpush.msra.mxu0 %v7556_v20  ;;  %v7568_v28 = vld [vmem:[#allocation5 + $0xaf0] sm:$0xff] }
0x1e02   :  { %v4431_v58 = vmul.f32 %v4429_v47, %v7343_v2  ;;  %v7558_v2 = vld [vmem:[#allocation5 + $0xb18] sm:$0xff]  ;;  %v7562_v47 = vld [vmem:[#allocation5 + $0xb00] sm:$0xff]  ;;  %8181 = vst [vmem:[#allocation54_spill] sm:$0xff] %v7568_v28 }
0x1e03   :  { %4545 = vmatpush.msra.mxu1 %v7558_v2  ;;  %8180 = vst [vmem:[#allocation53_spill] sm:$0xff] %v7562_v47  ;;  %4526 = vmatpush.msra.mxu0 %v7562_v47 }
0x1e04   :  { %4465 = vmatmul.f32.vlgmr.msrb.gmra.mxu3 %v4431_v58  ;;  %v7564_v58 = vld [vmem:[#allocation5 + $0xb08] sm:$0xff] }
0x1e05   :  { %4546 = vmatpush.msra.mxu1 %v7564_v58  ;;  %4527 = vmatpush.msra.mxu0 %v7568_v28  ;;  %v7586_v28 = vld [vmem:[#allocation2 + $0xd4] ss:$8 sm:$0x3] }
0x1e06   :  { %v4508_v50 = vperm.slane %v7586_v28, 0  ;;  %v4509_v52 = vperm.slane %v7586_v28, 1  ;;  %v5244_v28 = vld [vmem:[#allocation5 + $0xe80] sm:$0xff] }
0x1e07   :  { %4547 = vmatpush.msra.mxu1 %v7570_v0 }
0x1e87   :  { %v4466_v20 = vpop.f32.mrf.mxu3 }
0x1e88   :  { %v4467_v11 = vadd.f32 %v4466_v20, %v7574_v23 }
0x1e8a   :  { %v4469_v63 = vadd.f32 %v4467_v11, %v7333_v14 }
0x1e8c   :  { %v4471_v47 = vmul.f32 %v7577_v51, %v4469_v63  ;;  %v7686_v63 = vld [vmem:[#allocation5 + $0xdb0] sm:$0xff] }
0x1e8e   :  { %v7582_v32 = vadd.f32 %v4471_v47, %v7312_v9 }
0x1e90   :  { %4528 = vmatmul.f32.vlgmr.msra.gmra.mxu0 %v7582_v32  ;;  %4548 = vmatmul.f32.vlgmr.msra.gmra.mxu1 %v7582_v32 }
0x1f0d   :  { %v4529_v20 = vpop.f32.mrf.mxu0  ;;  %v4549_v23 = vpop.f32.mrf.mxu1 }
0x1f0e   :  { %v7592_v14 = vadd.f32 %v4529_v20, %v4508_v50  ;;  %v7596_v9 = vadd.f32 %v4549_v23, %v4509_v52  ;;  %v4736_v20 = vld [vmem:[#allocation5 + $0xc50] sm:$0xff] }
0x1f10   :  { %5550 = vmatpush.msk.msrb.mxu2 %vm4334_vm15, %v7592_v14  ;;  %5552 = vmatpush.msk.msra.mxu3 %vm4334_vm15, %v7596_v9 }
0x1f11   :  { %5554 = vmatpush.msk.msrb.mxu0 %vm4334_vm15, %v7592_v14  ;;  %5551 = vmatmul.msk.f32.vlgmr.msrb.gmra.mxu2 %vm4331_vm12, %v8113_v53 }
0x1f12   :  { %5553 = vmatmul.msk.f32.vlgmr.msra.gmra.mxu3 %vm4331_vm12, %v8113_v53  ;;  %5556 = vmatpush.msk.msra.mxu2 %vm4334_vm15, %v7596_v9 }
0x1f13   :  { %5555 = vmatmul.msk.f32.vlgmr.msrb.gmra.mxu0 %vm4331_vm12, %v8114_v1 }
0x1f14   :  { %4806 = vmatpush.msrb.mxu2 %v7259_v40  ;;  %v4217_v40 = vadd.f32 %v7417_v49, %v7422_v61 }
0x1f16   :  { %4807 = vmatpush.msrb.mxu2 %v7266_v35  ;;  %v4262_v35 = vadd.f32 %v7534_v30, %v4217_v40 }
0x1f18   :  { %4808 = vmatpush.msrb.mxu2 %v7270_v17  ;;  %v7629_v17 = vadd.f32 %v4262_v35, %v7306_v4  ;;  %v4742_v4 = vld [vmem:[#allocation5 + $0xcb0] sm:$0xff] }
0x1f19   :  { %5557 = vmatmul.msk.f32.vlgmr.msra.gmra.mxu2 %vm4331_vm12, %v8114_v1 }
0x1f1a   :  { %4809 = vmatpush.msrb.mxu2 %v7274_v13  ;;  %v4804_v13 = vmul.f32 %v7316_v26, %v7629_v17 }
0x1f1c   :  { %4810 = vmatpush.msrb.mxu2 %v7278_v19  ;;  %v7638_v19 = vadd.f32 %v4804_v13, %v7326_v22  ;;  %v4741_v22 = vld [vmem:[#allocation5 + $0xca0] sm:$0xff] }
0x1f1e   :  { %4811 = vmatpush.msrb.mxu2 %v7284_v24  ;;  %v4745_v24 = vld [vmem:[#allocation5 + $0xce0] sm:$0xff] }
0x1f1f   :  { %4763 = vmatpush.msrb.mxu3 %v4745_v24 }
0x1f20   :  { %4812 = vmatpush.msrb.mxu2 %v7288_v62  ;;  %v4744_v62 = vld [vmem:[#allocation5 + $0xcd0] sm:$0xff] }
0x1f21   :  { %4764 = vmatpush.msrb.mxu3 %v4744_v62 }
0x1f22   :  { %4813 = vmatpush.msrb.mxu2 %v7292_v48  ;;  %v7658_v48 = vld [vmem:[#allocation2 + $0xd5] ss:$8 sm:$0x3] }
0x1f23   :  { %v4602_v11 = vperm.slane %v7658_v48, 1 }
0x1f24   :  { %4814 = vmatpush.msrb.mxu2 %v7296_v36  ;;  %v7660_v36 = vld [vmem:[#allocation2 + $0xd6] ss:$8 sm:$0x3] }
0x1f25   :  { %v4610_v26 = vperm.slane %v7660_v36, 0  ;;  %v4611_v61 = vperm.slane %v7660_v36, 1 }
0x1f26   :  { %4815 = vmatpush.msrb.mxu2 %v7300_v21  ;;  %v7662_v21 = vld [vmem:[#allocation2 + $0xd7] ss:$8 sm:$0x3] }
0x1f27   :  { %v4614_v23 = vmul.f32 %v4610_v26, %v7592_v14  ;;  %v7707_v14 = vld [vmem:[#allocation5 + $0xd80] sm:$0xff] }
0x1f28   :  { %4816 = vmatpush.msrb.mxu2 %v7303_v54  ;;  %v4743_v54 = vld [vmem:[#allocation5 + $0xcc0] sm:$0xff] }
0x1f29   :  { %4765 = vmatpush.msrb.mxu3 %v4743_v54 }
0x1f2a   :  { %4817 = vmatpush.msrb.mxu2 %v7308_v37  ;;  %v7664_v37 = vld [vmem:[#allocation5 + $0xde0] sm:$0xff] }
0x1f2b   :  { %4766 = vmatpush.msrb.mxu3 %v4742_v4  ;;  %4783 = vmatpush.msra.mxu0 %v7664_v37 }
0x1f2c   :  { %4818 = vmatpush.msrb.mxu2 %v7314_v3  ;;  %v4601_v3 = vperm.slane %v7658_v48, 0 }
0x1f2d   :  { %4767 = vmatpush.msrb.mxu3 %v4741_v22 }
0x1f2e   :  { %4819 = vmatpush.msrb.mxu2 %v7319_v18  ;;  %v4661_v18 = vperm.slane %v7662_v21, 0 }
0x1f30   :  { %4820 = vmatpush.msrb.mxu2 %v7324_v55 }
0x1f32   :  { %4821 = vmatpush.msrb.mxu2 %v7329_v43  ;;  %v7670_v43 = vld [vmem:[#allocation5 + $0xdd0] sm:$0xff] }
0x1f33   :  { %4822 = vmatmul.f32.vlgmr.msrb.gmra.mxu2 %v7638_v19  ;;  %4784 = vmatpush.msra.mxu0 %v7670_v43 }
0x1f34   :  { %4967 = vmatpush.msra.mxu2 %v7474_v29  ;;  %v4662_v29 = vperm.slane %v7662_v21, 1  ;;  %v7912_v21 = vld [vmem:[#allocation2 + $0xe4] ss:$0 sm:$0xff] }
0x1f36   :  { %4968 = vmatpush.msra.mxu2 %v7480_v27  ;;  %v4737_v27 = vld [vmem:[#allocation5 + $0xc60] sm:$0xff] }
0x1f38   :  { %4969 = vmatpush.msra.mxu2 %v7484_v44  ;;  %v4738_v44 = vld [vmem:[#allocation5 + $0xc70] sm:$0xff] }
0x1f3a   :  { %4970 = vmatpush.msra.mxu2 %v7490_v8 }
0x1f3c   :  { %4971 = vmatpush.msra.mxu2 %v7496_v42 }
0x1f3e   :  { %4972 = vmatpush.msra.mxu2 %v7502_v7  ;;  %v4739_v7 = vld [vmem:[#allocation5 + $0xc80] sm:$0xff] }
0x1f40   :  { %4973 = vmatpush.msra.mxu2 %v7508_v6 }
0x1f42   :  { %4974 = vmatpush.msra.mxu2 %v7514_v45 }
0x1f44   :  { %4975 = vmatpush.msra.mxu2 %v7520_v39  ;;  %v7675_v39 = vld [vmem:[#allocation5 + $0xdc0] sm:$0xff] }
0x1f45   :  { %4785 = vmatpush.msra.mxu0 %v7675_v39 }
0x1f46   :  { %4976 = vmatpush.msra.mxu2 %v7526_v25  ;;  %v7673_v25 = vld [vmem:[#allocation2 + $0xe0] ss:$8 sm:$0x3] }
0x1f47   :  { %v4672_v49 = vperm.slane %v7673_v25, 0  ;;  %4786 = vmatpush.msra.mxu0 %v7686_v63 }
0x1f48   :  { %4977 = vmatpush.msra.mxu2 %v7532_v59 }
0x1f4a   :  { %4978 = vmatpush.msra.mxu2 %v7546_v15  ;;  %v7691_v15 = vld [vmem:[#allocation5 + $0xda0] sm:$0xff] }
0x1f4b   :  { %4787 = vmatpush.msra.mxu0 %v7691_v15 }
0x1f4c   :  { %4979 = vmatpush.msra.mxu2 %v7552_v12 }
0x1f4e   :  { %4980 = vmatpush.msra.mxu2 %v7558_v2  ;;  %v7697_v2 = vld [vmem:[#allocation5 + $0xd90] sm:$0xff] }
0x1f4f   :  { %4788 = vmatpush.msra.mxu0 %v7697_v2 }
0x1f50   :  { %4981 = vmatpush.msra.mxu2 %v7564_v58  ;;  %v4615_v58 = vmul.f32 %v4611_v61, %v7596_v9 }
0x1f51   :  { %4789 = vmatpush.msra.mxu0 %v7707_v14 }
0x1f52   :  { %4982 = vmatpush.msra.mxu2 %v7570_v0  ;;  %v4740_v0 = vld [vmem:[#allocation5 + $0xc90] sm:$0xff] }
0x1f53   :  { %4768 = vmatpush.msrb.mxu3 %v4740_v0 }
0x1f54   :  { %5137 = vmatpush.msrb.mxu2 %v4745_v24 }
0x1f55   :  { %4769 = vmatpush.msrb.mxu3 %v4739_v7 }
0x1f56   :  { %5138 = vmatpush.msrb.mxu2 %v4744_v62  ;;  %v4673_v62 = vperm.slane %v7673_v25, 1 }
0x1f57   :  { %4770 = vmatpush.msrb.mxu3 %v4738_v44 }
0x1f58   :  { %5139 = vmatpush.msrb.mxu2 %v4743_v54  ;;  %v4735_v54 = vld [vmem:[#allocation5 + $0xc40] sm:$0xff] }
0x1f59   :  { %4771 = vmatpush.msrb.mxu3 %v4737_v27 }
0x1f5a   :  { %5140 = vmatpush.msrb.mxu2 %v4742_v4  ;;  %v7716_v4 = vld [vmem:[#allocation5 + $0xd70] sm:$0xff] }
0x1f5b   :  { %4772 = vmatpush.msrb.mxu3 %v4736_v20  ;;  %4790 = vmatpush.msra.mxu0 %v7716_v4 }
0x1f5c   :  { %5141 = vmatpush.msrb.mxu2 %v4741_v22  ;;  %v4734_v22 = vld [vmem:[#allocation5 + $0xc30] sm:$0xff] }
0x1f5d   :  { %4773 = vmatpush.msrb.mxu3 %v4735_v54 }
0x1f5e   :  { %5142 = vmatpush.msrb.mxu2 %v4740_v0 }
0x1f5f   :  { %4774 = vmatpush.msrb.mxu3 %v4734_v22 }
0x1f60   :  { %5143 = vmatpush.msrb.mxu2 %v4739_v7 }
0x1f62   :  { %5144 = vmatpush.msrb.mxu2 %v4738_v44  ;;  %v7733_v44 = vld [vmem:[#allocation5 + $0xd40] sm:$0xff] }
0x1f64   :  { %5145 = vmatpush.msrb.mxu2 %v4737_v27  ;;  %v7737_v27 = vld [vmem:[#allocation5 + $0xd30] sm:$0xff] }
0x1f66   :  { %5146 = vmatpush.msrb.mxu2 %v4736_v20  ;;  %v4730_v20 = vld [vmem:[#allocation5 + $0xbf0] sm:$0xff] }
0x1f68   :  { %5147 = vmatpush.msrb.mxu2 %v4735_v54 }
0x1f6a   :  { %5148 = vmatpush.msrb.mxu2 %v4734_v22 }
0x1f90   :  { %v4635_v55 = vpop.f32.mrf.mxu0 }
0x1f91   :  { %v4665_v6 = vmul.f32 %v4661_v18, %v4635_v55 }
0x1f94   :  { %v4575_v12 = vpop.f32.mrf.mxu2 }
0x1f95   :  { %v4605_v45 = vmul.f32 %v4601_v3, %v4575_v12  ;;  %v4595_v8 = vpop.f32.mrf.mxu3  ;;  %v7720_v12 = vld [vmem:[#allocation5 + $0xd60] sm:$0xff] }
0x1f96   :  { %v4606_v59 = vmul.f32 %v4602_v11, %v4595_v8  ;;  %4791 = vmatpush.msra.mxu0 %v7720_v12  ;;  %v4732_v8 = vld [vmem:[#allocation5 + $0xc10] sm:$0xff] }
0x1f97   :  { %v4616_v42 = vadd.f32 %v4614_v23, %v4605_v45  ;;  %v4733_v23 = vld [vmem:[#allocation5 + $0xc20] sm:$0xff] }
0x1f98   :  { %v4617_v13 = vadd.f32 %v4615_v58, %v4606_v59  ;;  %4775 = vmatpush.msrb.mxu3 %v4733_v23  ;;  %5149 = vmatpush.msrb.mxu2 %v4733_v23  ;;  %v4731_v59 = vld [vmem:[#allocation5 + $0xc00] sm:$0xff] }
0x1f99   :  { %v4667_v30 = vadd.f32 %v4665_v6, %v4616_v42  ;;  %v7727_v6 = vld [vmem:[#allocation5 + $0xd50] sm:$0xff] }
0x1f9a   :  { %4792 = vmatpush.msra.mxu0 %v7727_v6  ;;  %4776 = vmatpush.msrb.mxu3 %v4732_v8 }
0x1f9b   :  { %v7701_v47 = vadd.f32 %v4672_v49, %v4667_v30  ;;  %5150 = vmatpush.msrb.mxu2 %v4732_v8 }
0x1f9c   :  { %v4655_v35 = vpop.f32.mrf.mxu2  ;;  %4793 = vmatpush.msra.mxu0 %v7733_v44  ;;  %4777 = vmatpush.msrb.mxu3 %v4731_v59 }
0x1f9d   :  { %v7710_v40 = vmul.f32 0.70710677, %v7701_v47  ;;  %v4666_v24 = vmul.f32 %v4662_v29, %v4655_v35  ;;  %v7740_v35 = vld [vmem:[#allocation5 + $0xd20] sm:$0xff]  ;;  %5151 = vmatpush.msrb.mxu2 %v4731_v59 }
0x1f9e   :  { %4794 = vmatpush.msra.mxu0 %v7737_v27  ;;  %4778 = vmatpush.msrb.mxu3 %v4730_v20 }
0x1f9f   :  { %v4682_v9 = vand.u32 2147483647, %v7710_v40  ;;  %v4668_v55 = vadd.f32 %v4666_v24, %v4617_v13  ;;  %v7743_v24 = vld [vmem:[#allocation5 + $0xd10] sm:$0xff]  ;;  %5152 = vmatpush.msrb.mxu2 %v4730_v20  ;;  %vm4720_vm0 = vcmp.ge.f32.partialorder %v7710_v40, 0.0 }
0x1fa0   :  { %4795 = vmatpush.msra.mxu0 %v7740_v35  ;;  %4924 = vmatpush.msra.mxu3 %v7401_v46 }
0x1fa1   :  { %v4684_v0 = vmul.f32 0.3275911, %v4682_v9  ;;  %v7725_v45 = vadd.f32 %v4673_v62, %v4668_v55  ;;  %v4708_v55 = vsub.f32 0.0, %v4682_v9 }
0x1fa2   :  { %4796 = vmatpush.msra.mxu0 %v7743_v24  ;;  %4925 = vmatpush.msra.mxu3 %v7403_v10 }
0x1fa3   :  { %v4686_v7 = vadd.f32 1.0, %v4684_v0  ;;  %v7731_v42 = vmul.f32 0.70710677, %v7725_v45  ;;  %v7747_v0 = vld [vmem:[#allocation5 + $0xd00] sm:$0xff]  ;;  %v4710_v8 = vmul.f32 %v4708_v55, %v4682_v9 }
0x1fa4   :  { %4797 = vmatpush.msra.mxu0 %v7747_v0  ;;  %4926 = vmatpush.msra.mxu3 %v7406_v56 }
0x1fa5   :  { %5671 = vrcp.f32 %v4686_v7  ;;  %v4683_v30 = vand.u32 2147483647, %v7731_v42  ;;  %v7751_v7 = vld [vmem:[#allocation5 + $0xcf0] sm:$0xff]  ;;  %v4712_v10 = vmul.f32 1.442695, %v4710_v8  ;;  %vm4721_vm1 = vcmp.ge.f32.partialorder %v7731_v42, 0.0 }
0x1fa6   :  { %4798 = vmatpush.msra.mxu0 %v7751_v7  ;;  %4927 = vmatpush.msra.mxu3 %v7409_v33 }
0x1fa7   :  { %v4685_v58 = vmul.f32 0.3275911, %v4683_v30  ;;  %v4709_v20 = vsub.f32 0.0, %v4683_v30 }
0x1fa8   :  { %4947 = vmatpush.msrb.mxu0 %v7472_v34  ;;  %4928 = vmatpush.msra.mxu3 %v7412_v16 }
0x1fa9   :  { %v4687_v13 = vadd.f32 1.0, %v4685_v58  ;;  %v4711_v33 = vmul.f32 %v4709_v20, %v4683_v30 }
0x1faa   :  { %4948 = vmatpush.msrb.mxu0 %v7476_v38  ;;  %4929 = vmatpush.msra.mxu3 %v7415_v41  ;;  %v8183_v41 = vld [vmem:[#allocation15_spill] sm:$0xff] }
0x1fab   :  { %v5672_v54 = vpop.eup %5671  ;;  %5673 = vrcp.f32 %v4687_v13  ;;  %v4714_v30 = vmul.f32 1.442695, %v4711_v33  ;;  %v8190_v33 = vld [vmem:[#allocation45_spill] sm:$0xff] }
0x1fac   :  { %v4690_v22 = vmul.f32 1.0614054, %v5672_v54  ;;  %4949 = vmatpush.msrb.mxu0 %v7482_v57  ;;  %4930 = vmatpush.msra.mxu3 %v7420_v60  ;;  %5675 = vpow2.f32 %v4712_v10  ;;  %v8184_v57 = vld [vmem:[#allocation42_spill] sm:$0xff]  ;;  %v8186_v60 = vld [vmem:[#allocation43_spill] sm:$0xff] }
0x1fad   :  { %5677 = vpow2.f32 %v4714_v30 }
0x1fae   :  { %v4692_v23 = vadd.f32 -1.4531521, %v4690_v22  ;;  %4950 = vmatpush.msrb.mxu0 %v7488_v5  ;;  %4931 = vmatpush.msra.mxu3 %v8183_v41 }
0x1fb0   :  { %v4694_v46 = vmul.f32 %v5672_v54, %v4692_v23  ;;  %4951 = vmatpush.msrb.mxu0 %v8184_v57 }
0x1fb1   :  { %v5674_v59 = vpop.eup %5673 }
0x1fb2   :  { %v4696_v58 = vadd.f32 1.4214138, %v4694_v46  ;;  %v4691_v13 = vmul.f32 1.0614054, %v5674_v59  ;;  %4952 = vmatpush.msrb.mxu0 %v8186_v60  ;;  %v8193_v60 = vld [vmem:[#allocation17_spill] sm:$0xff] }
0x1fb4   :  { %v4698_v22 = vmul.f32 %v5672_v54, %v4696_v58  ;;  %v4693_v56 = vadd.f32 -1.4531521, %v4691_v13  ;;  %v8185_v58 = vld [vmem:[#allocation31_spill] sm:$0xff] }
0x1fb5   :  { %4932 = vmatpush.msra.mxu3 %v8185_v58  ;;  %v8187_v13 = vld [vmem:[#allocation27_spill] sm:$0xff]  ;;  %v8191_v58 = vld [vmem:[#allocation18_spill] sm:$0xff] }
0x1fb6   :  { %v4823_v9 = vpop.f32.mrf.mxu2  ;;  %v4700_v55 = vadd.f32 -0.28449672, %v4698_v22  ;;  %v4695_v16 = vmul.f32 %v5674_v59, %v4693_v56  ;;  %v8188_v22 = vld [vmem:[#allocation44_spill] sm:$0xff]  ;;  %v5676_v56 = vpop.eup %5675 }
0x1fb7   :  { %v7762_v34 = vadd.f32 %v4823_v9, %v7340_v31  ;;  %4933 = vmatpush.msra.mxu3 %v8187_v13  ;;  %4953 = vmatpush.msrb.mxu0 %v8188_v22  ;;  %v8194_v13 = vld [vmem:[#allocation47_spill] sm:$0xff]  ;;  %v8196_v22 = vld [vmem:[#allocation48_spill] sm:$0xff] }
0x1fb8   :  { %v4702_v38 = vmul.f32 %v5672_v54, %v4700_v55  ;;  %v4697_v8 = vadd.f32 1.4214138, %v4695_v16 }
0x1fb9   :  { %v7767_v23 = vmul.f32 0.70710677, %v7762_v34  ;;  %4954 = vmatpush.msrb.mxu0 %v8190_v33  ;;  %v8197_v33 = vld [vmem:[#allocation40_spill] sm:$0xff] }
0x1fba   :  { %v4704_v46 = vadd.f32 0.2548296, %v4702_v38  ;;  %v4699_v5 = vmul.f32 %v5674_v59, %v4697_v8  ;;  %v8189_v38 = vld [vmem:[#allocation28_spill] sm:$0xff] }
0x1fbb   :  { %v4828_v31 = vand.u32 2147483647, %v7767_v23  ;;  %4934 = vmatpush.msra.mxu3 %v8189_v38  ;;  %vm4847_vm2 = vcmp.ge.f32.partialorder %v7767_v23, 0.0  ;;  %v8207_v23 = vld [vmem:[#allocation36_spill] sm:$0xff] }
0x1fbc   :  { %v4706_v20 = vmul.f32 %v5672_v54, %v4704_v46  ;;  %v4701_v9 = vadd.f32 -0.28449672, %v4699_v5  ;;  %v8192_v54 = vld [vmem:[#allocation46_spill] sm:$0xff]  ;;  %v5678_v5 = vpop.eup %5677 }
0x1fbd   :  { %v4829_v10 = vmul.f32 0.3275911, %v4828_v31  ;;  %4935 = vmatpush.msra.mxu3 %v8191_v58  ;;  %4955 = vmatpush.msrb.mxu0 %v8192_v54  ;;  %v4841_v38 = vsub.f32 0.0, %v4828_v31 }
0x1fbe   :  { %v4716_v55 = vmul.f32 %v5676_v56, %v4706_v20  ;;  %v4703_v41 = vmul.f32 %v5674_v59, %v4701_v9  ;;  %v4678_v56 = vmul.f32 0.5, %v7701_v47 }
0x1fbf   :  { %v4830_v16 = vadd.f32 1.0, %v4829_v10  ;;  %4936 = vmatpush.msra.mxu3 %v8193_v60  ;;  %4956 = vmatpush.msrb.mxu0 %v8194_v13  ;;  %v8195_v10 = vld [vmem:[#allocation39_spill] sm:$0xff]  ;;  %v4842_v47 = vmul.f32 %v4841_v38, %v4828_v31  ;;  %v8201_v60 = vld [vmem:[#allocation52_spill] sm:$0xff] }
0x1fc0   :  { %v4718_v57 = vsub.f32 1.0, %v4716_v55  ;;  %v4705_v8 = vadd.f32 0.2548296, %v4703_v41  ;;  %v8198_v41 = vld [vmem:[#allocation50_spill] sm:$0xff] }
0x1fc1   :  { %5679 = vrcp.f32 %v4830_v16  ;;  %4937 = vmatpush.msra.mxu3 %v8195_v10  ;;  %4957 = vmatpush.msrb.mxu0 %v8196_v22  ;;  %v8202_v10 = vld [vmem:[#allocation53_spill] sm:$0xff] }
0x1fc2   :  { %v4722_v46 = vsub.f32 0.0, %v4718_v57  ;;  %v4707_v30 = vmul.f32 %v5674_v59, %v4705_v8  ;;  %v8199_v59 = vld [vmem:[#allocation41_spill] sm:$0xff] }
0x1fc3   :  { %4938 = vmatpush.msra.mxu3 %v8197_v33  ;;  %4958 = vmatpush.msrb.mxu0 %v8198_v41 }
0x1fc4   :  { %v4724_v20 = vsel %vm4720_vm0, %v4718_v57, %v4722_v46  ;;  %v4717_v55 = vmul.f32 %v5678_v5, %v4707_v30  ;;  %v8200_v57 = vld [vmem:[#allocation51_spill] sm:$0xff]  ;;  %v4679_v5 = vmul.f32 0.5, %v7725_v45 }
0x1fc5   :  { %v4726_v9 = vadd.f32 1.0, %v4724_v20  ;;  %4939 = vmatpush.msra.mxu3 %v8199_v59  ;;  %4959 = vmatpush.msrb.mxu0 %v8200_v57  ;;  %v4826_v57 = vmul.f32 0.5, %v7762_v34  ;;  %v8208_v34 = vld [vmem:[#allocation11_spill] sm:$0xff] }
0x1fc6   :  { %v4719_v54 = vsub.f32 1.0, %v4717_v55  ;;  %v8203_v55 = vld [vmem:[#allocation54_spill] sm:$0xff] }
0x1fc7   :  { %v5680_v16 = vpop.eup %5679  ;;  %v4728_v58 = vmul.f32 %v4726_v9, %v4678_v56  ;;  %4960 = vmatpush.msrb.mxu0 %v8201_v60  ;;  %v4843_v9 = vmul.f32 1.442695, %v4842_v47  ;;  %v8204_v47 = vld [vmem:[#allocation32_spill] sm:$0xff]  ;;  %v8206_v60 = vld [vmem:[#allocation34_spill] sm:$0xff] }
0x1fc8   :  { %v4832_v40 = vmul.f32 1.0614054, %v5680_v16  ;;  %v4723_v8 = vsub.f32 0.0, %v4719_v54 }
0x1fc9   :  { %4779 = vmatmul.f32.vlgmr.msrb.gmra.mxu3 %v4728_v58  ;;  %4961 = vmatpush.msrb.mxu0 %v8202_v10  ;;  %5681 = vpow2.f32 %v4843_v9  ;;  %v8213_v10 = vld [vmem:[#allocation14_spill] sm:$0xff]  ;;  %v8216_v9 = vld [vmem:[#allocation24_spill] sm:$0xff] }
0x1fca   :  { %v4833_v46 = vadd.f32 -1.4531521, %v4832_v40  ;;  %v4725_v13 = vsel %vm4721_vm1, %v4719_v54, %v4723_v8 }
0x1fcb   :  { %v4727_v20 = vadd.f32 1.0, %v4725_v13  ;;  %4962 = vmatpush.msrb.mxu0 %v8203_v55  ;;  %v8209_v13 = vld [vmem:[#allocation12_spill] sm:$0xff]  ;;  %v8217_v55 = vld [vmem:[#allocation25_spill] sm:$0xff] }
0x1fcc   :  { %v4834_v30 = vmul.f32 %v5680_v16, %v4833_v46 }
0x1fcd   :  { %v4729_v56 = vmul.f32 %v4727_v20, %v4679_v5  ;;  %v8211_v5 = vld [vmem:[#allocation21_spill] sm:$0xff]  ;;  %v8212_v20 = vld [vmem:[#allocation22_spill] sm:$0xff] }
0x1fce   :  { %v4835_v22 = vadd.f32 1.4214138, %v4834_v30  ;;  %v8210_v30 = vld [vmem:[#allocation20_spill] sm:$0xff] }
0x1fcf   :  { %4799 = vmatmul.f32.vlgmr.msra.gmra.mxu0 %v4729_v56  ;;  %v5682_v58 = vpop.eup %5681  ;;  %v8215_v56 = vld [vmem:[#allocation23_spill] sm:$0xff] }
0x1fd0   :  { %v4836_v33 = vmul.f32 %v5680_v16, %v4835_v22  ;;  %v8214_v22 = vld [vmem:[#allocation16_spill] sm:$0xff] }
0x1fd2   :  { %v4837_v41 = vadd.f32 -0.28449672, %v4836_v33  ;;  %v8218_v33 = vld [vmem:[#allocation26_spill] sm:$0xff] }
0x1fd4   :  { %v4838_v42 = vmul.f32 %v5680_v16, %v4837_v41  ;;  %v8219_v41 = vld [vmem:[#allocation13_spill] sm:$0xff] }
0x1fd6   :  { %v4839_v31 = vadd.f32 0.2548296, %v4838_v42  ;;  %v7819_v42 = vld [vmem:[#allocation2 + $0xe1] ss:$0 sm:$0xff] }
0x1fd8   :  { %v4840_v38 = vmul.f32 %v5680_v16, %v4839_v31  ;;  %v8205_v16 = vld [vmem:[#allocation35_spill] sm:$0xff] }
0x1fda   :  { %v4845_v54 = vmul.f32 %v5682_v58, %v4840_v38 }
0x1fdc   :  { %v4846_v40 = vsub.f32 1.0, %v4845_v54 }
0x1fde   :  { %v4848_v59 = vsub.f32 0.0, %v4846_v40 }
0x1fe0   :  { %v4849_v45 = vsel %vm4847_vm2, %v4846_v40, %v4848_v59 }
0x1fe1   :  { %v4850_v8 = vadd.f32 1.0, %v4849_v45 }
0x1fe3   :  { %v4851_v46 = vmul.f32 %v4850_v8, %v4826_v57  ;;  %v8220_v57 = vld [vmem:[#allocation30_spill] sm:$0xff] }
0x1fe5   :  { %5558 = vmatpush.msk.msrb.mxu1 %vm4334_vm15, %v4851_v46 }
0x1fe6   :  { %5559 = vmatmul.msk.f32.vlgmr.msrb.gmra.mxu1 %vm4331_vm12, %v8113_v53 }
0x1fe7   :  { %5560 = vmatpush.msk.msra.mxu1 %vm4334_vm15, %v4851_v46 }
0x1fe9   :  { %4903 = vmatpush.msrb.mxu1 %v8204_v47  ;;  %v8221_v47 = vld [vmem:[#allocation29_spill] sm:$0xff] }
0x1feb   :  { %4904 = vmatpush.msrb.mxu1 %v8205_v16  ;;  %v4876_v16 = vmul.f32 %v4851_v46, %v8221_v47 }
0x1fed   :  { %4905 = vmatpush.msrb.mxu1 %v8206_v60 }
0x1fee   :  { %5561 = vmatmul.msk.f32.vlgmr.msra.gmra.mxu1 %vm4331_vm12, %v8114_v1 }
0x1fef   :  { %4906 = vmatpush.msrb.mxu1 %v8207_v23 }
0x1ff1   :  { %4907 = vmatpush.msrb.mxu1 %v8208_v34  ;;  %v8222_v34 = vld [vmem:[#allocation33_spill] sm:$0xff] }
0x1ff3   :  { %4908 = vmatpush.msrb.mxu1 %v8209_v13 }
0x1ff5   :  { %4909 = vmatpush.msrb.mxu1 %v8210_v30 }
0x1ff7   :  { %4910 = vmatpush.msrb.mxu1 %v8211_v5  ;;  %v8223_v5 = vld [vmem:[#allocation19_spill] sm:$0xff] }
0x1ff9   :  { %4911 = vmatpush.msrb.mxu1 %v8212_v20 }
0x1ffb   :  { %4912 = vmatpush.msrb.mxu1 %v8213_v10  ;;  %v8224_v10 = vld [vmem:[#allocation37_spill] sm:$0xff] }
0x1ffd   :  { %4913 = vmatpush.msrb.mxu1 %v8214_v22 }
0x1fff   :  { %4914 = vmatpush.msrb.mxu1 %v8215_v56  ;;  %v8225_v56 = vld [vmem:[#allocation38_spill] sm:$0xff] }
0x2001   :  { %4915 = vmatpush.msrb.mxu1 %v8216_v9 }
0x2003   :  { %4916 = vmatpush.msrb.mxu1 %v8217_v55 }
0x2005   :  { %4917 = vmatpush.msrb.mxu1 %v8218_v33 }
0x2007   :  { %4918 = vmatpush.msrb.mxu1 %v8219_v41 }
0x204c   :  { %v4780_v31 = vpop.f32.mrf.mxu3  ;;  %v4800_v58 = vpop.f32.mrf.mxu0 }
0x204d   :  { %v4781_v38 = vadd.f32 %v4780_v31, %v7819_v42 }
0x204f   :  { %v4801_v54 = vadd.f32 %v4800_v58, %v4781_v38 }
0x2051   :  { %v4803_v40 = vadd.f32 %v4801_v54, %v7582_v32  ;;  %v5785_v32 = vmov 128.0  }
0x2052   :  { %5683 = vrcp.f32 %v5785_v32 }
0x2053   :  { %v5180_v59 = vsel %vm4334_vm15, %v4803_v40, 0.0 }
0x2054   :  { %5181 = vadd.xlane.f32.xlu1 %v5180_v59 }
0x2058   :  { %v5684_v55 = vpop.eup %5683 }
0x2059   :  { %v5184_v33 = vmul.f32 128.0, %v5684_v55  ;;  %vm5188_vm3 = vweird.f32 %v5684_v55 }
0x205b   :  { %v5185_v41 = vsub.f32 1.0, %v5184_v33 }
0x205d   :  { %v5186_v31 = vmul.f32 %v5684_v55, %v5185_v41  ;;  %v7844_v41 = vld [vmem:[#allocation2 + $0xe2] ss:$0 sm:$0xff] }
0x205f   :  { %v5187_v38 = vadd.f32 %v5684_v55, %v5186_v31 }
0x2061   :  { %v7830_v58 = vsel %vm5188_vm3, %v5684_v55, %v5187_v38  ;;  %v7847_v38 = vld [vmem:[#allocation2 + $0xe3] ss:$0 sm:$0xff] }
0x2063   :  { %v4872_v45 = vpop.f32.mrf.mxu1 }
0x2064   :  { %v4875_v8 = vmul.f32 %v4872_v45, %v8220_v57 }
0x2066   :  { %v4877_v23 = vadd.f32 %v4876_v16, %v4875_v8  ;;  %v8226_v16 = vld [vmem:[#allocation49_spill] sm:$0xff] }
0x206b   :  { %v4895_v60 = vpop.f32.mrf.mxu1 }
0x206c   :  { %v4898_v13 = vmul.f32 %v4895_v60, %v8222_v34 }
0x206e   :  { %v4899_v30 = vadd.f32 %v4898_v13, %v4877_v23  ;;  %v8227_v13 = vld [vmem:[#allocation55_spill] sm:$0xff] }
0x2070   :  { %v4900_v20 = vadd.f32 %v4899_v30, %v8223_v5 }
0x2072   :  { %v4901_v22 = vmul.f32 %v4900_v20, %v8224_v10 }
0x2074   :  { %v4902_v9 = vadd.f32 %v4901_v22, %v8225_v56 }
0x2076   :  { %4919 = vmatmul.f32.vlgmr.msrb.gmra.mxu1 %v4902_v9 }
0x20c7   :  { %v5182_v54 = vpop.xlane.xlu1 %5181 }
0x20c8   :  { %v5190_v59 = vmul.f32 %v7830_v58, %v5182_v54 }
0x20ca   :  { %v5191_v45 = vsub.f32 %v4803_v40, %v5190_v59 }
0x20cc   :  { %v5192_v57 = vmul.f32 %v5191_v45, %v5191_v45 }
0x20ce   :  { %v5193_v8 = vsel %vm4334_vm15, %v5192_v57, 0.0  ;;  %v5250_v57 = vld [vmem:[#allocation5 + $0xee0] sm:$0xff] }
0x20cf   :  { %5194 = vadd.xlane.f32.xlu0 %v5193_v8 }
0x20f3   :  { %v4920_v47 = vpop.f32.mrf.mxu1 }
0x20f4   :  { %v4921_v60 = vadd.f32 %v4920_v47, %v8226_v16  ;;  %v5248_v47 = vld [vmem:[#allocation5 + $0xec0] sm:$0xff] }
0x20f6   :  { %v4923_v23 = vmul.f32 %v4921_v60, %v4851_v46 }
0x20f8   :  { %4940 = vmatmul.f32.vlgmr.msra.gmra.mxu3 %v4923_v23 }
0x2142   :  { %v5195_v40 = vpop.xlane.xlu0 %5194 }
0x2143   :  { %v5196_v22 = vmul.f32 %v5195_v40, %v7830_v58 }
0x2145   :  { %v5197_v56 = vadd.f32 1e-05, %v5196_v22  ;;  %v5243_v22 = vld [vmem:[#allocation5 + $0xe70] sm:$0xff] }
0x2147   :  { %5685 = vrsqrt.f32 %v5197_v56  ;;  %vm5204_vm5 = vweird.f32 %v5197_v56 }
0x214d   :  { %v5686_v46 = vpop.eup %5685 }
0x214e   :  { %v5199_v9 = vmul.f32 %v5686_v46, %v5197_v56  ;;  %vm5205_vm4 = vweird.f32 %v5686_v46 }
0x214f   :  { %vm5206_vm7 = vmor %vm5204_vm5, %vm5205_vm4 }
0x2150   :  { %v5200_v32 = vmul.f32 %v5686_v46, %v5199_v9  ;;  %v5239_v9 = vld [vmem:[#allocation5 + $0xe30] sm:$0xff] }
0x2152   :  { %v5201_v55 = vmul.f32 0.5, %v5200_v32 }
0x2154   :  { %v5202_v33 = vsub.f32 1.5, %v5201_v55  ;;  %v5237_v55 = vld [vmem:[#allocation5 + $0xe10] sm:$0xff] }
0x217b   :  { %v4941_v34 = vpop.f32.mrf.mxu3 }
0x217c   :  { %v4942_v30 = vadd.f32 %v4941_v34, %v8227_v13  ;;  %v5247_v34 = vld [vmem:[#allocation5 + $0xeb0] sm:$0xff] }
0x217e   :  { %v4944_v5 = vadd.f32 %v4942_v30, %v7638_v19  ;;  %v5203_v19 = vmul.f32 %v5686_v46, %v5202_v33  ;;  %v5246_v30 = vld [vmem:[#allocation5 + $0xea0] sm:$0xff] }
0x2180   :  { %v4945_v20 = vmul.f32 %v4944_v5, %v7577_v51  ;;  %v5207_v51 = vsel %vm5206_vm7, %v5686_v46, %v5203_v19  ;;  %v5235_v19 = vld [vmem:[#allocation5 + $0xdf0] sm:$0xff] }
0x2182   :  { %v7839_v10 = vadd.f32 %v4945_v20, %v7629_v17  ;;  %v5208_v17 = vmul.f32 %v5207_v51, %v5191_v45  ;;  %v5249_v45 = vld [vmem:[#allocation5 + $0xed0] sm:$0xff] }
0x2183   :  { %v5245_v20 = vld [vmem:[#allocation5 + $0xe90] sm:$0xff] }
0x2184   :  { %4963 = vmatmul.f32.vlgmr.msrb.gmra.mxu0 %v7839_v10  ;;  %4983 = vmatmul.f32.vlgmr.msra.gmra.mxu2 %v7839_v10  ;;  %v5209_v31 = vmul.f32 %v5208_v17, %v7844_v41 }
0x2186   :  { %v5210_v8 = vadd.f32 %v5209_v31, %v7847_v38 }
0x2188   :  { %v5252_v16 = vsel %vm4334_vm15, %v5210_v8, 0.0 }
0x2189   :  { %v5253_v13 = vrot.slane %v5252_v16, 4 }
0x2201   :  { %v4964_v54 = vpop.f32.mrf.mxu0 }
0x2202   :  { %v7851_v59 = vadd.f32 %v4964_v54, %v4508_v50  ;;  %v5786_v50 = vmov 2.0  }
0x2203   :  { %5687 = vrcp.f32 %v5786_v50 }
0x2204   :  { %5562 = vmatpush.msk.msra.mxu1 %vm4334_vm15, %v7851_v59  ;;  %5566 = vmatpush.msk.msra.mxu0 %vm4334_vm15, %v7851_v59 }
0x2205   :  { %5563 = vmatmul.msk.f32.vlgmr.msra.gmra.mxu1 %vm4331_vm12, %v8113_v53  ;;  %5567 = vmatmul.msk.f32.vlgmr.msra.gmra.mxu0 %vm4331_vm12, %v8114_v1 }
0x2206   :  { %5267 = vmatpush.msrb.mxu0 %v5250_v57 }
0x2207   :  { %v4984_v60 = vpop.f32.mrf.mxu2 }
0x2208   :  { %5268 = vmatpush.msrb.mxu0 %v5249_v45  ;;  %v7865_v23 = vadd.f32 %v4984_v60, %v4509_v52  ;;  %v5254_v52 = vadd.f32 %v5253_v13, %v5252_v16 }
0x2209   :  { %v5688_v5 = vpop.eup %5687 }
0x220a   :  { %5269 = vmatpush.msrb.mxu0 %v5248_v47  ;;  %5564 = vmatpush.msk.msrb.mxu3 %vm4334_vm15, %v7865_v23  ;;  %v5260_v40 = vmul.f32 2.0, %v5688_v5  ;;  %v5255_v56 = vrot.slane %v5254_v52, 2  ;;  %vm5264_vm8 = vweird.f32 %v5688_v5 }
0x220b   :  { %5568 = vmatpush.msk.msrb.mxu1 %vm4334_vm15, %v7865_v23  ;;  %5565 = vmatmul.msk.f32.vlgmr.msrb.gmra.mxu3 %vm4331_vm12, %v8113_v53  ;;  %v5242_v53 = vld [vmem:[#allocation5 + $0xe60] sm:$0xff] }
0x220c   :  { %5270 = vmatpush.msrb.mxu0 %v5247_v34  ;;  %5157 = vmatpush.msra.mxu3 %v7664_v37  ;;  %v5261_v37 = vsub.f32 1.0, %v5260_v40  ;;  %v5256_v46 = vadd.f32 %v5255_v56, %v5254_v52 }
0x220d   :  { %5298 = vmatpush.msra.mxu1 %v5250_v57 }
0x220e   :  { %5271 = vmatpush.msrb.mxu0 %v5246_v30  ;;  %5569 = vmatmul.msk.f32.vlgmr.msrb.gmra.mxu1 %vm4331_vm12, %v8114_v1  ;;  %v5241_v1 = vld [vmem:[#allocation5 + $0xe50] sm:$0xff]  ;;  %v5257_v32 = vrot.slane %v5256_v46, 1 }
0x220f   :  { %5158 = vmatpush.msra.mxu3 %v7670_v43  ;;  %5299 = vmatpush.msra.mxu1 %v5249_v45  ;;  %v5240_v43 = vld [vmem:[#allocation5 + $0xe40] sm:$0xff] }
0x2210   :  { %5272 = vmatpush.msrb.mxu0 %v5245_v20  ;;  %v5258_v33 = vadd.f32 %v5257_v32, %v5256_v46 }
0x2211   :  { %5159 = vmatpush.msra.mxu3 %v7675_v39  ;;  %5300 = vmatpush.msra.mxu1 %v5248_v47  ;;  %v5262_v39 = vmul.f32 %v5688_v5, %v5261_v37 }
0x2212   :  { %5273 = vmatpush.msrb.mxu0 %v5244_v28 }
0x2213   :  { %5160 = vmatpush.msra.mxu3 %v7686_v63  ;;  %5301 = vmatpush.msra.mxu1 %v5247_v34  ;;  %v5238_v63 = vld [vmem:[#allocation5 + $0xe20] sm:$0xff] }
0x2214   :  { %5274 = vmatpush.msrb.mxu0 %v5243_v22 }
0x2215   :  { %5161 = vmatpush.msra.mxu3 %v7691_v15  ;;  %5302 = vmatpush.msra.mxu1 %v5246_v30  ;;  %v5263_v15 = vadd.f32 %v5688_v5, %v5262_v39 }
0x2216   :  { %5275 = vmatpush.msrb.mxu0 %v5242_v53 }
0x2217   :  { %5162 = vmatpush.msra.mxu3 %v7697_v2  ;;  %5303 = vmatpush.msra.mxu1 %v5245_v20  ;;  %v5236_v2 = vld [vmem:[#allocation5 + $0xe00] sm:$0xff] }
0x2218   :  { %5276 = vmatpush.msrb.mxu0 %v5241_v1 }
0x2219   :  { %5163 = vmatpush.msra.mxu3 %v7707_v14  ;;  %5304 = vmatpush.msra.mxu1 %v5244_v28  ;;  %v7885_v14 = vsel %vm5264_vm8, %v5688_v5, %v5263_v15 }
0x221a   :  { %5277 = vmatpush.msrb.mxu0 %v5240_v43 }
0x221b   :  { %5164 = vmatpush.msra.mxu3 %v7716_v4  ;;  %5305 = vmatpush.msra.mxu1 %v5243_v22  ;;  %v5266_v4 = vmul.f32 %v7885_v14, %v5258_v33 }
0x221c   :  { %5278 = vmatpush.msrb.mxu0 %v5239_v9 }
0x221d   :  { %5165 = vmatpush.msra.mxu3 %v7720_v12  ;;  %5306 = vmatpush.msra.mxu1 %v5242_v53 }
0x221e   :  { %5279 = vmatpush.msrb.mxu0 %v5238_v63 }
0x221f   :  { %5166 = vmatpush.msra.mxu3 %v7727_v6  ;;  %5307 = vmatpush.msra.mxu1 %v5241_v1 }
0x2220   :  { %5280 = vmatpush.msrb.mxu0 %v5237_v55 }
0x2221   :  { %5167 = vmatpush.msra.mxu3 %v7733_v44  ;;  %5308 = vmatpush.msra.mxu1 %v5240_v43  ;;  %v5035_v44 = vmul.f32 %v7851_v59, %v4610_v26  ;;  %v5036_v26 = vmul.f32 %v7865_v23, %v4611_v61 }
0x2222   :  { %5281 = vmatpush.msrb.mxu0 %v5236_v2 }
0x2223   :  { %5168 = vmatpush.msra.mxu3 %v7737_v27  ;;  %5309 = vmatpush.msra.mxu1 %v5239_v9 }
0x2224   :  { %5282 = vmatpush.msrb.mxu0 %v5235_v19 }
0x2225   :  { %5283 = vmatmul.f32.vlgmr.msrb.gmra.mxu0 %v5266_v4  ;;  %5169 = vmatpush.msra.mxu3 %v7740_v35 }
0x2226   :  { %5310 = vmatpush.msra.mxu1 %v5238_v63 }
0x2227   :  { %5170 = vmatpush.msra.mxu3 %v7743_v24 }
0x2228   :  { %5311 = vmatpush.msra.mxu1 %v5237_v55 }
0x2229   :  { %5171 = vmatpush.msra.mxu3 %v7747_v0 }
0x222a   :  { %5312 = vmatpush.msra.mxu1 %v5236_v2 }
0x222b   :  { %5172 = vmatpush.msra.mxu3 %v7751_v7 }
0x222c   :  { %5313 = vmatpush.msra.mxu1 %v5235_v19 }
0x2282   :  { %v5010_v12 = vpop.f32.mrf.mxu1  ;;  %v5056_v27 = vpop.f32.mrf.mxu0 }
0x2283   :  { %v5033_v6 = vmul.f32 %v5010_v12, %v4601_v3  ;;  %v5079_v35 = vmul.f32 %v5056_v27, %v4661_v18 }
0x2285   :  { %v5037_v24 = vadd.f32 %v5035_v44, %v5033_v6 }
0x2287   :  { %v5081_v51 = vadd.f32 %v5079_v35, %v5037_v24 }
0x2289   :  { %v5083_v0 = vadd.f32 %v5081_v51, %v4672_v49 }
0x228b   :  { %v5087_v17 = vmul.f32 0.70710677, %v5083_v0  ;;  %v5076_v7 = vpop.f32.mrf.mxu1  ;;  %v5085_v4 = vmul.f32 0.5, %v5083_v0 }
0x228c   :  { %v5080_v18 = vmul.f32 %v5076_v7, %v4662_v29 }
0x228d   :  { %v5089_v31 = vand.u32 2147483647, %v5087_v17  ;;  %vm5127_vm10 = vcmp.ge.f32.partialorder %v5087_v17, 0.0 }
0x228e   :  { %v5030_v54 = vpop.f32.mrf.mxu3 }
0x228f   :  { %v5091_v57 = vmul.f32 0.3275911, %v5089_v31  ;;  %v5034_v3 = vmul.f32 %v5030_v54, %v4602_v11  ;;  %v5115_v16 = vsub.f32 0.0, %v5089_v31 }
0x2291   :  { %v5093_v59 = vadd.f32 1.0, %v5091_v57  ;;  %v5038_v8 = vadd.f32 %v5036_v26, %v5034_v3  ;;  %v5117_v36 = vmul.f32 %v5115_v16, %v5089_v31 }
0x2293   :  { %5689 = vrcp.f32 %v5093_v59  ;;  %v5082_v45 = vadd.f32 %v5080_v18, %v5038_v8  ;;  %v5119_v23 = vmul.f32 1.442695, %v5117_v36 }
0x2295   :  { %v5084_v49 = vadd.f32 %v5082_v45, %v4673_v62 }
0x2297   :  { %v5088_v47 = vmul.f32 0.70710677, %v5084_v49  ;;  %v5086_v54 = vmul.f32 0.5, %v5084_v49 }
0x2299   :  { %v5690_v50 = vpop.eup %5689  ;;  %v5090_v60 = vand.u32 2147483647, %v5088_v47  ;;  %vm5128_vm11 = vcmp.ge.f32.partialorder %v5088_v47, 0.0 }
0x229a   :  { %v5097_v48 = vmul.f32 1.0614054, %v5690_v50 }
0x229b   :  { %v5092_v11 = vmul.f32 0.3275911, %v5090_v60  ;;  %v5116_v28 = vsub.f32 0.0, %v5090_v60 }
0x229c   :  { %v5099_v34 = vadd.f32 -1.4531521, %v5097_v48 }
0x229d   :  { %v5094_v13 = vadd.f32 1.0, %v5092_v11  ;;  %v5118_v37 = vmul.f32 %v5116_v28, %v5090_v60 }
0x229e   :  { %v5101_v61 = vmul.f32 %v5690_v50, %v5099_v34 }
0x229f   :  { %5691 = vrcp.f32 %v5094_v13  ;;  %v5121_v63 = vmul.f32 1.442695, %v5118_v37 }
0x22a0   :  { %v5103_v29 = vadd.f32 1.4214138, %v5101_v61  ;;  %5693 = vpow2.f32 %v5119_v23 }
0x22a1   :  { %5695 = vpow2.f32 %v5121_v63 }
0x22a2   :  { %v5284_v30 = vpop.f32.mrf.mxu0  ;;  %v5105_v5 = vmul.f32 %v5690_v50, %v5103_v29 }
0x22a3   :  { %v5285_v25 = vadd.f32 %v5284_v30, %v7912_v21 }
0x22a4   :  { %v5107_v62 = vadd.f32 -0.28449672, %v5105_v5 }
0x22a5   :  { %v5287_v20 = vmax.f32 %v5285_v25, 0.0  ;;  %v5692_v52 = vpop.eup %5691 }
0x22a6   :  { %v5109_v40 = vmul.f32 %v5690_v50, %v5107_v62  ;;  %v5098_v22 = vmul.f32 1.0614054, %v5692_v52  ;;  %v5694_v46 = vpop.eup %5693 }
0x22a7   :  { %5289 = vst.msk [vmem:[#allocation7] sm:$0x1] %vm5288_vm9, %v5287_v20  ;;  %v5696_v35 = vpop.eup %5695 }
0x22a8   :  { %v5111_v53 = vadd.f32 0.2548296, %v5109_v40  ;;  %v5100_v56 = vadd.f32 -1.4531521, %v5098_v22 }
0x22aa   :  { %v5113_v1 = vmul.f32 %v5690_v50, %v5111_v53  ;;  %v5102_v43 = vmul.f32 %v5692_v52, %v5100_v56 }
0x22ac   :  { %v5123_v39 = vmul.f32 %v5694_v46, %v5113_v1  ;;  %v5104_v9 = vadd.f32 1.4214138, %v5102_v43 }
0x22ae   :  { %v5125_v32 = vsub.f32 1.0, %v5123_v39  ;;  %v5106_v15 = vmul.f32 %v5692_v52, %v5104_v9 }
0x22b0   :  { %v5129_v55 = vsub.f32 0.0, %v5125_v32  ;;  %v5108_v2 = vadd.f32 -0.28449672, %v5106_v15 }
0x22b2   :  { %v5131_v33 = vsel %vm5127_vm10, %v5125_v32, %v5129_v55  ;;  %v5110_v19 = vmul.f32 %v5692_v52, %v5108_v2 }
0x22b3   :  { %v5133_v12 = vadd.f32 1.0, %v5131_v33 }
0x22b4   :  { %v5112_v6 = vadd.f32 0.2548296, %v5110_v19 }
0x22b5   :  { %v5135_v44 = vmul.f32 %v5133_v12, %v5085_v4 }
0x22b6   :  { %v5114_v27 = vmul.f32 %v5692_v52, %v5112_v6 }
0x22b7   :  { %5153 = vmatmul.f32.vlgmr.msrb.gmra.mxu2 %v5135_v44 }
0x22b8   :  { %v5124_v24 = vmul.f32 %v5696_v35, %v5114_v27 }
0x22ba   :  { %v5126_v51 = vsub.f32 1.0, %v5124_v24 }
0x22bc   :  { %v5130_v7 = vsub.f32 0.0, %v5126_v51 }
0x22be   :  { %v5132_v31 = vsel %vm5128_vm11, %v5126_v51, %v5130_v7 }
0x22bf   :  { %v5134_v57 = vadd.f32 1.0, %v5132_v31 }
0x22c1   :  { %v5136_v3 = vmul.f32 %v5134_v57, %v5086_v54 }
0x22c3   :  { %5173 = vmatmul.f32.vlgmr.msra.gmra.mxu3 %v5136_v3 }
0x233a   :  { %v5154_v17 = vpop.f32.mrf.mxu2 }
0x233b   :  { %v5155_v26 = vadd.f32 %v5154_v17, %v7819_v42 }
0x2346   :  { %v5174_v18 = vpop.f32.mrf.mxu3 }
0x2347   :  { %v5175_v0 = vadd.f32 %v5174_v18, %v5155_v26 }
0x2349   :  { %v5177_v59 = vadd.f32 %v5175_v0, %v7839_v10 }
0x234b   :  { %v5211_v8 = vsel %vm4334_vm15, %v5177_v59, 0.0 }
0x234c   :  { %5212 = vadd.xlane.f32.xlu2 %v5211_v8 }
0x23bf   :  { %v5213_v45 = vpop.xlane.xlu2 %5212 }
0x23c0   :  { %v5214_v50 = vmul.f32 %v5213_v45, %v7830_v58 }
0x23c2   :  { %v5215_v16 = vsub.f32 %v5177_v59, %v5214_v50 }
0x23c4   :  { %v5216_v47 = vmul.f32 %v5215_v16, %v5215_v16 }
0x23c6   :  { %v5217_v49 = vsel %vm4334_vm15, %v5216_v47, 0.0 }
0x23c7   :  { %5218 = vadd.xlane.f32.xlu1 %v5217_v49 }
0x243a   :  { %v5219_v60 = vpop.xlane.xlu1 %5218 }
0x243b   :  { %v5220_v48 = vmul.f32 %v5219_v60, %v7830_v58 }
0x243d   :  { %v5221_v11 = vadd.f32 1e-05, %v5220_v48 }
0x243f   :  { %5697 = vrsqrt.f32 %v5221_v11  ;;  %vm5228_vm14 = vweird.f32 %v5221_v11 }
0x2445   :  { %v5698_v42 = vpop.eup %5697 }
0x2446   :  { %v5223_v34 = vmul.f32 %v5698_v42, %v5221_v11  ;;  %vm5229_vm13 = vweird.f32 %v5698_v42 }
0x2447   :  { %vm5230_vm6 = vmor %vm5228_vm14, %vm5229_vm13 }
0x2448   :  { %v5224_v36 = vmul.f32 %v5698_v42, %v5223_v34 }
0x244a   :  { %v5225_v10 = vmul.f32 0.5, %v5224_v36 }
0x244c   :  { %v5226_v13 = vsub.f32 1.5, %v5225_v10 }
0x244e   :  { %v5227_v61 = vmul.f32 %v5698_v42, %v5226_v13 }
0x2450   :  { %v5231_v29 = vsel %vm5230_vm6, %v5698_v42, %v5227_v61 }
0x2451   :  { %v5232_v23 = vmul.f32 %v5231_v29, %v5215_v16 }
0x2453   :  { %v5233_v30 = vmul.f32 %v5232_v23, %v7844_v41 }
0x2455   :  { %v5234_v5 = vadd.f32 %v5233_v30, %v7847_v38 }
0x2457   :  { %v5290_v25 = vsel %vm4334_vm15, %v5234_v5, 0.0 }
0x2458   :  { %v5291_v58 = vrot.slane %v5290_v25, 4 }
0x245a   :  { %v5292_v62 = vadd.f32 %v5291_v58, %v5290_v25 }
0x245c   :  { %v5293_v20 = vrot.slane %v5292_v62, 2 }
0x245e   :  { %v5294_v52 = vadd.f32 %v5293_v20, %v5292_v62 }
0x2460   :  { %v5295_v28 = vrot.slane %v5294_v52, 1 }
0x2462   :  { %v5296_v40 = vadd.f32 %v5295_v28, %v5294_v52 }
0x2464   :  { %v5297_v22 = vmul.f32 %v5296_v40, %v7885_v14 }
0x2466   :  { %5314 = vmatmul.f32.vlgmr.msra.gmra.mxu1 %v5297_v22 }
0x24e3   :  { %v5315_v53 = vpop.f32.mrf.mxu1 }
0x24e4   :  { %v5316_v41 = vadd.f32 %v5315_v53, %v7912_v21 }
0x24e6   :  { %v5318_v38 = vmax.f32 %v5316_v41, 0.0 }
0x24e8   :  { %5319 = vst.msk [vmem:[#allocation7 + $0x1] sm:$0x1] %vm5288_vm9, %v5318_v38 }
0x24e9   :  { %5330 = dma.vmem_to_hbm [thread:$0]  %s5326_s30, 32, %s5328_s6, [#allocation4]  }
0x24ea   :  { %5775 = dma.done.wait [#allocation4], 32  }
0x24eb   :  { %5776 = vsyncadd [#allocation4], 4294967264 }
0x24ec   :  { %5335 = vsyncpa [#allocation3], 1 }
0x24ed   :  { %5336 = vsyncpa [#allocation6], 1 }
0x24ee   :  { %5337 = vsyncpa [#allocation4], 1 }

</bundles_post_ra>
